<compile_context>
chip_gen: v7x
topology: tpu7x:2x2x1
jax: 0.10.0
libtpu: 0.0.40
codegen_flags: <defaults>
</compile_context>

<pallas_src>
import functools

import jax
import jax.numpy as jnp
from jax.experimental import pallas as pl
from jax.experimental.pallas import tpu as pltpu


# ----------------------------------------------------------------------------
# Tiling helper: biggest clean tile (single-TC chips want few, large steps).
# ----------------------------------------------------------------------------
def _pick_tile(m, cap):
    """Full M if it fits under cap, else the largest multiple-of-8 divisor of m
    that is <= cap (no masked edge block), else cap (Pallas masks the edge)."""
    if m <= cap:
        return m
    for t in range(cap - cap % 8, 7, -8):
        if m % t == 0:
            return t
    return cap


# ----------------------------------------------------------------------------
# Pallas kernels
# ----------------------------------------------------------------------------
def _matmul_bias_act_kernel(x_ref, w_ref, b_ref, o_ref, *, apply_relu):
    """o = relu(x @ w + b); bf16 MXU inputs, fp32 accumulation + epilogue."""
    acc = jnp.dot(x_ref[...], w_ref[...], preferred_element_type=jnp.float32)
    acc = acc + b_ref[...]                       # b is (1, N)
    if apply_relu:
        acc = jnp.maximum(acc, 0.0)
    o_ref[...] = acc.astype(o_ref.dtype)


def _avgpool_kernel(x_ref, o_ref, *, inv_area):
    """x: [k*k, tm, C] (taps leading) -> o: [tm, C] mean; fp32 accumulate."""
    s = jnp.sum(x_ref[...].astype(jnp.float32), axis=0)
    o_ref[...] = (s * inv_area).astype(o_ref.dtype)


def _tail_kernel(x_ref, w3_ref, b3_ref, w4_ref, b4_ref, w5_ref, b5_ref,
                 w6_ref, b6_ref, o_ref):
    """Fused conv3(+ReLU, NCHW-flattened) -> fc1(+ReLU) -> fc2(+ReLU) -> out."""
    def dense(h, w_ref, b_ref, relu):
        acc = jnp.dot(h.astype(jnp.bfloat16), w_ref[...],
                      preferred_element_type=jnp.float32) + b_ref[...]
        return jnp.maximum(acc, 0.0) if relu else acc

    h = dense(x_ref[...], w3_ref, b3_ref, True)      # conv3 + relu  (B, 1024)
    h = dense(h, w4_ref, b4_ref, True)               # fc1   + relu  (B, 512)
    h = dense(h, w5_ref, b5_ref, True)               # fc2   + relu  (B, 256)
    o_ref[...] = dense(h, w6_ref, b6_ref, False).astype(o_ref.dtype)  # (B,128)


# ----------------------------------------------------------------------------
# Pallas wrappers
# ----------------------------------------------------------------------------
def matmul_bias_relu(x, w, b, *, tm_cap=1024, out_dtype=jnp.bfloat16):
    """relu(x @ w + b), M tiled; 'parallel' semantics for v7x megacore."""
    M, K = x.shape
    _, N = w.shape
    tm = _pick_tile(M, tm_cap)
    cost = pl.CostEstimate(
        flops=2 * M * K * N,
        transcendentals=0,
        bytes_accessed=(M * K + K * N + M * N) * 2 + N * 4)
    return pl.pallas_call(
        functools.partial(_matmul_bias_act_kernel, apply_relu=True),
        out_shape=jax.ShapeDtypeStruct((M, N), out_dtype),
        grid=(pl.cdiv(M, tm),),
        in_specs=[
            pl.BlockSpec((tm, K), lambda i: (i, 0)),
            pl.BlockSpec((K, N), lambda i: (0, 0)),
            pl.BlockSpec((1, N), lambda i: (0, 0)),
        ],
        out_specs=pl.BlockSpec((tm, N), lambda i: (i, 0)),
        compiler_params=pltpu.CompilerParams(
            dimension_semantics=("parallel",)),
        cost_estimate=cost,
    )(x, w, b)


def _extract_windows(x, k, ho, wo):
    """NHWC [B,H,W,C] -> stride-1 valid windows for the first ho x wo output
    positions: [B, ho, wo, k*k, C].  XLA glue; fuses with the reshape."""
    cols = [x[:, i:i + ho, j:j + wo, :] for i in range(k) for j in range(k)]
    return jnp.stack(cols, axis=3)


def avgpool2d(x, k, *, tm_cap=1024):
    """AvgPool2d(kernel_size=k, stride=k); input is exactly HO*k x WO*k."""
    B, H, W, C = x.shape
    HO, WO = H // k, W // k
    assert H == HO * k and W == WO * k
    xt = x.reshape(B, HO, k, WO, k, C)
    # taps -> leading axis: [k*k, B*HO*WO, C]   (TODO(synk): fuse into conv)
    win = jnp.transpose(xt, (2, 4, 0, 1, 3, 5)).reshape(k * k, B * HO * WO, C)
    m = B * HO * WO
    tm = _pick_tile(m, tm_cap)
    out = pl.pallas_call(
        functools.partial(_avgpool_kernel, inv_area=1.0 / (k * k)),
        out_shape=jax.ShapeDtypeStruct((m, C), x.dtype),
        grid=(pl.cdiv(m, tm),),
        in_specs=[pl.BlockSpec((k * k, tm, C), lambda i: (0, i, 0))],
        out_specs=pl.BlockSpec((tm, C), lambda i: (i, 0)),
        compiler_params=pltpu.CompilerParams(
            dimension_semantics=("parallel",)),
    )(win)
    return out.reshape(B, HO, WO, C)


def fused_tail(x2, pk):
    """conv3 + fc1 + fc2 + output in one pallas_call; logits padded to 128."""
    B, kin = x2.shape
    if B >= 16:
        # >=2 parallel blocks so the second TensorCore on v7x gets work.
        tm = min(256, ((B + 1) // 2 + 7) // 8 * 8)
    else:
        tm = B
    args = (pk["w3big"], pk["b3big"], pk["wf1"], pk["bf1"],
            pk["wf2"], pk["bf2"], pk["wo"], pk["bo"])
    full2 = lambda a: pl.BlockSpec(a.shape, lambda i: (0, 0))
    wbytes = sum(int(a.size) * a.dtype.itemsize for a in args)
    cost = pl.CostEstimate(
        flops=2 * B * (1152 * 1024 + 1024 * 512 + 512 * 256 + 256 * 128),
        transcendentals=0,
        bytes_accessed=B * kin * 2 + wbytes + B * 128 * 4)
    out = pl.pallas_call(
        _tail_kernel,
        out_shape=jax.ShapeDtypeStruct((B, 128), jnp.float32),
        grid=(pl.cdiv(B, tm),),
        in_specs=[pl.BlockSpec((tm, kin), lambda i: (i, 0))]
                 + [full2(a) for a in args],
        out_specs=pl.BlockSpec((tm, 128), lambda i: (i, 0)),
        compiler_params=pltpu.CompilerParams(
            dimension_semantics=("parallel",)),
        cost_estimate=cost,
    )(x2, *args)
    return out[:, :7]


# ----------------------------------------------------------------------------
# Parameters (deterministic synthetic init; conv weights [KH,KW,Cin,Cout] ==
# torch [Cout,Cin,KH,KW].transpose(2,3,1,0); linear [in,out] == torch.T)
# ----------------------------------------------------------------------------
def _init_conv(key, kh, kw, cin, cout):
    k1, k2 = jax.random.split(key)
    w = jax.random.normal(k1, (kh, kw, cin, cout), jnp.float32) / jnp.sqrt(kh * kw * cin)
    b = 0.01 * jax.random.normal(k2, (cout,), jnp.float32)
    return w, b


def _init_linear(key, fin, fout):
    k1, k2 = jax.random.split(key)
    w = jax.random.normal(k1, (fin, fout), jnp.float32) / jnp.sqrt(fin)
    b = 0.01 * jax.random.normal(k2, (fout,), jnp.float32)
    return w, b


def init_params(key):
    ks = jax.random.split(key, 6)
    p = {}
    p["w1"], p["b1"] = _init_conv(ks[0], 5, 5, 3, 64)
    p["w2"], p["b2"] = _init_conv(ks[1], 5, 5, 64, 128)
    p["w3"], p["b3"] = _init_conv(ks[2], 2, 2, 128, 256)
    p["wf1"], p["bf1"] = _init_linear(ks[3], 1024, 512)
    p["wf2"], p["bf2"] = _init_linear(ks[4], 512, 256)
    p["wo"], p["bo"] = _init_linear(ks[5], 256, 7)
    return p


def pack_params(p):
    """One-time repacking: bf16 MXU weights, conv weights as matmuls, no dead
    zero-padding except the tiny 7->128 logit lane pad (sliced in wrapper)."""
    bf = jnp.bfloat16
    pk = {}
    # conv1 as im2col matmul: K = 25*3 = 75 (full-dim block; no pad copy).
    pk["w1"] = p["w1"].reshape(75, 64).astype(bf)
    pk["b1"] = p["b1"].reshape(1, 64).astype(jnp.float32)
    # conv2 as im2col matmul: K = 25*64 = 1600 (no channel zero-pad).
    pk["w2"] = p["w2"].reshape(1600, 128).astype(bf)
    pk["b2"] = p["b2"].reshape(1, 128).astype(jnp.float32)
    # conv3 as a matmul on the NHWC-flattened 3x3x128 input, producing the
    # NCHW-flattened (c*4 + oh*2 + ow) 1024-vector torch's Flatten would see.
    w3 = p["w3"]                                     # [2, 2, 128, 256]
    wbig = jnp.zeros((3, 3, 128, 256, 2, 2), jnp.float32)
    for oh in range(2):
        for ow in range(2):
            for kh in range(2):
                for kw in range(2):
                    wbig = wbig.at[oh + kh, ow + kw, :, :, oh, ow].set(w3[kh, kw])
    pk["w3big"] = wbig.reshape(3 * 3 * 128, 256 * 4).astype(bf)
    pk["b3big"] = jnp.repeat(p["b3"], 4).reshape(1, 1024).astype(jnp.float32)
    # fully-connected tail; logits padded 7 -> 128 lanes (lane-dense store).
    pk["wf1"] = p["wf1"].astype(bf)
    pk["bf1"] = p["bf1"].reshape(1, 512).astype(jnp.float32)
    pk["wf2"] = p["wf2"].astype(bf)
    pk["bf2"] = p["bf2"].reshape(1, 256).astype(jnp.float32)
    pk["wo"] = jnp.zeros((256, 128), jnp.float32).at[:, :7].set(p["wo"]).astype(bf)
    pk["bo"] = jnp.zeros((1, 128), jnp.float32).at[0, :7].set(p["bo"])
    return pk


# ----------------------------------------------------------------------------
# Forward pass (mirrors BaseLine.forward)
# 48 -conv5-> 44 -pool3-> 14 -conv5-> 10 -pool3-> 3 -conv2-> 2 ; 256*2*2 = 1024.
# Only the conv outputs the floor-mode pools actually keep are computed
# (42x42 of 44x44, 9x9 of 10x10) — identical final result, less work/copies.
# ----------------------------------------------------------------------------
@jax.jit
def baseline_forward(x_nchw, pk):
    x = jnp.transpose(x_nchw, (0, 2, 3, 1)).astype(jnp.bfloat16)   # NHWC, bf16
    B = x.shape[0]

    # conv1 (5x5, 3->64) + ReLU  — only the 42x42 outputs pool1 keeps.
    # TODO(synk): im2col stays in XLA; move to an in-kernel tap reduction.
    p1 = _extract_windows(x, 5, 42, 42).reshape(B * 42 * 42, 75)
    h = matmul_bias_relu(p1, pk["w1"], pk["b1"],
                         tm_cap=2048).reshape(B, 42, 42, 64)

    h = avgpool2d(h, 3)                                # [B,14,14,64]

    # conv2 (5x5, 64->128) + ReLU — only the 9x9 outputs pool2 keeps.
    p2 = _extract_windows(h, 5, 9, 9).reshape(B * 81, 1600)
    h = matmul_bias_relu(p2, pk["w2"], pk["b2"],
                         tm_cap=1024).reshape(B, 9, 9, 128)

    h = avgpool2d(h, 3)                                # [B,3,3,128]
    # avgpool3(kernel_size=1) is the identity -> removed.

    # fused tail: conv3+ReLU (NCHW-flatten matmul) + fc1 + fc2 + output.
    x2 = h.reshape(B, 3 * 3 * 128)
    return fused_tail(x2, pk)                          # [B, 7]


if __name__ == "__main__":
    key = jax.random.PRNGKey(0)
    k_params, k_x = jax.random.split(key)
    params = init_params(k_params)
    packed = pack_params(params)                       # one-time, outside jit
    # fc1.in_features == 1024 forces 48x48 spatial input (FER-style, 3ch).
    x = jax.random.normal(k_x, (2, 3, 48, 48), jnp.float32)
    y = baseline_forward(x, packed)
    y = jax.block_until_ready(y)
    assert y.shape == (2, 7), y.shape
    assert bool(jnp.all(jnp.isfinite(y)))
    print("KERNEL_OK")
</pallas_src>

<mosaic_0001>
module attributes {stable_mosaic.version = 11 : i64} {
  func.func @_matmul_bias_act_kernel(%arg0: i32, %arg1: memref<1176x75xbf16, #tpu.memory_space<vmem>>, %arg2: memref<75x64xbf16, #tpu.memory_space<vmem>>, %arg3: memref<1x64xf32, #tpu.memory_space<vmem>>, %arg4: memref<1176x64xbf16, #tpu.memory_space<vmem>>) attributes {dimension_semantics = [#tpu.dimension_semantics<parallel>], iteration_bounds = array<i64: 3>, scalar_prefetch = 0 : i64, scratch_operands = 0 : i64, tpu.core_type = #tpu.core_type<tc>, window_params = [{transform_indices = @transform_0, window_bounds = array<i64: 1176, 75>}, {pipeline_mode = #tpu.pipeline_mode<synchronous>, transform_indices = @transform_1, window_bounds = array<i64: 75, 64>}, {pipeline_mode = #tpu.pipeline_mode<synchronous>, transform_indices = @transform_2, window_bounds = array<i64: 1, 64>}, {transform_indices = @transform_3, window_bounds = array<i64: 1176, 64>}]} {
    %c0 = arith.constant 0 : index
    %c0_0 = arith.constant 0 : index
    %0 = vector.load %arg1[%c0, %c0_0] : memref<1176x75xbf16, #tpu.memory_space<vmem>>, vector<1176x75xbf16>
    %c0_1 = arith.constant 0 : index
    %c0_2 = arith.constant 0 : index
    %1 = vector.load %arg2[%c0_1, %c0_2] : memref<75x64xbf16, #tpu.memory_space<vmem>>, vector<75x64xbf16>
    %cst = arith.constant dense<0.000000e+00> : vector<1176x64xf32>
    %2 = tpu.matmul %0, %1, %cst {dimension_numbers = #tpu.dot_dimension_numbers<[1], [0], [0], [1], [0, 0, 1, 1], [], []>} : vector<1176x75xbf16>, vector<75x64xbf16>, vector<1176x64xf32> -> vector<1176x64xf32>
    %c0_3 = arith.constant 0 : index
    %c0_4 = arith.constant 0 : index
    %3 = vector.load %arg3[%c0_3, %c0_4] : memref<1x64xf32, #tpu.memory_space<vmem>>, vector<1x64xf32>
    %4 = vector.broadcast %3 : vector<1x64xf32> to vector<1176x64xf32>
    %5 = arith.addf %2, %4 : vector<1176x64xf32>
    %cst_5 = arith.constant 0.000000e+00 : f32
    %6 = vector.broadcast %cst_5 : f32 to vector<1176x64xf32>
    %7 = arith.maximumf %5, %6 : vector<1176x64xf32>
    %8 = arith.truncf %7 : vector<1176x64xf32> to vector<1176x64xbf16>
    %c0_6 = arith.constant 0 : index
    %c0_7 = arith.constant 0 : index
    %9 = vector.load %arg4[%c0_6, %c0_7] : memref<1176x64xbf16, #tpu.memory_space<vmem>>, vector<1176x64xbf16>
    tpu.vector_store %arg4[%c0_6, %c0_7], %8 {strides = array<i32>} : memref<1176x64xbf16, #tpu.memory_space<vmem>>, vector<1176x64xbf16>,
    return
  }
  func.func @transform_0(%arg0: i32) -> (i32, i32) {
    %c0_i32 = arith.constant 0 : i32
    %c0_i32_0 = arith.constant 0 : i32
    return %arg0, %c0_i32 : i32, i32
  }
  func.func @transform_1(%arg0: i32) -> (i32, i32) {
    %c0_i32 = arith.constant 0 : i32
    %c0_i32_0 = arith.constant 0 : i32
    %c0_i32_1 = arith.constant 0 : i32
    return %c0_i32, %c0_i32_0 : i32, i32
  }
  func.func @transform_2(%arg0: i32) -> (i32, i32) {
    %c0_i32 = arith.constant 0 : i32
    %c0_i32_0 = arith.constant 0 : i32
    %c0_i32_1 = arith.constant 0 : i32
    return %c0_i32, %c0_i32_0 : i32, i32
  }
  func.func @transform_3(%arg0: i32) -> (i32, i32) {
    %c0_i32 = arith.constant 0 : i32
    %c0_i32_0 = arith.constant 0 : i32
    return %arg0, %c0_i32 : i32, i32
  }
}

module attributes {stable_mosaic.version = 11 : i64} {
  func.func @_avgpool_kernel(%arg0: i32, %arg1: memref<9x392x64xbf16, #tpu.memory_space<vmem>>, %arg2: memref<392x64xbf16, #tpu.memory_space<vmem>>) attributes {dimension_semantics = [#tpu.dimension_semantics<parallel>], iteration_bounds = array<i64: 1>, scalar_prefetch = 0 : i64, scratch_operands = 0 : i64, tpu.core_type = #tpu.core_type<tc>, window_params = [{transform_indices = @transform_0, window_bounds = array<i64: 9, 392, 64>}, {transform_indices = @transform_1, window_bounds = array<i64: 392, 64>}]} {
    %c0 = arith.constant 0 : index
    %c0_0 = arith.constant 0 : index
    %c0_1 = arith.constant 0 : index
    %0 = vector.load %arg1[%c0, %c0_0, %c0_1] : memref<9x392x64xbf16, #tpu.memory_space<vmem>>, vector<9x392x64xbf16>
    %1 = arith.extf %0 : vector<9x392x64xbf16> to vector<9x392x64xf32>
    %cst = arith.constant dense<0.000000e+00> : vector<392x64xf32>
    %2 = vector.multi_reduction <add>, %1, %cst [0] : vector<9x392x64xf32> to vector<392x64xf32>
    %cst_2 = arith.constant 0.111111112 : f32
    %3 = vector.broadcast %cst_2 : f32 to vector<392x64xf32>
    %4 = arith.mulf %2, %3 : vector<392x64xf32>
    %5 = arith.truncf %4 : vector<392x64xf32> to vector<392x64xbf16>
    %c0_3 = arith.constant 0 : index
    %c0_4 = arith.constant 0 : index
    %6 = vector.load %arg2[%c0_3, %c0_4] : memref<392x64xbf16, #tpu.memory_space<vmem>>, vector<392x64xbf16>
    tpu.vector_store %arg2[%c0_3, %c0_4], %5 {strides = array<i32>} : memref<392x64xbf16, #tpu.memory_space<vmem>>, vector<392x64xbf16>,
    return
  }
  func.func @transform_0(%arg0: i32) -> (i32, i32, i32) {
    %c0_i32 = arith.constant 0 : i32
    %c0_i32_0 = arith.constant 0 : i32
    %c0_i32_1 = arith.constant 0 : i32
    return %c0_i32, %arg0, %c0_i32_0 : i32, i32, i32
  }
  func.func @transform_1(%arg0: i32) -> (i32, i32) {
    %c0_i32 = arith.constant 0 : i32
    %c0_i32_0 = arith.constant 0 : i32
    return %arg0, %c0_i32 : i32, i32
  }
}

module attributes {stable_mosaic.version = 11 : i64} {
  func.func @_matmul_bias_act_kernel(%arg0: i32, %arg1: memref<162x1600xbf16, #tpu.memory_space<vmem>>, %arg2: memref<1600x128xbf16, #tpu.memory_space<vmem>>, %arg3: memref<1x128xf32, #tpu.memory_space<vmem>>, %arg4: memref<162x128xbf16, #tpu.memory_space<vmem>>) attributes {dimension_semantics = [#tpu.dimension_semantics<parallel>], iteration_bounds = array<i64: 1>, scalar_prefetch = 0 : i64, scratch_operands = 0 : i64, tpu.core_type = #tpu.core_type<tc>, window_params = [{transform_indices = @transform_0, window_bounds = array<i64: 162, 1600>}, {pipeline_mode = #tpu.pipeline_mode<synchronous>, transform_indices = @transform_1, window_bounds = array<i64: 1600, 128>}, {pipeline_mode = #tpu.pipeline_mode<synchronous>, transform_indices = @transform_2, window_bounds = array<i64: 1, 128>}, {transform_indices = @transform_3, window_bounds = array<i64: 162, 128>}]} {
    %c0 = arith.constant 0 : index
    %c0_0 = arith.constant 0 : index
    %0 = vector.load %arg1[%c0, %c0_0] : memref<162x1600xbf16, #tpu.memory_space<vmem>>, vector<162x1600xbf16>
    %c0_1 = arith.constant 0 : index
    %c0_2 = arith.constant 0 : index
    %1 = vector.load %arg2[%c0_1, %c0_2] : memref<1600x128xbf16, #tpu.memory_space<vmem>>, vector<1600x128xbf16>
    %cst = arith.constant dense<0.000000e+00> : vector<162x128xf32>
    %2 = tpu.matmul %0, %1, %cst {dimension_numbers = #tpu.dot_dimension_numbers<[1], [0], [0], [1], [0, 0, 1, 1], [], []>} : vector<162x1600xbf16>, vector<1600x128xbf16>, vector<162x128xf32> -> vector<162x128xf32>
    %c0_3 = arith.constant 0 : index
    %c0_4 = arith.constant 0 : index
    %3 = vector.load %arg3[%c0_3, %c0_4] : memref<1x128xf32, #tpu.memory_space<vmem>>, vector<1x128xf32>
    %4 = vector.broadcast %3 : vector<1x128xf32> to vector<162x128xf32>
    %5 = arith.addf %2, %4 : vector<162x128xf32>
    %cst_5 = arith.constant 0.000000e+00 : f32
    %6 = vector.broadcast %cst_5 : f32 to vector<162x128xf32>
    %7 = arith.maximumf %5, %6 : vector<162x128xf32>
    %8 = arith.truncf %7 : vector<162x128xf32> to vector<162x128xbf16>
    %c0_6 = arith.constant 0 : index
    %c0_7 = arith.constant 0 : index
    %9 = vector.load %arg4[%c0_6, %c0_7] : memref<162x128xbf16, #tpu.memory_space<vmem>>, vector<162x128xbf16>
    tpu.vector_store %arg4[%c0_6, %c0_7], %8 {strides = array<i32>} : memref<162x128xbf16, #tpu.memory_space<vmem>>, vector<162x128xbf16>,
    return
  }
  func.func @transform_0(%arg0: i32) -> (i32, i32) {
    %c0_i32 = arith.constant 0 : i32
    %c0_i32_0 = arith.constant 0 : i32
    return %arg0, %c0_i32 : i32, i32
  }
  func.func @transform_1(%arg0: i32) -> (i32, i32) {
    %c0_i32 = arith.constant 0 : i32
    %c0_i32_0 = arith.constant 0 : i32
    %c0_i32_1 = arith.constant 0 : i32
    return %c0_i32, %c0_i32_0 : i32, i32
  }
  func.func @transform_2(%arg0: i32) -> (i32, i32) {
    %c0_i32 = arith.constant 0 : i32
    %c0_i32_0 = arith.constant 0 : i32
    %c0_i32_1 = arith.constant 0 : i32
    return %c0_i32, %c0_i32_0 : i32, i32
  }
  func.func @transform_3(%arg0: i32) -> (i32, i32) {
    %c0_i32 = arith.constant 0 : i32
    %c0_i32_0 = arith.constant 0 : i32
    return %arg0, %c0_i32 : i32, i32
  }
}

module attributes {stable_mosaic.version = 11 : i64} {
  func.func @_avgpool_kernel(%arg0: i32, %arg1: memref<9x18x128xbf16, #tpu.memory_space<vmem>>, %arg2: memref<18x128xbf16, #tpu.memory_space<vmem>>) attributes {dimension_semantics = [#tpu.dimension_semantics<parallel>], iteration_bounds = array<i64: 1>, scalar_prefetch = 0 : i64, scratch_operands = 0 : i64, tpu.core_type = #tpu.core_type<tc>, window_params = [{transform_indices = @transform_0, window_bounds = array<i64: 9, 18, 128>}, {transform_indices = @transform_1, window_bounds = array<i64: 18, 128>}]} {
    %c0 = arith.constant 0 : index
    %c0_0 = arith.constant 0 : index
    %c0_1 = arith.constant 0 : index
    %0 = vector.load %arg1[%c0, %c0_0, %c0_1] : memref<9x18x128xbf16, #tpu.memory_space<vmem>>, vector<9x18x128xbf16>
    %1 = arith.extf %0 : vector<9x18x128xbf16> to vector<9x18x128xf32>
    %cst = arith.constant dense<0.000000e+00> : vector<18x128xf32>
    %2 = vector.multi_reduction <add>, %1, %cst [0] : vector<9x18x128xf32> to vector<18x128xf32>
    %cst_2 = arith.constant 0.111111112 : f32
    %3 = vector.broadcast %cst_2 : f32 to vector<18x128xf32>
    %4 = arith.mulf %2, %3 : vector<18x128xf32>
    %5 = arith.truncf %4 : vector<18x128xf32> to vector<18x128xbf16>
    %c0_3 = arith.constant 0 : index
    %c0_4 = arith.constant 0 : index
    %6 = vector.load %arg2[%c0_3, %c0_4] : memref<18x128xbf16, #tpu.memory_space<vmem>>, vector<18x128xbf16>
    tpu.vector_store %arg2[%c0_3, %c0_4], %5 {strides = array<i32>} : memref<18x128xbf16, #tpu.memory_space<vmem>>, vector<18x128xbf16>,
    return
  }
  func.func @transform_0(%arg0: i32) -> (i32, i32, i32) {
    %c0_i32 = arith.constant 0 : i32
    %c0_i32_0 = arith.constant 0 : i32
    %c0_i32_1 = arith.constant 0 : i32
    return %c0_i32, %arg0, %c0_i32_0 : i32, i32, i32
  }
  func.func @transform_1(%arg0: i32) -> (i32, i32) {
    %c0_i32 = arith.constant 0 : i32
    %c0_i32_0 = arith.constant 0 : i32
    return %arg0, %c0_i32 : i32, i32
  }
}

module attributes {stable_mosaic.version = 11 : i64} {
  func.func @_tail_kernel(%arg0: i32, %arg1: memref<2x1152xbf16, #tpu.memory_space<vmem>>, %arg2: memref<1152x1024xbf16, #tpu.memory_space<vmem>>, %arg3: memref<1x1024xf32, #tpu.memory_space<vmem>>, %arg4: memref<1024x512xbf16, #tpu.memory_space<vmem>>, %arg5: memref<1x512xf32, #tpu.memory_space<vmem>>, %arg6: memref<512x256xbf16, #tpu.memory_space<vmem>>, %arg7: memref<1x256xf32, #tpu.memory_space<vmem>>, %arg8: memref<256x128xbf16, #tpu.memory_space<vmem>>, %arg9: memref<1x128xf32, #tpu.memory_space<vmem>>, %arg10: memref<2x128xf32, #tpu.memory_space<vmem>>) attributes {dimension_semantics = [#tpu.dimension_semantics<parallel>], iteration_bounds = array<i64: 1>, scalar_prefetch = 0 : i64, scratch_operands = 0 : i64, tpu.core_type = #tpu.core_type<tc>, window_params = [{transform_indices = @transform_0, window_bounds = array<i64: 2, 1152>}, {pipeline_mode = #tpu.pipeline_mode<synchronous>, transform_indices = @transform_1, window_bounds = array<i64: 1152, 1024>}, {pipeline_mode = #tpu.pipeline_mode<synchronous>, transform_indices = @transform_2, window_bounds = array<i64: 1, 1024>}, {pipeline_mode = #tpu.pipeline_mode<synchronous>, transform_indices = @transform_3, window_bounds = array<i64: 1024, 512>}, {pipeline_mode = #tpu.pipeline_mode<synchronous>, transform_indices = @transform_4, window_bounds = array<i64: 1, 512>}, {pipeline_mode = #tpu.pipeline_mode<synchronous>, transform_indices = @transform_5, window_bounds = array<i64: 512, 256>}, {pipeline_mode = #tpu.pipeline_mode<synchronous>, transform_indices = @transform_6, window_bounds = array<i64: 1, 256>}, {pipeline_mode = #tpu.pipeline_mode<synchronous>, transform_indices = @transform_7, window_bounds = array<i64: 256, 128>}, {pipeline_mode = #tpu.pipeline_mode<synchronous>, transform_indices = @transform_8, window_bounds = array<i64: 1, 128>}, {transform_indices = @transform_9, window_bounds = array<i64: 2, 128>}]} {
    %c0 = arith.constant 0 : index
    %c0_0 = arith.constant 0 : index
    %0 = vector.load %arg1[%c0, %c0_0] : memref<2x1152xbf16, #tpu.memory_space<vmem>>, vector<2x1152xbf16>
    %c0_1 = arith.constant 0 : index
    %c0_2 = arith.constant 0 : index
    %1 = vector.load %arg2[%c0_1, %c0_2] : memref<1152x1024xbf16, #tpu.memory_space<vmem>>, vector<1152x1024xbf16>
    %cst = arith.constant dense<0.000000e+00> : vector<2x1024xf32>
    %2 = tpu.matmul %0, %1, %cst {dimension_numbers = #tpu.dot_dimension_numbers<[1], [0], [0], [1], [0, 0, 1, 1], [], []>} : vector<2x1152xbf16>, vector<1152x1024xbf16>, vector<2x1024xf32> -> vector<2x1024xf32>
    %c0_3 = arith.constant 0 : index
    %c0_4 = arith.constant 0 : index
    %3 = vector.load %arg3[%c0_3, %c0_4] : memref<1x1024xf32, #tpu.memory_space<vmem>>, vector<1x1024xf32>
    %4 = vector.broadcast %3 : vector<1x1024xf32> to vector<2x1024xf32>
    %5 = arith.addf %2, %4 : vector<2x1024xf32>
    %cst_5 = arith.constant 0.000000e+00 : f32
    %6 = vector.broadcast %cst_5 : f32 to vector<2x1024xf32>
    %7 = arith.maximumf %5, %6 : vector<2x1024xf32>
    %8 = arith.truncf %7 : vector<2x1024xf32> to vector<2x1024xbf16>
    %c0_6 = arith.constant 0 : index
    %c0_7 = arith.constant 0 : index
    %9 = vector.load %arg4[%c0_6, %c0_7] : memref<1024x512xbf16, #tpu.memory_space<vmem>>, vector<1024x512xbf16>
    %cst_8 = arith.constant dense<0.000000e+00> : vector<2x512xf32>
    %10 = tpu.matmul %8, %9, %cst_8 {dimension_numbers = #tpu.dot_dimension_numbers<[1], [0], [0], [1], [0, 0, 1, 1], [], []>} : vector<2x1024xbf16>, vector<1024x512xbf16>, vector<2x512xf32> -> vector<2x512xf32>
    %c0_9 = arith.constant 0 : index
    %c0_10 = arith.constant 0 : index
    %11 = vector.load %arg5[%c0_9, %c0_10] : memref<1x512xf32, #tpu.memory_space<vmem>>, vector<1x512xf32>
    %12 = vector.broadcast %11 : vector<1x512xf32> to vector<2x512xf32>
    %13 = arith.addf %10, %12 : vector<2x512xf32>
    %cst_11 = arith.constant 0.000000e+00 : f32
    %14 = vector.broadcast %cst_11 : f32 to vector<2x512xf32>
    %15 = arith.maximumf %13, %14 : vector<2x512xf32>
    %16 = arith.truncf %15 : vector<2x512xf32> to vector<2x512xbf16>
    %c0_12 = arith.constant 0 : index
    %c0_13 = arith.constant 0 : index
    %17 = vector.load %arg6[%c0_12, %c0_13] : memref<512x256xbf16, #tpu.memory_space<vmem>>, vector<512x256xbf16>
    %cst_14 = arith.constant dense<0.000000e+00> : vector<2x256xf32>
    %18 = tpu.matmul %16, %17, %cst_14 {dimension_numbers = #tpu.dot_dimension_numbers<[1], [0], [0], [1], [0, 0, 1, 1], [], []>} : vector<2x512xbf16>, vector<512x256xbf16>, vector<2x256xf32> -> vector<2x256xf32>
    %c0_15 = arith.constant 0 : index
    %c0_16 = arith.constant 0 : index
    %19 = vector.load %arg7[%c0_15, %c0_16] : memref<1x256xf32, #tpu.memory_space<vmem>>, vector<1x256xf32>
    %20 = vector.broadcast %19 : vector<1x256xf32> to vector<2x256xf32>
    %21 = arith.addf %18, %20 : vector<2x256xf32>
    %cst_17 = arith.constant 0.000000e+00 : f32
    %22 = vector.broadcast %cst_17 : f32 to vector<2x256xf32>
    %23 = arith.maximumf %21, %22 : vector<2x256xf32>
    %24 = arith.truncf %23 : vector<2x256xf32> to vector<2x256xbf16>
    %c0_18 = arith.constant 0 : index
    %c0_19 = arith.constant 0 : index
    %25 = vector.load %arg8[%c0_18, %c0_19] : memref<256x128xbf16, #tpu.memory_space<vmem>>, vector<256x128xbf16>
    %cst_20 = arith.constant dense<0.000000e+00> : vector<2x128xf32>
    %26 = tpu.matmul %24, %25, %cst_20 {dimension_numbers = #tpu.dot_dimension_numbers<[1], [0], [0], [1], [0, 0, 1, 1], [], []>} : vector<2x256xbf16>, vector<256x128xbf16>, vector<2x128xf32> -> vector<2x128xf32>
    %c0_21 = arith.constant 0 : index
    %c0_22 = arith.constant 0 : index
    %27 = vector.load %arg9[%c0_21, %c0_22] : memref<1x128xf32, #tpu.memory_space<vmem>>, vector<1x128xf32>
    %28 = vector.broadcast %27 : vector<1x128xf32> to vector<2x128xf32>
    %29 = arith.addf %26, %28 : vector<2x128xf32>
    %c0_23 = arith.constant 0 : index
    %c0_24 = arith.constant 0 : index
    %30 = vector.load %arg10[%c0_23, %c0_24] : memref<2x128xf32, #tpu.memory_space<vmem>>, vector<2x128xf32>
    tpu.vector_store %arg10[%c0_23, %c0_24], %29 {strides = array<i32>} : memref<2x128xf32, #tpu.memory_space<vmem>>, vector<2x128xf32>,
    return
  }
  func.func @transform_0(%arg0: i32) -> (i32, i32) {
    %c0_i32 = arith.constant 0 : i32
    %c0_i32_0 = arith.constant 0 : i32
    return %arg0, %c0_i32 : i32, i32
  }
  func.func @transform_1(%arg0: i32) -> (i32, i32) {
    %c0_i32 = arith.constant 0 : i32
    %c0_i32_0 = arith.constant 0 : i32
    %c0_i32_1 = arith.constant 0 : i32
    return %c0_i32, %c0_i32_0 : i32, i32
  }
  func.func @transform_2(%arg0: i32) -> (i32, i32) {
    %c0_i32 = arith.constant 0 : i32
    %c0_i32_0 = arith.constant 0 : i32
    %c0_i32_1 = arith.constant 0 : i32
    return %c0_i32, %c0_i32_0 : i32, i32
  }
  func.func @transform_3(%arg0: i32) -> (i32, i32) {
    %c0_i32 = arith.constant 0 : i32
    %c0_i32_0 = arith.constant 0 : i32
    %c0_i32_1 = arith.constant 0 : i32
    return %c0_i32, %c0_i32_0 : i32, i32
  }
  func.func @transform_4(%arg0: i32) -> (i32, i32) {
    %c0_i32 = arith.constant 0 : i32
    %c0_i32_0 = arith.constant 0 : i32
    %c0_i32_1 = arith.constant 0 : i32
    return %c0_i32, %c0_i32_0 : i32, i32
  }
  func.func @transform_5(%arg0: i32) -> (i32, i32) {
    %c0_i32 = arith.constant 0 : i32
    %c0_i32_0 = arith.constant 0 : i32
    %c0_i32_1 = arith.constant 0 : i32
    return %c0_i32, %c0_i32_0 : i32, i32
  }
  func.func @transform_6(%arg0: i32) -> (i32, i32) {
    %c0_i32 = arith.constant 0 : i32
    %c0_i32_0 = arith.constant 0 : i32
    %c0_i32_1 = arith.constant 0 : i32
    return %c0_i32, %c0_i32_0 : i32, i32
  }
  func.func @transform_7(%arg0: i32) -> (i32, i32) {
    %c0_i32 = arith.constant 0 : i32
    %c0_i32_0 = arith.constant 0 : i32
    %c0_i32_1 = arith.constant 0 : i32
    return %c0_i32, %c0_i32_0 : i32, i32
  }
  func.func @transform_8(%arg0: i32) -> (i32, i32) {
    %c0_i32 = arith.constant 0 : i32
    %c0_i32_0 = arith.constant 0 : i32
    %c0_i32_1 = arith.constant 0 : i32
    return %c0_i32, %c0_i32_0 : i32, i32
  }
  func.func @transform_9(%arg0: i32) -> (i32, i32) {
    %c0_i32 = arith.constant 0 : i32
    %c0_i32_0 = arith.constant 0 : i32
    return %arg0, %c0_i32 : i32, i32
  }
}

</mosaic_0001>

<bundles_post_ra>
// kernel: baseline_forward.5
= control target key start
LH: loop header
LB: loop body
LE: loop exit
PB: predicated region body
PF: predicated region fallthrough
CT: control target
= control target key end

     0   :  { %s3352_s12 = smov 0   ;;  %s3994_s0 = inlined_call_operand.vmem [shape: bf16[3528,75], index: 0, kind: input, shape index: {}]   ;;  %s3995_s1 = inlined_call_operand.vmem [shape: bf16[75,64], index: 1, kind: input, shape index: {}]   ;;  %s3996_s2 = inlined_call_operand.vmem [shape: f32[1,64], index: 2, kind: input, shape index: {}]   ;;  %s3997_s3 = inlined_call_operand.vmem [shape: bf16[3528,64], index: 3, kind: output, shape index: {}]  }
   0x1 LB: > { %s2530_s13 = sadd.s32 4294967295, %s3329_s12   ;;  %p2534_p0 = scmp.ge.s32.totalorder %s3329_s12, 1  ;;  %s3329_s12 = sphi %s3352_s12, %s13_s12  }
   0x2   : > { %p138_p1 = scmp.lt.s32.totalorder %s3329_s12, 4 }
   0x4   : > { %p139_p2 = pnand %p2534_p0, %p138_p1 }
   0x5   : > { %v3243_v0 = vld [vmem:[%s3995_s1] sm:$0xff] (!%p139_p2)   ;;  %v3244_v1 = vld [vmem:[%s3995_s1 + $0x8] sm:$0xff] (!%p139_p2)   ;;  %vm959_vm0 = vcmask (!%p139_p2), 1044480   ;;  %v3245_v2 = vld [vmem:[%s3995_s1 + $0x10] sm:$0xff] (!%p139_p2)   ;;  %s162_s20 = smul.u32 (!%p139_p2), 147, %s2530_s13  ;;  %vm960_vm1 = vcmask (!%p139_p2), 1045504  }
   0x6   : > { %142 = sbr.rel (%p139_p2) target bundleno = 392 (0x188), region = 32  ;;  %3066 = vmatprep.subr.bf16.mxu0 (!%p139_p2), %v3243_v0  ;;  %3224 = vmatprep.subr.bf16.mxu1 (!%p139_p2), %v3243_v0  ;;  %v3331_v3 = vmov (!%p139_p2), 65535   ;;  %v3246_v5 = vld [vmem:[%s3995_s1 + $0x18] sm:$0xff] (!%p139_p2)   ;;  %v3247_v6 = vld [vmem:[%s3995_s1 + $0x20] sm:$0x3f] (!%p139_p2)   ;;  %vm736_vm2 = vcmask (!%p139_p2), 613376  }
   0x7   : > { %3067 = vmatpush3.bf16.msra.mxu0 (!%p139_p2), %v3243_v0  ;;  %3229 = vmatpush3.bf16.msra.mxu1 (!%p139_p2), %v3243_v0  ;;  %v961_v4 = vsel (!%p139_p2), %vm959_vm0, 4294967295, %v3331_v3  ;;  %p163_p3 = scmp.lt.s32.totalorder (!%p139_p2), %s162_s20, 440  ;;  %vm2326_vm3 = vcmask (!%p139_p2), 519168  }
   0x8   : > { %3068 = vmatprep.subr.bf16.mxu0 (!%p139_p2), %v3244_v1  ;;  %3225 = vmatprep.subr.bf16.mxu1 (!%p139_p2), %v3244_v1  ;;  %v962_v7 = vsel (!%p139_p2), %vm960_vm1, %v961_v4, 0 }
   0x9   : > { %v964_v8 = vand.u32 (!%p139_p2), %v3247_v6, %v962_v7 }
   0xb   : > { %3069 = vmatpush3.bf16.msra.mxu0 (!%p139_p2), %v3244_v1  ;;  %3230 = vmatpush3.bf16.msra.mxu1 (!%p139_p2), %v3244_v1 }
   0xc   : > { %3070 = vmatprep.subr.bf16.mxu0 (!%p139_p2), %v3245_v2  ;;  %3226 = vmatprep.subr.bf16.mxu1 (!%p139_p2), %v3245_v2 }
   0xd   : > { %s3999_s20 = smov (!%p163_p3, %s162_s20), 440 }
   0xe   : > { %s2535_s25 = sshll.u32 %s3999_s20, 2 }
   0xf   : > { %3071 = vmatpush3.bf16.msra.mxu0 %v3245_v2  ;;  %3231 = vmatpush3.bf16.msra.mxu1 %v3245_v2  ;;  %s3383_s28 = scalar_lea.vmem %s3994_s0, %s2535_s25  ;;  %s3549_s6 = scalar_lea.vmem %s3997_s3, %s2535_s25 }
  0x10   : > { %3072 = vmatprep.subr.bf16.mxu0 %v3246_v5  ;;  %3227 = vmatprep.subr.bf16.mxu1 %v3246_v5  ;;  %v3248_v9 = vld [vmem:[%s3383_s28] sm:$0xff]   ;;  %v3250_v10 = vld [vmem:[%s3383_s28 + $0x130] sm:$0xff]   ;;  %v3249_v11 = vld [vmem:[%s3383_s28 + $0x8] sm:$0xff]  }
  0x11   : > { %3076 = vmatprep.mubr.msk.bf16.mxu0 %vm736_vm2, %v3248_v9  ;;  %3152 = vmatprep.mubr.msk.bf16.mxu1 %vm736_vm2, %v3250_v10  ;;  %v3251_v12 = vld [vmem:[%s3383_s28 + $0x138] sm:$0xff]   ;;  %v3252_v13 = vld [vmem:[%s3383_s28 + $0x10] sm:$0xff]   ;;  %v3254_v14 = vld [vmem:[%s3383_s28 + $0x140] sm:$0xff]  }
  0x12   : > { %v3253_v15 = vld [vmem:[%s3383_s28 + $0x18] sm:$0xff]   ;;  %v3255_v16 = vld [vmem:[%s3383_s28 + $0x148] sm:$0xff]   ;;  %v3256_v17 = vld [vmem:[%s3383_s28 + $0x20] sm:$0xff]  }
  0x13   : > { %3073 = vmatpush3.bf16.msra.mxu0 %v3246_v5  ;;  %3232 = vmatpush3.bf16.msra.mxu1 %v3246_v5  ;;  %v3258_v18 = vld [vmem:[%s3383_s28 + $0x150] sm:$0xff]   ;;  %v3257_v19 = vld [vmem:[%s3383_s28 + $0x28] sm:$0xff]   ;;  %v3259_v20 = vld [vmem:[%s3383_s28 + $0x158] sm:$0xff]  }
  0x14   : > { %3074 = vmatprep.subr.bf16.mxu0 %v964_v8  ;;  %3228 = vmatprep.subr.bf16.mxu1 %v964_v8  ;;  %v3260_v21 = vld [vmem:[%s3383_s28 + $0x30] sm:$0xff]   ;;  %v3262_v22 = vld [vmem:[%s3383_s28 + $0x160] sm:$0xff]   ;;  %v3261_v23 = vld [vmem:[%s3383_s28 + $0x38] sm:$0xff]  }
  0x15   : > { %v3263_v24 = vld [vmem:[%s3383_s28 + $0x168] sm:$0xff]   ;;  %v3264_v25 = vld [vmem:[%s3383_s28 + $0x40] sm:$0xff]   ;;  %v3266_v26 = vld [vmem:[%s3383_s28 + $0x170] sm:$0xff]  }
  0x16   : > { %v3265_v27 = vld [vmem:[%s3383_s28 + $0x48] sm:$0xff]   ;;  %v3267_v28 = vld [vmem:[%s3383_s28 + $0x178] sm:$0xff]   ;;  %v3268_v29 = vld [vmem:[%s3383_s28 + $0x50] sm:$0xff]  }
  0x17   : > { %3075 = vmatpush3.bf16.msra.mxu0 %v964_v8  ;;  %3233 = vmatpush3.bf16.msra.mxu1 %v964_v8  ;;  %v3270_v30 = vld [vmem:[%s3383_s28 + $0x180] sm:$0xff]   ;;  %v3269_v31 = vld [vmem:[%s3383_s28 + $0x58] sm:$0xff]   ;;  %v3271_v32 = vld [vmem:[%s3383_s28 + $0x188] sm:$0xff]  }
  0x18   : > { %v3272_v33 = vld [vmem:[%s3383_s28 + $0x60] sm:$0xff]   ;;  %v3274_v34 = vld [vmem:[%s3383_s28 + $0x190] sm:$0xff]   ;;  %v3273_v35 = vld [vmem:[%s3383_s28 + $0x68] sm:$0xff]  }
  0x19   : > { %v3275_v36 = vld [vmem:[%s3383_s28 + $0x198] sm:$0xff]   ;;  %v3276_v37 = vld [vmem:[%s3383_s28 + $0x70] sm:$0xff]   ;;  %v3278_v38 = vld [vmem:[%s3383_s28 + $0x1a0] sm:$0xff]  }
  0x1a   : > { %3077 = vmatmul.mubr.msk.bf16.vlgmr.msra.gmra.mrb[0].mxu0 %vm736_vm2, %v3249_v11  ;;  %3153 = vmatmul.mubr.msk.bf16.vlgmr.msra.gmra.mrb[0].mxu1 %vm736_vm2, %v3251_v12  ;;  %v3277_v39 = vld [vmem:[%s3383_s28 + $0x78] sm:$0xff]   ;;  %v3279_v40 = vld [vmem:[%s3383_s28 + $0x1a8] sm:$0xff]   ;;  %v3280_v41 = vld [vmem:[%s3383_s28 + $0x80] sm:$0xff]  }
  0x1b   : > { %3080 = vmatprep.mubr.msk.bf16.mxu0 %vm736_vm2, %v3252_v13  ;;  %3156 = vmatprep.mubr.msk.bf16.mxu1 %vm736_vm2, %v3254_v14  ;;  %v3282_v42 = vld [vmem:[%s3383_s28 + $0x1b0] sm:$0xff]   ;;  %v3281_v43 = vld [vmem:[%s3383_s28 + $0x88] sm:$0xff]   ;;  %v3283_v44 = vld [vmem:[%s3383_s28 + $0x1b8] sm:$0xff]  }
  0x1c   : > { %v3284_v45 = vld [vmem:[%s3383_s28 + $0x90] sm:$0xff]   ;;  %v3286_v46 = vld [vmem:[%s3383_s28 + $0x1c0] sm:$0xff]   ;;  %v3285_v47 = vld [vmem:[%s3383_s28 + $0x98] sm:$0xff]  }
  0x1d   : > { %v3287_v48 = vld [vmem:[%s3383_s28 + $0x1c8] sm:$0xff]   ;;  %v3288_v49 = vld [vmem:[%s3383_s28 + $0xa0] sm:$0xff]   ;;  %v3290_v50 = vld [vmem:[%s3383_s28 + $0x1d0] sm:$0xff]  }
  0x1e   : > { %v3289_v51 = vld [vmem:[%s3383_s28 + $0xa8] sm:$0xff]   ;;  %v3291_v52 = vld [vmem:[%s3383_s28 + $0x1d8] sm:$0xff]   ;;  %v3292_v53 = vld [vmem:[%s3383_s28 + $0xb0] sm:$0xff]  }
  0x1f   : > { %v3294_v54 = vld [vmem:[%s3383_s28 + $0x1e0] sm:$0xff]   ;;  %v3293_v55 = vld [vmem:[%s3383_s28 + $0xb8] sm:$0xff]   ;;  %v3295_v56 = vld [vmem:[%s3383_s28 + $0x1e8] sm:$0xff]  }
  0x20   : > { %v3296_v57 = vld [vmem:[%s3383_s28 + $0xc0] sm:$0xff]   ;;  %v3298_v58 = vld [vmem:[%s3383_s28 + $0x1f0] sm:$0xff]   ;;  %v3297_v59 = vld [vmem:[%s3383_s28 + $0xc8] sm:$0xff]  }
  0x21   : > { %v3299_v60 = vld [vmem:[%s3383_s28 + $0x1f8] sm:$0xff]   ;;  %v3300_v61 = vld [vmem:[%s3383_s28 + $0xd0] sm:$0xff]   ;;  %v3302_v62 = vld [vmem:[%s3383_s28 + $0x200] sm:$0xff]  }
  0x22   : > { %3081 = vmatmul.mubr.msk.bf16.gmra.mrb[4].mxu0 %vm736_vm2, %v3253_v15  ;;  %3157 = vmatmul.mubr.msk.bf16.gmra.mrb[4].mxu1 %vm736_vm2, %v3255_v16  ;;  %v3301_v63 = vld [vmem:[%s3383_s28 + $0xd8] sm:$0xff]   ;;  %v3303_v0 = vld [vmem:[%s3383_s28 + $0x208] sm:$0xff]   ;;  %v3304_v1 = vld [vmem:[%s3383_s28 + $0xe0] sm:$0xff]  }
  0x23   : > { %3084 = vmatprep.mubr.msk.bf16.mxu0 %vm736_vm2, %v3256_v17  ;;  %3160 = vmatprep.mubr.msk.bf16.mxu1 %vm736_vm2, %v3258_v18  ;;  %v3306_v2 = vld [vmem:[%s3383_s28 + $0x210] sm:$0xff]   ;;  %v3305_v3 = vld [vmem:[%s3383_s28 + $0xe8] sm:$0xff]   ;;  %v3307_v4 = vld [vmem:[%s3383_s28 + $0x218] sm:$0xff]  }
  0x24   : > { %v3308_v5 = vld [vmem:[%s3383_s28 + $0xf0] sm:$0xff]   ;;  %v3310_v6 = vld [vmem:[%s3383_s28 + $0x220] sm:$0xff]   ;;  %v3309_v7 = vld [vmem:[%s3383_s28 + $0xf8] sm:$0xff]  }
  0x25   : > { %v3311_v8 = vld [vmem:[%s3383_s28 + $0x228] sm:$0xff]   ;;  %v3312_v9 = vld [vmem:[%s3383_s28 + $0x100] sm:$0xff]   ;;  %v3314_v10 = vld [vmem:[%s3383_s28 + $0x230] sm:$0xff]  }
  0x26   : > { %v3313_v11 = vld [vmem:[%s3383_s28 + $0x108] sm:$0xff]   ;;  %v3315_v12 = vld [vmem:[%s3383_s28 + $0x238] sm:$0xff]   ;;  %v3316_v13 = vld [vmem:[%s3383_s28 + $0x110] sm:$0xff]  }
  0x27   : > { %v3318_v14 = vld [vmem:[%s3383_s28 + $0x240] sm:$0xff]   ;;  %v3317_v15 = vld [vmem:[%s3383_s28 + $0x118] sm:$0xff]   ;;  %v3319_v16 = vld [vmem:[%s3383_s28 + $0x248] ss:$0 sps:$4 sm:$0xff]  }
  0x28   : > { %v3320_v17 = vld [vmem:[%s3383_s28 + $0x120] sm:$0xff]   ;;  %v3321_v18 = vld [vmem:[%s3383_s28 + $0x128] sm:$0xff]  }
  0x2a   : > { %3085 = vmatmul.mubr.msk.bf16.gmra.mrb[8].mxu0 %vm736_vm2, %v3257_v19  ;;  %3161 = vmatmul.mubr.msk.bf16.gmra.mrb[8].mxu1 %vm736_vm2, %v3259_v20  ;;  %v3536_v19 = vld [vmem:[%s3996_s2] ss:$0 sm:$0xff] }
  0x2b   : > { %3088 = vmatprep.mubr.msk.bf16.mxu0 %vm736_vm2, %v3260_v21  ;;  %3164 = vmatprep.mubr.msk.bf16.mxu1 %vm736_vm2, %v3262_v22 }
  0x32   : > { %3089 = vmatmul.mubr.msk.bf16.gmra.mrb[12].mxu0 %vm736_vm2, %v3261_v23  ;;  %3165 = vmatmul.mubr.msk.bf16.gmra.mrb[12].mxu1 %vm736_vm2, %v3263_v24 }
  0x33   : > { %3092 = vmatprep.mubr.msk.bf16.mxu0 %vm736_vm2, %v3264_v25  ;;  %3168 = vmatprep.mubr.msk.bf16.mxu1 %vm736_vm2, %v3266_v26 }
  0x3a   : > { %3093 = vmatmul.mubr.msk.bf16.gmra.mrb[16].mxu0 %vm736_vm2, %v3265_v27  ;;  %3169 = vmatmul.mubr.msk.bf16.gmra.mrb[16].mxu1 %vm736_vm2, %v3267_v28 }
  0x3b   : > { %3096 = vmatprep.mubr.msk.bf16.mxu0 %vm736_vm2, %v3268_v29  ;;  %3172 = vmatprep.mubr.msk.bf16.mxu1 %vm736_vm2, %v3270_v30 }
  0x42   : > { %3097 = vmatmul.mubr.msk.bf16.gmra.mrb[20].mxu0 %vm736_vm2, %v3269_v31  ;;  %3173 = vmatmul.mubr.msk.bf16.gmra.mrb[20].mxu1 %vm736_vm2, %v3271_v32 }
  0x43   : > { %3100 = vmatprep.mubr.msk.bf16.mxu0 %vm736_vm2, %v3272_v33  ;;  %3176 = vmatprep.mubr.msk.bf16.mxu1 %vm736_vm2, %v3274_v34 }
  0x4a   : > { %3101 = vmatmul.mubr.msk.bf16.gmra.mrb[24].mxu0 %vm736_vm2, %v3273_v35  ;;  %3177 = vmatmul.mubr.msk.bf16.gmra.mrb[24].mxu1 %vm736_vm2, %v3275_v36 }
  0x4b   : > { %3104 = vmatprep.mubr.msk.bf16.mxu0 %vm736_vm2, %v3276_v37  ;;  %3180 = vmatprep.mubr.msk.bf16.mxu1 %vm736_vm2, %v3278_v38 }
  0x52   : > { %3105 = vmatmul.mubr.msk.bf16.gmra.mrb[28].mxu0 %vm736_vm2, %v3277_v39  ;;  %3181 = vmatmul.mubr.msk.bf16.gmra.mrb[28].mxu1 %vm736_vm2, %v3279_v40 }
  0x53   : > { %3108 = vmatprep.mubr.msk.bf16.mxu0 %vm736_vm2, %v3280_v41  ;;  %3184 = vmatprep.mubr.msk.bf16.mxu1 %vm736_vm2, %v3282_v42 }
  0x5a   : > { %3109 = vmatmul.mubr.msk.bf16.gmra.mrb[32].mxu0 %vm736_vm2, %v3281_v43  ;;  %3185 = vmatmul.mubr.msk.bf16.gmra.mrb[32].mxu1 %vm736_vm2, %v3283_v44 }
  0x5b   : > { %3112 = vmatprep.mubr.msk.bf16.mxu0 %vm736_vm2, %v3284_v45  ;;  %3188 = vmatprep.mubr.msk.bf16.mxu1 %vm736_vm2, %v3286_v46 }
  0x62   : > { %3113 = vmatmul.mubr.msk.bf16.gmra.mrb[36].mxu0 %vm736_vm2, %v3285_v47  ;;  %3189 = vmatmul.mubr.msk.bf16.gmra.mrb[36].mxu1 %vm736_vm2, %v3287_v48 }
  0x63   : > { %3116 = vmatprep.mubr.msk.bf16.mxu0 %vm736_vm2, %v3288_v49  ;;  %3192 = vmatprep.mubr.msk.bf16.mxu1 %vm736_vm2, %v3290_v50 }
  0x6a   : > { %3117 = vmatmul.mubr.msk.bf16.gmra.mrb[40].mxu0 %vm736_vm2, %v3289_v51  ;;  %3193 = vmatmul.mubr.msk.bf16.gmra.mrb[40].mxu1 %vm736_vm2, %v3291_v52 }
  0x6b   : > { %3120 = vmatprep.mubr.msk.bf16.mxu0 %vm736_vm2, %v3292_v53  ;;  %3196 = vmatprep.mubr.msk.bf16.mxu1 %vm736_vm2, %v3294_v54 }
  0x72   : > { %3121 = vmatmul.mubr.msk.bf16.gmra.mrb[44].mxu0 %vm736_vm2, %v3293_v55  ;;  %3197 = vmatmul.mubr.msk.bf16.gmra.mrb[44].mxu1 %vm736_vm2, %v3295_v56 }
  0x73   : > { %3124 = vmatprep.mubr.msk.bf16.mxu0 %vm736_vm2, %v3296_v57  ;;  %3200 = vmatprep.mubr.msk.bf16.mxu1 %vm736_vm2, %v3298_v58 }
  0x7a   : > { %3125 = vmatmul.mubr.msk.bf16.gmra.mrb[48].mxu0 %vm736_vm2, %v3297_v59  ;;  %3201 = vmatmul.mubr.msk.bf16.gmra.mrb[48].mxu1 %vm736_vm2, %v3299_v60 }
  0x7b   : > { %3128 = vmatprep.mubr.msk.bf16.mxu0 %vm736_vm2, %v3300_v61  ;;  %3204 = vmatprep.mubr.msk.bf16.mxu1 %vm736_vm2, %v3302_v62 }
  0x82   : > { %3129 = vmatmul.mubr.msk.bf16.gmra.mrb[52].mxu0 %vm736_vm2, %v3301_v63  ;;  %3205 = vmatmul.mubr.msk.bf16.gmra.mrb[52].mxu1 %vm736_vm2, %v3303_v0 }
  0x83   : > { %3132 = vmatprep.mubr.msk.bf16.mxu0 %vm736_vm2, %v3304_v1  ;;  %3208 = vmatprep.mubr.msk.bf16.mxu1 %vm736_vm2, %v3306_v2 }
  0x8a   : > { %3133 = vmatmul.mubr.msk.bf16.gmra.mrb[56].mxu0 %vm736_vm2, %v3305_v3  ;;  %3209 = vmatmul.mubr.msk.bf16.gmra.mrb[56].mxu1 %vm736_vm2, %v3307_v4 }
  0x8b   : > { %3136 = vmatprep.mubr.msk.bf16.mxu0 %vm736_vm2, %v3308_v5  ;;  %3212 = vmatprep.mubr.msk.bf16.mxu1 %vm736_vm2, %v3310_v6 }
  0x92   : > { %3137 = vmatmul.mubr.msk.bf16.gmra.mrb[60].mxu0 %vm736_vm2, %v3309_v7  ;;  %3213 = vmatmul.mubr.msk.bf16.gmra.mrb[60].mxu1 %vm736_vm2, %v3311_v8 }
  0x93   : > { %3140 = vmatprep.mubr.msk.bf16.mxu0 %vm736_vm2, %v3312_v9  ;;  %3216 = vmatprep.mubr.msk.bf16.mxu1 %vm736_vm2, %v3314_v10 }
  0x9a   : > { %3141 = vmatmul.mubr.msk.bf16.gmra.mrb[64].mxu0 %vm736_vm2, %v3313_v11  ;;  %3217 = vmatmul.mubr.msk.bf16.gmra.mrb[64].mxu1 %vm736_vm2, %v3315_v12 }
  0x9b   : > { %3144 = vmatprep.mubr.msk.bf16.mxu0 %vm736_vm2, %v3316_v13  ;;  %3220 = vmatprep.mubr.msk.bf16.mxu1 %vm736_vm2, %v3318_v14 }
  0xa2   : > { %3145 = vmatmul.mubr.msk.bf16.gmra.mrb[68].mxu0 %vm736_vm2, %v3317_v15  ;;  %3221 = vmatmul.mubr.msk.bf16.gmra.mrb[68].mxu1 %vm736_vm2, %v3319_v16 }
  0xa3   : > { %3148 = vmatprep.mubr.msk.bf16.mxu0 %vm736_vm2, %v3320_v17 }
  0xaa   : > { %3149 = vmatmul.mubr.msk.bf16.gmra.mrb[72].mxu0 %vm736_vm2, %v3321_v18 }
  0xed   : > { %v3078_v20 = vpop.f32.mrb[0].mxu0  ;;  %v3154_v21 = vpop.f32.mrb[0].mxu1 }
  0xee   : > { %v1009_v22 = vadd.f32 %v3078_v20, %v3536_v19  ;;  %v1000_v23 = vpop.f32.mrb[1].mxu0  ;;  %v1313_v24 = vadd.f32 %v3154_v21, %v3536_v19  ;;  %v1304_v25 = vpop.f32.mrb[1].mxu1 }
  0xef   : > { %v1001_v26 = vadd.f32 %v3536_v19, %v1000_v23  ;;  %v3079_v27 = vpop.f32.mrb[2].mxu0  ;;  %v1305_v28 = vadd.f32 %v3536_v19, %v1304_v25  ;;  %v3155_v29 = vpop.f32.mrb[2].mxu1 }
  0xf0   : > { %v1592_v30 = vmax.f32 %v1009_v22, 0.0  ;;  %v1012_v31 = vadd.f32 %v3079_v27, %v3536_v19  ;;  %v1003_v32 = vpop.f32.mrb[3].mxu0  ;;  %v1668_v33 = vmax.f32 %v1313_v24, 0.0  ;;  %v1316_v34 = vadd.f32 %v3155_v29, %v3536_v19  ;;  %v1307_v35 = vpop.f32.mrb[3].mxu1 }
  0xf1   : > { %v1590_v36 = vmax.f32 %v1001_v26, 0.0  ;;  %v1004_v37 = vadd.f32 %v3536_v19, %v1003_v32  ;;  %v1666_v38 = vmax.f32 %v1305_v28, 0.0  ;;  %v1308_v39 = vadd.f32 %v3536_v19, %v1307_v35 }
  0xf2   : > { %v2842_v40 = vpack.c.bf16 %v1592_v30, %v1592_v30  ;;  %v1593_v41 = vmax.f32 %v1012_v31, 0.0  ;;  %v2918_v42 = vpack.c.bf16 %v1668_v33, %v1668_v33  ;;  %v1669_v43 = vmax.f32 %v1316_v34, 0.0 }
  0xf3   : > { %v2840_v44 = vpack.c.bf16 %v1590_v36, %v1590_v36  ;;  %v1591_v45 = vmax.f32 %v1004_v37, 0.0  ;;  %v2916_v46 = vpack.c.bf16 %v1666_v38, %v1666_v38  ;;  %v1667_v47 = vmax.f32 %v1308_v39, 0.0 }
  0xf4   : > { %2329 = vst.msk [vmem:[%s3549_s6 + $0x8] sm:$0xf] %vm2326_vm3, %v2842_v40  ;;  %v2843_v48 = vpack.c.bf16 %v1593_v41, %v1593_v41  ;;  %2405 = vst.msk [vmem:[%s3549_s6 + $0x138] sm:$0xf] %vm2326_vm3, %v2918_v42  ;;  %v2919_v49 = vpack.c.bf16 %v1669_v43, %v1669_v43 }
  0xf5   : > { %2327 = vst.msk [vmem:[%s3549_s6] sm:$0xf] %vm2326_vm3, %v2840_v44  ;;  %v2841_v50 = vpack.c.bf16 %v1591_v45, %v1591_v45  ;;  %2403 = vst.msk [vmem:[%s3549_s6 + $0x130] sm:$0xf] %vm2326_vm3, %v2916_v46  ;;  %v3082_v51 = vpop.f32.mrb[4].mxu0  ;;  %v2917_v52 = vpack.c.bf16 %v1667_v47, %v1667_v47  ;;  %v3158_v53 = vpop.f32.mrb[4].mxu1 }
  0xf6   : > { %2330 = vst.msk [vmem:[%s3549_s6 + $0xc] sm:$0xf] %vm2326_vm3, %v2843_v48  ;;  %2406 = vst.msk [vmem:[%s3549_s6 + $0x13c] sm:$0xf] %vm2326_vm3, %v2919_v49  ;;  %v1025_v54 = vadd.f32 %v3082_v51, %v3536_v19  ;;  %v1016_v55 = vpop.f32.mrb[5].mxu0  ;;  %v1329_v56 = vadd.f32 %v3158_v53, %v3536_v19  ;;  %v1320_v57 = vpop.f32.mrb[5].mxu1 }
  0xf7   : > { %2328 = vst.msk [vmem:[%s3549_s6 + $0x4] sm:$0xf] %vm2326_vm3, %v2841_v50  ;;  %2404 = vst.msk [vmem:[%s3549_s6 + $0x134] sm:$0xf] %vm2326_vm3, %v2917_v52  ;;  %v1017_v58 = vadd.f32 %v3536_v19, %v1016_v55  ;;  %v3083_v59 = vpop.f32.mrb[6].mxu0  ;;  %v1321_v60 = vadd.f32 %v3536_v19, %v1320_v57  ;;  %v3159_v61 = vpop.f32.mrb[6].mxu1 }
  0xf8   : > { %v1596_v62 = vmax.f32 %v1025_v54, 0.0  ;;  %v1028_v63 = vadd.f32 %v3083_v59, %v3536_v19  ;;  %v1019_v0 = vpop.f32.mrb[7].mxu0  ;;  %v1672_v1 = vmax.f32 %v1329_v56, 0.0  ;;  %v1332_v2 = vadd.f32 %v3159_v61, %v3536_v19  ;;  %v1323_v3 = vpop.f32.mrb[7].mxu1 }
  0xf9   : > { %v1594_v4 = vmax.f32 %v1017_v58, 0.0  ;;  %v1020_v5 = vadd.f32 %v3536_v19, %v1019_v0  ;;  %v1670_v6 = vmax.f32 %v1321_v60, 0.0  ;;  %v1324_v7 = vadd.f32 %v3536_v19, %v1323_v3 }
  0xfa   : > { %v2846_v8 = vpack.c.bf16 %v1596_v62, %v1596_v62  ;;  %v1597_v9 = vmax.f32 %v1028_v63, 0.0  ;;  %v2922_v10 = vpack.c.bf16 %v1672_v1, %v1672_v1  ;;  %v1673_v11 = vmax.f32 %v1332_v2, 0.0 }
  0xfb   : > { %v2844_v12 = vpack.c.bf16 %v1594_v4, %v1594_v4  ;;  %v1595_v13 = vmax.f32 %v1020_v5, 0.0  ;;  %v2920_v14 = vpack.c.bf16 %v1670_v6, %v1670_v6  ;;  %v1671_v15 = vmax.f32 %v1324_v7, 0.0 }
  0xfc   : > { %2333 = vst.msk [vmem:[%s3549_s6 + $0x18] sm:$0xf] %vm2326_vm3, %v2846_v8  ;;  %v2847_v16 = vpack.c.bf16 %v1597_v9, %v1597_v9  ;;  %2409 = vst.msk [vmem:[%s3549_s6 + $0x148] sm:$0xf] %vm2326_vm3, %v2922_v10  ;;  %v2923_v17 = vpack.c.bf16 %v1673_v11, %v1673_v11 }
  0xfd   : > { %2331 = vst.msk [vmem:[%s3549_s6 + $0x10] sm:$0xf] %vm2326_vm3, %v2844_v12  ;;  %v2845_v18 = vpack.c.bf16 %v1595_v13, %v1595_v13  ;;  %2407 = vst.msk [vmem:[%s3549_s6 + $0x140] sm:$0xf] %vm2326_vm3, %v2920_v14  ;;  %v3086_v20 = vpop.f32.mrb[8].mxu0  ;;  %v2921_v21 = vpack.c.bf16 %v1671_v15, %v1671_v15  ;;  %v3162_v22 = vpop.f32.mrb[8].mxu1 }
  0xfe   : > { %2334 = vst.msk [vmem:[%s3549_s6 + $0x1c] sm:$0xf] %vm2326_vm3, %v2847_v16  ;;  %2410 = vst.msk [vmem:[%s3549_s6 + $0x14c] sm:$0xf] %vm2326_vm3, %v2923_v17  ;;  %v1041_v23 = vadd.f32 %v3086_v20, %v3536_v19  ;;  %v1032_v24 = vpop.f32.mrb[9].mxu0  ;;  %v1345_v25 = vadd.f32 %v3162_v22, %v3536_v19  ;;  %v1336_v26 = vpop.f32.mrb[9].mxu1 }
  0xff   : > { %2332 = vst.msk [vmem:[%s3549_s6 + $0x14] sm:$0xf] %vm2326_vm3, %v2845_v18  ;;  %2408 = vst.msk [vmem:[%s3549_s6 + $0x144] sm:$0xf] %vm2326_vm3, %v2921_v21  ;;  %v1033_v27 = vadd.f32 %v3536_v19, %v1032_v24  ;;  %v3087_v28 = vpop.f32.mrb[10].mxu0  ;;  %v1337_v29 = vadd.f32 %v3536_v19, %v1336_v26  ;;  %v3163_v30 = vpop.f32.mrb[10].mxu1 }
 0x100   : > { %v1600_v31 = vmax.f32 %v1041_v23, 0.0  ;;  %v1044_v32 = vadd.f32 %v3087_v28, %v3536_v19  ;;  %v1035_v33 = vpop.f32.mrb[11].mxu0  ;;  %v1676_v34 = vmax.f32 %v1345_v25, 0.0  ;;  %v1348_v35 = vadd.f32 %v3163_v30, %v3536_v19  ;;  %v1339_v36 = vpop.f32.mrb[11].mxu1 }
 0x101   : > { %v1598_v37 = vmax.f32 %v1033_v27, 0.0  ;;  %v1036_v38 = vadd.f32 %v3536_v19, %v1035_v33  ;;  %v1674_v39 = vmax.f32 %v1337_v29, 0.0  ;;  %v1340_v40 = vadd.f32 %v3536_v19, %v1339_v36 }
 0x102   : > { %v2850_v41 = vpack.c.bf16 %v1600_v31, %v1600_v31  ;;  %v1601_v42 = vmax.f32 %v1044_v32, 0.0  ;;  %v2926_v43 = vpack.c.bf16 %v1676_v34, %v1676_v34  ;;  %v1677_v44 = vmax.f32 %v1348_v35, 0.0 }
 0x103   : > { %v2848_v45 = vpack.c.bf16 %v1598_v37, %v1598_v37  ;;  %v1599_v46 = vmax.f32 %v1036_v38, 0.0  ;;  %v2924_v47 = vpack.c.bf16 %v1674_v39, %v1674_v39  ;;  %v1675_v48 = vmax.f32 %v1340_v40, 0.0 }
 0x104   : > { %2337 = vst.msk [vmem:[%s3549_s6 + $0x28] sm:$0xf] %vm2326_vm3, %v2850_v41  ;;  %v2851_v49 = vpack.c.bf16 %v1601_v42, %v1601_v42  ;;  %2413 = vst.msk [vmem:[%s3549_s6 + $0x158] sm:$0xf] %vm2326_vm3, %v2926_v43  ;;  %v2927_v50 = vpack.c.bf16 %v1677_v44, %v1677_v44 }
 0x105   : > { %2335 = vst.msk [vmem:[%s3549_s6 + $0x20] sm:$0xf] %vm2326_vm3, %v2848_v45  ;;  %v2849_v51 = vpack.c.bf16 %v1599_v46, %v1599_v46  ;;  %2411 = vst.msk [vmem:[%s3549_s6 + $0x150] sm:$0xf] %vm2326_vm3, %v2924_v47  ;;  %v3090_v52 = vpop.f32.mrb[12].mxu0  ;;  %v2925_v53 = vpack.c.bf16 %v1675_v48, %v1675_v48  ;;  %v3166_v54 = vpop.f32.mrb[12].mxu1 }
 0x106   : > { %2338 = vst.msk [vmem:[%s3549_s6 + $0x2c] sm:$0xf] %vm2326_vm3, %v2851_v49  ;;  %2414 = vst.msk [vmem:[%s3549_s6 + $0x15c] sm:$0xf] %vm2326_vm3, %v2927_v50  ;;  %v1057_v55 = vadd.f32 %v3090_v52, %v3536_v19  ;;  %v1048_v56 = vpop.f32.mrb[13].mxu0  ;;  %v1361_v57 = vadd.f32 %v3166_v54, %v3536_v19  ;;  %v1352_v58 = vpop.f32.mrb[13].mxu1 }
 0x107   : > { %2336 = vst.msk [vmem:[%s3549_s6 + $0x24] sm:$0xf] %vm2326_vm3, %v2849_v51  ;;  %2412 = vst.msk [vmem:[%s3549_s6 + $0x154] sm:$0xf] %vm2326_vm3, %v2925_v53  ;;  %v1049_v59 = vadd.f32 %v3536_v19, %v1048_v56  ;;  %v3091_v60 = vpop.f32.mrb[14].mxu0  ;;  %v1353_v61 = vadd.f32 %v3536_v19, %v1352_v58  ;;  %v3167_v62 = vpop.f32.mrb[14].mxu1 }
 0x108   : > { %v1604_v63 = vmax.f32 %v1057_v55, 0.0  ;;  %v1060_v0 = vadd.f32 %v3091_v60, %v3536_v19  ;;  %v1051_v1 = vpop.f32.mrb[15].mxu0  ;;  %v1680_v2 = vmax.f32 %v1361_v57, 0.0  ;;  %v1364_v3 = vadd.f32 %v3167_v62, %v3536_v19  ;;  %v1355_v4 = vpop.f32.mrb[15].mxu1 }
 0x109   : > { %v1602_v5 = vmax.f32 %v1049_v59, 0.0  ;;  %v1052_v6 = vadd.f32 %v3536_v19, %v1051_v1  ;;  %v1678_v7 = vmax.f32 %v1353_v61, 0.0  ;;  %v1356_v8 = vadd.f32 %v3536_v19, %v1355_v4 }
 0x10a   : > { %v2854_v9 = vpack.c.bf16 %v1604_v63, %v1604_v63  ;;  %v1605_v10 = vmax.f32 %v1060_v0, 0.0  ;;  %v2930_v11 = vpack.c.bf16 %v1680_v2, %v1680_v2  ;;  %v1681_v12 = vmax.f32 %v1364_v3, 0.0 }
 0x10b   : > { %v2852_v13 = vpack.c.bf16 %v1602_v5, %v1602_v5  ;;  %v1603_v14 = vmax.f32 %v1052_v6, 0.0  ;;  %v2928_v15 = vpack.c.bf16 %v1678_v7, %v1678_v7  ;;  %v1679_v16 = vmax.f32 %v1356_v8, 0.0 }
 0x10c   : > { %2341 = vst.msk [vmem:[%s3549_s6 + $0x38] sm:$0xf] %vm2326_vm3, %v2854_v9  ;;  %v2855_v17 = vpack.c.bf16 %v1605_v10, %v1605_v10  ;;  %2417 = vst.msk [vmem:[%s3549_s6 + $0x168] sm:$0xf] %vm2326_vm3, %v2930_v11  ;;  %v2931_v18 = vpack.c.bf16 %v1681_v12, %v1681_v12 }
 0x10d   : > { %2339 = vst.msk [vmem:[%s3549_s6 + $0x30] sm:$0xf] %vm2326_vm3, %v2852_v13  ;;  %v2853_v20 = vpack.c.bf16 %v1603_v14, %v1603_v14  ;;  %2415 = vst.msk [vmem:[%s3549_s6 + $0x160] sm:$0xf] %vm2326_vm3, %v2928_v15  ;;  %v3094_v21 = vpop.f32.mrb[16].mxu0  ;;  %v2929_v22 = vpack.c.bf16 %v1679_v16, %v1679_v16  ;;  %v3170_v23 = vpop.f32.mrb[16].mxu1 }
 0x10e   : > { %2342 = vst.msk [vmem:[%s3549_s6 + $0x3c] sm:$0xf] %vm2326_vm3, %v2855_v17  ;;  %2418 = vst.msk [vmem:[%s3549_s6 + $0x16c] sm:$0xf] %vm2326_vm3, %v2931_v18  ;;  %v1073_v24 = vadd.f32 %v3094_v21, %v3536_v19  ;;  %v1064_v25 = vpop.f32.mrb[17].mxu0  ;;  %v1377_v26 = vadd.f32 %v3170_v23, %v3536_v19  ;;  %v1368_v27 = vpop.f32.mrb[17].mxu1 }
 0x10f   : > { %2340 = vst.msk [vmem:[%s3549_s6 + $0x34] sm:$0xf] %vm2326_vm3, %v2853_v20  ;;  %2416 = vst.msk [vmem:[%s3549_s6 + $0x164] sm:$0xf] %vm2326_vm3, %v2929_v22  ;;  %v1065_v28 = vadd.f32 %v3536_v19, %v1064_v25  ;;  %v3095_v29 = vpop.f32.mrb[18].mxu0  ;;  %v1369_v30 = vadd.f32 %v3536_v19, %v1368_v27  ;;  %v3171_v31 = vpop.f32.mrb[18].mxu1 }
 0x110   : > { %v1608_v32 = vmax.f32 %v1073_v24, 0.0  ;;  %v1076_v33 = vadd.f32 %v3095_v29, %v3536_v19  ;;  %v1067_v34 = vpop.f32.mrb[19].mxu0  ;;  %v1684_v35 = vmax.f32 %v1377_v26, 0.0  ;;  %v1380_v36 = vadd.f32 %v3171_v31, %v3536_v19  ;;  %v1371_v37 = vpop.f32.mrb[19].mxu1 }
 0x111   : > { %v1606_v38 = vmax.f32 %v1065_v28, 0.0  ;;  %v1068_v39 = vadd.f32 %v3536_v19, %v1067_v34  ;;  %v1682_v40 = vmax.f32 %v1369_v30, 0.0  ;;  %v1372_v41 = vadd.f32 %v3536_v19, %v1371_v37 }
 0x112   : > { %v2858_v42 = vpack.c.bf16 %v1608_v32, %v1608_v32  ;;  %v1609_v43 = vmax.f32 %v1076_v33, 0.0  ;;  %v2934_v44 = vpack.c.bf16 %v1684_v35, %v1684_v35  ;;  %v1685_v45 = vmax.f32 %v1380_v36, 0.0 }
 0x113   : > { %v2856_v46 = vpack.c.bf16 %v1606_v38, %v1606_v38  ;;  %v1607_v47 = vmax.f32 %v1068_v39, 0.0  ;;  %v2932_v48 = vpack.c.bf16 %v1682_v40, %v1682_v40  ;;  %v1683_v49 = vmax.f32 %v1372_v41, 0.0 }
 0x114   : > { %2345 = vst.msk [vmem:[%s3549_s6 + $0x48] sm:$0xf] %vm2326_vm3, %v2858_v42  ;;  %v2859_v50 = vpack.c.bf16 %v1609_v43, %v1609_v43  ;;  %2421 = vst.msk [vmem:[%s3549_s6 + $0x178] sm:$0xf] %vm2326_vm3, %v2934_v44  ;;  %v2935_v51 = vpack.c.bf16 %v1685_v45, %v1685_v45 }
 0x115   : > { %2343 = vst.msk [vmem:[%s3549_s6 + $0x40] sm:$0xf] %vm2326_vm3, %v2856_v46  ;;  %v2857_v52 = vpack.c.bf16 %v1607_v47, %v1607_v47  ;;  %2419 = vst.msk [vmem:[%s3549_s6 + $0x170] sm:$0xf] %vm2326_vm3, %v2932_v48  ;;  %v3098_v53 = vpop.f32.mrb[20].mxu0  ;;  %v2933_v54 = vpack.c.bf16 %v1683_v49, %v1683_v49  ;;  %v3174_v55 = vpop.f32.mrb[20].mxu1 }
 0x116   : > { %2346 = vst.msk [vmem:[%s3549_s6 + $0x4c] sm:$0xf] %vm2326_vm3, %v2859_v50  ;;  %2422 = vst.msk [vmem:[%s3549_s6 + $0x17c] sm:$0xf] %vm2326_vm3, %v2935_v51  ;;  %v1089_v56 = vadd.f32 %v3098_v53, %v3536_v19  ;;  %v1080_v57 = vpop.f32.mrb[21].mxu0  ;;  %v1393_v58 = vadd.f32 %v3174_v55, %v3536_v19  ;;  %v1384_v59 = vpop.f32.mrb[21].mxu1 }
 0x117   : > { %2344 = vst.msk [vmem:[%s3549_s6 + $0x44] sm:$0xf] %vm2326_vm3, %v2857_v52  ;;  %2420 = vst.msk [vmem:[%s3549_s6 + $0x174] sm:$0xf] %vm2326_vm3, %v2933_v54  ;;  %v1081_v60 = vadd.f32 %v3536_v19, %v1080_v57  ;;  %v3099_v61 = vpop.f32.mrb[22].mxu0  ;;  %v1385_v62 = vadd.f32 %v3536_v19, %v1384_v59  ;;  %v3175_v63 = vpop.f32.mrb[22].mxu1 }
 0x118   : > { %v1612_v0 = vmax.f32 %v1089_v56, 0.0  ;;  %v1092_v1 = vadd.f32 %v3099_v61, %v3536_v19  ;;  %v1083_v2 = vpop.f32.mrb[23].mxu0  ;;  %v1688_v3 = vmax.f32 %v1393_v58, 0.0  ;;  %v1396_v4 = vadd.f32 %v3175_v63, %v3536_v19  ;;  %v1387_v5 = vpop.f32.mrb[23].mxu1 }
 0x119   : > { %v1610_v6 = vmax.f32 %v1081_v60, 0.0  ;;  %v1084_v7 = vadd.f32 %v3536_v19, %v1083_v2  ;;  %v1686_v8 = vmax.f32 %v1385_v62, 0.0  ;;  %v1388_v9 = vadd.f32 %v3536_v19, %v1387_v5 }
 0x11a   : > { %v2862_v10 = vpack.c.bf16 %v1612_v0, %v1612_v0  ;;  %v1613_v11 = vmax.f32 %v1092_v1, 0.0  ;;  %v2938_v12 = vpack.c.bf16 %v1688_v3, %v1688_v3  ;;  %v1689_v13 = vmax.f32 %v1396_v4, 0.0 }
 0x11b   : > { %v2860_v14 = vpack.c.bf16 %v1610_v6, %v1610_v6  ;;  %v1611_v15 = vmax.f32 %v1084_v7, 0.0  ;;  %v2936_v16 = vpack.c.bf16 %v1686_v8, %v1686_v8  ;;  %v1687_v17 = vmax.f32 %v1388_v9, 0.0 }
 0x11c   : > { %2349 = vst.msk [vmem:[%s3549_s6 + $0x58] sm:$0xf] %vm2326_vm3, %v2862_v10  ;;  %v2863_v18 = vpack.c.bf16 %v1613_v11, %v1613_v11  ;;  %2425 = vst.msk [vmem:[%s3549_s6 + $0x188] sm:$0xf] %vm2326_vm3, %v2938_v12  ;;  %v2939_v20 = vpack.c.bf16 %v1689_v13, %v1689_v13 }
 0x11d   : > { %2347 = vst.msk [vmem:[%s3549_s6 + $0x50] sm:$0xf] %vm2326_vm3, %v2860_v14  ;;  %v2861_v21 = vpack.c.bf16 %v1611_v15, %v1611_v15  ;;  %2423 = vst.msk [vmem:[%s3549_s6 + $0x180] sm:$0xf] %vm2326_vm3, %v2936_v16  ;;  %v3102_v22 = vpop.f32.mrb[24].mxu0  ;;  %v2937_v23 = vpack.c.bf16 %v1687_v17, %v1687_v17  ;;  %v3178_v24 = vpop.f32.mrb[24].mxu1 }
 0x11e   : > { %2350 = vst.msk [vmem:[%s3549_s6 + $0x5c] sm:$0xf] %vm2326_vm3, %v2863_v18  ;;  %2426 = vst.msk [vmem:[%s3549_s6 + $0x18c] sm:$0xf] %vm2326_vm3, %v2939_v20  ;;  %v1105_v25 = vadd.f32 %v3102_v22, %v3536_v19  ;;  %v1096_v26 = vpop.f32.mrb[25].mxu0  ;;  %v1409_v27 = vadd.f32 %v3178_v24, %v3536_v19  ;;  %v1400_v28 = vpop.f32.mrb[25].mxu1 }
 0x11f   : > { %2348 = vst.msk [vmem:[%s3549_s6 + $0x54] sm:$0xf] %vm2326_vm3, %v2861_v21  ;;  %2424 = vst.msk [vmem:[%s3549_s6 + $0x184] sm:$0xf] %vm2326_vm3, %v2937_v23  ;;  %v1097_v29 = vadd.f32 %v3536_v19, %v1096_v26  ;;  %v3103_v30 = vpop.f32.mrb[26].mxu0  ;;  %v1401_v31 = vadd.f32 %v3536_v19, %v1400_v28  ;;  %v3179_v32 = vpop.f32.mrb[26].mxu1 }
 0x120   : > { %v1616_v33 = vmax.f32 %v1105_v25, 0.0  ;;  %v1108_v34 = vadd.f32 %v3103_v30, %v3536_v19  ;;  %v1099_v35 = vpop.f32.mrb[27].mxu0  ;;  %v1692_v36 = vmax.f32 %v1409_v27, 0.0  ;;  %v1412_v37 = vadd.f32 %v3179_v32, %v3536_v19  ;;  %v1403_v38 = vpop.f32.mrb[27].mxu1 }
 0x121   : > { %v1614_v39 = vmax.f32 %v1097_v29, 0.0  ;;  %v1100_v40 = vadd.f32 %v3536_v19, %v1099_v35  ;;  %v1690_v41 = vmax.f32 %v1401_v31, 0.0  ;;  %v1404_v42 = vadd.f32 %v3536_v19, %v1403_v38 }
 0x122   : > { %v2866_v43 = vpack.c.bf16 %v1616_v33, %v1616_v33  ;;  %v1617_v44 = vmax.f32 %v1108_v34, 0.0  ;;  %v2942_v45 = vpack.c.bf16 %v1692_v36, %v1692_v36  ;;  %v1693_v46 = vmax.f32 %v1412_v37, 0.0 }
 0x123   : > { %v2864_v47 = vpack.c.bf16 %v1614_v39, %v1614_v39  ;;  %v1615_v48 = vmax.f32 %v1100_v40, 0.0  ;;  %v2940_v49 = vpack.c.bf16 %v1690_v41, %v1690_v41  ;;  %v1691_v50 = vmax.f32 %v1404_v42, 0.0 }
 0x124   : > { %2353 = vst.msk [vmem:[%s3549_s6 + $0x68] sm:$0xf] %vm2326_vm3, %v2866_v43  ;;  %v2867_v51 = vpack.c.bf16 %v1617_v44, %v1617_v44  ;;  %2429 = vst.msk [vmem:[%s3549_s6 + $0x198] sm:$0xf] %vm2326_vm3, %v2942_v45  ;;  %v2943_v52 = vpack.c.bf16 %v1693_v46, %v1693_v46 }
 0x125   : > { %2351 = vst.msk [vmem:[%s3549_s6 + $0x60] sm:$0xf] %vm2326_vm3, %v2864_v47  ;;  %v2865_v53 = vpack.c.bf16 %v1615_v48, %v1615_v48  ;;  %2427 = vst.msk [vmem:[%s3549_s6 + $0x190] sm:$0xf] %vm2326_vm3, %v2940_v49  ;;  %v3106_v54 = vpop.f32.mrb[28].mxu0  ;;  %v2941_v55 = vpack.c.bf16 %v1691_v50, %v1691_v50  ;;  %v3182_v56 = vpop.f32.mrb[28].mxu1 }
 0x126   : > { %2354 = vst.msk [vmem:[%s3549_s6 + $0x6c] sm:$0xf] %vm2326_vm3, %v2867_v51  ;;  %2430 = vst.msk [vmem:[%s3549_s6 + $0x19c] sm:$0xf] %vm2326_vm3, %v2943_v52  ;;  %v1121_v57 = vadd.f32 %v3106_v54, %v3536_v19  ;;  %v1112_v58 = vpop.f32.mrb[29].mxu0  ;;  %v1425_v59 = vadd.f32 %v3182_v56, %v3536_v19  ;;  %v1416_v60 = vpop.f32.mrb[29].mxu1 }
 0x127   : > { %2352 = vst.msk [vmem:[%s3549_s6 + $0x64] sm:$0xf] %vm2326_vm3, %v2865_v53  ;;  %2428 = vst.msk [vmem:[%s3549_s6 + $0x194] sm:$0xf] %vm2326_vm3, %v2941_v55  ;;  %v1113_v61 = vadd.f32 %v3536_v19, %v1112_v58  ;;  %v3107_v62 = vpop.f32.mrb[30].mxu0  ;;  %v1417_v63 = vadd.f32 %v3536_v19, %v1416_v60  ;;  %v3183_v0 = vpop.f32.mrb[30].mxu1 }
 0x128   : > { %v1620_v1 = vmax.f32 %v1121_v57, 0.0  ;;  %v1124_v2 = vadd.f32 %v3107_v62, %v3536_v19  ;;  %v1115_v3 = vpop.f32.mrb[31].mxu0  ;;  %v1696_v4 = vmax.f32 %v1425_v59, 0.0  ;;  %v1428_v5 = vadd.f32 %v3183_v0, %v3536_v19  ;;  %v1419_v6 = vpop.f32.mrb[31].mxu1 }
 0x129   : > { %v1618_v7 = vmax.f32 %v1113_v61, 0.0  ;;  %v1116_v8 = vadd.f32 %v3536_v19, %v1115_v3  ;;  %v1694_v9 = vmax.f32 %v1417_v63, 0.0  ;;  %v1420_v10 = vadd.f32 %v3536_v19, %v1419_v6 }
 0x12a   : > { %v2870_v11 = vpack.c.bf16 %v1620_v1, %v1620_v1  ;;  %v1621_v12 = vmax.f32 %v1124_v2, 0.0  ;;  %v2946_v13 = vpack.c.bf16 %v1696_v4, %v1696_v4  ;;  %v1697_v14 = vmax.f32 %v1428_v5, 0.0 }
 0x12b   : > { %v2868_v15 = vpack.c.bf16 %v1618_v7, %v1618_v7  ;;  %v1619_v16 = vmax.f32 %v1116_v8, 0.0  ;;  %v2944_v17 = vpack.c.bf16 %v1694_v9, %v1694_v9  ;;  %v1695_v18 = vmax.f32 %v1420_v10, 0.0 }
 0x12c   : > { %2357 = vst.msk [vmem:[%s3549_s6 + $0x78] sm:$0xf] %vm2326_vm3, %v2870_v11  ;;  %v2871_v20 = vpack.c.bf16 %v1621_v12, %v1621_v12  ;;  %2433 = vst.msk [vmem:[%s3549_s6 + $0x1a8] sm:$0xf] %vm2326_vm3, %v2946_v13  ;;  %v2947_v21 = vpack.c.bf16 %v1697_v14, %v1697_v14 }
 0x12d   : > { %2355 = vst.msk [vmem:[%s3549_s6 + $0x70] sm:$0xf] %vm2326_vm3, %v2868_v15  ;;  %v2869_v22 = vpack.c.bf16 %v1619_v16, %v1619_v16  ;;  %2431 = vst.msk [vmem:[%s3549_s6 + $0x1a0] sm:$0xf] %vm2326_vm3, %v2944_v17  ;;  %v3110_v23 = vpop.f32.mrb[32].mxu0  ;;  %v2945_v24 = vpack.c.bf16 %v1695_v18, %v1695_v18  ;;  %v3186_v25 = vpop.f32.mrb[32].mxu1 }
 0x12e   : > { %2358 = vst.msk [vmem:[%s3549_s6 + $0x7c] sm:$0xf] %vm2326_vm3, %v2871_v20  ;;  %2434 = vst.msk [vmem:[%s3549_s6 + $0x1ac] sm:$0xf] %vm2326_vm3, %v2947_v21  ;;  %v1137_v26 = vadd.f32 %v3110_v23, %v3536_v19  ;;  %v1128_v27 = vpop.f32.mrb[33].mxu0  ;;  %v1441_v28 = vadd.f32 %v3186_v25, %v3536_v19  ;;  %v1432_v29 = vpop.f32.mrb[33].mxu1 }
 0x12f   : > { %2356 = vst.msk [vmem:[%s3549_s6 + $0x74] sm:$0xf] %vm2326_vm3, %v2869_v22  ;;  %2432 = vst.msk [vmem:[%s3549_s6 + $0x1a4] sm:$0xf] %vm2326_vm3, %v2945_v24  ;;  %v1129_v30 = vadd.f32 %v3536_v19, %v1128_v27  ;;  %v3111_v31 = vpop.f32.mrb[34].mxu0  ;;  %v1433_v32 = vadd.f32 %v3536_v19, %v1432_v29  ;;  %v3187_v33 = vpop.f32.mrb[34].mxu1 }
 0x130   : > { %v1624_v34 = vmax.f32 %v1137_v26, 0.0  ;;  %v1140_v35 = vadd.f32 %v3111_v31, %v3536_v19  ;;  %v1131_v36 = vpop.f32.mrb[35].mxu0  ;;  %v1700_v37 = vmax.f32 %v1441_v28, 0.0  ;;  %v1444_v38 = vadd.f32 %v3187_v33, %v3536_v19  ;;  %v1435_v39 = vpop.f32.mrb[35].mxu1 }
 0x131   : > { %v1622_v40 = vmax.f32 %v1129_v30, 0.0  ;;  %v1132_v41 = vadd.f32 %v3536_v19, %v1131_v36  ;;  %v1698_v42 = vmax.f32 %v1433_v32, 0.0  ;;  %v1436_v43 = vadd.f32 %v3536_v19, %v1435_v39 }
 0x132   : > { %v2874_v44 = vpack.c.bf16 %v1624_v34, %v1624_v34  ;;  %v1625_v45 = vmax.f32 %v1140_v35, 0.0  ;;  %v2950_v46 = vpack.c.bf16 %v1700_v37, %v1700_v37  ;;  %v1701_v47 = vmax.f32 %v1444_v38, 0.0 }
 0x133   : > { %v2872_v48 = vpack.c.bf16 %v1622_v40, %v1622_v40  ;;  %v1623_v49 = vmax.f32 %v1132_v41, 0.0  ;;  %v2948_v50 = vpack.c.bf16 %v1698_v42, %v1698_v42  ;;  %v1699_v51 = vmax.f32 %v1436_v43, 0.0 }
 0x134   : > { %2361 = vst.msk [vmem:[%s3549_s6 + $0x88] sm:$0xf] %vm2326_vm3, %v2874_v44  ;;  %v2875_v52 = vpack.c.bf16 %v1625_v45, %v1625_v45  ;;  %2437 = vst.msk [vmem:[%s3549_s6 + $0x1b8] sm:$0xf] %vm2326_vm3, %v2950_v46  ;;  %v2951_v53 = vpack.c.bf16 %v1701_v47, %v1701_v47 }
 0x135   : > { %2359 = vst.msk [vmem:[%s3549_s6 + $0x80] sm:$0xf] %vm2326_vm3, %v2872_v48  ;;  %v2873_v54 = vpack.c.bf16 %v1623_v49, %v1623_v49  ;;  %2435 = vst.msk [vmem:[%s3549_s6 + $0x1b0] sm:$0xf] %vm2326_vm3, %v2948_v50  ;;  %v3114_v55 = vpop.f32.mrb[36].mxu0  ;;  %v2949_v56 = vpack.c.bf16 %v1699_v51, %v1699_v51  ;;  %v3190_v57 = vpop.f32.mrb[36].mxu1 }
 0x136   : > { %2362 = vst.msk [vmem:[%s3549_s6 + $0x8c] sm:$0xf] %vm2326_vm3, %v2875_v52  ;;  %2438 = vst.msk [vmem:[%s3549_s6 + $0x1bc] sm:$0xf] %vm2326_vm3, %v2951_v53  ;;  %v1153_v58 = vadd.f32 %v3114_v55, %v3536_v19  ;;  %v1144_v59 = vpop.f32.mrb[37].mxu0  ;;  %v1457_v60 = vadd.f32 %v3190_v57, %v3536_v19  ;;  %v1448_v61 = vpop.f32.mrb[37].mxu1 }
 0x137   : > { %2360 = vst.msk [vmem:[%s3549_s6 + $0x84] sm:$0xf] %vm2326_vm3, %v2873_v54  ;;  %2436 = vst.msk [vmem:[%s3549_s6 + $0x1b4] sm:$0xf] %vm2326_vm3, %v2949_v56  ;;  %v1145_v62 = vadd.f32 %v3536_v19, %v1144_v59  ;;  %v3115_v63 = vpop.f32.mrb[38].mxu0  ;;  %v1449_v0 = vadd.f32 %v3536_v19, %v1448_v61  ;;  %v3191_v1 = vpop.f32.mrb[38].mxu1 }
 0x138   : > { %v1628_v2 = vmax.f32 %v1153_v58, 0.0  ;;  %v1156_v3 = vadd.f32 %v3115_v63, %v3536_v19  ;;  %v1147_v4 = vpop.f32.mrb[39].mxu0  ;;  %v1704_v5 = vmax.f32 %v1457_v60, 0.0  ;;  %v1460_v6 = vadd.f32 %v3191_v1, %v3536_v19  ;;  %v1451_v7 = vpop.f32.mrb[39].mxu1 }
 0x139   : > { %v1626_v8 = vmax.f32 %v1145_v62, 0.0  ;;  %v1148_v9 = vadd.f32 %v3536_v19, %v1147_v4  ;;  %v1702_v10 = vmax.f32 %v1449_v0, 0.0  ;;  %v1452_v11 = vadd.f32 %v3536_v19, %v1451_v7 }
 0x13a   : > { %v2878_v12 = vpack.c.bf16 %v1628_v2, %v1628_v2  ;;  %v1629_v13 = vmax.f32 %v1156_v3, 0.0  ;;  %v2954_v14 = vpack.c.bf16 %v1704_v5, %v1704_v5  ;;  %v1705_v15 = vmax.f32 %v1460_v6, 0.0 }
 0x13b   : > { %v2876_v16 = vpack.c.bf16 %v1626_v8, %v1626_v8  ;;  %v1627_v17 = vmax.f32 %v1148_v9, 0.0  ;;  %v2952_v18 = vpack.c.bf16 %v1702_v10, %v1702_v10  ;;  %v1703_v20 = vmax.f32 %v1452_v11, 0.0 }
 0x13c   : > { %2365 = vst.msk [vmem:[%s3549_s6 + $0x98] sm:$0xf] %vm2326_vm3, %v2878_v12  ;;  %v2879_v21 = vpack.c.bf16 %v1629_v13, %v1629_v13  ;;  %2441 = vst.msk [vmem:[%s3549_s6 + $0x1c8] sm:$0xf] %vm2326_vm3, %v2954_v14  ;;  %v2955_v22 = vpack.c.bf16 %v1705_v15, %v1705_v15 }
 0x13d   : > { %2363 = vst.msk [vmem:[%s3549_s6 + $0x90] sm:$0xf] %vm2326_vm3, %v2876_v16  ;;  %v2877_v23 = vpack.c.bf16 %v1627_v17, %v1627_v17  ;;  %2439 = vst.msk [vmem:[%s3549_s6 + $0x1c0] sm:$0xf] %vm2326_vm3, %v2952_v18  ;;  %v3118_v24 = vpop.f32.mrb[40].mxu0  ;;  %v2953_v25 = vpack.c.bf16 %v1703_v20, %v1703_v20  ;;  %v3194_v26 = vpop.f32.mrb[40].mxu1 }
 0x13e   : > { %2366 = vst.msk [vmem:[%s3549_s6 + $0x9c] sm:$0xf] %vm2326_vm3, %v2879_v21  ;;  %2442 = vst.msk [vmem:[%s3549_s6 + $0x1cc] sm:$0xf] %vm2326_vm3, %v2955_v22  ;;  %v1169_v27 = vadd.f32 %v3118_v24, %v3536_v19  ;;  %v1160_v28 = vpop.f32.mrb[41].mxu0  ;;  %v1473_v29 = vadd.f32 %v3194_v26, %v3536_v19  ;;  %v1464_v30 = vpop.f32.mrb[41].mxu1 }
 0x13f   : > { %2364 = vst.msk [vmem:[%s3549_s6 + $0x94] sm:$0xf] %vm2326_vm3, %v2877_v23  ;;  %2440 = vst.msk [vmem:[%s3549_s6 + $0x1c4] sm:$0xf] %vm2326_vm3, %v2953_v25  ;;  %v1161_v31 = vadd.f32 %v3536_v19, %v1160_v28  ;;  %v3119_v32 = vpop.f32.mrb[42].mxu0  ;;  %v1465_v33 = vadd.f32 %v3536_v19, %v1464_v30  ;;  %v3195_v34 = vpop.f32.mrb[42].mxu1 }
 0x140   : > { %v1632_v35 = vmax.f32 %v1169_v27, 0.0  ;;  %v1172_v36 = vadd.f32 %v3119_v32, %v3536_v19  ;;  %v1163_v37 = vpop.f32.mrb[43].mxu0  ;;  %v1708_v38 = vmax.f32 %v1473_v29, 0.0  ;;  %v1476_v39 = vadd.f32 %v3195_v34, %v3536_v19  ;;  %v1467_v40 = vpop.f32.mrb[43].mxu1 }
 0x141   : > { %v1630_v41 = vmax.f32 %v1161_v31, 0.0  ;;  %v1164_v42 = vadd.f32 %v3536_v19, %v1163_v37  ;;  %v1706_v43 = vmax.f32 %v1465_v33, 0.0  ;;  %v1468_v44 = vadd.f32 %v3536_v19, %v1467_v40 }
 0x142   : > { %v2882_v45 = vpack.c.bf16 %v1632_v35, %v1632_v35  ;;  %v1633_v46 = vmax.f32 %v1172_v36, 0.0  ;;  %v2958_v47 = vpack.c.bf16 %v1708_v38, %v1708_v38  ;;  %v1709_v48 = vmax.f32 %v1476_v39, 0.0 }
 0x143   : > { %v2880_v49 = vpack.c.bf16 %v1630_v41, %v1630_v41  ;;  %v1631_v50 = vmax.f32 %v1164_v42, 0.0  ;;  %v2956_v51 = vpack.c.bf16 %v1706_v43, %v1706_v43  ;;  %v1707_v52 = vmax.f32 %v1468_v44, 0.0 }
 0x144   : > { %2369 = vst.msk [vmem:[%s3549_s6 + $0xa8] sm:$0xf] %vm2326_vm3, %v2882_v45  ;;  %v2883_v53 = vpack.c.bf16 %v1633_v46, %v1633_v46  ;;  %2445 = vst.msk [vmem:[%s3549_s6 + $0x1d8] sm:$0xf] %vm2326_vm3, %v2958_v47  ;;  %v2959_v54 = vpack.c.bf16 %v1709_v48, %v1709_v48 }
 0x145   : > { %2367 = vst.msk [vmem:[%s3549_s6 + $0xa0] sm:$0xf] %vm2326_vm3, %v2880_v49  ;;  %v2881_v55 = vpack.c.bf16 %v1631_v50, %v1631_v50  ;;  %2443 = vst.msk [vmem:[%s3549_s6 + $0x1d0] sm:$0xf] %vm2326_vm3, %v2956_v51  ;;  %v3122_v56 = vpop.f32.mrb[44].mxu0  ;;  %v2957_v57 = vpack.c.bf16 %v1707_v52, %v1707_v52  ;;  %v3198_v58 = vpop.f32.mrb[44].mxu1 }
 0x146   : > { %2370 = vst.msk [vmem:[%s3549_s6 + $0xac] sm:$0xf] %vm2326_vm3, %v2883_v53  ;;  %2446 = vst.msk [vmem:[%s3549_s6 + $0x1dc] sm:$0xf] %vm2326_vm3, %v2959_v54  ;;  %v1185_v59 = vadd.f32 %v3122_v56, %v3536_v19  ;;  %v1176_v60 = vpop.f32.mrb[45].mxu0  ;;  %v1489_v61 = vadd.f32 %v3198_v58, %v3536_v19  ;;  %v1480_v62 = vpop.f32.mrb[45].mxu1 }
 0x147   : > { %2368 = vst.msk [vmem:[%s3549_s6 + $0xa4] sm:$0xf] %vm2326_vm3, %v2881_v55  ;;  %2444 = vst.msk [vmem:[%s3549_s6 + $0x1d4] sm:$0xf] %vm2326_vm3, %v2957_v57  ;;  %v1177_v63 = vadd.f32 %v3536_v19, %v1176_v60  ;;  %v3123_v0 = vpop.f32.mrb[46].mxu0  ;;  %v1481_v1 = vadd.f32 %v3536_v19, %v1480_v62  ;;  %v3199_v2 = vpop.f32.mrb[46].mxu1 }
 0x148   : > { %v1636_v3 = vmax.f32 %v1185_v59, 0.0  ;;  %v1188_v4 = vadd.f32 %v3123_v0, %v3536_v19  ;;  %v1179_v5 = vpop.f32.mrb[47].mxu0  ;;  %v1712_v6 = vmax.f32 %v1489_v61, 0.0  ;;  %v1492_v7 = vadd.f32 %v3199_v2, %v3536_v19  ;;  %v1483_v8 = vpop.f32.mrb[47].mxu1  ;;  %v3856_v59 = vld [vmem:[%s3996_s2] ss:$0 sm:$0xff] }
 0x149   : > { %v1634_v9 = vmax.f32 %v1177_v63, 0.0  ;;  %v1180_v10 = vadd.f32 %v3536_v19, %v1179_v5  ;;  %v1710_v11 = vmax.f32 %v1481_v1, 0.0  ;;  %v1484_v12 = vadd.f32 %v3536_v19, %v1483_v8 }
 0x14a   : > { %v2886_v13 = vpack.c.bf16 %v1636_v3, %v1636_v3  ;;  %v1637_v14 = vmax.f32 %v1188_v4, 0.0  ;;  %v2962_v15 = vpack.c.bf16 %v1712_v6, %v1712_v6  ;;  %v1713_v16 = vmax.f32 %v1492_v7, 0.0 }
 0x14b   : > { %v2884_v17 = vpack.c.bf16 %v1634_v9, %v1634_v9  ;;  %v1635_v18 = vmax.f32 %v1180_v10, 0.0  ;;  %v2960_v20 = vpack.c.bf16 %v1710_v11, %v1710_v11  ;;  %v1711_v21 = vmax.f32 %v1484_v12, 0.0 }
 0x14c   : > { %2373 = vst.msk [vmem:[%s3549_s6 + $0xb8] sm:$0xf] %vm2326_vm3, %v2886_v13  ;;  %v2887_v22 = vpack.c.bf16 %v1637_v14, %v1637_v14  ;;  %2449 = vst.msk [vmem:[%s3549_s6 + $0x1e8] sm:$0xf] %vm2326_vm3, %v2962_v15  ;;  %v2963_v23 = vpack.c.bf16 %v1713_v16, %v1713_v16 }
 0x14d   : > { %2371 = vst.msk [vmem:[%s3549_s6 + $0xb0] sm:$0xf] %vm2326_vm3, %v2884_v17  ;;  %v2885_v24 = vpack.c.bf16 %v1635_v18, %v1635_v18  ;;  %2447 = vst.msk [vmem:[%s3549_s6 + $0x1e0] sm:$0xf] %vm2326_vm3, %v2960_v20  ;;  %v3126_v25 = vpop.f32.mrb[48].mxu0  ;;  %v2961_v26 = vpack.c.bf16 %v1711_v21, %v1711_v21  ;;  %v3202_v27 = vpop.f32.mrb[48].mxu1 }
 0x14e   : > { %2374 = vst.msk [vmem:[%s3549_s6 + $0xbc] sm:$0xf] %vm2326_vm3, %v2887_v22  ;;  %2450 = vst.msk [vmem:[%s3549_s6 + $0x1ec] sm:$0xf] %vm2326_vm3, %v2963_v23  ;;  %v1201_v28 = vadd.f32 %v3126_v25, %v3536_v19  ;;  %v1192_v29 = vpop.f32.mrb[49].mxu0  ;;  %v1505_v30 = vadd.f32 %v3202_v27, %v3536_v19  ;;  %v1496_v31 = vpop.f32.mrb[49].mxu1 }
 0x14f   : > { %2372 = vst.msk [vmem:[%s3549_s6 + $0xb4] sm:$0xf] %vm2326_vm3, %v2885_v24  ;;  %2448 = vst.msk [vmem:[%s3549_s6 + $0x1e4] sm:$0xf] %vm2326_vm3, %v2961_v26  ;;  %v1193_v32 = vadd.f32 %v3536_v19, %v1192_v29  ;;  %v3127_v33 = vpop.f32.mrb[50].mxu0  ;;  %v1497_v34 = vadd.f32 %v3536_v19, %v1496_v31  ;;  %v3203_v35 = vpop.f32.mrb[50].mxu1 }
 0x150   : > { %v1640_v36 = vmax.f32 %v1201_v28, 0.0  ;;  %v1204_v37 = vadd.f32 %v3127_v33, %v3536_v19  ;;  %v1195_v38 = vpop.f32.mrb[51].mxu0  ;;  %v1716_v39 = vmax.f32 %v1505_v30, 0.0  ;;  %v1508_v40 = vadd.f32 %v3203_v35, %v3536_v19  ;;  %v1499_v41 = vpop.f32.mrb[51].mxu1 }
 0x151   : > { %v1638_v42 = vmax.f32 %v1193_v32, 0.0  ;;  %v1196_v43 = vadd.f32 %v3536_v19, %v1195_v38  ;;  %v1714_v44 = vmax.f32 %v1497_v34, 0.0  ;;  %v1500_v45 = vadd.f32 %v3536_v19, %v1499_v41 }
 0x152   : > { %v2890_v46 = vpack.c.bf16 %v1640_v36, %v1640_v36  ;;  %v1641_v47 = vmax.f32 %v1204_v37, 0.0  ;;  %v2966_v48 = vpack.c.bf16 %v1716_v39, %v1716_v39  ;;  %v1717_v49 = vmax.f32 %v1508_v40, 0.0 }
 0x153   : > { %v2888_v50 = vpack.c.bf16 %v1638_v42, %v1638_v42  ;;  %v1639_v51 = vmax.f32 %v1196_v43, 0.0  ;;  %v2964_v52 = vpack.c.bf16 %v1714_v44, %v1714_v44  ;;  %v1715_v53 = vmax.f32 %v1500_v45, 0.0 }
 0x154   : > { %2377 = vst.msk [vmem:[%s3549_s6 + $0xc8] sm:$0xf] %vm2326_vm3, %v2890_v46  ;;  %v2891_v54 = vpack.c.bf16 %v1641_v47, %v1641_v47  ;;  %2453 = vst.msk [vmem:[%s3549_s6 + $0x1f8] sm:$0xf] %vm2326_vm3, %v2966_v48  ;;  %v2967_v55 = vpack.c.bf16 %v1717_v49, %v1717_v49 }
 0x155   : > { %2375 = vst.msk [vmem:[%s3549_s6 + $0xc0] sm:$0xf] %vm2326_vm3, %v2888_v50  ;;  %v2889_v19 = vpack.c.bf16 %v1639_v51, %v1639_v51  ;;  %2451 = vst.msk [vmem:[%s3549_s6 + $0x1f0] sm:$0xf] %vm2326_vm3, %v2964_v52  ;;  %v3130_v56 = vpop.f32.mrb[52].mxu0  ;;  %v2965_v57 = vpack.c.bf16 %v1715_v53, %v1715_v53  ;;  %v3206_v58 = vpop.f32.mrb[52].mxu1 }
 0x156   : > { %2378 = vst.msk [vmem:[%s3549_s6 + $0xcc] sm:$0xf] %vm2326_vm3, %v2891_v54  ;;  %2454 = vst.msk [vmem:[%s3549_s6 + $0x1fc] sm:$0xf] %vm2326_vm3, %v2967_v55  ;;  %v1217_v60 = vadd.f32 %v3856_v59, %v3130_v56  ;;  %v1208_v61 = vpop.f32.mrb[53].mxu0  ;;  %v1521_v62 = vadd.f32 %v3856_v59, %v3206_v58  ;;  %v1512_v63 = vpop.f32.mrb[53].mxu1 }
 0x157   : > { %2376 = vst.msk [vmem:[%s3549_s6 + $0xc4] sm:$0xf] %vm2326_vm3, %v2889_v19  ;;  %2452 = vst.msk [vmem:[%s3549_s6 + $0x1f4] sm:$0xf] %vm2326_vm3, %v2965_v57  ;;  %v1209_v0 = vadd.f32 %v3856_v59, %v1208_v61  ;;  %v3131_v1 = vpop.f32.mrb[54].mxu0  ;;  %v1513_v2 = vadd.f32 %v3856_v59, %v1512_v63  ;;  %v3207_v3 = vpop.f32.mrb[54].mxu1 }
 0x158   : > { %v1644_v4 = vmax.f32 %v1217_v60, 0.0  ;;  %v1220_v5 = vadd.f32 %v3856_v59, %v3131_v1  ;;  %v1211_v6 = vpop.f32.mrb[55].mxu0  ;;  %v1720_v7 = vmax.f32 %v1521_v62, 0.0  ;;  %v1524_v8 = vadd.f32 %v3856_v59, %v3207_v3  ;;  %v1515_v9 = vpop.f32.mrb[55].mxu1 }
 0x159   : > { %v1642_v10 = vmax.f32 %v1209_v0, 0.0  ;;  %v1212_v11 = vadd.f32 %v3856_v59, %v1211_v6  ;;  %v1718_v12 = vmax.f32 %v1513_v2, 0.0  ;;  %v1516_v13 = vadd.f32 %v3856_v59, %v1515_v9 }
 0x15a   : > { %v2894_v14 = vpack.c.bf16 %v1644_v4, %v1644_v4  ;;  %v1645_v15 = vmax.f32 %v1220_v5, 0.0  ;;  %v2970_v16 = vpack.c.bf16 %v1720_v7, %v1720_v7  ;;  %v1721_v17 = vmax.f32 %v1524_v8, 0.0 }
 0x15b   : > { %v2892_v18 = vpack.c.bf16 %v1642_v10, %v1642_v10  ;;  %v1643_v20 = vmax.f32 %v1212_v11, 0.0  ;;  %v2968_v21 = vpack.c.bf16 %v1718_v12, %v1718_v12  ;;  %v1719_v22 = vmax.f32 %v1516_v13, 0.0 }
 0x15c   : > { %2381 = vst.msk [vmem:[%s3549_s6 + $0xd8] sm:$0xf] %vm2326_vm3, %v2894_v14  ;;  %v2895_v23 = vpack.c.bf16 %v1645_v15, %v1645_v15  ;;  %2457 = vst.msk [vmem:[%s3549_s6 + $0x208] sm:$0xf] %vm2326_vm3, %v2970_v16  ;;  %v2971_v24 = vpack.c.bf16 %v1721_v17, %v1721_v17 }
 0x15d   : > { %2379 = vst.msk [vmem:[%s3549_s6 + $0xd0] sm:$0xf] %vm2326_vm3, %v2892_v18  ;;  %v2893_v25 = vpack.c.bf16 %v1643_v20, %v1643_v20  ;;  %2455 = vst.msk [vmem:[%s3549_s6 + $0x200] sm:$0xf] %vm2326_vm3, %v2968_v21  ;;  %v3134_v26 = vpop.f32.mrb[56].mxu0  ;;  %v2969_v27 = vpack.c.bf16 %v1719_v22, %v1719_v22  ;;  %v3210_v28 = vpop.f32.mrb[56].mxu1 }
 0x15e   : > { %2382 = vst.msk [vmem:[%s3549_s6 + $0xdc] sm:$0xf] %vm2326_vm3, %v2895_v23  ;;  %2458 = vst.msk [vmem:[%s3549_s6 + $0x20c] sm:$0xf] %vm2326_vm3, %v2971_v24  ;;  %v1233_v29 = vadd.f32 %v3856_v59, %v3134_v26  ;;  %v1224_v30 = vpop.f32.mrb[57].mxu0  ;;  %v1537_v31 = vadd.f32 %v3856_v59, %v3210_v28  ;;  %v1528_v32 = vpop.f32.mrb[57].mxu1 }
 0x15f   : > { %2380 = vst.msk [vmem:[%s3549_s6 + $0xd4] sm:$0xf] %vm2326_vm3, %v2893_v25  ;;  %2456 = vst.msk [vmem:[%s3549_s6 + $0x204] sm:$0xf] %vm2326_vm3, %v2969_v27  ;;  %v1225_v33 = vadd.f32 %v3856_v59, %v1224_v30  ;;  %v3135_v34 = vpop.f32.mrb[58].mxu0  ;;  %v1529_v35 = vadd.f32 %v3856_v59, %v1528_v32  ;;  %v3211_v36 = vpop.f32.mrb[58].mxu1 }
 0x160   : > { %v1648_v37 = vmax.f32 %v1233_v29, 0.0  ;;  %v1236_v38 = vadd.f32 %v3856_v59, %v3135_v34  ;;  %v1227_v39 = vpop.f32.mrb[59].mxu0  ;;  %v1724_v40 = vmax.f32 %v1537_v31, 0.0  ;;  %v1540_v41 = vadd.f32 %v3856_v59, %v3211_v36  ;;  %v1531_v42 = vpop.f32.mrb[59].mxu1 }
 0x161   : > { %v1646_v43 = vmax.f32 %v1225_v33, 0.0  ;;  %v1228_v44 = vadd.f32 %v3856_v59, %v1227_v39  ;;  %v1722_v45 = vmax.f32 %v1529_v35, 0.0  ;;  %v1532_v46 = vadd.f32 %v3856_v59, %v1531_v42 }
 0x162   : > { %v2898_v47 = vpack.c.bf16 %v1648_v37, %v1648_v37  ;;  %v1649_v48 = vmax.f32 %v1236_v38, 0.0  ;;  %v2974_v49 = vpack.c.bf16 %v1724_v40, %v1724_v40  ;;  %v1725_v50 = vmax.f32 %v1540_v41, 0.0 }
 0x163   : > { %v2896_v51 = vpack.c.bf16 %v1646_v43, %v1646_v43  ;;  %v1647_v52 = vmax.f32 %v1228_v44, 0.0  ;;  %v2972_v53 = vpack.c.bf16 %v1722_v45, %v1722_v45  ;;  %v1723_v54 = vmax.f32 %v1532_v46, 0.0 }
 0x164   : > { %2385 = vst.msk [vmem:[%s3549_s6 + $0xe8] sm:$0xf] %vm2326_vm3, %v2898_v47  ;;  %v2899_v55 = vpack.c.bf16 %v1649_v48, %v1649_v48  ;;  %2461 = vst.msk [vmem:[%s3549_s6 + $0x218] sm:$0xf] %vm2326_vm3, %v2974_v49  ;;  %v2975_v19 = vpack.c.bf16 %v1725_v50, %v1725_v50 }
 0x165   : > { %2383 = vst.msk [vmem:[%s3549_s6 + $0xe0] sm:$0xf] %vm2326_vm3, %v2896_v51  ;;  %v2897_v56 = vpack.c.bf16 %v1647_v52, %v1647_v52  ;;  %2459 = vst.msk [vmem:[%s3549_s6 + $0x210] sm:$0xf] %vm2326_vm3, %v2972_v53  ;;  %v3138_v57 = vpop.f32.mrb[60].mxu0  ;;  %v2973_v58 = vpack.c.bf16 %v1723_v54, %v1723_v54  ;;  %v3214_v60 = vpop.f32.mrb[60].mxu1 }
 0x166   : > { %2386 = vst.msk [vmem:[%s3549_s6 + $0xec] sm:$0xf] %vm2326_vm3, %v2899_v55  ;;  %2462 = vst.msk [vmem:[%s3549_s6 + $0x21c] sm:$0xf] %vm2326_vm3, %v2975_v19  ;;  %v1249_v61 = vadd.f32 %v3856_v59, %v3138_v57  ;;  %v1240_v62 = vpop.f32.mrb[61].mxu0  ;;  %v1553_v63 = vadd.f32 %v3856_v59, %v3214_v60  ;;  %v1544_v0 = vpop.f32.mrb[61].mxu1 }
 0x167   : > { %2384 = vst.msk [vmem:[%s3549_s6 + $0xe4] sm:$0xf] %vm2326_vm3, %v2897_v56  ;;  %2460 = vst.msk [vmem:[%s3549_s6 + $0x214] sm:$0xf] %vm2326_vm3, %v2973_v58  ;;  %v1241_v1 = vadd.f32 %v3856_v59, %v1240_v62  ;;  %v3139_v2 = vpop.f32.mrb[62].mxu0  ;;  %v1545_v3 = vadd.f32 %v3856_v59, %v1544_v0  ;;  %v3215_v4 = vpop.f32.mrb[62].mxu1 }
 0x168   : > { %v1652_v5 = vmax.f32 %v1249_v61, 0.0  ;;  %v1252_v6 = vadd.f32 %v3856_v59, %v3139_v2  ;;  %v1243_v7 = vpop.f32.mrb[63].mxu0  ;;  %v1728_v8 = vmax.f32 %v1553_v63, 0.0  ;;  %v1556_v9 = vadd.f32 %v3856_v59, %v3215_v4  ;;  %v1547_v10 = vpop.f32.mrb[63].mxu1 }
 0x169   : > { %v1650_v11 = vmax.f32 %v1241_v1, 0.0  ;;  %v1244_v12 = vadd.f32 %v3856_v59, %v1243_v7  ;;  %v1726_v13 = vmax.f32 %v1545_v3, 0.0  ;;  %v1548_v14 = vadd.f32 %v3856_v59, %v1547_v10 }
 0x16a   : > { %v2902_v15 = vpack.c.bf16 %v1652_v5, %v1652_v5  ;;  %v1653_v16 = vmax.f32 %v1252_v6, 0.0  ;;  %v2978_v17 = vpack.c.bf16 %v1728_v8, %v1728_v8  ;;  %v1729_v18 = vmax.f32 %v1556_v9, 0.0 }
 0x16b   : > { %v2900_v20 = vpack.c.bf16 %v1650_v11, %v1650_v11  ;;  %v1651_v21 = vmax.f32 %v1244_v12, 0.0  ;;  %v2976_v22 = vpack.c.bf16 %v1726_v13, %v1726_v13  ;;  %v1727_v23 = vmax.f32 %v1548_v14, 0.0 }
 0x16c   : > { %2389 = vst.msk [vmem:[%s3549_s6 + $0xf8] sm:$0xf] %vm2326_vm3, %v2902_v15  ;;  %v2903_v24 = vpack.c.bf16 %v1653_v16, %v1653_v16  ;;  %2465 = vst.msk [vmem:[%s3549_s6 + $0x228] sm:$0xf] %vm2326_vm3, %v2978_v17  ;;  %v2979_v25 = vpack.c.bf16 %v1729_v18, %v1729_v18 }
 0x16d   : > { %2387 = vst.msk [vmem:[%s3549_s6 + $0xf0] sm:$0xf] %vm2326_vm3, %v2900_v20  ;;  %v2901_v26 = vpack.c.bf16 %v1651_v21, %v1651_v21  ;;  %2463 = vst.msk [vmem:[%s3549_s6 + $0x220] sm:$0xf] %vm2326_vm3, %v2976_v22  ;;  %v3142_v27 = vpop.f32.mrb[64].mxu0  ;;  %v2977_v28 = vpack.c.bf16 %v1727_v23, %v1727_v23  ;;  %v3218_v29 = vpop.f32.mrb[64].mxu1 }
 0x16e   : > { %2390 = vst.msk [vmem:[%s3549_s6 + $0xfc] sm:$0xf] %vm2326_vm3, %v2903_v24  ;;  %2466 = vst.msk [vmem:[%s3549_s6 + $0x22c] sm:$0xf] %vm2326_vm3, %v2979_v25  ;;  %v1265_v30 = vadd.f32 %v3856_v59, %v3142_v27  ;;  %v1256_v31 = vpop.f32.mrb[65].mxu0  ;;  %v1569_v32 = vadd.f32 %v3856_v59, %v3218_v29  ;;  %v1560_v33 = vpop.f32.mrb[65].mxu1 }
 0x16f   : > { %2388 = vst.msk [vmem:[%s3549_s6 + $0xf4] sm:$0xf] %vm2326_vm3, %v2901_v26  ;;  %2464 = vst.msk [vmem:[%s3549_s6 + $0x224] sm:$0xf] %vm2326_vm3, %v2977_v28  ;;  %v1257_v34 = vadd.f32 %v3856_v59, %v1256_v31  ;;  %v3143_v35 = vpop.f32.mrb[66].mxu0  ;;  %v1561_v36 = vadd.f32 %v3856_v59, %v1560_v33  ;;  %v3219_v37 = vpop.f32.mrb[66].mxu1 }
 0x170   : > { %v1656_v38 = vmax.f32 %v1265_v30, 0.0  ;;  %v1268_v39 = vadd.f32 %v3856_v59, %v3143_v35  ;;  %v1259_v40 = vpop.f32.mrb[67].mxu0  ;;  %v1732_v41 = vmax.f32 %v1569_v32, 0.0  ;;  %v1572_v42 = vadd.f32 %v3856_v59, %v3219_v37  ;;  %v1563_v43 = vpop.f32.mrb[67].mxu1 }
 0x171   : > { %v1654_v44 = vmax.f32 %v1257_v34, 0.0  ;;  %v1260_v45 = vadd.f32 %v3856_v59, %v1259_v40  ;;  %v1730_v46 = vmax.f32 %v1561_v36, 0.0  ;;  %v1564_v47 = vadd.f32 %v3856_v59, %v1563_v43 }
 0x172   : > { %v2906_v48 = vpack.c.bf16 %v1656_v38, %v1656_v38  ;;  %v1657_v49 = vmax.f32 %v1268_v39, 0.0  ;;  %v2982_v50 = vpack.c.bf16 %v1732_v41, %v1732_v41  ;;  %v1733_v51 = vmax.f32 %v1572_v42, 0.0 }
 0x173   : > { %v2904_v52 = vpack.c.bf16 %v1654_v44, %v1654_v44  ;;  %v1655_v53 = vmax.f32 %v1260_v45, 0.0  ;;  %v2980_v54 = vpack.c.bf16 %v1730_v46, %v1730_v46  ;;  %v1731_v55 = vmax.f32 %v1564_v47, 0.0 }
 0x174   : > { %2393 = vst.msk [vmem:[%s3549_s6 + $0x108] sm:$0xf] %vm2326_vm3, %v2906_v48  ;;  %v2907_v19 = vpack.c.bf16 %v1657_v49, %v1657_v49  ;;  %2469 = vst.msk [vmem:[%s3549_s6 + $0x238] sm:$0xf] %vm2326_vm3, %v2982_v50  ;;  %v2983_v56 = vpack.c.bf16 %v1733_v51, %v1733_v51 }
 0x175   : > { %2391 = vst.msk [vmem:[%s3549_s6 + $0x100] sm:$0xf] %vm2326_vm3, %v2904_v52  ;;  %v2905_v57 = vpack.c.bf16 %v1655_v53, %v1655_v53  ;;  %2467 = vst.msk [vmem:[%s3549_s6 + $0x230] sm:$0xf] %vm2326_vm3, %v2980_v54  ;;  %v3146_v58 = vpop.f32.mrb[68].mxu0  ;;  %v2981_v60 = vpack.c.bf16 %v1731_v55, %v1731_v55  ;;  %v3222_v61 = vpop.f32.mrb[68].mxu1 }
 0x176   : > { %2394 = vst.msk [vmem:[%s3549_s6 + $0x10c] sm:$0xf] %vm2326_vm3, %v2907_v19  ;;  %2470 = vst.msk [vmem:[%s3549_s6 + $0x23c] sm:$0xf] %vm2326_vm3, %v2983_v56  ;;  %v1281_v62 = vadd.f32 %v3856_v59, %v3146_v58  ;;  %v1272_v63 = vpop.f32.mrb[69].mxu0  ;;  %v1585_v0 = vadd.f32 %v3856_v59, %v3222_v61  ;;  %v1576_v1 = vpop.f32.mrb[69].mxu1 }
 0x177   : > { %2392 = vst.msk [vmem:[%s3549_s6 + $0x104] sm:$0xf] %vm2326_vm3, %v2905_v57  ;;  %2468 = vst.msk [vmem:[%s3549_s6 + $0x234] sm:$0xf] %vm2326_vm3, %v2981_v60  ;;  %v1273_v2 = vadd.f32 %v3856_v59, %v1272_v63  ;;  %v3147_v3 = vpop.f32.mrb[70].mxu0  ;;  %v1577_v4 = vadd.f32 %v3856_v59, %v1576_v1  ;;  %v3223_v5 = vpop.f32.mrb[70].mxu1 }
 0x178   : > { %v1660_v6 = vmax.f32 %v1281_v62, 0.0  ;;  %v1284_v7 = vadd.f32 %v3856_v59, %v3147_v3  ;;  %v1275_v8 = vpop.f32.mrb[71].mxu0  ;;  %v1736_v9 = vmax.f32 %v1585_v0, 0.0  ;;  %v1579_v10 = vpop.f32.mrb[71].mxu1 }
 0x179   : > { %v1658_v11 = vmax.f32 %v1273_v2, 0.0  ;;  %v1276_v12 = vadd.f32 %v3856_v59, %v1275_v8  ;;  %v1734_v13 = vmax.f32 %v1577_v4, 0.0  ;;  %v1580_v14 = vadd.f32 %v3856_v59, %v1579_v10 }
 0x17a   : > { %v2910_v15 = vpack.c.bf16 %v1660_v6, %v1660_v6  ;;  %v1661_v16 = vmax.f32 %v1284_v7, 0.0  ;;  %v2986_v17 = vpack.c.bf16 %v1736_v9, %v1736_v9 }
 0x17b   : > { %v2908_v18 = vpack.c.bf16 %v1658_v11, %v1658_v11  ;;  %v1659_v20 = vmax.f32 %v1276_v12, 0.0  ;;  %v2984_v21 = vpack.c.bf16 %v1734_v13, %v1734_v13  ;;  %v1735_v22 = vmax.f32 %v1580_v14, 0.0 }
 0x17c   : > { %2397 = vst.msk [vmem:[%s3549_s6 + $0x118] sm:$0xf] %vm2326_vm3, %v2910_v15  ;;  %v2911_v23 = vpack.c.bf16 %v1661_v16, %v1661_v16  ;;  %2473 = vst.msk [vmem:[%s3549_s6 + $0x248] sm:$0xf] %vm2326_vm3, %v2986_v17 }
 0x17d   : > { %2395 = vst.msk [vmem:[%s3549_s6 + $0x110] sm:$0xf] %vm2326_vm3, %v2908_v18  ;;  %v2909_v24 = vpack.c.bf16 %v1659_v20, %v1659_v20  ;;  %2471 = vst.msk [vmem:[%s3549_s6 + $0x240] sm:$0xf] %vm2326_vm3, %v2984_v21  ;;  %v3150_v25 = vpop.f32.mrb[72].mxu0  ;;  %v2985_v26 = vpack.c.bf16 %v1735_v22, %v1735_v22 }
 0x17e   : > { %2398 = vst.msk [vmem:[%s3549_s6 + $0x11c] sm:$0xf] %vm2326_vm3, %v2911_v23  ;;  %v1297_v27 = vadd.f32 %v3856_v59, %v3150_v25  ;;  %v1288_v28 = vpop.f32.mrb[73].mxu0 }
 0x17f   : > { %2396 = vst.msk [vmem:[%s3549_s6 + $0x114] sm:$0xf] %vm2326_vm3, %v2909_v24  ;;  %2472 = vst.msk [vmem:[%s3549_s6 + $0x244] sm:$0xf] %vm2326_vm3, %v2985_v26  ;;  %v1289_v29 = vadd.f32 %v3856_v59, %v1288_v28  ;;  %v3151_v30 = vpop.f32.mrb[74].mxu0 }
 0x180   : > { %v1664_v31 = vmax.f32 %v1297_v27, 0.0  ;;  %v1300_v32 = vadd.f32 %v3856_v59, %v3151_v30  ;;  %v1291_v33 = vpop.f32.mrb[75].mxu0 }
 0x181   : > { %v1662_v34 = vmax.f32 %v1289_v29, 0.0  ;;  %v1292_v35 = vadd.f32 %v3856_v59, %v1291_v33 }
 0x182   : > { %v2914_v36 = vpack.c.bf16 %v1664_v31, %v1664_v31  ;;  %v1665_v37 = vmax.f32 %v1300_v32, 0.0 }
 0x183   : > { %v2912_v38 = vpack.c.bf16 %v1662_v34, %v1662_v34  ;;  %v1663_v39 = vmax.f32 %v1292_v35, 0.0 }
 0x184   : > { %2401 = vst.msk [vmem:[%s3549_s6 + $0x128] sm:$0xf] %vm2326_vm3, %v2914_v36  ;;  %v2915_v40 = vpack.c.bf16 %v1665_v37, %v1665_v37 }
 0x185   : > { %2399 = vst.msk [vmem:[%s3549_s6 + $0x120] sm:$0xf] %vm2326_vm3, %v2912_v38  ;;  %v2913_v41 = vpack.c.bf16 %v1663_v39, %v1663_v39 }
 0x186   : > { %2402 = vst.msk [vmem:[%s3549_s6 + $0x12c] sm:$0xf] %vm2326_vm3, %v2915_v40 }
 0x187   : > { %2400 = vst.msk [vmem:[%s3549_s6 + $0x124] sm:$0xf] %vm2326_vm3, %v2913_v41 }
 0x188 PF: > { %s13_s12 = sadd.s32 1, %s3329_s12  }
 0x189   : > { %p10_p4 = scmp.ge.s32.totalorder %s13_s12, 5  }
 0x18b   :  { %12 = sbr.rel (!%p10_p4) target bundleno = 1 (0x1), region = 62 }

// kernel: baseline_forward.6
= control target key start
LH: loop header
LB: loop body
LE: loop exit
PB: predicated region body
PF: predicated region fallthrough
CT: control target
= control target key end

     0   :  { %vm890_vm0 = vcmask 523264   ;;  %vm1970_vm1 = vcmask 519168   ;;  %s5187_s0 = inlined_call_operand.vmem [shape: bf16[9,392,64], index: 0, kind: input, shape index: {}]   ;;  %s5188_s1 = inlined_call_operand.vmem [shape: bf16[392,64], index: 1, kind: output, shape index: {}]  }
   0x1   :  { %v2123_v0 = vld [vmem:[%s5187_s0] sm:$0xff]   ;;  %v3050_v2 = vld [vmem:[%s5187_s0 + $0x188] sm:$0xff]   ;;  %v3099_v7 = vld [vmem:[%s5187_s0 + $0x310] sm:$0xff]  }
   0x2   :  { %v3025_v1 = vld [vmem:[%s5187_s0 + $0xc0] sm:$0xff]   ;;  %v2124_v3 = vunpack.c.l.bf16 %v2123_v0  ;;  %v2320_v5 = vunpack.c.l.bf16 %v3050_v2  ;;  %v3074_v6 = vld [vmem:[%s5187_s0 + $0x248] sm:$0xff]   ;;  %v3123_v9 = vld [vmem:[%s5187_s0 + $0x3d0] sm:$0xff]   ;;  %v2516_v11 = vunpack.c.l.bf16 %v3099_v7  ;;  %v2125_v21 = vunpack.c.h.bf16 %v2123_v0 }
   0x3   :  { %v2221_v4 = vunpack.c.h.bf16 %v3025_v1  ;;  %v2417_v8 = vunpack.c.h.bf16 %v3074_v6  ;;  %v3148_v10 = vld [vmem:[%s5187_s0 + $0x498] sm:$0xff]   ;;  %v2613_v12 = vunpack.c.h.bf16 %v3123_v9  ;;  %v3259_v14 = vld [vmem:[%s5187_s0 + $0x620] sm:$0xff]   ;;  %v3026_v16 = vld [vmem:[%s5187_s0 + $0xc8] sm:$0xff]   ;;  %v2321_v22 = vunpack.c.h.bf16 %v3050_v2 }
   0x4   :  { %v2712_v13 = vunpack.c.l.bf16 %v3148_v10  ;;  %v891_v15 = vsel %vm890_vm0, %v2124_v3, 0.0  ;;  %v3075_v17 = vld [vmem:[%s5187_s0 + $0x250] sm:$0xff]   ;;  %v3172_v18 = vld [vmem:[%s5187_s0 + $0x558] sm:$0xff]   ;;  %v894_v20 = vsel %vm890_vm0, %v2320_v5, 0.0  ;;  %v2908_v25 = vunpack.c.l.bf16 %v3259_v14  ;;  %v3173_v34 = vld [vmem:[%s5187_s0 + $0x560] sm:$0xff]  }
   0x5   :  { %v892_v19 = vsel %vm890_vm0, %v2221_v4, 0.0  ;;  %v2809_v23 = vunpack.c.h.bf16 %v3172_v18  ;;  %v896_v26 = vsel %vm890_vm0, %v2417_v8, 0.0  ;;  %v2224_v27 = vunpack.c.l.bf16 %v3026_v16  ;;  %v3278_v29 = vld [vmem:[%s5187_s0 + $0x3d8] sm:$0xff]   ;;  %v3002_v39 = vld [vmem:[%s5187_s0 + $0x8] sm:$0xff]   ;;  %v3051_v44 = vld [vmem:[%s5187_s0 + $0x190] sm:$0xff]  }
   0x6   :  { %v893_v24 = vadd.f32 %v892_v19, %v891_v15  ;;  %v2420_v28 = vunpack.c.l.bf16 %v3075_v17  ;;  %v898_v31 = vsel %vm890_vm0, %v2516_v11, 0.0  ;;  %v900_v32 = vsel %vm890_vm0, %v2613_v12, 0.0  ;;  %v3302_v53 = vld [vmem:[%s5187_s0 + $0x318] sm:$0xff]   ;;  %v3311_v62 = vld [vmem:[%s5187_s0 + $0x4a0] sm:$0xff]   ;;  %v3317_v0 = vld [vmem:[%s5187_s0 + $0x628] sm:$0xff]  }
   0x7   :  { %v902_v33 = vsel %vm890_vm0, %v2712_v13, 0.0  ;;  %v2517_v35 = vunpack.c.h.bf16 %v3099_v7  ;;  %v908_v36 = vsel %vm890_vm0, %v2125_v21, 0.0  ;;  %v909_v37 = vsel %vm890_vm0, %v2224_v27, 0.0  ;;  %v3326_v8 = vld [vmem:[%s5187_s0 + $0xd0] sm:$0xff]  }
   0x8   :  { %v895_v30 = vadd.f32 %v894_v20, %v893_v24  ;;  %v911_v38 = vsel %vm890_vm0, %v2321_v22, 0.0  ;;  %v2616_v41 = vunpack.c.l.bf16 %v3278_v29  ;;  %v2713_v42 = vunpack.c.h.bf16 %v3148_v10 }
   0x9   :  { %v910_v43 = vadd.f32 %v909_v37, %v908_v36  ;;  %v904_v45 = vsel %vm890_vm0, %v2809_v23, 0.0  ;;  %v906_v46 = vsel %vm890_vm0, %v2908_v25, 0.0  ;;  %v2812_v47 = vunpack.c.l.bf16 %v3173_v34 }
   0xa   :  { %v897_v40 = vadd.f32 %v896_v26, %v895_v30  ;;  %v913_v48 = vsel %vm890_vm0, %v2420_v28, 0.0  ;;  %v2128_v51 = vunpack.c.l.bf16 %v3002_v39  ;;  %v2225_v52 = vunpack.c.h.bf16 %v3026_v16 }
   0xb   :  { %v912_v50 = vadd.f32 %v911_v38, %v910_v43  ;;  %v2909_v54 = vunpack.c.h.bf16 %v3259_v14  ;;  %v915_v55 = vsel %vm890_vm0, %v2517_v35, 0.0  ;;  %v2324_v56 = vunpack.c.l.bf16 %v3051_v44 }
   0xc   :  { %v899_v49 = vadd.f32 %v898_v31, %v897_v40  ;;  %v2421_v57 = vunpack.c.h.bf16 %v3075_v17  ;;  %v917_v60 = vsel %vm890_vm0, %v2616_v41, 0.0  ;;  %v919_v61 = vsel %vm890_vm0, %v2713_v42, 0.0  ;;  %v3335_v17 = vld [vmem:[%s5187_s0 + $0x258] sm:$0xff]   ;;  %v3003_v40 = vld [vmem:[%s5187_s0 + $0x10] sm:$0xff]  }
   0xd   :  { %v914_v59 = vadd.f32 %v913_v48, %v912_v50  ;;  %v2520_v63 = vunpack.c.l.bf16 %v3302_v53  ;;  %v925_v1 = vsel %vm890_vm0, %v2128_v51, 0.0  ;;  %v926_v2 = vsel %vm890_vm0, %v2225_v52, 0.0 }
   0xe   :  { %v901_v58 = vadd.f32 %v900_v32, %v899_v49  ;;  %v928_v3 = vsel %vm890_vm0, %v2324_v56, 0.0  ;;  %v921_v6 = vsel %vm890_vm0, %v2812_v47, 0.0  ;;  %v927_v7 = vadd.f32 %v926_v2, %v925_v1 }
   0xf   :  { %v916_v5 = vadd.f32 %v915_v55, %v914_v59  ;;  %v2617_v9 = vunpack.c.h.bf16 %v3278_v29  ;;  %v2716_v10 = vunpack.c.l.bf16 %v3311_v62  ;;  %v2813_v11 = vunpack.c.h.bf16 %v3173_v34  ;;  %v3352_v34 = vld [vmem:[%s5187_s0 + $0x568] sm:$0xff]  }
  0x10   :  { %v903_v4 = vadd.f32 %v902_v33, %v901_v58  ;;  %v930_v12 = vsel %vm890_vm0, %v2421_v57, 0.0  ;;  %v2912_v15 = vunpack.c.l.bf16 %v3317_v0  ;;  %v929_v16 = vadd.f32 %v928_v3, %v927_v7  ;;  %v3347_v33 = vld [vmem:[%s5187_s0 + $0x3e0] sm:$0xff]  }
  0x11   :  { %v918_v14 = vadd.f32 %v917_v60, %v916_v5  ;;  %v932_v18 = vsel %vm890_vm0, %v2520_v63, 0.0  ;;  %v2129_v19 = vunpack.c.h.bf16 %v3002_v39  ;;  %v2228_v20 = vunpack.c.l.bf16 %v3326_v8  ;;  %v3385_v63 = vld [vmem:[%s5187_s0 + $0x4a8] sm:$0xff]  }
  0x12   :  { %v905_v13 = vadd.f32 %v904_v45, %v903_v4  ;;  %v2325_v21 = vunpack.c.h.bf16 %v3051_v44  ;;  %v923_v24 = vsel %vm890_vm0, %v2909_v54, 0.0  ;;  %v931_v25 = vadd.f32 %v930_v12, %v929_v16  ;;  %v3052_v45 = vld [vmem:[%s5187_s0 + $0x198] sm:$0xff]   ;;  %v3376_v54 = vld [vmem:[%s5187_s0 + $0x320] sm:$0xff]  }
  0x13   :  { %v920_v23 = vadd.f32 %v919_v61, %v918_v14  ;;  %v934_v26 = vsel %vm890_vm0, %v2617_v9, 0.0  ;;  %v936_v27 = vsel %vm890_vm0, %v2716_v10, 0.0  ;;  %v938_v28 = vsel %vm890_vm0, %v2813_v11, 0.0  ;;  %v3405_v9 = vld [vmem:[%s5187_s0 + $0xd8] sm:$0xff]  }
  0x14   :  { %v907_v22 = vadd.f32 %v906_v46, %v905_v13  ;;  %v2424_v29 = vunpack.c.l.bf16 %v3335_v17  ;;  %v933_v32 = vadd.f32 %v932_v18, %v931_v25  ;;  %v942_v35 = vsel %vm890_vm0, %v2129_v19, 0.0  ;;  %v3415_v18 = vld [vmem:[%s5187_s0 + $0x260] sm:$0xff]  }
  0x15   :  { %v922_v31 = vadd.f32 %v921_v6, %v920_v23  ;;  %v940_v36 = vsel %vm890_vm0, %v2912_v15, 0.0  ;;  %v2521_v37 = vunpack.c.h.bf16 %v3302_v53  ;;  %v943_v38 = vsel %vm890_vm0, %v2228_v20, 0.0  ;;  %v3398_v6 = vld [vmem:[%s5187_s0 + $0x630] sm:$0xff]  }
  0x16   :  { %v1724_v30 = vmul.f32 0.11111111, %v907_v22  ;;  %v945_v39 = vsel %vm890_vm0, %v2325_v21, 0.0  ;;  %v935_v43 = vadd.f32 %v934_v26, %v933_v32  ;;  %v944_v44 = vadd.f32 %v943_v38, %v942_v35 }
  0x17   :  { %v924_v42 = vadd.f32 %v923_v24, %v922_v31  ;;  %v2620_v46 = vunpack.c.l.bf16 %v3347_v33  ;;  %v2717_v47 = vunpack.c.h.bf16 %v3311_v62  ;;  %v2816_v48 = vunpack.c.l.bf16 %v3352_v34 }
  0x18   :  { %v2073_v41 = vpack.c.bf16 %v1724_v30, %v1724_v30  ;;  %v947_v49 = vsel %vm890_vm0, %v2424_v29, 0.0  ;;  %v937_v51 = vadd.f32 %v936_v27, %v935_v43  ;;  %v946_v52 = vadd.f32 %v945_v39, %v944_v44  ;;  %v3004_v39 = vld [vmem:[%s5187_s0 + $0x18] sm:$0xff]   ;;  %v3445_v43 = vld [vmem:[%s5187_s0 + $0x570] sm:$0xff]  }
  0x19   :  { %v1725_v50 = vmul.f32 0.11111111, %v924_v42  ;;  %v2132_v53 = vunpack.c.l.bf16 %v3003_v40  ;;  %v2913_v55 = vunpack.c.h.bf16 %v3317_v0  ;;  %v949_v56 = vsel %vm890_vm0, %v2521_v37, 0.0 }
  0x1a   :  { %1971 = vst.msk [vmem:[%s5188_s1] sm:$0xf] %vm1970_vm1, %v2073_v41  ;;  %v2229_v57 = vunpack.c.h.bf16 %v3326_v8  ;;  %v2328_v58 = vunpack.c.l.bf16 %v3052_v45  ;;  %v939_v60 = vadd.f32 %v938_v28, %v937_v51  ;;  %v948_v61 = vadd.f32 %v947_v49, %v946_v52 }
  0x1b   :  { %v2074_v59 = vpack.c.bf16 %v1725_v50, %v1725_v50  ;;  %v2425_v62 = vunpack.c.h.bf16 %v3335_v17  ;;  %v951_v1 = vsel %vm890_vm0, %v2620_v46, 0.0  ;;  %v953_v2 = vsel %vm890_vm0, %v2717_v47, 0.0 }
  0x1c   :  { %v2524_v0 = vunpack.c.l.bf16 %v3376_v54  ;;  %v959_v3 = vsel %vm890_vm0, %v2132_v53, 0.0  ;;  %v941_v4 = vadd.f32 %v940_v36, %v939_v60  ;;  %v950_v5 = vadd.f32 %v949_v56, %v948_v61 }
  0x1d   :  { %1972 = vst.msk [vmem:[%s5188_s1 + $0x4] sm:$0xf] %vm1970_vm1, %v2074_v59  ;;  %v960_v7 = vsel %vm890_vm0, %v2229_v57, 0.0  ;;  %v962_v8 = vsel %vm890_vm0, %v2328_v58, 0.0  ;;  %v955_v10 = vsel %vm890_vm0, %v2816_v48, 0.0  ;;  %v2621_v11 = vunpack.c.h.bf16 %v3347_v33  ;;  %v3431_v33 = vld [vmem:[%s5187_s0 + $0x3e8] sm:$0xff]  }
  0x1e   :  { %v2720_v12 = vunpack.c.l.bf16 %v3385_v63  ;;  %v961_v13 = vadd.f32 %v960_v7, %v959_v3  ;;  %v1726_v14 = vmul.f32 0.11111111, %v941_v4  ;;  %v952_v15 = vadd.f32 %v951_v1, %v950_v5  ;;  %v3459_v58 = vld [vmem:[%s5187_s0 + $0x328] sm:$0xff]  }
  0x1f   :  { %v2817_v16 = vunpack.c.h.bf16 %v3352_v34  ;;  %v964_v17 = vsel %vm890_vm0, %v2425_v62, 0.0  ;;  %v2916_v19 = vunpack.c.l.bf16 %v3398_v6  ;;  %v2133_v21 = vunpack.c.h.bf16 %v3003_v40 }
  0x20   :  { %v963_v20 = vadd.f32 %v962_v8, %v961_v13  ;;  %v2232_v22 = vunpack.c.l.bf16 %v3405_v9  ;;  %v2075_v23 = vpack.c.bf16 %v1726_v14, %v1726_v14  ;;  %v954_v24 = vadd.f32 %v953_v2, %v952_v15  ;;  %v3481_v8 = vld [vmem:[%s5187_s0 + $0xe0] sm:$0xff]  }
  0x21   :  { %v966_v25 = vsel %vm890_vm0, %v2524_v0, 0.0  ;;  %v2329_v26 = vunpack.c.h.bf16 %v3052_v45  ;;  %v957_v27 = vsel %vm890_vm0, %v2913_v55, 0.0  ;;  %v2428_v29 = vunpack.c.l.bf16 %v3415_v18  ;;  %v3053_v45 = vld [vmem:[%s5187_s0 + $0x1a0] sm:$0xff]   ;;  %v3468_v0 = vld [vmem:[%s5187_s0 + $0x4b0] sm:$0xff]  }
  0x22   :  { %v965_v28 = vadd.f32 %v964_v17, %v963_v20  ;;  %1973 = vst.msk [vmem:[%s5188_s1 + $0x8] sm:$0xf] %vm1970_vm1, %v2075_v23  ;;  %v956_v30 = vadd.f32 %v955_v10, %v954_v24  ;;  %v968_v31 = vsel %vm890_vm0, %v2621_v11, 0.0  ;;  %v970_v32 = vsel %vm890_vm0, %v2720_v12, 0.0  ;;  %v3488_v12 = vld [vmem:[%s5187_s0 + $0x638] sm:$0xff]  }
  0x23   :  { %v976_v34 = vsel %vm890_vm0, %v2133_v21, 0.0  ;;  %v2525_v36 = vunpack.c.h.bf16 %v3376_v54  ;;  %v977_v37 = vsel %vm890_vm0, %v2232_v22, 0.0  ;;  %v979_v38 = vsel %vm890_vm0, %v2329_v26, 0.0 }
  0x24   :  { %v967_v35 = vadd.f32 %v966_v25, %v965_v28  ;;  %v958_v40 = vadd.f32 %v957_v27, %v956_v30  ;;  %v972_v41 = vsel %vm890_vm0, %v2817_v16, 0.0  ;;  %v974_v42 = vsel %vm890_vm0, %v2916_v19, 0.0 }
  0x25   :  { %v978_v44 = vadd.f32 %v977_v37, %v976_v34  ;;  %v2624_v47 = vunpack.c.l.bf16 %v3431_v33  ;;  %v2721_v48 = vunpack.c.h.bf16 %v3385_v63  ;;  %v981_v49 = vsel %vm890_vm0, %v2428_v29, 0.0  ;;  %v3508_v34 = vld [vmem:[%s5187_s0 + $0x3f0] sm:$0xff]  }
  0x26   :  { %v969_v46 = vadd.f32 %v968_v31, %v967_v35  ;;  %v1727_v50 = vmul.f32 0.11111111, %v958_v40  ;;  %v2136_v52 = vunpack.c.l.bf16 %v3004_v39  ;;  %v2233_v53 = vunpack.c.h.bf16 %v3405_v9  ;;  %v3005_v40 = vld [vmem:[%s5187_s0 + $0x20] sm:$0xff]  }
  0x27   :  { %v980_v51 = vadd.f32 %v979_v38, %v978_v44  ;;  %v2820_v55 = vunpack.c.l.bf16 %v3445_v43  ;;  %v983_v56 = vsel %vm890_vm0, %v2525_v36, 0.0  ;;  %v2332_v57 = vunpack.c.l.bf16 %v3053_v45  ;;  %v3526_v44 = vld [vmem:[%s5187_s0 + $0x578] sm:$0xff]  }
  0x28   :  { %v971_v54 = vadd.f32 %v970_v32, %v969_v46  ;;  %v2076_v59 = vpack.c.bf16 %v1727_v50, %v1727_v50  ;;  %v2917_v60 = vunpack.c.h.bf16 %v3398_v6  ;;  %v2429_v62 = vunpack.c.h.bf16 %v3415_v18  ;;  %v3496_v18 = vld [vmem:[%s5187_s0 + $0x268] sm:$0xff]  }
  0x29   :  { %v982_v61 = vadd.f32 %v981_v49, %v980_v51  ;;  %v985_v1 = vsel %vm890_vm0, %v2624_v47, 0.0  ;;  %v987_v2 = vsel %vm890_vm0, %v2721_v48, 0.0  ;;  %v993_v3 = vsel %vm890_vm0, %v2136_v52, 0.0  ;;  %v3054_v46 = vld [vmem:[%s5187_s0 + $0x1a8] sm:$0xff]  }
  0x2a   :  { %v973_v63 = vadd.f32 %v972_v41, %v971_v54  ;;  %1974 = vst.msk [vmem:[%s5188_s1 + $0xc] sm:$0xf] %vm1970_vm1, %v2076_v59  ;;  %v2528_v5 = vunpack.c.l.bf16 %v3459_v58  ;;  %v994_v6 = vsel %vm890_vm0, %v2233_v53, 0.0  ;;  %v996_v7 = vsel %vm890_vm0, %v2332_v57, 0.0  ;;  %v3540_v59 = vld [vmem:[%s5187_s0 + $0x330] sm:$0xff]  }
  0x2b   :  { %v984_v4 = vadd.f32 %v983_v56, %v982_v61  ;;  %v989_v10 = vsel %vm890_vm0, %v2820_v55, 0.0  ;;  %v2625_v11 = vunpack.c.h.bf16 %v3431_v33  ;;  %v995_v13 = vadd.f32 %v994_v6, %v993_v3  ;;  %v3549_v3 = vld [vmem:[%s5187_s0 + $0x4b8] sm:$0xff]  }
  0x2c   :  { %v975_v9 = vadd.f32 %v974_v42, %v973_v63  ;;  %v2724_v15 = vunpack.c.l.bf16 %v3468_v0  ;;  %v2821_v16 = vunpack.c.h.bf16 %v3445_v43  ;;  %v998_v17 = vsel %vm890_vm0, %v2429_v62, 0.0 }
  0x2d   :  { %v986_v14 = vadd.f32 %v985_v1, %v984_v4  ;;  %v997_v20 = vadd.f32 %v996_v7, %v995_v13  ;;  %v2137_v21 = vunpack.c.h.bf16 %v3004_v39  ;;  %v2236_v22 = vunpack.c.l.bf16 %v3481_v8  ;;  %v3569_v13 = vld [vmem:[%s5187_s0 + $0x640] sm:$0xff]  }
  0x2e   :  { %v1728_v19 = vmul.f32 0.11111111, %v975_v9  ;;  %v2920_v24 = vunpack.c.l.bf16 %v3488_v12  ;;  %v1000_v25 = vsel %vm890_vm0, %v2528_v5, 0.0  ;;  %v2333_v26 = vunpack.c.h.bf16 %v3053_v45  ;;  %v3562_v9 = vld [vmem:[%s5187_s0 + $0xe8] sm:$0xff]  }
  0x2f   :  { %v988_v23 = vadd.f32 %v987_v2, %v986_v14  ;;  %v991_v28 = vsel %vm890_vm0, %v2917_v60, 0.0  ;;  %v999_v29 = vadd.f32 %v998_v17, %v997_v20  ;;  %v2432_v30 = vunpack.c.l.bf16 %v3496_v18 }
  0x30   :  { %v2077_v27 = vpack.c.bf16 %v1728_v19, %v1728_v19  ;;  %v1002_v32 = vsel %vm890_vm0, %v2625_v11, 0.0  ;;  %v1004_v33 = vsel %vm890_vm0, %v2724_v15, 0.0  ;;  %v1010_v35 = vsel %vm890_vm0, %v2137_v21, 0.0  ;;  %v3577_v19 = vld [vmem:[%s5187_s0 + $0x270] sm:$0xff]  }
  0x31   :  { %v990_v31 = vadd.f32 %v989_v10, %v988_v23  ;;  %v1001_v36 = vadd.f32 %v1000_v25, %v999_v29  ;;  %v2529_v37 = vunpack.c.h.bf16 %v3459_v58  ;;  %v1011_v38 = vsel %vm890_vm0, %v2236_v22, 0.0 }
  0x32   :  { %1975 = vst.msk [vmem:[%s5188_s1 + $0x10] sm:$0xf] %vm1970_vm1, %v2077_v27  ;;  %v1013_v39 = vsel %vm890_vm0, %v2333_v26, 0.0  ;;  %v1006_v42 = vsel %vm890_vm0, %v2821_v16, 0.0  ;;  %v1008_v43 = vsel %vm890_vm0, %v2920_v24, 0.0  ;;  %v1012_v45 = vadd.f32 %v1011_v38, %v1010_v35  ;;  %v3589_v35 = vld [vmem:[%s5187_s0 + $0x3f8] sm:$0xff]  }
  0x33   :  { %v992_v41 = vadd.f32 %v991_v28, %v990_v31  ;;  %v1003_v47 = vadd.f32 %v1002_v32, %v1001_v36  ;;  %v2628_v48 = vunpack.c.l.bf16 %v3508_v34  ;;  %v2725_v49 = vunpack.c.h.bf16 %v3468_v0 }
  0x34   :  { %v1015_v50 = vsel %vm890_vm0, %v2432_v30, 0.0  ;;  %v1014_v52 = vadd.f32 %v1013_v39, %v1012_v45  ;;  %v2140_v53 = vunpack.c.l.bf16 %v3005_v40  ;;  %v2237_v54 = vunpack.c.h.bf16 %v3481_v8  ;;  %v3607_v45 = vld [vmem:[%s5187_s0 + $0x580] sm:$0xff]  }
  0x35   :  { %v1729_v51 = vmul.f32 0.11111111, %v992_v41  ;;  %v1005_v55 = vadd.f32 %v1004_v33, %v1003_v47  ;;  %v2824_v56 = vunpack.c.l.bf16 %v3526_v44  ;;  %v1017_v57 = vsel %vm890_vm0, %v2529_v37, 0.0  ;;  %v3006_v41 = vld [vmem:[%s5187_s0 + $0x28] sm:$0xff]   ;;  %v3055_v47 = vld [vmem:[%s5187_s0 + $0x1b0] sm:$0xff]  }
  0x36   :  { %v2336_v58 = vunpack.c.l.bf16 %v3054_v46  ;;  %v2921_v61 = vunpack.c.h.bf16 %v3488_v12  ;;  %v1016_v62 = vadd.f32 %v1015_v50, %v1014_v52  ;;  %v2433_v63 = vunpack.c.h.bf16 %v3496_v18 }
  0x37   :  { %v2078_v60 = vpack.c.bf16 %v1729_v51, %v1729_v51  ;;  %v1007_v1 = vadd.f32 %v1006_v42, %v1005_v55  ;;  %v1019_v2 = vsel %vm890_vm0, %v2628_v48, 0.0  ;;  %v1021_v0 = vsel %vm890_vm0, %v2725_v49, 0.0 }
  0x38   :  { %v1027_v4 = vsel %vm890_vm0, %v2140_v53, 0.0  ;;  %v1018_v5 = vadd.f32 %v1017_v57, %v1016_v62  ;;  %v2532_v6 = vunpack.c.l.bf16 %v3540_v59  ;;  %v1028_v7 = vsel %vm890_vm0, %v2237_v54, 0.0 }
  0x39   :  { %1976 = vst.msk [vmem:[%s5188_s1 + $0x14] sm:$0xf] %vm1970_vm1, %v2078_v60  ;;  %v1030_v8 = vsel %vm890_vm0, %v2336_v58, 0.0  ;;  %v1009_v10 = vadd.f32 %v1008_v43, %v1007_v1  ;;  %v1023_v11 = vsel %vm890_vm0, %v2824_v56, 0.0  ;;  %v2629_v12 = vunpack.c.h.bf16 %v3508_v34  ;;  %v3621_v60 = vld [vmem:[%s5187_s0 + $0x338] sm:$0xff]  }
  0x3a   :  { %v1029_v14 = vadd.f32 %v1028_v7, %v1027_v4  ;;  %v1020_v15 = vadd.f32 %v1019_v2, %v1018_v5  ;;  %v2728_v16 = vunpack.c.l.bf16 %v3549_v3  ;;  %v2825_v17 = vunpack.c.h.bf16 %v3526_v44  ;;  %v3630_v4 = vld [vmem:[%s5187_s0 + $0x4c0] sm:$0xff]  }
  0x3b   :  { %v1032_v18 = vsel %vm890_vm0, %v2433_v63, 0.0  ;;  %v1730_v20 = vmul.f32 0.11111111, %v1009_v10  ;;  %v2141_v22 = vunpack.c.h.bf16 %v3005_v40  ;;  %v2240_v23 = vunpack.c.l.bf16 %v3562_v9  ;;  %v3643_v10 = vld [vmem:[%s5187_s0 + $0xf0] sm:$0xff]  }
  0x3c   :  { %v1031_v21 = vadd.f32 %v1030_v8, %v1029_v14  ;;  %v1022_v24 = vadd.f32 %v1021_v0, %v1020_v15  ;;  %v2924_v25 = vunpack.c.l.bf16 %v3569_v13  ;;  %v1034_v26 = vsel %vm890_vm0, %v2532_v6, 0.0  ;;  %v3650_v14 = vld [vmem:[%s5187_s0 + $0x648] sm:$0xff]  }
  0x3d   :  { %v2337_v27 = vunpack.c.h.bf16 %v3054_v46  ;;  %v2079_v28 = vpack.c.bf16 %v1730_v20, %v1730_v20  ;;  %v1025_v29 = vsel %vm890_vm0, %v2921_v61, 0.0  ;;  %v2436_v31 = vunpack.c.l.bf16 %v3577_v19  ;;  %v3658_v20 = vld [vmem:[%s5187_s0 + $0x278] sm:$0xff]  }
  0x3e   :  { %v1033_v30 = vadd.f32 %v1032_v18, %v1031_v21  ;;  %v1024_v32 = vadd.f32 %v1023_v11, %v1022_v24  ;;  %v1036_v33 = vsel %vm890_vm0, %v2629_v12, 0.0  ;;  %v1038_v34 = vsel %vm890_vm0, %v2728_v16, 0.0 }
  0x3f   :  { %v1044_v36 = vsel %vm890_vm0, %v2141_v22, 0.0  ;;  %1977 = vst.msk [vmem:[%s5188_s1 + $0x18] sm:$0xf] %vm1970_vm1, %v2079_v28  ;;  %v2533_v38 = vunpack.c.h.bf16 %v3540_v59  ;;  %v1045_v39 = vsel %vm890_vm0, %v2240_v23, 0.0  ;;  %v1047_v40 = vsel %vm890_vm0, %v2337_v27, 0.0 }
  0x40   :  { %v1035_v37 = vadd.f32 %v1034_v26, %v1033_v30  ;;  %v1026_v42 = vadd.f32 %v1025_v29, %v1024_v32  ;;  %v1040_v43 = vsel %vm890_vm0, %v2825_v17, 0.0  ;;  %v1042_v44 = vsel %vm890_vm0, %v2924_v25, 0.0 }
  0x41   :  { %v1046_v46 = vadd.f32 %v1045_v39, %v1044_v36  ;;  %v2632_v49 = vunpack.c.l.bf16 %v3589_v35  ;;  %v2729_v50 = vunpack.c.h.bf16 %v3549_v3  ;;  %v1049_v51 = vsel %vm890_vm0, %v2436_v31, 0.0  ;;  %v3670_v36 = vld [vmem:[%s5187_s0 + $0x400] sm:$0xff]  }
  0x42   :  { %v1037_v48 = vadd.f32 %v1036_v33, %v1035_v37  ;;  %v1731_v52 = vmul.f32 0.11111111, %v1026_v42  ;;  %v2144_v54 = vunpack.c.l.bf16 %v3006_v41  ;;  %v2241_v55 = vunpack.c.h.bf16 %v3562_v9  ;;  %v3007_v42 = vld [vmem:[%s5187_s0 + $0x30] sm:$0xff]  }
  0x43   :  { %v1048_v53 = vadd.f32 %v1047_v40, %v1046_v46  ;;  %v2828_v57 = vunpack.c.l.bf16 %v3607_v45  ;;  %v1051_v58 = vsel %vm890_vm0, %v2533_v38, 0.0  ;;  %v2340_v59 = vunpack.c.l.bf16 %v3055_v47  ;;  %v3688_v46 = vld [vmem:[%s5187_s0 + $0x588] sm:$0xff]  }
  0x44   :  { %v1039_v56 = vadd.f32 %v1038_v34, %v1037_v48  ;;  %v2080_v61 = vpack.c.bf16 %v1731_v52, %v1731_v52  ;;  %v2925_v62 = vunpack.c.h.bf16 %v3569_v13  ;;  %v2437_v1 = vunpack.c.h.bf16 %v3577_v19  ;;  %v3056_v48 = vld [vmem:[%s5187_s0 + $0x1b8] sm:$0xff]  }
  0x45   :  { %v1050_v63 = vadd.f32 %v1049_v51, %v1048_v53  ;;  %v1053_v0 = vsel %vm890_vm0, %v2632_v49, 0.0  ;;  %v1055_v3 = vsel %vm890_vm0, %v2729_v50, 0.0  ;;  %v1061_v5 = vsel %vm890_vm0, %v2144_v54, 0.0 }
  0x46   :  { %v1041_v2 = vadd.f32 %v1040_v43, %v1039_v56  ;;  %1978 = vst.msk [vmem:[%s5188_s1 + $0x1c] sm:$0xf] %vm1970_vm1, %v2080_v61  ;;  %v2536_v7 = vunpack.c.l.bf16 %v3621_v60  ;;  %v1062_v8 = vsel %vm890_vm0, %v2241_v55, 0.0  ;;  %v1064_v9 = vsel %vm890_vm0, %v2340_v59, 0.0  ;;  %v3702_v61 = vld [vmem:[%s5187_s0 + $0x340] sm:$0xff]  }
  0x47   :  { %v1052_v6 = vadd.f32 %v1051_v58, %v1050_v63  ;;  %v1057_v12 = vsel %vm890_vm0, %v2828_v57, 0.0  ;;  %v2633_v13 = vunpack.c.h.bf16 %v3589_v35  ;;  %v1063_v15 = vadd.f32 %v1062_v8, %v1061_v5  ;;  %v3711_v5 = vld [vmem:[%s5187_s0 + $0x4c8] sm:$0xff]  }
  0x48   :  { %v1043_v11 = vadd.f32 %v1042_v44, %v1041_v2  ;;  %v2732_v17 = vunpack.c.l.bf16 %v3630_v4  ;;  %v2829_v18 = vunpack.c.h.bf16 %v3607_v45  ;;  %v1066_v19 = vsel %vm890_vm0, %v2437_v1, 0.0 }
  0x49   :  { %v1054_v16 = vadd.f32 %v1053_v0, %v1052_v6  ;;  %v1065_v22 = vadd.f32 %v1064_v9, %v1063_v15  ;;  %v2145_v23 = vunpack.c.h.bf16 %v3006_v41  ;;  %v2244_v24 = vunpack.c.l.bf16 %v3643_v10  ;;  %v3731_v15 = vld [vmem:[%s5187_s0 + $0x650] sm:$0xff]  }
  0x4a   :  { %v1732_v21 = vmul.f32 0.11111111, %v1043_v11  ;;  %v2928_v26 = vunpack.c.l.bf16 %v3650_v14  ;;  %v1068_v27 = vsel %vm890_vm0, %v2536_v7, 0.0  ;;  %v2341_v28 = vunpack.c.h.bf16 %v3055_v47  ;;  %v3724_v11 = vld [vmem:[%s5187_s0 + $0xf8] sm:$0xff]  }
  0x4b   :  { %v1056_v25 = vadd.f32 %v1055_v3, %v1054_v16  ;;  %v1059_v30 = vsel %vm890_vm0, %v2925_v62, 0.0  ;;  %v1067_v31 = vadd.f32 %v1066_v19, %v1065_v22  ;;  %v2440_v32 = vunpack.c.l.bf16 %v3658_v20 }
  0x4c   :  { %v2081_v29 = vpack.c.bf16 %v1732_v21, %v1732_v21  ;;  %v1070_v34 = vsel %vm890_vm0, %v2633_v13, 0.0  ;;  %v1072_v35 = vsel %vm890_vm0, %v2732_v17, 0.0  ;;  %v1078_v37 = vsel %vm890_vm0, %v2145_v23, 0.0  ;;  %v3739_v21 = vld [vmem:[%s5187_s0 + $0x280] sm:$0xff]  }
  0x4d   :  { %v1058_v33 = vadd.f32 %v1057_v12, %v1056_v25  ;;  %v1069_v38 = vadd.f32 %v1068_v27, %v1067_v31  ;;  %v2537_v39 = vunpack.c.h.bf16 %v3621_v60  ;;  %v1079_v40 = vsel %vm890_vm0, %v2244_v24, 0.0 }
  0x4e   :  { %1979 = vst.msk [vmem:[%s5188_s1 + $0x20] sm:$0xf] %vm1970_vm1, %v2081_v29  ;;  %v1081_v41 = vsel %vm890_vm0, %v2341_v28, 0.0  ;;  %v1074_v44 = vsel %vm890_vm0, %v2829_v18, 0.0  ;;  %v1076_v45 = vsel %vm890_vm0, %v2928_v26, 0.0  ;;  %v1080_v47 = vadd.f32 %v1079_v40, %v1078_v37  ;;  %v3751_v37 = vld [vmem:[%s5187_s0 + $0x408] sm:$0xff]  }
  0x4f   :  { %v1060_v43 = vadd.f32 %v1059_v30, %v1058_v33  ;;  %v1071_v49 = vadd.f32 %v1070_v34, %v1069_v38  ;;  %v2636_v50 = vunpack.c.l.bf16 %v3670_v36  ;;  %v2733_v51 = vunpack.c.h.bf16 %v3630_v4 }
  0x50   :  { %v1083_v52 = vsel %vm890_vm0, %v2440_v32, 0.0  ;;  %v1082_v54 = vadd.f32 %v1081_v41, %v1080_v47  ;;  %v2148_v55 = vunpack.c.l.bf16 %v3007_v42  ;;  %v2245_v56 = vunpack.c.h.bf16 %v3643_v10  ;;  %v3769_v47 = vld [vmem:[%s5187_s0 + $0x590] sm:$0xff]  }
  0x51   :  { %v1733_v53 = vmul.f32 0.11111111, %v1060_v43  ;;  %v1073_v57 = vadd.f32 %v1072_v35, %v1071_v49  ;;  %v2832_v58 = vunpack.c.l.bf16 %v3688_v46  ;;  %v1085_v59 = vsel %vm890_vm0, %v2537_v39, 0.0  ;;  %v3008_v43 = vld [vmem:[%s5187_s0 + $0x38] sm:$0xff]   ;;  %v3057_v49 = vld [vmem:[%s5187_s0 + $0x1c0] sm:$0xff]  }
  0x52   :  { %v2344_v60 = vunpack.c.l.bf16 %v3056_v48  ;;  %v2929_v63 = vunpack.c.h.bf16 %v3650_v14  ;;  %v1084_v1 = vadd.f32 %v1083_v52, %v1082_v54  ;;  %v2441_v2 = vunpack.c.h.bf16 %v3658_v20 }
  0x53   :  { %v2082_v62 = vpack.c.bf16 %v1733_v53, %v1733_v53  ;;  %v1075_v0 = vadd.f32 %v1074_v44, %v1073_v57  ;;  %v1087_v3 = vsel %vm890_vm0, %v2636_v50, 0.0  ;;  %v1089_v4 = vsel %vm890_vm0, %v2733_v51, 0.0 }
  0x54   :  { %v1095_v6 = vsel %vm890_vm0, %v2148_v55, 0.0  ;;  %v1086_v7 = vadd.f32 %v1085_v59, %v1084_v1  ;;  %v2540_v8 = vunpack.c.l.bf16 %v3702_v61  ;;  %v1096_v9 = vsel %vm890_vm0, %v2245_v56, 0.0 }
  0x55   :  { %1980 = vst.msk [vmem:[%s5188_s1 + $0x24] sm:$0xf] %vm1970_vm1, %v2082_v62  ;;  %v1098_v10 = vsel %vm890_vm0, %v2344_v60, 0.0  ;;  %v1077_v12 = vadd.f32 %v1076_v45, %v1075_v0  ;;  %v1091_v13 = vsel %vm890_vm0, %v2832_v58, 0.0  ;;  %v2637_v14 = vunpack.c.h.bf16 %v3670_v36  ;;  %v3783_v62 = vld [vmem:[%s5187_s0 + $0x348] sm:$0xff]  }
  0x56   :  { %v1097_v16 = vadd.f32 %v1096_v9, %v1095_v6  ;;  %v1088_v17 = vadd.f32 %v1087_v3, %v1086_v7  ;;  %v2736_v18 = vunpack.c.l.bf16 %v3711_v5  ;;  %v2833_v19 = vunpack.c.h.bf16 %v3688_v46  ;;  %v3792_v6 = vld [vmem:[%s5187_s0 + $0x4d0] sm:$0xff]  }
  0x57   :  { %v1100_v20 = vsel %vm890_vm0, %v2441_v2, 0.0  ;;  %v1734_v22 = vmul.f32 0.11111111, %v1077_v12  ;;  %v2149_v24 = vunpack.c.h.bf16 %v3007_v42  ;;  %v2248_v25 = vunpack.c.l.bf16 %v3724_v11  ;;  %v3805_v12 = vld [vmem:[%s5187_s0 + $0x100] sm:$0xff]  }
  0x58   :  { %v1099_v23 = vadd.f32 %v1098_v10, %v1097_v16  ;;  %v1090_v26 = vadd.f32 %v1089_v4, %v1088_v17  ;;  %v2932_v27 = vunpack.c.l.bf16 %v3731_v15  ;;  %v1102_v28 = vsel %vm890_vm0, %v2540_v8, 0.0  ;;  %v3812_v16 = vld [vmem:[%s5187_s0 + $0x658] sm:$0xff]  }
  0x59   :  { %v2345_v29 = vunpack.c.h.bf16 %v3056_v48  ;;  %v2083_v30 = vpack.c.bf16 %v1734_v22, %v1734_v22  ;;  %v1093_v31 = vsel %vm890_vm0, %v2929_v63, 0.0  ;;  %v2444_v33 = vunpack.c.l.bf16 %v3739_v21  ;;  %v3820_v22 = vld [vmem:[%s5187_s0 + $0x288] sm:$0xff]  }
  0x5a   :  { %v1101_v32 = vadd.f32 %v1100_v20, %v1099_v23  ;;  %v1092_v34 = vadd.f32 %v1091_v13, %v1090_v26  ;;  %v1104_v35 = vsel %vm890_vm0, %v2637_v14, 0.0  ;;  %v1106_v36 = vsel %vm890_vm0, %v2736_v18, 0.0 }
  0x5b   :  { %v1112_v38 = vsel %vm890_vm0, %v2149_v24, 0.0  ;;  %1981 = vst.msk [vmem:[%s5188_s1 + $0x28] sm:$0xf] %vm1970_vm1, %v2083_v30  ;;  %v2541_v40 = vunpack.c.h.bf16 %v3702_v61  ;;  %v1113_v41 = vsel %vm890_vm0, %v2248_v25, 0.0  ;;  %v1115_v42 = vsel %vm890_vm0, %v2345_v29, 0.0 }
  0x5c   :  { %v1103_v39 = vadd.f32 %v1102_v28, %v1101_v32  ;;  %v1094_v44 = vadd.f32 %v1093_v31, %v1092_v34  ;;  %v1108_v45 = vsel %vm890_vm0, %v2833_v19, 0.0  ;;  %v1110_v46 = vsel %vm890_vm0, %v2932_v27, 0.0 }
  0x5d   :  { %v1114_v48 = vadd.f32 %v1113_v41, %v1112_v38  ;;  %v2640_v51 = vunpack.c.l.bf16 %v3751_v37  ;;  %v2737_v52 = vunpack.c.h.bf16 %v3711_v5  ;;  %v1117_v53 = vsel %vm890_vm0, %v2444_v33, 0.0  ;;  %v3832_v38 = vld [vmem:[%s5187_s0 + $0x410] sm:$0xff]  }
  0x5e   :  { %v1105_v50 = vadd.f32 %v1104_v35, %v1103_v39  ;;  %v1735_v54 = vmul.f32 0.11111111, %v1094_v44  ;;  %v2152_v56 = vunpack.c.l.bf16 %v3008_v43  ;;  %v2249_v57 = vunpack.c.h.bf16 %v3724_v11  ;;  %v3009_v44 = vld [vmem:[%s5187_s0 + $0x40] sm:$0xff]  }
  0x5f   :  { %v1116_v55 = vadd.f32 %v1115_v42, %v1114_v48  ;;  %v2836_v59 = vunpack.c.l.bf16 %v3769_v47  ;;  %v1119_v60 = vsel %vm890_vm0, %v2541_v40, 0.0  ;;  %v2348_v61 = vunpack.c.l.bf16 %v3057_v49  ;;  %v3850_v48 = vld [vmem:[%s5187_s0 + $0x598] sm:$0xff]  }
  0x60   :  { %v1107_v58 = vadd.f32 %v1106_v36, %v1105_v50  ;;  %v2084_v63 = vpack.c.bf16 %v1735_v54, %v1735_v54  ;;  %v2933_v1 = vunpack.c.h.bf16 %v3731_v15  ;;  %v2445_v0 = vunpack.c.h.bf16 %v3739_v21  ;;  %v3058_v50 = vld [vmem:[%s5187_s0 + $0x1c8] sm:$0xff]  }
  0x61   :  { %v1118_v2 = vadd.f32 %v1117_v53, %v1116_v55  ;;  %v1121_v4 = vsel %vm890_vm0, %v2640_v51, 0.0  ;;  %v1123_v5 = vsel %vm890_vm0, %v2737_v52, 0.0  ;;  %v1129_v7 = vsel %vm890_vm0, %v2152_v56, 0.0 }
  0x62   :  { %v1109_v3 = vadd.f32 %v1108_v45, %v1107_v58  ;;  %1982 = vst.msk [vmem:[%s5188_s1 + $0x2c] sm:$0xf] %vm1970_vm1, %v2084_v63  ;;  %v2544_v9 = vunpack.c.l.bf16 %v3783_v62  ;;  %v1130_v10 = vsel %vm890_vm0, %v2249_v57, 0.0  ;;  %v1132_v11 = vsel %vm890_vm0, %v2348_v61, 0.0  ;;  %v3864_v63 = vld [vmem:[%s5187_s0 + $0x350] sm:$0xff]  }
  0x63   :  { %v1120_v8 = vadd.f32 %v1119_v60, %v1118_v2  ;;  %v1125_v14 = vsel %vm890_vm0, %v2836_v59, 0.0  ;;  %v2641_v15 = vunpack.c.h.bf16 %v3751_v37  ;;  %v1131_v17 = vadd.f32 %v1130_v10, %v1129_v7  ;;  %v3873_v7 = vld [vmem:[%s5187_s0 + $0x4d8] sm:$0xff]  }
  0x64   :  { %v1111_v13 = vadd.f32 %v1110_v46, %v1109_v3  ;;  %v2740_v19 = vunpack.c.l.bf16 %v3792_v6  ;;  %v2837_v20 = vunpack.c.h.bf16 %v3769_v47  ;;  %v1134_v21 = vsel %vm890_vm0, %v2445_v0, 0.0 }
  0x65   :  { %v1122_v18 = vadd.f32 %v1121_v4, %v1120_v8  ;;  %v1133_v24 = vadd.f32 %v1132_v11, %v1131_v17  ;;  %v2153_v25 = vunpack.c.h.bf16 %v3008_v43  ;;  %v2252_v26 = vunpack.c.l.bf16 %v3805_v12  ;;  %v3893_v17 = vld [vmem:[%s5187_s0 + $0x660] sm:$0xff]  }
  0x66   :  { %v1736_v23 = vmul.f32 0.11111111, %v1111_v13  ;;  %v2936_v28 = vunpack.c.l.bf16 %v3812_v16  ;;  %v1136_v29 = vsel %vm890_vm0, %v2544_v9, 0.0  ;;  %v2349_v30 = vunpack.c.h.bf16 %v3057_v49  ;;  %v3886_v13 = vld [vmem:[%s5187_s0 + $0x108] sm:$0xff]  }
  0x67   :  { %v1124_v27 = vadd.f32 %v1123_v5, %v1122_v18  ;;  %v1127_v32 = vsel %vm890_vm0, %v2933_v1, 0.0  ;;  %v1135_v33 = vadd.f32 %v1134_v21, %v1133_v24  ;;  %v2448_v34 = vunpack.c.l.bf16 %v3820_v22 }
  0x68   :  { %v2085_v31 = vpack.c.bf16 %v1736_v23, %v1736_v23  ;;  %v1138_v36 = vsel %vm890_vm0, %v2641_v15, 0.0  ;;  %v1140_v37 = vsel %vm890_vm0, %v2740_v19, 0.0  ;;  %v1146_v39 = vsel %vm890_vm0, %v2153_v25, 0.0  ;;  %v3901_v23 = vld [vmem:[%s5187_s0 + $0x290] sm:$0xff]  }
  0x69   :  { %v1126_v35 = vadd.f32 %v1125_v14, %v1124_v27  ;;  %v1137_v40 = vadd.f32 %v1136_v29, %v1135_v33  ;;  %v2545_v41 = vunpack.c.h.bf16 %v3783_v62  ;;  %v1147_v42 = vsel %vm890_vm0, %v2252_v26, 0.0 }
  0x6a   :  { %1983 = vst.msk [vmem:[%s5188_s1 + $0x30] sm:$0xf] %vm1970_vm1, %v2085_v31  ;;  %v1149_v43 = vsel %vm890_vm0, %v2349_v30, 0.0  ;;  %v1142_v46 = vsel %vm890_vm0, %v2837_v20, 0.0  ;;  %v1144_v47 = vsel %vm890_vm0, %v2936_v28, 0.0  ;;  %v1148_v49 = vadd.f32 %v1147_v42, %v1146_v39  ;;  %v3913_v39 = vld [vmem:[%s5187_s0 + $0x418] sm:$0xff]  }
  0x6b   :  { %v1128_v45 = vadd.f32 %v1127_v32, %v1126_v35  ;;  %v1139_v51 = vadd.f32 %v1138_v36, %v1137_v40  ;;  %v2644_v52 = vunpack.c.l.bf16 %v3832_v38  ;;  %v2741_v53 = vunpack.c.h.bf16 %v3792_v6 }
  0x6c   :  { %v1151_v54 = vsel %vm890_vm0, %v2448_v34, 0.0  ;;  %v1150_v56 = vadd.f32 %v1149_v43, %v1148_v49  ;;  %v2156_v57 = vunpack.c.l.bf16 %v3009_v44  ;;  %v2253_v58 = vunpack.c.h.bf16 %v3805_v12  ;;  %v3931_v49 = vld [vmem:[%s5187_s0 + $0x5a0] sm:$0xff]  }
  0x6d   :  { %v1737_v55 = vmul.f32 0.11111111, %v1128_v45  ;;  %v1141_v59 = vadd.f32 %v1140_v37, %v1139_v51  ;;  %v2840_v60 = vunpack.c.l.bf16 %v3850_v48  ;;  %v1153_v61 = vsel %vm890_vm0, %v2545_v41, 0.0  ;;  %v3010_v45 = vld [vmem:[%s5187_s0 + $0x48] sm:$0xff]   ;;  %v3059_v51 = vld [vmem:[%s5187_s0 + $0x1d0] sm:$0xff]  }
  0x6e   :  { %v2352_v62 = vunpack.c.l.bf16 %v3058_v50  ;;  %v2937_v2 = vunpack.c.h.bf16 %v3812_v16  ;;  %v1152_v0 = vadd.f32 %v1151_v54, %v1150_v56  ;;  %v2449_v3 = vunpack.c.h.bf16 %v3820_v22 }
  0x6f   :  { %v2086_v1 = vpack.c.bf16 %v1737_v55, %v1737_v55  ;;  %v1143_v4 = vadd.f32 %v1142_v46, %v1141_v59  ;;  %v1155_v5 = vsel %vm890_vm0, %v2644_v52, 0.0  ;;  %v1157_v6 = vsel %vm890_vm0, %v2741_v53, 0.0 }
  0x70   :  { %v1163_v8 = vsel %vm890_vm0, %v2156_v57, 0.0  ;;  %v1154_v9 = vadd.f32 %v1153_v61, %v1152_v0  ;;  %v2548_v10 = vunpack.c.l.bf16 %v3864_v63  ;;  %v1164_v11 = vsel %vm890_vm0, %v2253_v58, 0.0 }
  0x71   :  { %1984 = vst.msk [vmem:[%s5188_s1 + $0x34] sm:$0xf] %vm1970_vm1, %v2086_v1  ;;  %v1166_v12 = vsel %vm890_vm0, %v2352_v62, 0.0  ;;  %v1145_v14 = vadd.f32 %v1144_v47, %v1143_v4  ;;  %v1159_v15 = vsel %vm890_vm0, %v2840_v60, 0.0  ;;  %v2645_v16 = vunpack.c.h.bf16 %v3832_v38  ;;  %v3945_v1 = vld [vmem:[%s5187_s0 + $0x358] sm:$0xff]  }
  0x72   :  { %v1165_v18 = vadd.f32 %v1164_v11, %v1163_v8  ;;  %v1156_v19 = vadd.f32 %v1155_v5, %v1154_v9  ;;  %v2744_v20 = vunpack.c.l.bf16 %v3873_v7  ;;  %v2841_v21 = vunpack.c.h.bf16 %v3850_v48  ;;  %v3954_v8 = vld [vmem:[%s5187_s0 + $0x4e0] sm:$0xff]  }
  0x73   :  { %v1168_v22 = vsel %vm890_vm0, %v2449_v3, 0.0  ;;  %v1738_v24 = vmul.f32 0.11111111, %v1145_v14  ;;  %v2157_v26 = vunpack.c.h.bf16 %v3009_v44  ;;  %v2256_v27 = vunpack.c.l.bf16 %v3886_v13  ;;  %v3967_v14 = vld [vmem:[%s5187_s0 + $0x110] sm:$0xff]  }
  0x74   :  { %v1167_v25 = vadd.f32 %v1166_v12, %v1165_v18  ;;  %v1158_v28 = vadd.f32 %v1157_v6, %v1156_v19  ;;  %v2940_v29 = vunpack.c.l.bf16 %v3893_v17  ;;  %v1170_v30 = vsel %vm890_vm0, %v2548_v10, 0.0  ;;  %v3974_v18 = vld [vmem:[%s5187_s0 + $0x668] sm:$0xff]  }
  0x75   :  { %v2353_v31 = vunpack.c.h.bf16 %v3058_v50  ;;  %v2087_v32 = vpack.c.bf16 %v1738_v24, %v1738_v24  ;;  %v1161_v33 = vsel %vm890_vm0, %v2937_v2, 0.0  ;;  %v2452_v35 = vunpack.c.l.bf16 %v3901_v23  ;;  %v3982_v24 = vld [vmem:[%s5187_s0 + $0x298] sm:$0xff]  }
  0x76   :  { %v1169_v34 = vadd.f32 %v1168_v22, %v1167_v25  ;;  %v1160_v36 = vadd.f32 %v1159_v15, %v1158_v28  ;;  %v1172_v37 = vsel %vm890_vm0, %v2645_v16, 0.0  ;;  %v1174_v38 = vsel %vm890_vm0, %v2744_v20, 0.0 }
  0x77   :  { %v1180_v40 = vsel %vm890_vm0, %v2157_v26, 0.0  ;;  %1985 = vst.msk [vmem:[%s5188_s1 + $0x38] sm:$0xf] %vm1970_vm1, %v2087_v32  ;;  %v2549_v42 = vunpack.c.h.bf16 %v3864_v63  ;;  %v1181_v43 = vsel %vm890_vm0, %v2256_v27, 0.0  ;;  %v1183_v44 = vsel %vm890_vm0, %v2353_v31, 0.0 }
  0x78   :  { %v1171_v41 = vadd.f32 %v1170_v30, %v1169_v34  ;;  %v1162_v46 = vadd.f32 %v1161_v33, %v1160_v36  ;;  %v1176_v47 = vsel %vm890_vm0, %v2841_v21, 0.0  ;;  %v1178_v48 = vsel %vm890_vm0, %v2940_v29, 0.0 }
  0x79   :  { %v1182_v50 = vadd.f32 %v1181_v43, %v1180_v40  ;;  %v2648_v53 = vunpack.c.l.bf16 %v3913_v39  ;;  %v2745_v54 = vunpack.c.h.bf16 %v3873_v7  ;;  %v1185_v55 = vsel %vm890_vm0, %v2452_v35, 0.0  ;;  %v3994_v40 = vld [vmem:[%s5187_s0 + $0x420] sm:$0xff]  }
  0x7a   :  { %v1173_v52 = vadd.f32 %v1172_v37, %v1171_v41  ;;  %v1739_v56 = vmul.f32 0.11111111, %v1162_v46  ;;  %v2160_v58 = vunpack.c.l.bf16 %v3010_v45  ;;  %v2257_v59 = vunpack.c.h.bf16 %v3886_v13  ;;  %v3011_v46 = vld [vmem:[%s5187_s0 + $0x50] sm:$0xff]  }
  0x7b   :  { %v1184_v57 = vadd.f32 %v1183_v44, %v1182_v50  ;;  %v2844_v61 = vunpack.c.l.bf16 %v3931_v49  ;;  %v1187_v62 = vsel %vm890_vm0, %v2549_v42, 0.0  ;;  %v2356_v63 = vunpack.c.l.bf16 %v3059_v51  ;;  %v4012_v50 = vld [vmem:[%s5187_s0 + $0x5a8] sm:$0xff]  }
  0x7c   :  { %v1175_v60 = vadd.f32 %v1174_v38, %v1173_v52  ;;  %v2088_v2 = vpack.c.bf16 %v1739_v56, %v1739_v56  ;;  %v2941_v0 = vunpack.c.h.bf16 %v3893_v17  ;;  %v2453_v4 = vunpack.c.h.bf16 %v3901_v23  ;;  %v3060_v52 = vld [vmem:[%s5187_s0 + $0x1d8] sm:$0xff]  }
  0x7d   :  { %v1186_v3 = vadd.f32 %v1185_v55, %v1184_v57  ;;  %v1189_v6 = vsel %vm890_vm0, %v2648_v53, 0.0  ;;  %v1191_v7 = vsel %vm890_vm0, %v2745_v54, 0.0  ;;  %v1197_v9 = vsel %vm890_vm0, %v2160_v58, 0.0 }
  0x7e   :  { %v1177_v5 = vadd.f32 %v1176_v47, %v1175_v60  ;;  %1986 = vst.msk [vmem:[%s5188_s1 + $0x3c] sm:$0xf] %vm1970_vm1, %v2088_v2  ;;  %v2552_v11 = vunpack.c.l.bf16 %v3945_v1  ;;  %v1198_v12 = vsel %vm890_vm0, %v2257_v59, 0.0  ;;  %v1200_v13 = vsel %vm890_vm0, %v2356_v63, 0.0  ;;  %v4026_v2 = vld [vmem:[%s5187_s0 + $0x360] sm:$0xff]  }
  0x7f   :  { %v1188_v10 = vadd.f32 %v1187_v62, %v1186_v3  ;;  %v1193_v16 = vsel %vm890_vm0, %v2844_v61, 0.0  ;;  %v2649_v17 = vunpack.c.h.bf16 %v3913_v39  ;;  %v1199_v19 = vadd.f32 %v1198_v12, %v1197_v9  ;;  %v4035_v9 = vld [vmem:[%s5187_s0 + $0x4e8] sm:$0xff]  }
  0x80   :  { %v1179_v15 = vadd.f32 %v1178_v48, %v1177_v5  ;;  %v2748_v21 = vunpack.c.l.bf16 %v3954_v8  ;;  %v2845_v22 = vunpack.c.h.bf16 %v3931_v49  ;;  %v1202_v23 = vsel %vm890_vm0, %v2453_v4, 0.0 }
  0x81   :  { %v1190_v20 = vadd.f32 %v1189_v6, %v1188_v10  ;;  %v1201_v26 = vadd.f32 %v1200_v13, %v1199_v19  ;;  %v2161_v27 = vunpack.c.h.bf16 %v3010_v45  ;;  %v2260_v28 = vunpack.c.l.bf16 %v3967_v14  ;;  %v4055_v19 = vld [vmem:[%s5187_s0 + $0x670] sm:$0xff]  }
  0x82   :  { %v1740_v25 = vmul.f32 0.11111111, %v1179_v15  ;;  %v2944_v30 = vunpack.c.l.bf16 %v3974_v18  ;;  %v1204_v31 = vsel %vm890_vm0, %v2552_v11, 0.0  ;;  %v2357_v32 = vunpack.c.h.bf16 %v3059_v51  ;;  %v4048_v15 = vld [vmem:[%s5187_s0 + $0x118] sm:$0xff]  }
  0x83   :  { %v1192_v29 = vadd.f32 %v1191_v7, %v1190_v20  ;;  %v1195_v34 = vsel %vm890_vm0, %v2941_v0, 0.0  ;;  %v1203_v35 = vadd.f32 %v1202_v23, %v1201_v26  ;;  %v2456_v36 = vunpack.c.l.bf16 %v3982_v24 }
  0x84   :  { %v2089_v33 = vpack.c.bf16 %v1740_v25, %v1740_v25  ;;  %v1206_v38 = vsel %vm890_vm0, %v2649_v17, 0.0  ;;  %v1208_v39 = vsel %vm890_vm0, %v2748_v21, 0.0  ;;  %v1214_v41 = vsel %vm890_vm0, %v2161_v27, 0.0  ;;  %v4063_v25 = vld [vmem:[%s5187_s0 + $0x2a0] sm:$0xff]  }
  0x85   :  { %v1194_v37 = vadd.f32 %v1193_v16, %v1192_v29  ;;  %v1205_v42 = vadd.f32 %v1204_v31, %v1203_v35  ;;  %v2553_v43 = vunpack.c.h.bf16 %v3945_v1  ;;  %v1215_v44 = vsel %vm890_vm0, %v2260_v28, 0.0 }
  0x86   :  { %1987 = vst.msk [vmem:[%s5188_s1 + $0x40] sm:$0xf] %vm1970_vm1, %v2089_v33  ;;  %v1217_v45 = vsel %vm890_vm0, %v2357_v32, 0.0  ;;  %v1210_v48 = vsel %vm890_vm0, %v2845_v22, 0.0  ;;  %v1212_v49 = vsel %vm890_vm0, %v2944_v30, 0.0  ;;  %v1216_v51 = vadd.f32 %v1215_v44, %v1214_v41  ;;  %v4075_v41 = vld [vmem:[%s5187_s0 + $0x428] sm:$0xff]  }
  0x87   :  { %v1196_v47 = vadd.f32 %v1195_v34, %v1194_v37  ;;  %v1207_v53 = vadd.f32 %v1206_v38, %v1205_v42  ;;  %v2652_v54 = vunpack.c.l.bf16 %v3994_v40  ;;  %v2749_v55 = vunpack.c.h.bf16 %v3954_v8 }
  0x88   :  { %v1219_v56 = vsel %vm890_vm0, %v2456_v36, 0.0  ;;  %v1218_v58 = vadd.f32 %v1217_v45, %v1216_v51  ;;  %v2164_v59 = vunpack.c.l.bf16 %v3011_v46  ;;  %v2261_v60 = vunpack.c.h.bf16 %v3967_v14  ;;  %v4093_v51 = vld [vmem:[%s5187_s0 + $0x5b0] sm:$0xff]  }
  0x89   :  { %v1741_v57 = vmul.f32 0.11111111, %v1196_v47  ;;  %v1209_v61 = vadd.f32 %v1208_v39, %v1207_v53  ;;  %v2848_v62 = vunpack.c.l.bf16 %v4012_v50  ;;  %v1221_v63 = vsel %vm890_vm0, %v2553_v43, 0.0  ;;  %v3012_v47 = vld [vmem:[%s5187_s0 + $0x58] sm:$0xff]   ;;  %v3061_v53 = vld [vmem:[%s5187_s0 + $0x1e0] sm:$0xff]  }
  0x8a   :  { %v2360_v1 = vunpack.c.l.bf16 %v3060_v52  ;;  %v2945_v3 = vunpack.c.h.bf16 %v3974_v18  ;;  %v1220_v4 = vadd.f32 %v1219_v56, %v1218_v58  ;;  %v2457_v5 = vunpack.c.h.bf16 %v3982_v24 }
  0x8b   :  { %v2090_v0 = vpack.c.bf16 %v1741_v57, %v1741_v57  ;;  %v1211_v6 = vadd.f32 %v1210_v48, %v1209_v61  ;;  %v1223_v7 = vsel %vm890_vm0, %v2652_v54, 0.0  ;;  %v1225_v8 = vsel %vm890_vm0, %v2749_v55, 0.0 }
  0x8c   :  { %v1231_v10 = vsel %vm890_vm0, %v2164_v59, 0.0  ;;  %v1222_v11 = vadd.f32 %v1221_v63, %v1220_v4  ;;  %v2556_v12 = vunpack.c.l.bf16 %v4026_v2  ;;  %v1232_v13 = vsel %vm890_vm0, %v2261_v60, 0.0 }
  0x8d   :  { %1988 = vst.msk [vmem:[%s5188_s1 + $0x44] sm:$0xf] %vm1970_vm1, %v2090_v0  ;;  %v1234_v14 = vsel %vm890_vm0, %v2360_v1, 0.0  ;;  %v1213_v16 = vadd.f32 %v1212_v49, %v1211_v6  ;;  %v1227_v17 = vsel %vm890_vm0, %v2848_v62, 0.0  ;;  %v2653_v18 = vunpack.c.h.bf16 %v3994_v40  ;;  %v4107_v0 = vld [vmem:[%s5187_s0 + $0x368] sm:$0xff]  }
  0x8e   :  { %v1233_v20 = vadd.f32 %v1232_v13, %v1231_v10  ;;  %v1224_v21 = vadd.f32 %v1223_v7, %v1222_v11  ;;  %v2752_v22 = vunpack.c.l.bf16 %v4035_v9  ;;  %v2849_v23 = vunpack.c.h.bf16 %v4012_v50  ;;  %v4116_v10 = vld [vmem:[%s5187_s0 + $0x4f0] sm:$0xff]  }
  0x8f   :  { %v1236_v24 = vsel %vm890_vm0, %v2457_v5, 0.0  ;;  %v1742_v26 = vmul.f32 0.11111111, %v1213_v16  ;;  %v2165_v28 = vunpack.c.h.bf16 %v3011_v46  ;;  %v2264_v29 = vunpack.c.l.bf16 %v4048_v15  ;;  %v4129_v16 = vld [vmem:[%s5187_s0 + $0x120] sm:$0xff]  }
  0x90   :  { %v1235_v27 = vadd.f32 %v1234_v14, %v1233_v20  ;;  %v1226_v30 = vadd.f32 %v1225_v8, %v1224_v21  ;;  %v2948_v31 = vunpack.c.l.bf16 %v4055_v19  ;;  %v1238_v32 = vsel %vm890_vm0, %v2556_v12, 0.0  ;;  %v4136_v20 = vld [vmem:[%s5187_s0 + $0x678] sm:$0xff]  }
  0x91   :  { %v2361_v33 = vunpack.c.h.bf16 %v3060_v52  ;;  %v2091_v34 = vpack.c.bf16 %v1742_v26, %v1742_v26  ;;  %v1229_v35 = vsel %vm890_vm0, %v2945_v3, 0.0  ;;  %v2460_v37 = vunpack.c.l.bf16 %v4063_v25  ;;  %v4144_v26 = vld [vmem:[%s5187_s0 + $0x2a8] sm:$0xff]  }
  0x92   :  { %v1237_v36 = vadd.f32 %v1236_v24, %v1235_v27  ;;  %v1228_v38 = vadd.f32 %v1227_v17, %v1226_v30  ;;  %v1240_v39 = vsel %vm890_vm0, %v2653_v18, 0.0  ;;  %v1242_v40 = vsel %vm890_vm0, %v2752_v22, 0.0 }
  0x93   :  { %v1248_v42 = vsel %vm890_vm0, %v2165_v28, 0.0  ;;  %1989 = vst.msk [vmem:[%s5188_s1 + $0x48] sm:$0xf] %vm1970_vm1, %v2091_v34  ;;  %v2557_v44 = vunpack.c.h.bf16 %v4026_v2  ;;  %v1249_v45 = vsel %vm890_vm0, %v2264_v29, 0.0  ;;  %v1251_v46 = vsel %vm890_vm0, %v2361_v33, 0.0 }
  0x94   :  { %v1239_v43 = vadd.f32 %v1238_v32, %v1237_v36  ;;  %v1230_v48 = vadd.f32 %v1229_v35, %v1228_v38  ;;  %v1244_v49 = vsel %vm890_vm0, %v2849_v23, 0.0  ;;  %v1246_v50 = vsel %vm890_vm0, %v2948_v31, 0.0 }
  0x95   :  { %v1250_v52 = vadd.f32 %v1249_v45, %v1248_v42  ;;  %v2656_v55 = vunpack.c.l.bf16 %v4075_v41  ;;  %v2753_v56 = vunpack.c.h.bf16 %v4035_v9  ;;  %v1253_v57 = vsel %vm890_vm0, %v2460_v37, 0.0  ;;  %v4156_v42 = vld [vmem:[%s5187_s0 + $0x430] sm:$0xff]  }
  0x96   :  { %v1241_v54 = vadd.f32 %v1240_v39, %v1239_v43  ;;  %v1743_v58 = vmul.f32 0.11111111, %v1230_v48  ;;  %v2168_v60 = vunpack.c.l.bf16 %v3012_v47  ;;  %v2265_v61 = vunpack.c.h.bf16 %v4048_v15  ;;  %v3013_v48 = vld [vmem:[%s5187_s0 + $0x60] sm:$0xff]  }
  0x97   :  { %v1252_v59 = vadd.f32 %v1251_v46, %v1250_v52  ;;  %v2852_v63 = vunpack.c.l.bf16 %v4093_v51  ;;  %v1255_v1 = vsel %vm890_vm0, %v2557_v44, 0.0  ;;  %v2364_v2 = vunpack.c.l.bf16 %v3061_v53  ;;  %v4174_v52 = vld [vmem:[%s5187_s0 + $0x5b8] sm:$0xff]  }
  0x98   :  { %v1243_v62 = vadd.f32 %v1242_v40, %v1241_v54  ;;  %v2092_v3 = vpack.c.bf16 %v1743_v58, %v1743_v58  ;;  %v2949_v4 = vunpack.c.h.bf16 %v4055_v19  ;;  %v2461_v6 = vunpack.c.h.bf16 %v4063_v25  ;;  %v3062_v54 = vld [vmem:[%s5187_s0 + $0x1e8] sm:$0xff]  }
  0x99   :  { %v1254_v5 = vadd.f32 %v1253_v57, %v1252_v59  ;;  %v1257_v8 = vsel %vm890_vm0, %v2656_v55, 0.0  ;;  %v1259_v9 = vsel %vm890_vm0, %v2753_v56, 0.0  ;;  %v1265_v11 = vsel %vm890_vm0, %v2168_v60, 0.0 }
  0x9a   :  { %v1245_v7 = vadd.f32 %v1244_v49, %v1243_v62  ;;  %1990 = vst.msk [vmem:[%s5188_s1 + $0x4c] sm:$0xf] %vm1970_vm1, %v2092_v3  ;;  %v2560_v13 = vunpack.c.l.bf16 %v4107_v0  ;;  %v1266_v14 = vsel %vm890_vm0, %v2265_v61, 0.0  ;;  %v1268_v15 = vsel %vm890_vm0, %v2364_v2, 0.0  ;;  %v4188_v3 = vld [vmem:[%s5187_s0 + $0x370] sm:$0xff]  }
  0x9b   :  { %v1256_v12 = vadd.f32 %v1255_v1, %v1254_v5  ;;  %v1261_v18 = vsel %vm890_vm0, %v2852_v63, 0.0  ;;  %v2657_v19 = vunpack.c.h.bf16 %v4075_v41  ;;  %v1267_v21 = vadd.f32 %v1266_v14, %v1265_v11  ;;  %v4197_v11 = vld [vmem:[%s5187_s0 + $0x4f8] sm:$0xff]  }
  0x9c   :  { %v1247_v17 = vadd.f32 %v1246_v50, %v1245_v7  ;;  %v2756_v23 = vunpack.c.l.bf16 %v4116_v10  ;;  %v2853_v24 = vunpack.c.h.bf16 %v4093_v51  ;;  %v1270_v25 = vsel %vm890_vm0, %v2461_v6, 0.0 }
  0x9d   :  { %v1258_v22 = vadd.f32 %v1257_v8, %v1256_v12  ;;  %v1269_v28 = vadd.f32 %v1268_v15, %v1267_v21  ;;  %v2169_v29 = vunpack.c.h.bf16 %v3012_v47  ;;  %v2268_v30 = vunpack.c.l.bf16 %v4129_v16  ;;  %v4217_v21 = vld [vmem:[%s5187_s0 + $0x680] sm:$0xff]  }
  0x9e   :  { %v1744_v27 = vmul.f32 0.11111111, %v1247_v17  ;;  %v2952_v32 = vunpack.c.l.bf16 %v4136_v20  ;;  %v1272_v33 = vsel %vm890_vm0, %v2560_v13, 0.0  ;;  %v2365_v34 = vunpack.c.h.bf16 %v3061_v53  ;;  %v4210_v17 = vld [vmem:[%s5187_s0 + $0x128] sm:$0xff]  }
  0x9f   :  { %v1260_v31 = vadd.f32 %v1259_v9, %v1258_v22  ;;  %v1263_v36 = vsel %vm890_vm0, %v2949_v4, 0.0  ;;  %v1271_v37 = vadd.f32 %v1270_v25, %v1269_v28  ;;  %v2464_v38 = vunpack.c.l.bf16 %v4144_v26 }
  0xa0   :  { %v2093_v35 = vpack.c.bf16 %v1744_v27, %v1744_v27  ;;  %v1274_v40 = vsel %vm890_vm0, %v2657_v19, 0.0  ;;  %v1276_v41 = vsel %vm890_vm0, %v2756_v23, 0.0  ;;  %v1282_v43 = vsel %vm890_vm0, %v2169_v29, 0.0  ;;  %v4225_v27 = vld [vmem:[%s5187_s0 + $0x2b0] sm:$0xff]  }
  0xa1   :  { %v1262_v39 = vadd.f32 %v1261_v18, %v1260_v31  ;;  %v1273_v44 = vadd.f32 %v1272_v33, %v1271_v37  ;;  %v2561_v45 = vunpack.c.h.bf16 %v4107_v0  ;;  %v1283_v46 = vsel %vm890_vm0, %v2268_v30, 0.0 }
  0xa2   :  { %1991 = vst.msk [vmem:[%s5188_s1 + $0x50] sm:$0xf] %vm1970_vm1, %v2093_v35  ;;  %v1285_v47 = vsel %vm890_vm0, %v2365_v34, 0.0  ;;  %v1278_v50 = vsel %vm890_vm0, %v2853_v24, 0.0  ;;  %v1280_v51 = vsel %vm890_vm0, %v2952_v32, 0.0  ;;  %v1284_v53 = vadd.f32 %v1283_v46, %v1282_v43  ;;  %v4237_v43 = vld [vmem:[%s5187_s0 + $0x438] sm:$0xff]  }
  0xa3   :  { %v1264_v49 = vadd.f32 %v1263_v36, %v1262_v39  ;;  %v1275_v55 = vadd.f32 %v1274_v40, %v1273_v44  ;;  %v2660_v56 = vunpack.c.l.bf16 %v4156_v42  ;;  %v2757_v57 = vunpack.c.h.bf16 %v4116_v10 }
  0xa4   :  { %v1287_v58 = vsel %vm890_vm0, %v2464_v38, 0.0  ;;  %v1286_v60 = vadd.f32 %v1285_v47, %v1284_v53  ;;  %v2172_v61 = vunpack.c.l.bf16 %v3013_v48  ;;  %v2269_v62 = vunpack.c.h.bf16 %v4129_v16  ;;  %v4255_v53 = vld [vmem:[%s5187_s0 + $0x5c0] sm:$0xff]  }
  0xa5   :  { %v1745_v59 = vmul.f32 0.11111111, %v1264_v49  ;;  %v1277_v63 = vadd.f32 %v1276_v41, %v1275_v55  ;;  %v2856_v1 = vunpack.c.l.bf16 %v4174_v52  ;;  %v1289_v2 = vsel %vm890_vm0, %v2561_v45, 0.0  ;;  %v3014_v49 = vld [vmem:[%s5187_s0 + $0x68] sm:$0xff]   ;;  %v3063_v55 = vld [vmem:[%s5187_s0 + $0x1f0] sm:$0xff]  }
  0xa6   :  { %v2368_v0 = vunpack.c.l.bf16 %v3062_v54  ;;  %v2953_v5 = vunpack.c.h.bf16 %v4136_v20  ;;  %v1288_v6 = vadd.f32 %v1287_v58, %v1286_v60  ;;  %v2465_v7 = vunpack.c.h.bf16 %v4144_v26 }
  0xa7   :  { %v2094_v4 = vpack.c.bf16 %v1745_v59, %v1745_v59  ;;  %v1279_v8 = vadd.f32 %v1278_v50, %v1277_v63  ;;  %v1291_v9 = vsel %vm890_vm0, %v2660_v56, 0.0  ;;  %v1293_v10 = vsel %vm890_vm0, %v2757_v57, 0.0 }
  0xa8   :  { %v1299_v12 = vsel %vm890_vm0, %v2172_v61, 0.0  ;;  %v1290_v13 = vadd.f32 %v1289_v2, %v1288_v6  ;;  %v2564_v14 = vunpack.c.l.bf16 %v4188_v3  ;;  %v1300_v15 = vsel %vm890_vm0, %v2269_v62, 0.0 }
  0xa9   :  { %1992 = vst.msk [vmem:[%s5188_s1 + $0x54] sm:$0xf] %vm1970_vm1, %v2094_v4  ;;  %v1302_v16 = vsel %vm890_vm0, %v2368_v0, 0.0  ;;  %v1281_v18 = vadd.f32 %v1280_v51, %v1279_v8  ;;  %v1295_v19 = vsel %vm890_vm0, %v2856_v1, 0.0  ;;  %v2661_v20 = vunpack.c.h.bf16 %v4156_v42  ;;  %v4269_v4 = vld [vmem:[%s5187_s0 + $0x378] sm:$0xff]  }
  0xaa   :  { %v1301_v22 = vadd.f32 %v1300_v15, %v1299_v12  ;;  %v1292_v23 = vadd.f32 %v1291_v9, %v1290_v13  ;;  %v2760_v24 = vunpack.c.l.bf16 %v4197_v11  ;;  %v2857_v25 = vunpack.c.h.bf16 %v4174_v52  ;;  %v4278_v12 = vld [vmem:[%s5187_s0 + $0x500] sm:$0xff]  }
  0xab   :  { %v1304_v26 = vsel %vm890_vm0, %v2465_v7, 0.0  ;;  %v1746_v28 = vmul.f32 0.11111111, %v1281_v18  ;;  %v2173_v30 = vunpack.c.h.bf16 %v3013_v48  ;;  %v2272_v31 = vunpack.c.l.bf16 %v4210_v17  ;;  %v4291_v18 = vld [vmem:[%s5187_s0 + $0x130] sm:$0xff]  }
  0xac   :  { %v1303_v29 = vadd.f32 %v1302_v16, %v1301_v22  ;;  %v1294_v32 = vadd.f32 %v1293_v10, %v1292_v23  ;;  %v2956_v33 = vunpack.c.l.bf16 %v4217_v21  ;;  %v1306_v34 = vsel %vm890_vm0, %v2564_v14, 0.0  ;;  %v4298_v22 = vld [vmem:[%s5187_s0 + $0x688] sm:$0xff]  }
  0xad   :  { %v2369_v35 = vunpack.c.h.bf16 %v3062_v54  ;;  %v2095_v36 = vpack.c.bf16 %v1746_v28, %v1746_v28  ;;  %v1297_v37 = vsel %vm890_vm0, %v2953_v5, 0.0  ;;  %v2468_v39 = vunpack.c.l.bf16 %v4225_v27  ;;  %v4306_v28 = vld [vmem:[%s5187_s0 + $0x2b8] sm:$0xff]  }
  0xae   :  { %v1305_v38 = vadd.f32 %v1304_v26, %v1303_v29  ;;  %v1296_v40 = vadd.f32 %v1295_v19, %v1294_v32  ;;  %v1308_v41 = vsel %vm890_vm0, %v2661_v20, 0.0  ;;  %v1310_v42 = vsel %vm890_vm0, %v2760_v24, 0.0 }
  0xaf   :  { %v1316_v44 = vsel %vm890_vm0, %v2173_v30, 0.0  ;;  %1993 = vst.msk [vmem:[%s5188_s1 + $0x58] sm:$0xf] %vm1970_vm1, %v2095_v36  ;;  %v2565_v46 = vunpack.c.h.bf16 %v4188_v3  ;;  %v1317_v47 = vsel %vm890_vm0, %v2272_v31, 0.0  ;;  %v1319_v48 = vsel %vm890_vm0, %v2369_v35, 0.0 }
  0xb0   :  { %v1307_v45 = vadd.f32 %v1306_v34, %v1305_v38  ;;  %v1298_v50 = vadd.f32 %v1297_v37, %v1296_v40  ;;  %v1312_v51 = vsel %vm890_vm0, %v2857_v25, 0.0  ;;  %v1314_v52 = vsel %vm890_vm0, %v2956_v33, 0.0 }
  0xb1   :  { %v1318_v54 = vadd.f32 %v1317_v47, %v1316_v44  ;;  %v2664_v57 = vunpack.c.l.bf16 %v4237_v43  ;;  %v2761_v58 = vunpack.c.h.bf16 %v4197_v11  ;;  %v1321_v59 = vsel %vm890_vm0, %v2468_v39, 0.0  ;;  %v4318_v44 = vld [vmem:[%s5187_s0 + $0x440] sm:$0xff]  }
  0xb2   :  { %v1309_v56 = vadd.f32 %v1308_v41, %v1307_v45  ;;  %v1747_v60 = vmul.f32 0.11111111, %v1298_v50  ;;  %v2176_v62 = vunpack.c.l.bf16 %v3014_v49  ;;  %v2273_v63 = vunpack.c.h.bf16 %v4210_v17  ;;  %v3015_v50 = vld [vmem:[%s5187_s0 + $0x70] sm:$0xff]  }
  0xb3   :  { %v1320_v61 = vadd.f32 %v1319_v48, %v1318_v54  ;;  %v2860_v2 = vunpack.c.l.bf16 %v4255_v53  ;;  %v1323_v0 = vsel %vm890_vm0, %v2565_v46, 0.0  ;;  %v2372_v3 = vunpack.c.l.bf16 %v3063_v55  ;;  %v4336_v54 = vld [vmem:[%s5187_s0 + $0x5c8] sm:$0xff]  }
  0xb4   :  { %v1311_v1 = vadd.f32 %v1310_v42, %v1309_v56  ;;  %v2096_v5 = vpack.c.bf16 %v1747_v60, %v1747_v60  ;;  %v2957_v6 = vunpack.c.h.bf16 %v4217_v21  ;;  %v2469_v8 = vunpack.c.h.bf16 %v4225_v27  ;;  %v3064_v56 = vld [vmem:[%s5187_s0 + $0x1f8] sm:$0xff]  }
  0xb5   :  { %v1322_v7 = vadd.f32 %v1321_v59, %v1320_v61  ;;  %v1325_v10 = vsel %vm890_vm0, %v2664_v57, 0.0  ;;  %v1327_v11 = vsel %vm890_vm0, %v2761_v58, 0.0  ;;  %v1333_v13 = vsel %vm890_vm0, %v2176_v62, 0.0 }
  0xb6   :  { %v1313_v9 = vadd.f32 %v1312_v51, %v1311_v1  ;;  %1994 = vst.msk [vmem:[%s5188_s1 + $0x5c] sm:$0xf] %vm1970_vm1, %v2096_v5  ;;  %v2568_v15 = vunpack.c.l.bf16 %v4269_v4  ;;  %v1334_v16 = vsel %vm890_vm0, %v2273_v63, 0.0  ;;  %v1336_v17 = vsel %vm890_vm0, %v2372_v3, 0.0  ;;  %v4350_v5 = vld [vmem:[%s5187_s0 + $0x380] sm:$0xff]  }
  0xb7   :  { %v1324_v14 = vadd.f32 %v1323_v0, %v1322_v7  ;;  %v1329_v20 = vsel %vm890_vm0, %v2860_v2, 0.0  ;;  %v2665_v21 = vunpack.c.h.bf16 %v4237_v43  ;;  %v1335_v23 = vadd.f32 %v1334_v16, %v1333_v13  ;;  %v4359_v13 = vld [vmem:[%s5187_s0 + $0x508] sm:$0xff]  }
  0xb8   :  { %v1315_v19 = vadd.f32 %v1314_v52, %v1313_v9  ;;  %v2764_v25 = vunpack.c.l.bf16 %v4278_v12  ;;  %v2861_v26 = vunpack.c.h.bf16 %v4255_v53  ;;  %v1338_v27 = vsel %vm890_vm0, %v2469_v8, 0.0 }
  0xb9   :  { %v1326_v24 = vadd.f32 %v1325_v10, %v1324_v14  ;;  %v1337_v30 = vadd.f32 %v1336_v17, %v1335_v23  ;;  %v2177_v31 = vunpack.c.h.bf16 %v3014_v49  ;;  %v2276_v32 = vunpack.c.l.bf16 %v4291_v18  ;;  %v4379_v23 = vld [vmem:[%s5187_s0 + $0x690] sm:$0xff]  }
  0xba   :  { %v1748_v29 = vmul.f32 0.11111111, %v1315_v19  ;;  %v2960_v34 = vunpack.c.l.bf16 %v4298_v22  ;;  %v1340_v35 = vsel %vm890_vm0, %v2568_v15, 0.0  ;;  %v2373_v36 = vunpack.c.h.bf16 %v3063_v55  ;;  %v4372_v19 = vld [vmem:[%s5187_s0 + $0x138] sm:$0xff]  }
  0xbb   :  { %v1328_v33 = vadd.f32 %v1327_v11, %v1326_v24  ;;  %v1331_v38 = vsel %vm890_vm0, %v2957_v6, 0.0  ;;  %v1339_v39 = vadd.f32 %v1338_v27, %v1337_v30  ;;  %v2472_v40 = vunpack.c.l.bf16 %v4306_v28 }
  0xbc   :  { %v2097_v37 = vpack.c.bf16 %v1748_v29, %v1748_v29  ;;  %v1342_v42 = vsel %vm890_vm0, %v2665_v21, 0.0  ;;  %v1344_v43 = vsel %vm890_vm0, %v2764_v25, 0.0  ;;  %v1350_v45 = vsel %vm890_vm0, %v2177_v31, 0.0  ;;  %v4387_v29 = vld [vmem:[%s5187_s0 + $0x2c0] sm:$0xff]  }
  0xbd   :  { %v1330_v41 = vadd.f32 %v1329_v20, %v1328_v33  ;;  %v1341_v46 = vadd.f32 %v1340_v35, %v1339_v39  ;;  %v2569_v47 = vunpack.c.h.bf16 %v4269_v4  ;;  %v1351_v48 = vsel %vm890_vm0, %v2276_v32, 0.0 }
  0xbe   :  { %1995 = vst.msk [vmem:[%s5188_s1 + $0x60] sm:$0xf] %vm1970_vm1, %v2097_v37  ;;  %v1353_v49 = vsel %vm890_vm0, %v2373_v36, 0.0  ;;  %v1346_v52 = vsel %vm890_vm0, %v2861_v26, 0.0  ;;  %v1348_v53 = vsel %vm890_vm0, %v2960_v34, 0.0  ;;  %v1352_v55 = vadd.f32 %v1351_v48, %v1350_v45  ;;  %v4399_v45 = vld [vmem:[%s5187_s0 + $0x448] sm:$0xff]  }
  0xbf   :  { %v1332_v51 = vadd.f32 %v1331_v38, %v1330_v41  ;;  %v1343_v57 = vadd.f32 %v1342_v42, %v1341_v46  ;;  %v2668_v58 = vunpack.c.l.bf16 %v4318_v44  ;;  %v2765_v59 = vunpack.c.h.bf16 %v4278_v12 }
  0xc0   :  { %v1355_v60 = vsel %vm890_vm0, %v2472_v40, 0.0  ;;  %v1354_v62 = vadd.f32 %v1353_v49, %v1352_v55  ;;  %v2180_v63 = vunpack.c.l.bf16 %v3015_v50  ;;  %v2277_v1 = vunpack.c.h.bf16 %v4291_v18  ;;  %v4417_v55 = vld [vmem:[%s5187_s0 + $0x5d0] sm:$0xff]  }
  0xc1   :  { %v1749_v61 = vmul.f32 0.11111111, %v1332_v51  ;;  %v1345_v2 = vadd.f32 %v1344_v43, %v1343_v57  ;;  %v2864_v0 = vunpack.c.l.bf16 %v4336_v54  ;;  %v1357_v3 = vsel %vm890_vm0, %v2569_v47, 0.0  ;;  %v3016_v51 = vld [vmem:[%s5187_s0 + $0x78] sm:$0xff]   ;;  %v3065_v57 = vld [vmem:[%s5187_s0 + $0x200] sm:$0xff]  }
  0xc2   :  { %v2376_v4 = vunpack.c.l.bf16 %v3064_v56  ;;  %v2961_v7 = vunpack.c.h.bf16 %v4298_v22  ;;  %v1356_v8 = vadd.f32 %v1355_v60, %v1354_v62  ;;  %v2473_v9 = vunpack.c.h.bf16 %v4306_v28 }
  0xc3   :  { %v2098_v6 = vpack.c.bf16 %v1749_v61, %v1749_v61  ;;  %v1347_v10 = vadd.f32 %v1346_v52, %v1345_v2  ;;  %v1359_v11 = vsel %vm890_vm0, %v2668_v58, 0.0  ;;  %v1361_v12 = vsel %vm890_vm0, %v2765_v59, 0.0 }
  0xc4   :  { %v1367_v14 = vsel %vm890_vm0, %v2180_v63, 0.0  ;;  %v1358_v15 = vadd.f32 %v1357_v3, %v1356_v8  ;;  %v2572_v16 = vunpack.c.l.bf16 %v4350_v5  ;;  %v1368_v17 = vsel %vm890_vm0, %v2277_v1, 0.0 }
  0xc5   :  { %1996 = vst.msk [vmem:[%s5188_s1 + $0x64] sm:$0xf] %vm1970_vm1, %v2098_v6  ;;  %v1370_v18 = vsel %vm890_vm0, %v2376_v4, 0.0  ;;  %v1349_v20 = vadd.f32 %v1348_v53, %v1347_v10  ;;  %v1363_v21 = vsel %vm890_vm0, %v2864_v0, 0.0  ;;  %v2669_v22 = vunpack.c.h.bf16 %v4318_v44  ;;  %v4431_v6 = vld [vmem:[%s5187_s0 + $0x388] sm:$0xff]  }
  0xc6   :  { %v1369_v24 = vadd.f32 %v1368_v17, %v1367_v14  ;;  %v1360_v25 = vadd.f32 %v1359_v11, %v1358_v15  ;;  %v2768_v26 = vunpack.c.l.bf16 %v4359_v13  ;;  %v2865_v27 = vunpack.c.h.bf16 %v4336_v54  ;;  %v4440_v14 = vld [vmem:[%s5187_s0 + $0x510] sm:$0xff]  }
  0xc7   :  { %v1372_v28 = vsel %vm890_vm0, %v2473_v9, 0.0  ;;  %v1750_v30 = vmul.f32 0.11111111, %v1349_v20  ;;  %v2181_v32 = vunpack.c.h.bf16 %v3015_v50  ;;  %v2280_v33 = vunpack.c.l.bf16 %v4372_v19  ;;  %v4453_v20 = vld [vmem:[%s5187_s0 + $0x140] sm:$0xff]  }
  0xc8   :  { %v1371_v31 = vadd.f32 %v1370_v18, %v1369_v24  ;;  %v1362_v34 = vadd.f32 %v1361_v12, %v1360_v25  ;;  %v2964_v35 = vunpack.c.l.bf16 %v4379_v23  ;;  %v1374_v36 = vsel %vm890_vm0, %v2572_v16, 0.0  ;;  %v4460_v24 = vld [vmem:[%s5187_s0 + $0x698] sm:$0xff]  }
  0xc9   :  { %v2377_v37 = vunpack.c.h.bf16 %v3064_v56  ;;  %v2099_v38 = vpack.c.bf16 %v1750_v30, %v1750_v30  ;;  %v1365_v39 = vsel %vm890_vm0, %v2961_v7, 0.0  ;;  %v2476_v41 = vunpack.c.l.bf16 %v4387_v29  ;;  %v4468_v30 = vld [vmem:[%s5187_s0 + $0x2c8] sm:$0xff]  }
  0xca   :  { %v1373_v40 = vadd.f32 %v1372_v28, %v1371_v31  ;;  %v1364_v42 = vadd.f32 %v1363_v21, %v1362_v34  ;;  %v1376_v43 = vsel %vm890_vm0, %v2669_v22, 0.0  ;;  %v1378_v44 = vsel %vm890_vm0, %v2768_v26, 0.0 }
  0xcb   :  { %v1384_v46 = vsel %vm890_vm0, %v2181_v32, 0.0  ;;  %1997 = vst.msk [vmem:[%s5188_s1 + $0x68] sm:$0xf] %vm1970_vm1, %v2099_v38  ;;  %v2573_v48 = vunpack.c.h.bf16 %v4350_v5  ;;  %v1385_v49 = vsel %vm890_vm0, %v2280_v33, 0.0  ;;  %v1387_v50 = vsel %vm890_vm0, %v2377_v37, 0.0 }
  0xcc   :  { %v1375_v47 = vadd.f32 %v1374_v36, %v1373_v40  ;;  %v1366_v52 = vadd.f32 %v1365_v39, %v1364_v42  ;;  %v1380_v53 = vsel %vm890_vm0, %v2865_v27, 0.0  ;;  %v1382_v54 = vsel %vm890_vm0, %v2964_v35, 0.0 }
  0xcd   :  { %v1386_v56 = vadd.f32 %v1385_v49, %v1384_v46  ;;  %v2672_v59 = vunpack.c.l.bf16 %v4399_v45  ;;  %v2769_v60 = vunpack.c.h.bf16 %v4359_v13  ;;  %v1389_v61 = vsel %vm890_vm0, %v2476_v41, 0.0  ;;  %v4480_v46 = vld [vmem:[%s5187_s0 + $0x450] sm:$0xff]  }
  0xce   :  { %v1377_v58 = vadd.f32 %v1376_v43, %v1375_v47  ;;  %v1751_v62 = vmul.f32 0.11111111, %v1366_v52  ;;  %v2184_v1 = vunpack.c.l.bf16 %v3016_v51  ;;  %v2281_v2 = vunpack.c.h.bf16 %v4372_v19  ;;  %v3017_v52 = vld [vmem:[%s5187_s0 + $0x80] sm:$0xff]  }
  0xcf   :  { %v1388_v63 = vadd.f32 %v1387_v50, %v1386_v56  ;;  %v2868_v3 = vunpack.c.l.bf16 %v4417_v55  ;;  %v1391_v4 = vsel %vm890_vm0, %v2573_v48, 0.0  ;;  %v2380_v5 = vunpack.c.l.bf16 %v3065_v57  ;;  %v4498_v56 = vld [vmem:[%s5187_s0 + $0x5d8] sm:$0xff]  }
  0xd0   :  { %v1379_v0 = vadd.f32 %v1378_v44, %v1377_v58  ;;  %v2100_v7 = vpack.c.bf16 %v1751_v62, %v1751_v62  ;;  %v2965_v8 = vunpack.c.h.bf16 %v4379_v23  ;;  %v2477_v10 = vunpack.c.h.bf16 %v4387_v29  ;;  %v3066_v58 = vld [vmem:[%s5187_s0 + $0x208] sm:$0xff]  }
  0xd1   :  { %v1390_v9 = vadd.f32 %v1389_v61, %v1388_v63  ;;  %v1393_v12 = vsel %vm890_vm0, %v2672_v59, 0.0  ;;  %v1395_v13 = vsel %vm890_vm0, %v2769_v60, 0.0  ;;  %v1401_v15 = vsel %vm890_vm0, %v2184_v1, 0.0 }
  0xd2   :  { %v1381_v11 = vadd.f32 %v1380_v53, %v1379_v0  ;;  %1998 = vst.msk [vmem:[%s5188_s1 + $0x6c] sm:$0xf] %vm1970_vm1, %v2100_v7  ;;  %v2576_v17 = vunpack.c.l.bf16 %v4431_v6  ;;  %v1402_v18 = vsel %vm890_vm0, %v2281_v2, 0.0  ;;  %v1404_v19 = vsel %vm890_vm0, %v2380_v5, 0.0  ;;  %v4512_v7 = vld [vmem:[%s5187_s0 + $0x390] sm:$0xff]  }
  0xd3   :  { %v1392_v16 = vadd.f32 %v1391_v4, %v1390_v9  ;;  %v1397_v22 = vsel %vm890_vm0, %v2868_v3, 0.0  ;;  %v2673_v23 = vunpack.c.h.bf16 %v4399_v45  ;;  %v1403_v25 = vadd.f32 %v1402_v18, %v1401_v15  ;;  %v4521_v15 = vld [vmem:[%s5187_s0 + $0x518] sm:$0xff]  }
  0xd4   :  { %v1383_v21 = vadd.f32 %v1382_v54, %v1381_v11  ;;  %v2772_v27 = vunpack.c.l.bf16 %v4440_v14  ;;  %v2869_v28 = vunpack.c.h.bf16 %v4417_v55  ;;  %v1406_v29 = vsel %vm890_vm0, %v2477_v10, 0.0 }
  0xd5   :  { %v1394_v26 = vadd.f32 %v1393_v12, %v1392_v16  ;;  %v1405_v32 = vadd.f32 %v1404_v19, %v1403_v25  ;;  %v2185_v33 = vunpack.c.h.bf16 %v3016_v51  ;;  %v2284_v34 = vunpack.c.l.bf16 %v4453_v20  ;;  %v4541_v25 = vld [vmem:[%s5187_s0 + $0x6a0] sm:$0xff]  }
  0xd6   :  { %v1752_v31 = vmul.f32 0.11111111, %v1383_v21  ;;  %v2968_v36 = vunpack.c.l.bf16 %v4460_v24  ;;  %v1408_v37 = vsel %vm890_vm0, %v2576_v17, 0.0  ;;  %v2381_v38 = vunpack.c.h.bf16 %v3065_v57  ;;  %v4534_v21 = vld [vmem:[%s5187_s0 + $0x148] sm:$0xff]  }
  0xd7   :  { %v1396_v35 = vadd.f32 %v1395_v13, %v1394_v26  ;;  %v1399_v40 = vsel %vm890_vm0, %v2965_v8, 0.0  ;;  %v1407_v41 = vadd.f32 %v1406_v29, %v1405_v32  ;;  %v2480_v42 = vunpack.c.l.bf16 %v4468_v30 }
  0xd8   :  { %v2101_v39 = vpack.c.bf16 %v1752_v31, %v1752_v31  ;;  %v1410_v44 = vsel %vm890_vm0, %v2673_v23, 0.0  ;;  %v1412_v45 = vsel %vm890_vm0, %v2772_v27, 0.0  ;;  %v1418_v47 = vsel %vm890_vm0, %v2185_v33, 0.0  ;;  %v4549_v31 = vld [vmem:[%s5187_s0 + $0x2d0] sm:$0xff]  }
  0xd9   :  { %v1398_v43 = vadd.f32 %v1397_v22, %v1396_v35  ;;  %v1409_v48 = vadd.f32 %v1408_v37, %v1407_v41  ;;  %v2577_v49 = vunpack.c.h.bf16 %v4431_v6  ;;  %v1419_v50 = vsel %vm890_vm0, %v2284_v34, 0.0 }
  0xda   :  { %1999 = vst.msk [vmem:[%s5188_s1 + $0x70] sm:$0xf] %vm1970_vm1, %v2101_v39  ;;  %v1421_v51 = vsel %vm890_vm0, %v2381_v38, 0.0  ;;  %v1414_v54 = vsel %vm890_vm0, %v2869_v28, 0.0  ;;  %v1416_v55 = vsel %vm890_vm0, %v2968_v36, 0.0  ;;  %v1420_v57 = vadd.f32 %v1419_v50, %v1418_v47  ;;  %v4561_v47 = vld [vmem:[%s5187_s0 + $0x458] sm:$0xff]  }
  0xdb   :  { %v1400_v53 = vadd.f32 %v1399_v40, %v1398_v43  ;;  %v1411_v59 = vadd.f32 %v1410_v44, %v1409_v48  ;;  %v2676_v60 = vunpack.c.l.bf16 %v4480_v46  ;;  %v2773_v61 = vunpack.c.h.bf16 %v4440_v14 }
  0xdc   :  { %v1423_v62 = vsel %vm890_vm0, %v2480_v42, 0.0  ;;  %v1422_v1 = vadd.f32 %v1421_v51, %v1420_v57  ;;  %v2188_v2 = vunpack.c.l.bf16 %v3017_v52  ;;  %v2285_v0 = vunpack.c.h.bf16 %v4453_v20  ;;  %v4579_v57 = vld [vmem:[%s5187_s0 + $0x5e0] sm:$0xff]  }
  0xdd   :  { %v1753_v63 = vmul.f32 0.11111111, %v1400_v53  ;;  %v1413_v3 = vadd.f32 %v1412_v45, %v1411_v59  ;;  %v2872_v4 = vunpack.c.l.bf16 %v4498_v56  ;;  %v1425_v5 = vsel %vm890_vm0, %v2577_v49, 0.0  ;;  %v3018_v53 = vld [vmem:[%s5187_s0 + $0x88] sm:$0xff]   ;;  %v3067_v59 = vld [vmem:[%s5187_s0 + $0x210] sm:$0xff]  }
  0xde   :  { %v2384_v6 = vunpack.c.l.bf16 %v3066_v58  ;;  %v2969_v9 = vunpack.c.h.bf16 %v4460_v24  ;;  %v1424_v10 = vadd.f32 %v1423_v62, %v1422_v1  ;;  %v2481_v11 = vunpack.c.h.bf16 %v4468_v30 }
  0xdf   :  { %v2102_v8 = vpack.c.bf16 %v1753_v63, %v1753_v63  ;;  %v1415_v12 = vadd.f32 %v1414_v54, %v1413_v3  ;;  %v1427_v13 = vsel %vm890_vm0, %v2676_v60, 0.0  ;;  %v1429_v14 = vsel %vm890_vm0, %v2773_v61, 0.0 }
  0xe0   :  { %v1435_v16 = vsel %vm890_vm0, %v2188_v2, 0.0  ;;  %v1426_v17 = vadd.f32 %v1425_v5, %v1424_v10  ;;  %v2580_v18 = vunpack.c.l.bf16 %v4512_v7  ;;  %v1436_v19 = vsel %vm890_vm0, %v2285_v0, 0.0 }
  0xe1   :  { %2000 = vst.msk [vmem:[%s5188_s1 + $0x74] sm:$0xf] %vm1970_vm1, %v2102_v8  ;;  %v1438_v20 = vsel %vm890_vm0, %v2384_v6, 0.0  ;;  %v1417_v22 = vadd.f32 %v1416_v55, %v1415_v12  ;;  %v1431_v23 = vsel %vm890_vm0, %v2872_v4, 0.0  ;;  %v2677_v24 = vunpack.c.h.bf16 %v4480_v46  ;;  %v4593_v8 = vld [vmem:[%s5187_s0 + $0x398] sm:$0xff]  }
  0xe2   :  { %v1437_v26 = vadd.f32 %v1436_v19, %v1435_v16  ;;  %v1428_v27 = vadd.f32 %v1427_v13, %v1426_v17  ;;  %v2776_v28 = vunpack.c.l.bf16 %v4521_v15  ;;  %v2873_v29 = vunpack.c.h.bf16 %v4498_v56  ;;  %v4602_v16 = vld [vmem:[%s5187_s0 + $0x520] sm:$0xff]  }
  0xe3   :  { %v1440_v30 = vsel %vm890_vm0, %v2481_v11, 0.0  ;;  %v1754_v32 = vmul.f32 0.11111111, %v1417_v22  ;;  %v2189_v34 = vunpack.c.h.bf16 %v3017_v52  ;;  %v2288_v35 = vunpack.c.l.bf16 %v4534_v21  ;;  %v4615_v22 = vld [vmem:[%s5187_s0 + $0x150] sm:$0xff]  }
  0xe4   :  { %v1439_v33 = vadd.f32 %v1438_v20, %v1437_v26  ;;  %v1430_v36 = vadd.f32 %v1429_v14, %v1428_v27  ;;  %v2972_v37 = vunpack.c.l.bf16 %v4541_v25  ;;  %v1442_v38 = vsel %vm890_vm0, %v2580_v18, 0.0  ;;  %v4622_v26 = vld [vmem:[%s5187_s0 + $0x6a8] sm:$0xff]  }
  0xe5   :  { %v2385_v39 = vunpack.c.h.bf16 %v3066_v58  ;;  %v2103_v40 = vpack.c.bf16 %v1754_v32, %v1754_v32  ;;  %v1433_v41 = vsel %vm890_vm0, %v2969_v9, 0.0  ;;  %v2484_v43 = vunpack.c.l.bf16 %v4549_v31  ;;  %v4630_v32 = vld [vmem:[%s5187_s0 + $0x2d8] sm:$0xff]  }
  0xe6   :  { %v1441_v42 = vadd.f32 %v1440_v30, %v1439_v33  ;;  %v1432_v44 = vadd.f32 %v1431_v23, %v1430_v36  ;;  %v1444_v45 = vsel %vm890_vm0, %v2677_v24, 0.0  ;;  %v1446_v46 = vsel %vm890_vm0, %v2776_v28, 0.0 }
  0xe7   :  { %v1452_v48 = vsel %vm890_vm0, %v2189_v34, 0.0  ;;  %2001 = vst.msk [vmem:[%s5188_s1 + $0x78] sm:$0xf] %vm1970_vm1, %v2103_v40  ;;  %v2581_v50 = vunpack.c.h.bf16 %v4512_v7  ;;  %v1453_v51 = vsel %vm890_vm0, %v2288_v35, 0.0  ;;  %v1455_v52 = vsel %vm890_vm0, %v2385_v39, 0.0 }
  0xe8   :  { %v1443_v49 = vadd.f32 %v1442_v38, %v1441_v42  ;;  %v1434_v54 = vadd.f32 %v1433_v41, %v1432_v44  ;;  %v1448_v55 = vsel %vm890_vm0, %v2873_v29, 0.0  ;;  %v1450_v56 = vsel %vm890_vm0, %v2972_v37, 0.0 }
  0xe9   :  { %v1454_v58 = vadd.f32 %v1453_v51, %v1452_v48  ;;  %v2680_v61 = vunpack.c.l.bf16 %v4561_v47  ;;  %v2777_v62 = vunpack.c.h.bf16 %v4521_v15  ;;  %v1457_v63 = vsel %vm890_vm0, %v2484_v43, 0.0  ;;  %v4642_v48 = vld [vmem:[%s5187_s0 + $0x460] sm:$0xff]  }
  0xea   :  { %v1445_v60 = vadd.f32 %v1444_v45, %v1443_v49  ;;  %v1755_v1 = vmul.f32 0.11111111, %v1434_v54  ;;  %v2192_v0 = vunpack.c.l.bf16 %v3018_v53  ;;  %v2289_v3 = vunpack.c.h.bf16 %v4534_v21  ;;  %v3019_v54 = vld [vmem:[%s5187_s0 + $0x90] sm:$0xff]  }
  0xeb   :  { %v1456_v2 = vadd.f32 %v1455_v52, %v1454_v58  ;;  %v2876_v5 = vunpack.c.l.bf16 %v4579_v57  ;;  %v1459_v6 = vsel %vm890_vm0, %v2581_v50, 0.0  ;;  %v2388_v7 = vunpack.c.l.bf16 %v3067_v59  ;;  %v4660_v58 = vld [vmem:[%s5187_s0 + $0x5e8] sm:$0xff]  }
  0xec   :  { %v1447_v4 = vadd.f32 %v1446_v46, %v1445_v60  ;;  %v2104_v9 = vpack.c.bf16 %v1755_v1, %v1755_v1  ;;  %v2973_v10 = vunpack.c.h.bf16 %v4541_v25  ;;  %v2485_v12 = vunpack.c.h.bf16 %v4549_v31  ;;  %v3068_v60 = vld [vmem:[%s5187_s0 + $0x218] sm:$0xff]  }
  0xed   :  { %v1458_v11 = vadd.f32 %v1457_v63, %v1456_v2  ;;  %v1461_v14 = vsel %vm890_vm0, %v2680_v61, 0.0  ;;  %v1463_v15 = vsel %vm890_vm0, %v2777_v62, 0.0  ;;  %v1469_v17 = vsel %vm890_vm0, %v2192_v0, 0.0 }
  0xee   :  { %v1449_v13 = vadd.f32 %v1448_v55, %v1447_v4  ;;  %2002 = vst.msk [vmem:[%s5188_s1 + $0x7c] sm:$0xf] %vm1970_vm1, %v2104_v9  ;;  %v2584_v19 = vunpack.c.l.bf16 %v4593_v8  ;;  %v1470_v20 = vsel %vm890_vm0, %v2289_v3, 0.0  ;;  %v1472_v21 = vsel %vm890_vm0, %v2388_v7, 0.0  ;;  %v4674_v9 = vld [vmem:[%s5187_s0 + $0x3a0] sm:$0xff]  }
  0xef   :  { %v1460_v18 = vadd.f32 %v1459_v6, %v1458_v11  ;;  %v1465_v24 = vsel %vm890_vm0, %v2876_v5, 0.0  ;;  %v2681_v25 = vunpack.c.h.bf16 %v4561_v47  ;;  %v1471_v27 = vadd.f32 %v1470_v20, %v1469_v17  ;;  %v4683_v17 = vld [vmem:[%s5187_s0 + $0x528] sm:$0xff]  }
  0xf0   :  { %v1451_v23 = vadd.f32 %v1450_v56, %v1449_v13  ;;  %v2780_v29 = vunpack.c.l.bf16 %v4602_v16  ;;  %v2877_v30 = vunpack.c.h.bf16 %v4579_v57  ;;  %v1474_v31 = vsel %vm890_vm0, %v2485_v12, 0.0 }
  0xf1   :  { %v1462_v28 = vadd.f32 %v1461_v14, %v1460_v18  ;;  %v1473_v34 = vadd.f32 %v1472_v21, %v1471_v27  ;;  %v2193_v35 = vunpack.c.h.bf16 %v3018_v53  ;;  %v2292_v36 = vunpack.c.l.bf16 %v4615_v22  ;;  %v4703_v27 = vld [vmem:[%s5187_s0 + $0x6b0] sm:$0xff]  }
  0xf2   :  { %v1756_v33 = vmul.f32 0.11111111, %v1451_v23  ;;  %v2976_v38 = vunpack.c.l.bf16 %v4622_v26  ;;  %v1476_v39 = vsel %vm890_vm0, %v2584_v19, 0.0  ;;  %v2389_v40 = vunpack.c.h.bf16 %v3067_v59  ;;  %v4696_v23 = vld [vmem:[%s5187_s0 + $0x158] sm:$0xff]  }
  0xf3   :  { %v1464_v37 = vadd.f32 %v1463_v15, %v1462_v28  ;;  %v1467_v42 = vsel %vm890_vm0, %v2973_v10, 0.0  ;;  %v1475_v43 = vadd.f32 %v1474_v31, %v1473_v34  ;;  %v2488_v44 = vunpack.c.l.bf16 %v4630_v32 }
  0xf4   :  { %v2105_v41 = vpack.c.bf16 %v1756_v33, %v1756_v33  ;;  %v1478_v46 = vsel %vm890_vm0, %v2681_v25, 0.0  ;;  %v1480_v47 = vsel %vm890_vm0, %v2780_v29, 0.0  ;;  %v1486_v49 = vsel %vm890_vm0, %v2193_v35, 0.0  ;;  %v4711_v33 = vld [vmem:[%s5187_s0 + $0x2e0] sm:$0xff]  }
  0xf5   :  { %v1466_v45 = vadd.f32 %v1465_v24, %v1464_v37  ;;  %v1477_v50 = vadd.f32 %v1476_v39, %v1475_v43  ;;  %v2585_v51 = vunpack.c.h.bf16 %v4593_v8  ;;  %v1487_v52 = vsel %vm890_vm0, %v2292_v36, 0.0 }
  0xf6   :  { %2003 = vst.msk [vmem:[%s5188_s1 + $0x80] sm:$0xf] %vm1970_vm1, %v2105_v41  ;;  %v1489_v53 = vsel %vm890_vm0, %v2389_v40, 0.0  ;;  %v1482_v56 = vsel %vm890_vm0, %v2877_v30, 0.0  ;;  %v1484_v57 = vsel %vm890_vm0, %v2976_v38, 0.0  ;;  %v1488_v59 = vadd.f32 %v1487_v52, %v1486_v49  ;;  %v4723_v49 = vld [vmem:[%s5187_s0 + $0x468] sm:$0xff]  }
  0xf7   :  { %v1468_v55 = vadd.f32 %v1467_v42, %v1466_v45  ;;  %v1479_v61 = vadd.f32 %v1478_v46, %v1477_v50  ;;  %v2684_v62 = vunpack.c.l.bf16 %v4642_v48  ;;  %v2781_v63 = vunpack.c.h.bf16 %v4602_v16 }
  0xf8   :  { %v1491_v1 = vsel %vm890_vm0, %v2488_v44, 0.0  ;;  %v1490_v0 = vadd.f32 %v1489_v53, %v1488_v59  ;;  %v2196_v3 = vunpack.c.l.bf16 %v3019_v54  ;;  %v2293_v4 = vunpack.c.h.bf16 %v4615_v22  ;;  %v4741_v59 = vld [vmem:[%s5187_s0 + $0x5f0] sm:$0xff]  }
  0xf9   :  { %v1757_v2 = vmul.f32 0.11111111, %v1468_v55  ;;  %v1481_v5 = vadd.f32 %v1480_v47, %v1479_v61  ;;  %v2880_v6 = vunpack.c.l.bf16 %v4660_v58  ;;  %v1493_v7 = vsel %vm890_vm0, %v2585_v51, 0.0  ;;  %v3020_v55 = vld [vmem:[%s5187_s0 + $0x98] sm:$0xff]   ;;  %v3069_v61 = vld [vmem:[%s5187_s0 + $0x220] sm:$0xff]  }
  0xfa   :  { %v2392_v8 = vunpack.c.l.bf16 %v3068_v60  ;;  %v2977_v11 = vunpack.c.h.bf16 %v4622_v26  ;;  %v1492_v12 = vadd.f32 %v1491_v1, %v1490_v0  ;;  %v2489_v13 = vunpack.c.h.bf16 %v4630_v32 }
  0xfb   :  { %v2106_v10 = vpack.c.bf16 %v1757_v2, %v1757_v2  ;;  %v1483_v14 = vadd.f32 %v1482_v56, %v1481_v5  ;;  %v1495_v15 = vsel %vm890_vm0, %v2684_v62, 0.0  ;;  %v1497_v16 = vsel %vm890_vm0, %v2781_v63, 0.0 }
  0xfc   :  { %v1503_v18 = vsel %vm890_vm0, %v2196_v3, 0.0  ;;  %v1494_v19 = vadd.f32 %v1493_v7, %v1492_v12  ;;  %v2588_v20 = vunpack.c.l.bf16 %v4674_v9  ;;  %v1504_v21 = vsel %vm890_vm0, %v2293_v4, 0.0 }
  0xfd   :  { %2004 = vst.msk [vmem:[%s5188_s1 + $0x84] sm:$0xf] %vm1970_vm1, %v2106_v10  ;;  %v1506_v22 = vsel %vm890_vm0, %v2392_v8, 0.0  ;;  %v1485_v24 = vadd.f32 %v1484_v57, %v1483_v14  ;;  %v1499_v25 = vsel %vm890_vm0, %v2880_v6, 0.0  ;;  %v2685_v26 = vunpack.c.h.bf16 %v4642_v48  ;;  %v4755_v10 = vld [vmem:[%s5187_s0 + $0x3a8] sm:$0xff]  }
  0xfe   :  { %v1505_v28 = vadd.f32 %v1504_v21, %v1503_v18  ;;  %v1496_v29 = vadd.f32 %v1495_v15, %v1494_v19  ;;  %v2784_v30 = vunpack.c.l.bf16 %v4683_v17  ;;  %v2881_v31 = vunpack.c.h.bf16 %v4660_v58  ;;  %v4764_v18 = vld [vmem:[%s5187_s0 + $0x530] sm:$0xff]  }
  0xff   :  { %v1508_v32 = vsel %vm890_vm0, %v2489_v13, 0.0  ;;  %v1758_v34 = vmul.f32 0.11111111, %v1485_v24  ;;  %v2197_v36 = vunpack.c.h.bf16 %v3019_v54  ;;  %v2296_v37 = vunpack.c.l.bf16 %v4696_v23  ;;  %v4777_v24 = vld [vmem:[%s5187_s0 + $0x160] sm:$0xff]  }
 0x100   :  { %v1507_v35 = vadd.f32 %v1506_v22, %v1505_v28  ;;  %v1498_v38 = vadd.f32 %v1497_v16, %v1496_v29  ;;  %v2980_v39 = vunpack.c.l.bf16 %v4703_v27  ;;  %v1510_v40 = vsel %vm890_vm0, %v2588_v20, 0.0  ;;  %v4784_v28 = vld [vmem:[%s5187_s0 + $0x6b8] sm:$0xff]  }
 0x101   :  { %v2393_v41 = vunpack.c.h.bf16 %v3068_v60  ;;  %v2107_v42 = vpack.c.bf16 %v1758_v34, %v1758_v34  ;;  %v1501_v43 = vsel %vm890_vm0, %v2977_v11, 0.0  ;;  %v2492_v45 = vunpack.c.l.bf16 %v4711_v33  ;;  %v4792_v34 = vld [vmem:[%s5187_s0 + $0x2e8] sm:$0xff]  }
 0x102   :  { %v1509_v44 = vadd.f32 %v1508_v32, %v1507_v35  ;;  %v1500_v46 = vadd.f32 %v1499_v25, %v1498_v38  ;;  %v1512_v47 = vsel %vm890_vm0, %v2685_v26, 0.0  ;;  %v1514_v48 = vsel %vm890_vm0, %v2784_v30, 0.0 }
 0x103   :  { %v1520_v50 = vsel %vm890_vm0, %v2197_v36, 0.0  ;;  %2005 = vst.msk [vmem:[%s5188_s1 + $0x88] sm:$0xf] %vm1970_vm1, %v2107_v42  ;;  %v2589_v52 = vunpack.c.h.bf16 %v4674_v9  ;;  %v1521_v53 = vsel %vm890_vm0, %v2296_v37, 0.0  ;;  %v1523_v54 = vsel %vm890_vm0, %v2393_v41, 0.0 }
 0x104   :  { %v1511_v51 = vadd.f32 %v1510_v40, %v1509_v44  ;;  %v1502_v56 = vadd.f32 %v1501_v43, %v1500_v46  ;;  %v1516_v57 = vsel %vm890_vm0, %v2881_v31, 0.0  ;;  %v1518_v58 = vsel %vm890_vm0, %v2980_v39, 0.0 }
 0x105   :  { %v1522_v60 = vadd.f32 %v1521_v53, %v1520_v50  ;;  %v2688_v63 = vunpack.c.l.bf16 %v4723_v49  ;;  %v2785_v1 = vunpack.c.h.bf16 %v4683_v17  ;;  %v1525_v2 = vsel %vm890_vm0, %v2492_v45, 0.0  ;;  %v4804_v50 = vld [vmem:[%s5187_s0 + $0x470] sm:$0xff]  }
 0x106   :  { %v1513_v62 = vadd.f32 %v1512_v47, %v1511_v51  ;;  %v1759_v0 = vmul.f32 0.11111111, %v1502_v56  ;;  %v2200_v4 = vunpack.c.l.bf16 %v3020_v55  ;;  %v2297_v5 = vunpack.c.h.bf16 %v4696_v23  ;;  %v3021_v56 = vld [vmem:[%s5187_s0 + $0xa0] sm:$0xff]  }
 0x107   :  { %v1524_v3 = vadd.f32 %v1523_v54, %v1522_v60  ;;  %v2884_v7 = vunpack.c.l.bf16 %v4741_v59  ;;  %v1527_v8 = vsel %vm890_vm0, %v2589_v52, 0.0  ;;  %v2396_v9 = vunpack.c.l.bf16 %v3069_v61  ;;  %v4822_v60 = vld [vmem:[%s5187_s0 + $0x5f8] sm:$0xff]  }
 0x108   :  { %v1515_v6 = vadd.f32 %v1514_v48, %v1513_v62  ;;  %v2108_v11 = vpack.c.bf16 %v1759_v0, %v1759_v0  ;;  %v2981_v12 = vunpack.c.h.bf16 %v4703_v27  ;;  %v2493_v14 = vunpack.c.h.bf16 %v4711_v33  ;;  %v3070_v62 = vld [vmem:[%s5187_s0 + $0x228] sm:$0xff]  }
 0x109   :  { %v1526_v13 = vadd.f32 %v1525_v2, %v1524_v3  ;;  %v1529_v16 = vsel %vm890_vm0, %v2688_v63, 0.0  ;;  %v1531_v17 = vsel %vm890_vm0, %v2785_v1, 0.0  ;;  %v1537_v19 = vsel %vm890_vm0, %v2200_v4, 0.0 }
 0x10a   :  { %v1517_v15 = vadd.f32 %v1516_v57, %v1515_v6  ;;  %2006 = vst.msk [vmem:[%s5188_s1 + $0x8c] sm:$0xf] %vm1970_vm1, %v2108_v11  ;;  %v2592_v21 = vunpack.c.l.bf16 %v4755_v10  ;;  %v1538_v22 = vsel %vm890_vm0, %v2297_v5, 0.0  ;;  %v1540_v23 = vsel %vm890_vm0, %v2396_v9, 0.0  ;;  %v4836_v11 = vld [vmem:[%s5187_s0 + $0x3b0] sm:$0xff]  }
 0x10b   :  { %v1528_v20 = vadd.f32 %v1527_v8, %v1526_v13  ;;  %v1533_v26 = vsel %vm890_vm0, %v2884_v7, 0.0  ;;  %v2689_v27 = vunpack.c.h.bf16 %v4723_v49  ;;  %v1539_v29 = vadd.f32 %v1538_v22, %v1537_v19  ;;  %v4845_v19 = vld [vmem:[%s5187_s0 + $0x538] sm:$0xff]  }
 0x10c   :  { %v1519_v25 = vadd.f32 %v1518_v58, %v1517_v15  ;;  %v2788_v31 = vunpack.c.l.bf16 %v4764_v18  ;;  %v2885_v32 = vunpack.c.h.bf16 %v4741_v59  ;;  %v1542_v33 = vsel %vm890_vm0, %v2493_v14, 0.0 }
 0x10d   :  { %v1530_v30 = vadd.f32 %v1529_v16, %v1528_v20  ;;  %v1541_v36 = vadd.f32 %v1540_v23, %v1539_v29  ;;  %v2201_v37 = vunpack.c.h.bf16 %v3020_v55  ;;  %v2300_v38 = vunpack.c.l.bf16 %v4777_v24  ;;  %v4865_v29 = vld [vmem:[%s5187_s0 + $0x6c0] sm:$0xff]  }
 0x10e   :  { %v1760_v35 = vmul.f32 0.11111111, %v1519_v25  ;;  %v2984_v40 = vunpack.c.l.bf16 %v4784_v28  ;;  %v1544_v41 = vsel %vm890_vm0, %v2592_v21, 0.0  ;;  %v2397_v42 = vunpack.c.h.bf16 %v3069_v61  ;;  %v4858_v25 = vld [vmem:[%s5187_s0 + $0x168] sm:$0xff]  }
 0x10f   :  { %v1532_v39 = vadd.f32 %v1531_v17, %v1530_v30  ;;  %v1535_v44 = vsel %vm890_vm0, %v2981_v12, 0.0  ;;  %v1543_v45 = vadd.f32 %v1542_v33, %v1541_v36  ;;  %v2496_v46 = vunpack.c.l.bf16 %v4792_v34 }
 0x110   :  { %v2109_v43 = vpack.c.bf16 %v1760_v35, %v1760_v35  ;;  %v1546_v48 = vsel %vm890_vm0, %v2689_v27, 0.0  ;;  %v1548_v49 = vsel %vm890_vm0, %v2788_v31, 0.0  ;;  %v1554_v51 = vsel %vm890_vm0, %v2201_v37, 0.0  ;;  %v4873_v35 = vld [vmem:[%s5187_s0 + $0x2f0] sm:$0xff]  }
 0x111   :  { %v1534_v47 = vadd.f32 %v1533_v26, %v1532_v39  ;;  %v1545_v52 = vadd.f32 %v1544_v41, %v1543_v45  ;;  %v2593_v53 = vunpack.c.h.bf16 %v4755_v10  ;;  %v1555_v54 = vsel %vm890_vm0, %v2300_v38, 0.0 }
 0x112   :  { %2007 = vst.msk [vmem:[%s5188_s1 + $0x90] sm:$0xf] %vm1970_vm1, %v2109_v43  ;;  %v1557_v55 = vsel %vm890_vm0, %v2397_v42, 0.0  ;;  %v1550_v58 = vsel %vm890_vm0, %v2885_v32, 0.0  ;;  %v1552_v59 = vsel %vm890_vm0, %v2984_v40, 0.0  ;;  %v1556_v61 = vadd.f32 %v1555_v54, %v1554_v51  ;;  %v4885_v51 = vld [vmem:[%s5187_s0 + $0x478] sm:$0xff]  }
 0x113   :  { %v1536_v57 = vadd.f32 %v1535_v44, %v1534_v47  ;;  %v1547_v63 = vadd.f32 %v1546_v48, %v1545_v52  ;;  %v2692_v1 = vunpack.c.l.bf16 %v4804_v50  ;;  %v2789_v2 = vunpack.c.h.bf16 %v4764_v18 }
 0x114   :  { %v1559_v0 = vsel %vm890_vm0, %v2496_v46, 0.0  ;;  %v1558_v4 = vadd.f32 %v1557_v55, %v1556_v61  ;;  %v2204_v5 = vunpack.c.l.bf16 %v3021_v56  ;;  %v2301_v6 = vunpack.c.h.bf16 %v4777_v24  ;;  %v4903_v61 = vld [vmem:[%s5187_s0 + $0x600] sm:$0xff]  }
 0x115   :  { %v1761_v3 = vmul.f32 0.11111111, %v1536_v57  ;;  %v1549_v7 = vadd.f32 %v1548_v49, %v1547_v63  ;;  %v2888_v8 = vunpack.c.l.bf16 %v4822_v60  ;;  %v1561_v9 = vsel %vm890_vm0, %v2593_v53, 0.0  ;;  %v3022_v57 = vld [vmem:[%s5187_s0 + $0xa8] sm:$0xff]   ;;  %v3071_v63 = vld [vmem:[%s5187_s0 + $0x230] sm:$0xff]  }
 0x116   :  { %v2400_v10 = vunpack.c.l.bf16 %v3070_v62  ;;  %v2985_v13 = vunpack.c.h.bf16 %v4784_v28  ;;  %v1560_v14 = vadd.f32 %v1559_v0, %v1558_v4  ;;  %v2497_v15 = vunpack.c.h.bf16 %v4792_v34 }
 0x117   :  { %v2110_v12 = vpack.c.bf16 %v1761_v3, %v1761_v3  ;;  %v1551_v16 = vadd.f32 %v1550_v58, %v1549_v7  ;;  %v1563_v17 = vsel %vm890_vm0, %v2692_v1, 0.0  ;;  %v1565_v18 = vsel %vm890_vm0, %v2789_v2, 0.0 }
 0x118   :  { %v1571_v20 = vsel %vm890_vm0, %v2204_v5, 0.0  ;;  %v1562_v21 = vadd.f32 %v1561_v9, %v1560_v14  ;;  %v2596_v22 = vunpack.c.l.bf16 %v4836_v11  ;;  %v1572_v23 = vsel %vm890_vm0, %v2301_v6, 0.0 }
 0x119   :  { %2008 = vst.msk [vmem:[%s5188_s1 + $0x94] sm:$0xf] %vm1970_vm1, %v2110_v12  ;;  %v1574_v24 = vsel %vm890_vm0, %v2400_v10, 0.0  ;;  %v1553_v26 = vadd.f32 %v1552_v59, %v1551_v16  ;;  %v1567_v27 = vsel %vm890_vm0, %v2888_v8, 0.0  ;;  %v2693_v28 = vunpack.c.h.bf16 %v4804_v50  ;;  %v4917_v12 = vld [vmem:[%s5187_s0 + $0x3b8] sm:$0xff]  }
 0x11a   :  { %v1573_v30 = vadd.f32 %v1572_v23, %v1571_v20  ;;  %v1564_v31 = vadd.f32 %v1563_v17, %v1562_v21  ;;  %v2792_v32 = vunpack.c.l.bf16 %v4845_v19  ;;  %v2889_v33 = vunpack.c.h.bf16 %v4822_v60  ;;  %v4926_v20 = vld [vmem:[%s5187_s0 + $0x540] sm:$0xff]  }
 0x11b   :  { %v1576_v34 = vsel %vm890_vm0, %v2497_v15, 0.0  ;;  %v1762_v36 = vmul.f32 0.11111111, %v1553_v26  ;;  %v2205_v38 = vunpack.c.h.bf16 %v3021_v56  ;;  %v2304_v39 = vunpack.c.l.bf16 %v4858_v25  ;;  %v4939_v26 = vld [vmem:[%s5187_s0 + $0x170] sm:$0xff]  }
 0x11c   :  { %v1575_v37 = vadd.f32 %v1574_v24, %v1573_v30  ;;  %v1566_v40 = vadd.f32 %v1565_v18, %v1564_v31  ;;  %v2988_v41 = vunpack.c.l.bf16 %v4865_v29  ;;  %v1578_v42 = vsel %vm890_vm0, %v2596_v22, 0.0  ;;  %v4946_v30 = vld [vmem:[%s5187_s0 + $0x6c8] sm:$0xff]  }
 0x11d   :  { %v2401_v43 = vunpack.c.h.bf16 %v3070_v62  ;;  %v2111_v44 = vpack.c.bf16 %v1762_v36, %v1762_v36  ;;  %v1569_v45 = vsel %vm890_vm0, %v2985_v13, 0.0  ;;  %v2500_v47 = vunpack.c.l.bf16 %v4873_v35  ;;  %v4954_v36 = vld [vmem:[%s5187_s0 + $0x2f8] sm:$0xff]  }
 0x11e   :  { %v1577_v46 = vadd.f32 %v1576_v34, %v1575_v37  ;;  %v1568_v48 = vadd.f32 %v1567_v27, %v1566_v40  ;;  %v1580_v49 = vsel %vm890_vm0, %v2693_v28, 0.0  ;;  %v1582_v50 = vsel %vm890_vm0, %v2792_v32, 0.0 }
 0x11f   :  { %v1588_v52 = vsel %vm890_vm0, %v2205_v38, 0.0  ;;  %2009 = vst.msk [vmem:[%s5188_s1 + $0x98] sm:$0xf] %vm1970_vm1, %v2111_v44  ;;  %v2597_v54 = vunpack.c.h.bf16 %v4836_v11  ;;  %v1589_v55 = vsel %vm890_vm0, %v2304_v39, 0.0  ;;  %v1591_v56 = vsel %vm890_vm0, %v2401_v43, 0.0 }
 0x120   :  { %v1579_v53 = vadd.f32 %v1578_v42, %v1577_v46  ;;  %v1570_v58 = vadd.f32 %v1569_v45, %v1568_v48  ;;  %v1584_v59 = vsel %vm890_vm0, %v2889_v33, 0.0  ;;  %v1586_v60 = vsel %vm890_vm0, %v2988_v41, 0.0 }
 0x121   :  { %v1590_v62 = vadd.f32 %v1589_v55, %v1588_v52  ;;  %v2696_v2 = vunpack.c.l.bf16 %v4885_v51  ;;  %v2793_v0 = vunpack.c.h.bf16 %v4845_v19  ;;  %v1593_v3 = vsel %vm890_vm0, %v2500_v47, 0.0  ;;  %v4966_v52 = vld [vmem:[%s5187_s0 + $0x480] sm:$0xff]  }
 0x122   :  { %v1581_v1 = vadd.f32 %v1580_v49, %v1579_v53  ;;  %v1763_v4 = vmul.f32 0.11111111, %v1570_v58  ;;  %v2208_v6 = vunpack.c.l.bf16 %v3022_v57  ;;  %v2305_v7 = vunpack.c.h.bf16 %v4858_v25  ;;  %v3023_v58 = vld [vmem:[%s5187_s0 + $0xb0] sm:$0xff]  }
 0x123   :  { %v1592_v5 = vadd.f32 %v1591_v56, %v1590_v62  ;;  %v2892_v9 = vunpack.c.l.bf16 %v4903_v61  ;;  %v1595_v10 = vsel %vm890_vm0, %v2597_v54, 0.0  ;;  %v2404_v11 = vunpack.c.l.bf16 %v3071_v63  ;;  %v4984_v62 = vld [vmem:[%s5187_s0 + $0x608] sm:$0xff]  }
 0x124   :  { %v1583_v8 = vadd.f32 %v1582_v50, %v1581_v1  ;;  %v2112_v13 = vpack.c.bf16 %v1763_v4, %v1763_v4  ;;  %v2989_v14 = vunpack.c.h.bf16 %v4865_v29  ;;  %v2501_v16 = vunpack.c.h.bf16 %v4873_v35  ;;  %v3072_v1 = vld [vmem:[%s5187_s0 + $0x238] sm:$0xff]  }
 0x125   :  { %v1594_v15 = vadd.f32 %v1593_v3, %v1592_v5  ;;  %v1597_v18 = vsel %vm890_vm0, %v2696_v2, 0.0  ;;  %v1599_v19 = vsel %vm890_vm0, %v2793_v0, 0.0  ;;  %v1605_v21 = vsel %vm890_vm0, %v2208_v6, 0.0 }
 0x126   :  { %v1585_v17 = vadd.f32 %v1584_v59, %v1583_v8  ;;  %2010 = vst.msk [vmem:[%s5188_s1 + $0x9c] sm:$0xf] %vm1970_vm1, %v2112_v13  ;;  %v2600_v23 = vunpack.c.l.bf16 %v4917_v12  ;;  %v1606_v24 = vsel %vm890_vm0, %v2305_v7, 0.0  ;;  %v1608_v25 = vsel %vm890_vm0, %v2404_v11, 0.0  ;;  %v4998_v13 = vld [vmem:[%s5187_s0 + $0x3c0] sm:$0xff]  }
 0x127   :  { %v1596_v22 = vadd.f32 %v1595_v10, %v1594_v15  ;;  %v1601_v28 = vsel %vm890_vm0, %v2892_v9, 0.0  ;;  %v2697_v29 = vunpack.c.h.bf16 %v4885_v51  ;;  %v1607_v31 = vadd.f32 %v1606_v24, %v1605_v21  ;;  %v5007_v21 = vld [vmem:[%s5187_s0 + $0x548] sm:$0xff]  }
 0x128   :  { %v1587_v27 = vadd.f32 %v1586_v60, %v1585_v17  ;;  %v2796_v33 = vunpack.c.l.bf16 %v4926_v20  ;;  %v2893_v34 = vunpack.c.h.bf16 %v4903_v61  ;;  %v1610_v35 = vsel %vm890_vm0, %v2501_v16, 0.0 }
 0x129   :  { %v1598_v32 = vadd.f32 %v1597_v18, %v1596_v22  ;;  %v1609_v38 = vadd.f32 %v1608_v25, %v1607_v31  ;;  %v2209_v39 = vunpack.c.h.bf16 %v3022_v57  ;;  %v2308_v40 = vunpack.c.l.bf16 %v4939_v26  ;;  %v5027_v31 = vld [vmem:[%s5187_s0 + $0x6d0] sm:$0xff]  }
 0x12a   :  { %v1764_v37 = vmul.f32 0.11111111, %v1587_v27  ;;  %v2992_v42 = vunpack.c.l.bf16 %v4946_v30  ;;  %v1612_v43 = vsel %vm890_vm0, %v2600_v23, 0.0  ;;  %v2405_v44 = vunpack.c.h.bf16 %v3071_v63  ;;  %v5020_v27 = vld [vmem:[%s5187_s0 + $0x178] sm:$0xff]  }
 0x12b   :  { %v1600_v41 = vadd.f32 %v1599_v19, %v1598_v32  ;;  %v1603_v46 = vsel %vm890_vm0, %v2989_v14, 0.0  ;;  %v1611_v47 = vadd.f32 %v1610_v35, %v1609_v38  ;;  %v2504_v48 = vunpack.c.l.bf16 %v4954_v36 }
 0x12c   :  { %v2113_v45 = vpack.c.bf16 %v1764_v37, %v1764_v37  ;;  %v1614_v50 = vsel %vm890_vm0, %v2697_v29, 0.0  ;;  %v1616_v51 = vsel %vm890_vm0, %v2796_v33, 0.0  ;;  %v1622_v53 = vsel %vm890_vm0, %v2209_v39, 0.0  ;;  %v5035_v37 = vld [vmem:[%s5187_s0 + $0x300] sm:$0xff]  }
 0x12d   :  { %v1602_v49 = vadd.f32 %v1601_v28, %v1600_v41  ;;  %v1613_v54 = vadd.f32 %v1612_v43, %v1611_v47  ;;  %v2601_v55 = vunpack.c.h.bf16 %v4917_v12  ;;  %v1623_v56 = vsel %vm890_vm0, %v2308_v40, 0.0 }
 0x12e   :  { %2011 = vst.msk [vmem:[%s5188_s1 + $0xa0] sm:$0xf] %vm1970_vm1, %v2113_v45  ;;  %v1625_v57 = vsel %vm890_vm0, %v2405_v44, 0.0  ;;  %v1618_v60 = vsel %vm890_vm0, %v2893_v34, 0.0  ;;  %v1620_v61 = vsel %vm890_vm0, %v2992_v42, 0.0  ;;  %v1624_v63 = vadd.f32 %v1623_v56, %v1622_v53  ;;  %v5047_v53 = vld [vmem:[%s5187_s0 + $0x488] sm:$0xff]  }
 0x12f   :  { %v1604_v59 = vadd.f32 %v1603_v46, %v1602_v49  ;;  %v1615_v2 = vadd.f32 %v1614_v50, %v1613_v54  ;;  %v2700_v0 = vunpack.c.l.bf16 %v4966_v52  ;;  %v2797_v3 = vunpack.c.h.bf16 %v4926_v20 }
 0x130   :  { %v1627_v4 = vsel %vm890_vm0, %v2504_v48, 0.0  ;;  %v1626_v6 = vadd.f32 %v1625_v57, %v1624_v63  ;;  %v2212_v7 = vunpack.c.l.bf16 %v3023_v58  ;;  %v2309_v8 = vunpack.c.h.bf16 %v4939_v26  ;;  %v5065_v63 = vld [vmem:[%s5187_s0 + $0x610] sm:$0xff]  }
 0x131   :  { %v1765_v5 = vmul.f32 0.11111111, %v1604_v59  ;;  %v1617_v9 = vadd.f32 %v1616_v51, %v1615_v2  ;;  %v2896_v10 = vunpack.c.l.bf16 %v4984_v62  ;;  %v1629_v11 = vsel %vm890_vm0, %v2601_v55, 0.0  ;;  %v3024_v59 = vld [vmem:[%s5187_s0 + $0xb8] sm:$0xff]   ;;  %v3073_v2 = vld [vmem:[%s5187_s0 + $0x240] sm:$0xff]  }
 0x132   :  { %v2408_v12 = vunpack.c.l.bf16 %v3072_v1  ;;  %v2993_v15 = vunpack.c.h.bf16 %v4946_v30  ;;  %v1628_v16 = vadd.f32 %v1627_v4, %v1626_v6  ;;  %v2505_v17 = vunpack.c.h.bf16 %v4954_v36 }
 0x133   :  { %v2114_v14 = vpack.c.bf16 %v1765_v5, %v1765_v5  ;;  %v1619_v18 = vadd.f32 %v1618_v60, %v1617_v9  ;;  %v1631_v19 = vsel %vm890_vm0, %v2700_v0, 0.0  ;;  %v1633_v20 = vsel %vm890_vm0, %v2797_v3, 0.0 }
 0x134   :  { %v1639_v22 = vsel %vm890_vm0, %v2212_v7, 0.0  ;;  %v1630_v23 = vadd.f32 %v1629_v11, %v1628_v16  ;;  %v2604_v24 = vunpack.c.l.bf16 %v4998_v13  ;;  %v1640_v25 = vsel %vm890_vm0, %v2309_v8, 0.0 }
 0x135   :  { %2012 = vst.msk [vmem:[%s5188_s1 + $0xa4] sm:$0xf] %vm1970_vm1, %v2114_v14  ;;  %v1642_v26 = vsel %vm890_vm0, %v2408_v12, 0.0  ;;  %v1621_v28 = vadd.f32 %v1620_v61, %v1619_v18  ;;  %v1635_v29 = vsel %vm890_vm0, %v2896_v10, 0.0  ;;  %v2701_v30 = vunpack.c.h.bf16 %v4966_v52  ;;  %v5079_v14 = vld [vmem:[%s5187_s0 + $0x3c8] sm:$0xff]  }
 0x136   :  { %v1641_v32 = vadd.f32 %v1640_v25, %v1639_v22  ;;  %v1632_v33 = vadd.f32 %v1631_v19, %v1630_v23  ;;  %v2800_v34 = vunpack.c.l.bf16 %v5007_v21  ;;  %v2897_v35 = vunpack.c.h.bf16 %v4984_v62 }
 0x137   :  { %v1644_v36 = vsel %vm890_vm0, %v2505_v17, 0.0  ;;  %v1766_v38 = vmul.f32 0.11111111, %v1621_v28  ;;  %v2213_v40 = vunpack.c.h.bf16 %v3023_v58  ;;  %v2312_v41 = vunpack.c.l.bf16 %v5020_v27 }
 0x138   :  { %v1643_v39 = vadd.f32 %v1642_v26, %v1641_v32  ;;  %v1634_v42 = vadd.f32 %v1633_v20, %v1632_v33  ;;  %v2996_v43 = vunpack.c.l.bf16 %v5027_v31  ;;  %v1646_v44 = vsel %vm890_vm0, %v2604_v24, 0.0  ;;  %v5095_v26 = vld [vmem:[%s5187_s0 + $0x180] sm:$0xff]  }
 0x139   :  { %v2409_v45 = vunpack.c.h.bf16 %v3072_v1  ;;  %v2115_v46 = vpack.c.bf16 %v1766_v38, %v1766_v38  ;;  %v1637_v47 = vsel %vm890_vm0, %v2993_v15, 0.0  ;;  %v2508_v49 = vunpack.c.l.bf16 %v5035_v37 }
 0x13a   :  { %v1645_v48 = vadd.f32 %v1644_v36, %v1643_v39  ;;  %v1636_v50 = vadd.f32 %v1635_v29, %v1634_v42  ;;  %v1648_v51 = vsel %vm890_vm0, %v2701_v30, 0.0  ;;  %v1650_v52 = vsel %vm890_vm0, %v2800_v34, 0.0  ;;  %v5102_v30 = vld [vmem:[%s5187_s0 + $0x550] sm:$0xff]   ;;  %v5110_v36 = vld [vmem:[%s5187_s0 + $0x308] sm:$0xff]  }
 0x13b   :  { %v1656_v54 = vsel %vm890_vm0, %v2213_v40, 0.0  ;;  %2013 = vst.msk [vmem:[%s5188_s1 + $0xa8] sm:$0xf] %vm1970_vm1, %v2115_v46  ;;  %v2605_v56 = vunpack.c.h.bf16 %v4998_v13  ;;  %v1657_v57 = vsel %vm890_vm0, %v2312_v41, 0.0  ;;  %v1659_v58 = vsel %vm890_vm0, %v2409_v45, 0.0 }
 0x13c   :  { %v1647_v55 = vadd.f32 %v1646_v44, %v1645_v48  ;;  %v1638_v60 = vadd.f32 %v1637_v47, %v1636_v50  ;;  %v1652_v61 = vsel %vm890_vm0, %v2897_v35, 0.0  ;;  %v1654_v62 = vsel %vm890_vm0, %v2996_v43, 0.0  ;;  %v3220_v47 = vld [vmem:[%s5187_s0 + $0x6d8] sm:$0xff]  }
 0x13d   :  { %v1658_v1 = vadd.f32 %v1657_v57, %v1656_v54  ;;  %v2704_v3 = vunpack.c.l.bf16 %v5047_v53  ;;  %v2801_v4 = vunpack.c.h.bf16 %v5007_v21  ;;  %v1661_v5 = vsel %vm890_vm0, %v2508_v49, 0.0 }
 0x13e   :  { %v1649_v0 = vadd.f32 %v1648_v51, %v1647_v55  ;;  %v1767_v6 = vmul.f32 0.11111111, %v1638_v60  ;;  %v2216_v8 = vunpack.c.l.bf16 %v3024_v59  ;;  %v2313_v9 = vunpack.c.h.bf16 %v5020_v27 }
 0x13f   :  { %v1660_v7 = vadd.f32 %v1659_v58, %v1658_v1  ;;  %v2900_v11 = vunpack.c.l.bf16 %v5065_v63  ;;  %v1663_v12 = vsel %vm890_vm0, %v2605_v56, 0.0  ;;  %v2412_v13 = vunpack.c.l.bf16 %v3073_v2 }
 0x140   :  { %v1651_v10 = vadd.f32 %v1650_v52, %v1649_v0  ;;  %v2116_v15 = vpack.c.bf16 %v1767_v6, %v1767_v6  ;;  %v2997_v16 = vunpack.c.h.bf16 %v5027_v31  ;;  %v2509_v18 = vunpack.c.h.bf16 %v5035_v37  ;;  %v3147_v52 = vld [vmem:[%s5187_s0 + $0x490] sm:$0xff]  }
 0x141   :  { %v1662_v17 = vadd.f32 %v1661_v5, %v1660_v7  ;;  %v1665_v20 = vsel %vm890_vm0, %v2704_v3, 0.0  ;;  %v1673_v21 = vsel %vm890_vm0, %v2216_v8, 0.0  ;;  %v2608_v23 = vunpack.c.l.bf16 %v5079_v14  ;;  %v3196_v3 = vld [vmem:[%s5187_s0 + $0x618] sm:$0xff]   ;;  %v3221_v5 = vld [vmem:[%s5187_s0 + $0xc0] sm:$0xff]  }
 0x142   :  { %v1653_v19 = vadd.f32 %v1652_v61, %v1651_v10  ;;  %2014 = vst.msk [vmem:[%s5188_s1 + $0xac] sm:$0xf] %vm1970_vm1, %v2116_v15  ;;  %v1674_v24 = vsel %vm890_vm0, %v2313_v9, 0.0  ;;  %v1676_v25 = vsel %vm890_vm0, %v2412_v13, 0.0  ;;  %v1667_v28 = vsel %vm890_vm0, %v2801_v4, 0.0 }
 0x143   :  { %v1664_v22 = vadd.f32 %v1663_v12, %v1662_v17  ;;  %v1669_v29 = vsel %vm890_vm0, %v2900_v11, 0.0  ;;  %v1675_v31 = vadd.f32 %v1674_v24, %v1673_v21  ;;  %v1671_v33 = vsel %vm890_vm0, %v2997_v16, 0.0  ;;  %v3222_v11 = vld [vmem:[%s5187_s0 + $0x248] sm:$0xff]  }
 0x144   :  { %v1655_v27 = vadd.f32 %v1654_v62, %v1653_v19  ;;  %v2705_v34 = vunpack.c.h.bf16 %v5047_v53  ;;  %v1678_v35 = vsel %vm890_vm0, %v2509_v18, 0.0  ;;  %v2217_v39 = vunpack.c.h.bf16 %v3024_v59 }
 0x145   :  { %v1666_v32 = vadd.f32 %v1665_v20, %v1664_v22  ;;  %v1677_v38 = vadd.f32 %v1676_v25, %v1675_v31  ;;  %v2316_v40 = vunpack.c.l.bf16 %v5095_v26  ;;  %v2804_v42 = vunpack.c.l.bf16 %v5102_v30  ;;  %v3223_v22 = vld [vmem:[%s5187_s0 + $0x3d0] sm:$0xff]  }
 0x146   :  { %v1768_v37 = vmul.f32 0.11111111, %v1655_v27  ;;  %v1680_v43 = vsel %vm890_vm0, %v2608_v23, 0.0  ;;  %v2413_v44 = vunpack.c.h.bf16 %v3073_v2  ;;  %v2901_v46 = vunpack.c.h.bf16 %v5065_v63 }
 0x147   :  { %v1668_v41 = vadd.f32 %v1667_v28, %v1666_v32  ;;  %v1679_v48 = vadd.f32 %v1678_v35, %v1677_v38  ;;  %v2512_v49 = vunpack.c.l.bf16 %v5110_v36  ;;  %v1682_v51 = vsel %vm890_vm0, %v2705_v34, 0.0 }
 0x148   :  { %v2117_v45 = vpack.c.bf16 %v1768_v37, %v1768_v37  ;;  %v1690_v53 = vsel %vm890_vm0, %v2217_v39, 0.0  ;;  %v2609_v55 = vunpack.c.h.bf16 %v5079_v14  ;;  %v1691_v56 = vsel %vm890_vm0, %v2316_v40, 0.0  ;;  %v3224_v37 = vld [vmem:[%s5187_s0 + $0x558] sm:$0xff]  }
 0x149   :  { %v1670_v50 = vadd.f32 %v1669_v29, %v1668_v41  ;;  %v1681_v54 = vadd.f32 %v1680_v43, %v1679_v48  ;;  %v1693_v57 = vsel %vm890_vm0, %v2413_v44, 0.0  ;;  %v3000_v59 = vunpack.c.l.bf16 %v3220_v47 }
 0x14a   :  { %2015 = vst.msk [vmem:[%s5188_s1 + $0xb0] sm:$0xf] %vm1970_vm1, %v2117_v45  ;;  %v1684_v60 = vsel %vm890_vm0, %v2804_v42, 0.0  ;;  %v1692_v61 = vadd.f32 %v1691_v56, %v1690_v53  ;;  %v1686_v63 = vsel %vm890_vm0, %v2901_v46, 0.0  ;;  %v2708_v1 = vunpack.c.l.bf16 %v3147_v52  ;;  %v448_v42 = vld [vmem:[%s5187_s0 + $0x6e0] sm:$0xf] }
 0x14b   :  { %v1672_v58 = vadd.f32 %v1671_v33, %v1670_v50  ;;  %v1683_v62 = vadd.f32 %v1682_v51, %v1681_v54  ;;  %v1695_v2 = vsel %vm890_vm0, %v2512_v49, 0.0  ;;  %v2220_v6 = vunpack.c.l.bf16 %v3221_v5 }
 0x14c   :  { %v1694_v4 = vadd.f32 %v1693_v57, %v1692_v61  ;;  %v2317_v7 = vunpack.c.h.bf16 %v5095_v26  ;;  %v2805_v9 = vunpack.c.h.bf16 %v5102_v30  ;;  %v1697_v10 = vsel %vm890_vm0, %v2609_v55, 0.0 }
 0x14d   :  { %v1769_v0 = vmul.f32 0.11111111, %v1672_v58  ;;  %v1685_v8 = vadd.f32 %v1684_v60, %v1683_v62  ;;  %v2416_v12 = vunpack.c.l.bf16 %v3222_v11  ;;  %v1688_v14 = vsel %vm890_vm0, %v3000_v59, 0.0 }
 0x14e   :  { %v1696_v15 = vadd.f32 %v1695_v2, %v1694_v4  ;;  %v2513_v16 = vunpack.c.h.bf16 %v5110_v36  ;;  %v2904_v18 = vunpack.c.l.bf16 %v3196_v3  ;;  %v1699_v19 = vsel %vm890_vm0, %v2708_v1, 0.0 }
 0x14f   :  { %v2118_v13 = vpack.c.bf16 %v1769_v0, %v1769_v0  ;;  %v1687_v17 = vadd.f32 %v1686_v63, %v1685_v8  ;;  %v1707_v20 = vsel %vm890_vm0, %v2220_v6, 0.0  ;;  %v2612_v23 = vunpack.c.l.bf16 %v3223_v22 }
 0x150   :  { %v1698_v21 = vadd.f32 %v1697_v10, %v1696_v15  ;;  %v1708_v24 = vsel %vm890_vm0, %v2317_v7, 0.0  ;;  %v1710_v25 = vsel %vm890_vm0, %v2416_v12, 0.0  ;;  %v3001_v27 = vunpack.c.h.bf16 %v3220_v47 }
 0x151   :  { %2016 = vst.msk [vmem:[%s5188_s1 + $0xb4] sm:$0xf] %vm1970_vm1, %v2118_v13  ;;  %v1689_v26 = vadd.f32 %v1688_v14, %v1687_v17  ;;  %v1701_v28 = vsel %vm890_vm0, %v2805_v9, 0.0  ;;  %v1709_v29 = vadd.f32 %v1708_v24, %v1707_v20  ;;  %v2709_v31 = vunpack.c.h.bf16 %v3147_v52 }
 0x152   :  { %v1700_v30 = vadd.f32 %v1699_v19, %v1698_v21  ;;  %v1712_v32 = vsel %vm890_vm0, %v2513_v16, 0.0  ;;  %v1703_v34 = vsel %vm890_vm0, %v2904_v18, 0.0  ;;  %v2808_v38 = vunpack.c.l.bf16 %v3224_v37 }
 0x153   :  { %v1770_v33 = vmul.f32 0.11111111, %v1689_v26  ;;  %v1711_v35 = vadd.f32 %v1710_v25, %v1709_v29  ;;  %v1714_v39 = vsel %vm890_vm0, %v2612_v23, 0.0  ;;  %v1705_v41 = vsel %vm890_vm0, %v3001_v27, 0.0 }
 0x154   :  { %v1702_v36 = vadd.f32 %v1701_v28, %v1700_v30  ;;  %v2905_v45 = vunpack.c.h.bf16 %v3196_v3  ;;  %v1716_v46 = vsel %vm890_vm0, %v2709_v31, 0.0  ;;  %v889_v49 = vunpack.c.l.bf16 %v448_v42 }
 0x155   :  { %v2119_v40 = vpack.c.bf16 %v1770_v33, %v1770_v33  ;;  %v1713_v43 = vadd.f32 %v1712_v32, %v1711_v35  ;;  %v1718_v50 = vsel %vm890_vm0, %v2808_v38, 0.0 }
 0x156   :  { %v1704_v44 = vadd.f32 %v1703_v34, %v1702_v36  ;;  %v1720_v53 = vsel %vm890_vm0, %v2905_v45, 0.0  ;;  %v1722_v56 = vsel %vm890_vm0, %v889_v49, 0.0 }
 0x157   :  { %2017 = vst.msk [vmem:[%s5188_s1 + $0xb8] sm:$0xf] %vm1970_vm1, %v2119_v40  ;;  %v1715_v47 = vadd.f32 %v1714_v39, %v1713_v43 }
 0x158   :  { %v1706_v48 = vadd.f32 %v1705_v41, %v1704_v44 }
 0x159   :  { %v1717_v51 = vadd.f32 %v1716_v46, %v1715_v47 }
 0x15a   :  { %v1771_v52 = vmul.f32 0.11111111, %v1706_v48 }
 0x15b   :  { %v1719_v54 = vadd.f32 %v1718_v50, %v1717_v51 }
 0x15c   :  { %v2120_v55 = vpack.c.bf16 %v1771_v52, %v1771_v52 }
 0x15d   :  { %v1721_v57 = vadd.f32 %v1720_v53, %v1719_v54 }
 0x15e   :  { %2018 = vst.msk [vmem:[%s5188_s1 + $0xbc] sm:$0xf] %vm1970_vm1, %v2120_v55 }
 0x15f   :  { %v1723_v58 = vadd.f32 %v1722_v56, %v1721_v57 }
 0x161   :  { %v1772_v59 = vmul.f32 0.11111111, %v1723_v58 }
 0x163   :  { %v2121_v60 = vpack.c.bf16 %v1772_v59, %v1772_v59 }
 0x165   :  { %2019 = vst.msk [vmem:[%s5188_s1 + $0xc0] sm:$0xf] %vm1970_vm1, %v2121_v60 }

// kernel: baseline_forward.7
= control target key start
LH: loop header
LB: loop body
LE: loop exit
PB: predicated region body
PF: predicated region fallthrough
CT: control target
= control target key end

     0   :  { %vm3906_vm0 = vmmov 0   ;;  %vm1664_vm1 = vcmask 523264   ;;  %s4923_s1 = inlined_call_operand.vmem [shape: bf16[1600,128], index: 1, kind: input, shape index: {}]   ;;  %s4924_s0 = inlined_call_operand.vmem [shape: bf16[162,1600], index: 0, kind: input, shape index: {}]   ;;  %s4925_s2 = inlined_call_operand.vmem [shape: f32[1,128], index: 2, kind: input, shape index: {}]   ;;  %s4926_s3 = inlined_call_operand.vmem [shape: bf16[162,128], index: 3, kind: output, shape index: {}]  }
   0x1   :  { %v3602_v0 = vld [vmem:[%s4923_s1 + $0x40] sm:$0xff]   ;;  %v3604_v2 = vld [vmem:[%s4923_s1 + $0x48] sm:$0xff]   ;;  %v3606_v4 = vld [vmem:[%s4923_s1 + $0x50] sm:$0xff]  }
   0x2   :  { %v3603_v1 = vld [vmem:[%s4923_s1] sm:$0xff]   ;;  %3025 = vmatprep.subr.bf16.mxu0 %v3602_v0  ;;  %3584 = vmatprep.subr.bf16.mxu1 %v3602_v0  ;;  %v3605_v3 = vld [vmem:[%s4923_s1 + $0x8] sm:$0xff]   ;;  %v3607_v5 = vld [vmem:[%s4923_s1 + $0x10] sm:$0xff]  }
   0x3   :  { %3026 = vmatpush3.bf16.msra.mxu0 %v3603_v1  ;;  %3592 = vmatpush3.bf16.msra.mxu1 %v3603_v1  ;;  %v3608_v6 = vld [vmem:[%s4923_s1 + $0x58] sm:$0xff]   ;;  %v3610_v8 = vld [vmem:[%s4923_s1 + $0x60] sm:$0xff]   ;;  %v3612_v10 = vld [vmem:[%s4923_s1 + $0x68] sm:$0xff]  }
   0x4   :  { %3027 = vmatprep.subr.bf16.mxu0 %v3604_v2  ;;  %3585 = vmatprep.subr.bf16.mxu1 %v3604_v2  ;;  %v3609_v7 = vld [vmem:[%s4923_s1 + $0x18] sm:$0xff]   ;;  %v3611_v9 = vld [vmem:[%s4923_s1 + $0x20] sm:$0xff]   ;;  %v3623_v12 = vld [vmem:[%s4924_s0 + $0x274] ss:$52 sps:$4 sm:$0xff]  }
   0x5   :  { %v3620_v11 = vld [vmem:[%s4924_s0 + $0x4] ss:$52 sps:$4 sm:$0xff]   ;;  %v3613_v13 = vld [vmem:[%s4923_s1 + $0x28] sm:$0xff]   ;;  %v3614_v14 = vld [vmem:[%s4923_s1 + $0x70] sm:$0xff]   ;;  %1778 = vmatprep.mubr.bf16.mxu1 %v3623_v12 }
   0x6   :  { %1730 = vmatprep.mubr.bf16.mxu0 %v3620_v11  ;;  %v3615_v15 = vld [vmem:[%s4923_s1 + $0x30] sm:$0xff]   ;;  %v3616_v16 = vld [vmem:[%s4923_s1 + $0x78] sm:$0xff]   ;;  %v3624_v18 = vld [vmem:[%s4923_s1 + $0x140] sm:$0xff]  }
   0x7   :  { %3028 = vmatpush3.bf16.msra.mxu0 %v3605_v3  ;;  %3593 = vmatpush3.bf16.msra.mxu1 %v3605_v3  ;;  %v3617_v17 = vld [vmem:[%s4923_s1 + $0x38] sm:$0xff]   ;;  %v3618_v19 = vld [vmem:[%s4924_s0] ss:$52 sps:$4 sm:$0xff]   ;;  %v3621_v20 = vld [vmem:[%s4924_s0 + $0x270] ss:$52 sps:$4 sm:$0xff]  }
   0x8   :  { %3029 = vmatprep.subr.bf16.mxu0 %v3606_v4  ;;  %3586 = vmatprep.subr.bf16.mxu1 %v3606_v4  ;;  %v3626_v21 = vld [vmem:[%s4923_s1 + $0xc0] sm:$0xff]   ;;  %v3628_v24 = vld [vmem:[%s4923_s1 + $0x148] sm:$0xff]   ;;  %v3631_v26 = vld [vmem:[%s4924_s0 + $0x2dc] ss:$52 sps:$4 sm:$0xff]  }
   0x9   :  { %v3625_v22 = vld [vmem:[%s4923_s1 + $0x100] sm:$0xff]   ;;  %v3636_v27 = vld [vmem:[%s4923_s1 + $0xc8] sm:$0xff]   ;;  %v3638_v30 = vld [vmem:[%s4923_s1 + $0x150] sm:$0xff]  }
   0xa   :  { %v3627_v23 = vld [vmem:[%s4923_s1 + $0x80] sm:$0xff]   ;;  %v3633_v28 = vld [vmem:[%s4923_s1 + $0x108] sm:$0xff]   ;;  %v3639_v33 = vld [vmem:[%s4923_s1 + $0xd0] sm:$0xff]  }
   0xb   :  { %3030 = vmatpush3.bf16.msra.mxu0 %v3607_v5  ;;  %3594 = vmatpush3.bf16.msra.mxu1 %v3607_v5  ;;  %v3629_v25 = vld [vmem:[%s4924_s0 + $0x6c] ss:$52 sps:$4 sm:$0xff]   ;;  %v3634_v31 = vld [vmem:[%s4924_s0 + $0x68] ss:$52 sps:$4 sm:$0xff]   ;;  %v3640_v34 = vld [vmem:[%s4923_s1 + $0x110] sm:$0xff]  }
   0xc   :  { %3031 = vmatprep.subr.bf16.mxu0 %v3608_v6  ;;  %3587 = vmatprep.subr.bf16.mxu1 %v3608_v6  ;;  %v3637_v29 = vld [vmem:[%s4923_s1 + $0x88] sm:$0xff]   ;;  %v3641_v35 = vld [vmem:[%s4923_s1 + $0x90] sm:$0xff]   ;;  %v3644_v37 = vld [vmem:[%s4924_s0 + $0x344] ss:$52 sps:$4 sm:$0xff]  }
   0xd   :  { %v3635_v32 = vld [vmem:[%s4924_s0 + $0x2d8] ss:$52 sps:$4 sm:$0xff]   ;;  %v3642_v36 = vld [vmem:[%s4924_s0 + $0xd4] ss:$52 sps:$4 sm:$0xff]   ;;  %v3646_v42 = vld [vmem:[%s4924_s0 + $0xd0] ss:$52 sps:$4 sm:$0xff]  }
   0xe   :  { %v3648_v38 = vld [vmem:[%s4923_s1 + $0xd8] sm:$0xff]   ;;  %v3647_v43 = vld [vmem:[%s4924_s0 + $0x340] ss:$52 sps:$4 sm:$0xff]   ;;  %v3662_v50 = vld [vmem:[%s4923_s1 + $0xe8] sm:$0xff]  }
   0xf   :  { %3032 = vmatpush3.bf16.msra.mxu0 %v3609_v7  ;;  %3595 = vmatpush3.bf16.msra.mxu1 %v3609_v7  ;;  %v3649_v39 = vld [vmem:[%s4923_s1 + $0x158] sm:$0xff]   ;;  %v3656_v44 = vld [vmem:[%s4923_s1 + $0xe0] sm:$0xff]   ;;  %v3664_v51 = vld [vmem:[%s4923_s1 + $0x168] sm:$0xff]  }
  0x10   :  { %3033 = vmatprep.subr.bf16.mxu0 %v3610_v8  ;;  %3588 = vmatprep.subr.bf16.mxu1 %v3610_v8  ;;  %v3650_v40 = vld [vmem:[%s4923_s1 + $0x98] sm:$0xff]   ;;  %v3654_v46 = vld [vmem:[%s4924_s0 + $0x3ac] ss:$52 sps:$4 sm:$0xff]   ;;  %v155_v53 = vld [vmem:[%s4924_s0 + $0x410] sm:$0x11] }
  0x11   :  { %v3651_v41 = vld [vmem:[%s4923_s1 + $0x118] sm:$0xff]   ;;  %v3660_v47 = vld [vmem:[%s4923_s1 + $0x160] sm:$0xff]   ;;  %v3663_v52 = vld [vmem:[%s4923_s1 + $0xa8] sm:$0xff]   ;;  %v2801_v59 = vcombine.high %v155_v53, %v155_v53  ;;  %v2800_v5 = vcombine.low %v155_v53, %v155_v53 }
  0x12   :  { %v3652_v45 = vld [vmem:[%s4924_s0 + $0x13c] ss:$52 sps:$4 sm:$0xff]   ;;  %v3659_v48 = vld [vmem:[%s4923_s1 + $0xa0] sm:$0xff]   ;;  %v3657_v54 = vld [vmem:[%s4924_s0 + $0x138] ss:$52 sps:$4 sm:$0xff]  }
  0x13   :  { %3034 = vmatpush3.bf16.msra.mxu0 %v3611_v9  ;;  %3596 = vmatpush3.bf16.msra.mxu1 %v3611_v9  ;;  %v3661_v49 = vld [vmem:[%s4923_s1 + $0x120] sm:$0xff]   ;;  %v3658_v55 = vld [vmem:[%s4924_s0 + $0x3a8] ss:$52 sps:$4 sm:$0xff]   ;;  %v3671_v57 = vld [vmem:[%s4923_s1 + $0xf0] sm:$0xff]  }
  0x14   :  { %3035 = vmatprep.subr.bf16.mxu0 %v3612_v10  ;;  %3589 = vmatprep.subr.bf16.mxu1 %v3612_v10  ;;  %v3668_v56 = vld [vmem:[%s4923_s1 + $0x128] sm:$0xff]   ;;  %v3665_v58 = vld [vmem:[%s4924_s0 + $0x1a4] ss:$52 sps:$4 sm:$0xff]   ;;  %v3672_v60 = vld [vmem:[%s4923_s1 + $0xb0] sm:$0xff]  }
  0x15   :  { %v3674_v61 = vld [vmem:[%s4923_s1 + $0x170] sm:$0xff]   ;;  %v3673_v62 = vld [vmem:[%s4923_s1 + $0xf8] sm:$0xff]   ;;  %v3677_v2 = vld [vmem:[%s4924_s0 + $0x20c] ss:$52 sps:$4 sm:$0xff]  }
  0x16   :  { %v3676_v63 = vld [vmem:[%s4923_s1 + $0x130] sm:$0xff]   ;;  %v3675_v1 = vld [vmem:[%s4923_s1 + $0xb8] sm:$0xff]   ;;  %v3681_v3 = vld [vmem:[%s4924_s0 + $0xc] ss:$52 sps:$4 sm:$0xff]  }
  0x17   :  { %3036 = vmatpush3.bf16.msra.mxu0 %v3613_v13  ;;  %3597 = vmatpush3.bf16.msra.mxu1 %v3613_v13  ;;  %v3669_v0 = vld [vmem:[%s4924_s0 + $0x1a0] ss:$52 sps:$4 sm:$0xff]   ;;  %v3683_v4 = vld [vmem:[%s4923_s1 + $0x178] sm:$0xff]  }
  0x18   :  { %3037 = vmatprep.subr.bf16.mxu0 %v3614_v14  ;;  %3590 = vmatprep.subr.bf16.mxu1 %v3614_v14  ;;  %v3684_v6 = vld [vmem:[%s4923_s1 + $0x138] sm:$0xff]   ;;  %v3685_v7 = vld [vmem:[%s4923_s1 + $0x1c0] sm:$0xff]   ;;  %v3687_v12 = vld [vmem:[%s4924_s0 + $0x74] ss:$52 sps:$4 sm:$0xff]  }
  0x19   :  { %v3679_v8 = vld [vmem:[%s4924_s0 + $0x8] ss:$52 sps:$4 sm:$0xff]   ;;  %v3693_v10 = vld [vmem:[%s4923_s1 + $0x240] sm:$0xff]  }
  0x1a   :  { %v3682_v9 = vld [vmem:[%s4924_s0 + $0x208] ss:$52 sps:$4 sm:$0xff]   ;;  %v3686_v11 = vld [vmem:[%s4923_s1 + $0x180] sm:$0xff]  }
  0x1b   :  { %3038 = vmatpush3.bf16.msra.mxu0 %v3615_v15  ;;  %3598 = vmatpush3.bf16.msra.mxu1 %v3615_v15  ;;  %v3691_v13 = vld [vmem:[%s4924_s0 + $0x14] ss:$52 sps:$4 sm:$0xff]   ;;  %v3731_v53 = vld [vmem:[%s4924_s0 + $0x27c] ss:$52 sps:$4 sm:$0xff]  }
  0x1c   :  { %3039 = vmatprep.subr.bf16.mxu0 %v3616_v16  ;;  %3591 = vmatprep.subr.bf16.mxu1 %v3616_v16  ;;  %v3695_v14 = vld [vmem:[%s4923_s1 + $0x1c8] sm:$0xff]   ;;  %v3689_v16 = vld [vmem:[%s4924_s0 + $0x10] ss:$52 sps:$4 sm:$0xff]  }
  0x1d   :  { %v3700_v15 = vld [vmem:[%s4923_s1 + $0x188] sm:$0xff]  }
  0x1f   :  { %3040 = vmatpush3.bf16.msra.mxu0 %v3617_v17  ;;  %3599 = vmatpush3.bf16.msra.mxu1 %v3617_v17  ;;  %v3692_v17 = vld [vmem:[%s4924_s0 + $0x70] ss:$52 sps:$4 sm:$0xff]  }
  0x20   :  { %3189 = vmatprep.subr.bf16.mxu0 %v3624_v18  ;;  %3107 = vmatprep.subr.bf16.mxu1 %v3626_v21  ;;  %v3694_v18 = vld [vmem:[%s4923_s1 + $0x200] sm:$0xff]   ;;  %v3711_v21 = vld [vmem:[%s4923_s1 + $0x1d0] sm:$0xff]  }
  0x22   :  { %1731 = vmatmul.mubr.bf16.vlgmr.msra.gmra.mrb[0].mxu0 %v3618_v19  ;;  %1779 = vmatmul.mubr.bf16.vlgmr.msra.gmra.mrb[0].mxu1 %v3621_v20  ;;  %v3696_v19 = vld [vmem:[%s4924_s0 + $0xdc] ss:$52 sps:$4 sm:$0xff]  }
  0x23   :  { %3190 = vmatpush3.bf16.msra.mxu0 %v3625_v22  ;;  %3108 = vmatpush3.bf16.msra.mxu1 %v3627_v23  ;;  %v3698_v20 = vld [vmem:[%s4924_s0 + $0x7c] ss:$52 sps:$4 sm:$0xff]   ;;  %v3703_v22 = vld [vmem:[%s4923_s1 + $0x248] sm:$0xff]  }
  0x24   :  { %3191 = vmatprep.subr.bf16.mxu0 %v3628_v24  ;;  %1738 = vmatprep.mubr.bf16.mxu0 %v3629_v25  ;;  %v3712_v23 = vld [vmem:[%s4923_s1 + $0x190] sm:$0xff]   ;;  %v3704_v24 = vld [vmem:[%s4923_s1 + $0x208] sm:$0xff]  }
  0x25   :  { %1786 = vmatprep.mubr.bf16.mxu1 %v3631_v26  ;;  %3109 = vmatprep.subr.bf16.mxu1 %v3636_v27  ;;  %v3701_v25 = vld [vmem:[%s4924_s0 + $0xd8] ss:$52 sps:$4 sm:$0xff]   ;;  %v3713_v27 = vld [vmem:[%s4923_s1 + $0x250] sm:$0xff]  }
  0x26   :  { %v3702_v26 = vld [vmem:[%s4924_s0 + $0x78] ss:$52 sps:$4 sm:$0xff]  }
  0x27   :  { %3192 = vmatpush3.bf16.msra.mxu0 %v3633_v28  ;;  %3110 = vmatpush3.bf16.msra.mxu1 %v3637_v29  ;;  %v3705_v28 = vld [vmem:[%s4924_s0 + $0x144] ss:$52 sps:$4 sm:$0xff]  }
  0x28   :  { %3193 = vmatprep.subr.bf16.mxu0 %v3638_v30  ;;  %3111 = vmatprep.subr.bf16.mxu1 %v3639_v33  ;;  %v3707_v29 = vld [vmem:[%s4924_s0 + $0xe4] ss:$52 sps:$4 sm:$0xff]  }
  0x29   :  { %v3721_v30 = vld [vmem:[%s4923_s1 + $0x1d8] sm:$0xff]  }
  0x2a   :  { %1739 = vmatmul.mubr.bf16.gmra.mrb[4].mxu0 %v3634_v31  ;;  %1787 = vmatmul.mubr.bf16.gmra.mrb[4].mxu1 %v3635_v32  ;;  %v3722_v31 = vld [vmem:[%s4923_s1 + $0x198] sm:$0xff]   ;;  %v3718_v32 = vld [vmem:[%s4923_s1 + $0x210] sm:$0xff]  }
  0x2b   :  { %3194 = vmatpush3.bf16.msra.mxu0 %v3640_v34  ;;  %3112 = vmatpush3.bf16.msra.mxu1 %v3641_v35  ;;  %v3729_v33 = vld [vmem:[%s4923_s1 + $0x258] sm:$0xff]   ;;  %v3709_v35 = vld [vmem:[%s4924_s0 + $0x140] ss:$52 sps:$4 sm:$0xff]  }
  0x2c   :  { %1746 = vmatprep.mubr.bf16.mxu0 %v3642_v36  ;;  %1794 = vmatprep.mubr.bf16.mxu1 %v3644_v37  ;;  %v3730_v34 = vld [vmem:[%s4923_s1 + $0x218] sm:$0xff]   ;;  %v3710_v36 = vld [vmem:[%s4924_s0 + $0xe0] ss:$52 sps:$4 sm:$0xff]  }
  0x2d   :  { %3113 = vmatprep.subr.bf16.mxu1 %v3648_v38  ;;  %3195 = vmatprep.subr.bf16.mxu0 %v3649_v39  ;;  %v3714_v37 = vld [vmem:[%s4924_s0 + $0x1ac] ss:$52 sps:$4 sm:$0xff]  }
  0x2e   :  { %v3716_v38 = vld [vmem:[%s4924_s0 + $0x14c] ss:$52 sps:$4 sm:$0xff]  }
  0x2f   :  { %3114 = vmatpush3.bf16.msra.mxu1 %v3650_v40  ;;  %3196 = vmatpush3.bf16.msra.mxu0 %v3651_v41  ;;  %v3735_v39 = vld [vmem:[%s4923_s1 + $0x1e0] sm:$0xff]  }
  0x30   :  { %3115 = vmatprep.subr.bf16.mxu1 %v3656_v44  ;;  %3197 = vmatprep.subr.bf16.mxu0 %v3660_v47  ;;  %v3738_v40 = vld [vmem:[%s4923_s1 + $0x1a0] sm:$0xff]   ;;  %v3720_v44 = vld [vmem:[%s4924_s0 + $0x148] ss:$52 sps:$4 sm:$0xff]  }
  0x31   :  { %v3739_v41 = vld [vmem:[%s4923_s1 + $0x260] sm:$0xff]   ;;  %v3747_v47 = vld [vmem:[%s4923_s1 + $0x1e8] sm:$0xff]  }
  0x32   :  { %1747 = vmatmul.mubr.bf16.gmra.mrb[8].mxu0 %v3646_v42  ;;  %1795 = vmatmul.mubr.bf16.gmra.mrb[8].mxu1 %v3647_v43  ;;  %v3740_v42 = vld [vmem:[%s4923_s1 + $0x220] sm:$0xff]   ;;  %v3719_v43 = vld [vmem:[%s4924_s0 + $0x1a8] ss:$52 sps:$4 sm:$0xff]  }
  0x33   :  { %1754 = vmatprep.mubr.bf16.mxu0 %v3652_v45  ;;  %1802 = vmatprep.mubr.bf16.mxu1 %v3654_v46  ;;  %v3723_v45 = vld [vmem:[%s4924_s0 + $0x214] ss:$52 sps:$4 sm:$0xff]  }
  0x34   :  { %3116 = vmatpush3.bf16.msra.mxu1 %v3659_v48  ;;  %3198 = vmatpush3.bf16.msra.mxu0 %v3661_v49  ;;  %v3725_v46 = vld [vmem:[%s4924_s0 + $0x1b4] ss:$52 sps:$4 sm:$0xff]  }
  0x35   :  { %3117 = vmatprep.subr.bf16.mxu1 %v3662_v50  ;;  %3199 = vmatprep.subr.bf16.mxu0 %v3664_v51  ;;  %v3748_v48 = vld [vmem:[%s4923_s1 + $0x1a8] sm:$0xff]   ;;  %v3727_v50 = vld [vmem:[%s4924_s0 + $0x210] ss:$52 sps:$4 sm:$0xff]  }
  0x36   :  { %v3753_v49 = vld [vmem:[%s4923_s1 + $0x268] sm:$0xff]   ;;  %v3728_v51 = vld [vmem:[%s4924_s0 + $0x1b0] ss:$52 sps:$4 sm:$0xff]  }
  0x38   :  { %3118 = vmatpush3.bf16.msra.mxu1 %v3663_v52  ;;  %3200 = vmatpush3.bf16.msra.mxu0 %v3668_v56  ;;  %v3756_v52 = vld [vmem:[%s4923_s1 + $0x228] sm:$0xff]   ;;  %v3733_v56 = vld [vmem:[%s4924_s0 + $0x21c] ss:$52 sps:$4 sm:$0xff]  }
  0x39   :  { %3119 = vmatprep.subr.bf16.mxu1 %v3671_v57  ;;  %3201 = vmatprep.subr.bf16.mxu0 %v3674_v61  ;;  %v3765_v57 = vld [vmem:[%s4923_s1 + $0x270] sm:$0xff]   ;;  %v3741_v61 = vld [vmem:[%s4924_s0 + $0x2e4] ss:$52 sps:$4 sm:$0xff]  }
  0x3a   :  { %1755 = vmatmul.mubr.bf16.gmra.mrb[12].mxu0 %v3657_v54  ;;  %1803 = vmatmul.mubr.bf16.gmra.mrb[12].mxu1 %v3658_v55  ;;  %v3757_v54 = vld [vmem:[%s4923_s1 + $0x1f0] sm:$0xff]  }
  0x3b   :  { %1762 = vmatprep.mubr.bf16.mxu0 %v3665_v58  ;;  %1810 = vmatprep.mubr.bf16.mxu1 %v2801_v59  ;;  %v3758_v55 = vld [vmem:[%s4923_s1 + $0x1b0] sm:$0xff]   ;;  %v3736_v59 = vld [vmem:[%s4924_s0 + $0x278] ss:$52 sps:$4 sm:$0xff]  }
  0x3c   :  { %3120 = vmatpush3.bf16.msra.mxu1 %v3672_v60  ;;  %3202 = vmatpush3.bf16.msra.mxu0 %v3676_v63  ;;  %v3766_v58 = vld [vmem:[%s4923_s1 + $0x230] sm:$0xff]   ;;  %v3737_v60 = vld [vmem:[%s4924_s0 + $0x218] ss:$52 sps:$4 sm:$0xff]  }
  0x3d   :  { %3121 = vmatprep.subr.bf16.mxu1 %v3673_v62  ;;  %3203 = vmatprep.subr.bf16.mxu0 %v3683_v4  ;;  %v3743_v62 = vld [vmem:[%s4924_s0 + $0x284] ss:$52 sps:$4 sm:$0xff]   ;;  %v3905_v4 = vmov 0.0  }
  0x3e   :  { %v3772_v63 = vld [vmem:[%s4923_s1 + $0x1f8] sm:$0xff]  }
  0x40   :  { %3122 = vmatpush3.bf16.msra.mxu1 %v3675_v1  ;;  %3204 = vmatpush3.bf16.msra.mxu0 %v3684_v6  ;;  %v3774_v1 = vld [vmem:[%s4923_s1 + $0x278] sm:$0xff]   ;;  %v3746_v6 = vld [vmem:[%s4924_s0 + $0x280] ss:$52 sps:$4 sm:$0xff]  }
  0x41   :  { %3271 = vmatprep.subr.bf16.mxu1 %v3685_v7  ;;  %3353 = vmatprep.subr.bf16.mxu0 %v3693_v10  ;;  %v3749_v7 = vld [vmem:[%s4924_s0 + $0x34c] ss:$52 sps:$4 sm:$0xff]   ;;  %v3755_v10 = vld [vmem:[%s4924_s0 + $0x2e8] ss:$52 sps:$4 sm:$0xff]  }
  0x42   :  { %1763 = vmatmul.mubr.bf16.gmra.mrb[16].mxu0 %v3669_v0  ;;  %1811 = vmatmul.mubr.bf16.gmra.mrb[16].mxu1 %v2800_v5  ;;  %v3773_v0 = vld [vmem:[%s4923_s1 + $0x1b8] sm:$0xff]   ;;  %v3745_v5 = vld [vmem:[%s4924_s0 + $0x2e0] ss:$52 sps:$4 sm:$0xff]  }
  0x43   :  { %1770 = vmatprep.mubr.bf16.mxu0 %v3677_v2  ;;  %1850 = vmatprep.mubr.bf16.mxu1 %v3681_v3  ;;  %v3775_v2 = vld [vmem:[%s4923_s1 + $0x238] sm:$0xff]   ;;  %v3781_v3 = vld [vmem:[%s4923_s1 + $0x2c0] sm:$0xff]  }
  0x4a   :  { %1771 = vmatmul.mubr.bf16.gmra.mrb[20].mxu0 %v3682_v9  ;;  %1851 = vmatmul.mubr.bf16.vlgmr.msra.gmra.mrb[20].mxu1 %v3679_v8  ;;  %v3751_v8 = vld [vmem:[%s4924_s0 + $0x2ec] ss:$52 sps:$4 sm:$0xff]   ;;  %v3754_v9 = vld [vmem:[%s4924_s0 + $0x348] ss:$52 sps:$4 sm:$0xff]  }
  0x4b   :  { %3272 = vmatpush3.bf16.msra.mxu1 %v3686_v11  ;;  %1858 = vmatprep.mubr.bf16.mxu1 %v3687_v12  ;;  %v3759_v11 = vld [vmem:[%s4924_s0 + $0x3b4] ss:$52 sps:$4 sm:$0xff]  }
  0x4c   :  { %1970 = vmatprep.mubr.bf16.mxu0 %v3691_v13  ;;  %3273 = vmatprep.subr.bf16.mxu1 %v3695_v14  ;;  %v3761_v12 = vld [vmem:[%s4924_s0 + $0x354] ss:$52 sps:$4 sm:$0xff]   ;;  %v156_v13 = vld [vmem:[%s4924_s0 + $0x418] sm:$0x11]  ;;  %v3763_v14 = vld [vmem:[%s4924_s0 + $0x3b0] ss:$52 sps:$4 sm:$0xff]  }
  0x4f   :  { %3274 = vmatpush3.bf16.msra.mxu1 %v3700_v15  ;;  %v3764_v15 = vld [vmem:[%s4924_s0 + $0x350] ss:$52 sps:$4 sm:$0xff]  }
  0x50   :  { %3275 = vmatprep.subr.bf16.mxu1 %v3711_v21 }
  0x52   :  { %1859 = vmatmul.mubr.bf16.gmra.mrb[24].mxu1 %v3692_v17  ;;  %1971 = vmatmul.mubr.bf16.vlgmr.msra.gmra.mrb[24].mxu0 %v3689_v16  ;;  %v2803_v16 = vcombine.high %v156_v13, %v156_v13  ;;  %v3768_v17 = vld [vmem:[%s4924_s0 + $0x3bc] ss:$52 sps:$4 sm:$0xff]  }
  0x53   :  { %3354 = vmatpush3.bf16.msra.mxu0 %v3694_v18  ;;  %1866 = vmatprep.mubr.bf16.mxu1 %v3696_v19  ;;  %v157_v18 = vld [vmem:[%s4924_s0 + $0x420] sm:$0x11]  ;;  %v2802_v19 = vcombine.low %v156_v13, %v156_v13 }
  0x54   :  { %1978 = vmatprep.mubr.bf16.mxu0 %v3698_v20  ;;  %3355 = vmatprep.subr.bf16.mxu0 %v3703_v22  ;;  %v3771_v20 = vld [vmem:[%s4924_s0 + $0x3b8] ss:$52 sps:$4 sm:$0xff]   ;;  %v2805_v21 = vcombine.high %v157_v18, %v157_v18  ;;  %v3779_v22 = vld [vmem:[%s4924_s0 + $0x1c] ss:$52 sps:$4 sm:$0xff]  }
  0x55   :  { %3276 = vmatpush3.bf16.msra.mxu1 %v3712_v23  ;;  %v3777_v23 = vld [vmem:[%s4924_s0 + $0x18] ss:$52 sps:$4 sm:$0xff]  }
  0x56   :  { %3277 = vmatprep.subr.bf16.mxu1 %v3721_v30  ;;  %v3804_v30 = vld [vmem:[%s4923_s1 + $0x2d0] sm:$0xff]   ;;  %v3846_v13 = vld [vmem:[%s4924_s0 + $0x3c4] ss:$52 sps:$4 sm:$0xff]  }
  0x57   :  { %3356 = vmatpush3.bf16.msra.mxu0 %v3704_v24  ;;  %v2804_v24 = vcombine.low %v157_v18, %v157_v18 }
  0x58   :  { %3357 = vmatprep.subr.bf16.mxu0 %v3713_v27  ;;  %v3787_v27 = vld [vmem:[%s4924_s0 + $0x24] ss:$52 sps:$4 sm:$0xff]  }
  0x59   :  { %3278 = vmatpush3.bf16.msra.mxu1 %v3722_v31  ;;  %v3785_v31 = vld [vmem:[%s4924_s0 + $0x20] ss:$52 sps:$4 sm:$0xff]  }
  0x5a   :  { %1867 = vmatmul.mubr.bf16.gmra.mrb[28].mxu1 %v3701_v25  ;;  %1979 = vmatmul.mubr.bf16.gmra.mrb[28].mxu0 %v3702_v26  ;;  %v3782_v25 = vld [vmem:[%s4923_s1 + $0x280] sm:$0xff]  }
  0x5b   :  { %1874 = vmatprep.mubr.bf16.mxu1 %v3705_v28  ;;  %1986 = vmatprep.mubr.bf16.mxu0 %v3707_v29  ;;  %v3783_v26 = vld [vmem:[%s4924_s0 + $0x84] ss:$52 sps:$4 sm:$0xff]   ;;  %v3790_v28 = vld [vmem:[%s4923_s1 + $0x2c8] sm:$0xff]  }
  0x5c   :  { %3358 = vmatpush3.bf16.msra.mxu0 %v3718_v32  ;;  %3279 = vmatprep.subr.bf16.mxu1 %v3735_v39  ;;  %v3795_v29 = vld [vmem:[%s4923_s1 + $0x288] sm:$0xff]   ;;  %v3788_v32 = vld [vmem:[%s4924_s0 + $0x80] ss:$52 sps:$4 sm:$0xff]  }
  0x5d   :  { %3359 = vmatprep.subr.bf16.mxu0 %v3729_v33  ;;  %3280 = vmatpush3.bf16.msra.mxu1 %v3738_v40  ;;  %v3789_v33 = vld [vmem:[%s4923_s1 + $0x300] sm:$0xff]   ;;  %v3796_v39 = vld [vmem:[%s4924_s0 + $0xe8] ss:$52 sps:$4 sm:$0xff]  }
  0x5e   :  { %3281 = vmatprep.subr.bf16.mxu1 %v3747_v47  ;;  %v3814_v40 = vld [vmem:[%s4923_s1 + $0x298] sm:$0xff]   ;;  %v3836_v47 = vld [vmem:[%s4923_s1 + $0x2e8] sm:$0xff]  }
  0x60   :  { %3360 = vmatpush3.bf16.msra.mxu0 %v3730_v34  ;;  %v3791_v34 = vld [vmem:[%s4924_s0 + $0xec] ss:$52 sps:$4 sm:$0xff]  }
  0x61   :  { %3361 = vmatprep.subr.bf16.mxu0 %v3739_v41  ;;  %3282 = vmatpush3.bf16.msra.mxu1 %v3748_v48  ;;  %v3797_v41 = vld [vmem:[%s4924_s0 + $0x88] ss:$52 sps:$4 sm:$0xff]   ;;  %v3802_v48 = vld [vmem:[%s4924_s0 + $0x150] ss:$52 sps:$4 sm:$0xff]  }
  0x62   :  { %1875 = vmatmul.mubr.bf16.gmra.mrb[32].mxu1 %v3709_v35  ;;  %1987 = vmatmul.mubr.bf16.gmra.mrb[32].mxu0 %v3710_v36  ;;  %v3793_v35 = vld [vmem:[%s4924_s0 + $0x8c] ss:$52 sps:$4 sm:$0xff]   ;;  %v3805_v36 = vld [vmem:[%s4923_s1 + $0x290] sm:$0xff]  }
  0x63   :  { %1882 = vmatprep.mubr.bf16.mxu1 %v3714_v37  ;;  %1994 = vmatprep.mubr.bf16.mxu0 %v3716_v38  ;;  %v3813_v37 = vld [vmem:[%s4923_s1 + $0x2d8] sm:$0xff]   ;;  %v3810_v38 = vld [vmem:[%s4923_s1 + $0x308] sm:$0xff]  }
  0x64   :  { %3362 = vmatpush3.bf16.msra.mxu0 %v3740_v42  ;;  %3283 = vmatprep.subr.bf16.mxu1 %v3757_v54  ;;  %v3825_v42 = vld [vmem:[%s4923_s1 + $0x2e0] sm:$0xff]   ;;  %v3808_v54 = vld [vmem:[%s4924_s0 + $0x15c] ss:$52 sps:$4 sm:$0xff]  }
  0x65   :  { %3363 = vmatprep.subr.bf16.mxu0 %v3753_v49  ;;  %3284 = vmatpush3.bf16.msra.mxu1 %v3758_v55  ;;  %v3837_v49 = vld [vmem:[%s4923_s1 + $0x2a8] sm:$0xff]   ;;  %v3845_v55 = vld [vmem:[%s4923_s1 + $0x2b0] sm:$0xff]  }
  0x66   :  { %3285 = vmatprep.subr.bf16.mxu1 %v3772_v63  ;;  %v3820_v63 = vld [vmem:[%s4924_s0 + $0x1c0] ss:$52 sps:$4 sm:$0xff]  }
  0x68   :  { %3364 = vmatpush3.bf16.msra.mxu0 %v3756_v52  ;;  %v3803_v52 = vld [vmem:[%s4924_s0 + $0xf0] ss:$52 sps:$4 sm:$0xff]  }
  0x69   :  { %3365 = vmatprep.subr.bf16.mxu0 %v3765_v57  ;;  %3286 = vmatpush3.bf16.msra.mxu1 %v3773_v0  ;;  %v3811_v57 = vld [vmem:[%s4924_s0 + $0x1b8] ss:$52 sps:$4 sm:$0xff]  }
  0x6a   :  { %1883 = vmatmul.mubr.bf16.gmra.mrb[36].mxu1 %v3719_v43  ;;  %1995 = vmatmul.mubr.bf16.gmra.mrb[36].mxu0 %v3720_v44  ;;  %v3798_v43 = vld [vmem:[%s4924_s0 + $0x154] ss:$52 sps:$4 sm:$0xff]   ;;  %v3821_v0 = vld [vmem:[%s4924_s0 + $0x28c] ss:$52 sps:$4 sm:$0xff]  }
  0x6b   :  { %1890 = vmatprep.mubr.bf16.mxu1 %v3723_v45  ;;  %2002 = vmatprep.mubr.bf16.mxu0 %v3725_v46  ;;  %v3800_v44 = vld [vmem:[%s4924_s0 + $0xf4] ss:$52 sps:$4 sm:$0xff]   ;;  %v3828_v45 = vld [vmem:[%s4923_s1 + $0x2a0] sm:$0xff]  }
  0x6c   :  { %3366 = vmatpush3.bf16.msra.mxu0 %v3766_v58  ;;  %3435 = vmatprep.subr.bf16.mxu1 %v3781_v3  ;;  %v3829_v46 = vld [vmem:[%s4923_s1 + $0x310] sm:$0xff]   ;;  %v3812_v58 = vld [vmem:[%s4924_s0 + $0x158] ss:$52 sps:$4 sm:$0xff]   ;;  %v3827_v3 = vld [vmem:[%s4924_s0 + $0x228] ss:$52 sps:$4 sm:$0xff]  }
  0x6d   :  { %3367 = vmatprep.subr.bf16.mxu0 %v3774_v1  ;;  %v3823_v1 = vld [vmem:[%s4924_s0 + $0x22c] ss:$52 sps:$4 sm:$0xff]  }
  0x70   :  { %3368 = vmatpush3.bf16.msra.mxu0 %v3775_v2  ;;  %v3826_v2 = vld [vmem:[%s4924_s0 + $0x288] ss:$52 sps:$4 sm:$0xff]  }
  0x71   :  { %3532 = vmatprep.subr.bf16.mxu0 %v3905_v4 }
  0x72   :  { %1891 = vmatmul.mubr.bf16.gmra.mrb[40].mxu1 %v3727_v50  ;;  %2003 = vmatmul.mubr.bf16.gmra.mrb[40].mxu0 %v3728_v51  ;;  %v3852_v50 = vld [vmem:[%s4923_s1 + $0x318] sm:$0xff]   ;;  %v3844_v51 = vld [vmem:[%s4923_s1 + $0x2f0] sm:$0xff]  }
  0x73   :  { %1898 = vmatprep.mubr.bf16.mxu1 %v3731_v53  ;;  %2010 = vmatprep.mubr.bf16.mxu0 %v3733_v56  ;;  %v3806_v53 = vld [vmem:[%s4924_s0 + $0x1bc] ss:$52 sps:$4 sm:$0xff]  }
  0x74   :  { %v3858_v56 = vld [vmem:[%s4923_s1 + $0x2f8] sm:$0xff]  }
  0x7a   :  { %1899 = vmatmul.mubr.bf16.gmra.mrb[44].mxu1 %v3736_v59  ;;  %2011 = vmatmul.mubr.bf16.gmra.mrb[44].mxu0 %v3737_v60  ;;  %v3859_v59 = vld [vmem:[%s4923_s1 + $0x2b8] sm:$0xff]  }
  0x7b   :  { %1906 = vmatprep.mubr.bf16.mxu1 %v3741_v61  ;;  %2018 = vmatprep.mubr.bf16.mxu0 %v3743_v62  ;;  %v3815_v60 = vld [vmem:[%s4924_s0 + $0x224] ss:$52 sps:$4 sm:$0xff]   ;;  %v3819_v62 = vld [vmem:[%s4924_s0 + $0x220] ss:$52 sps:$4 sm:$0xff]  }
  0x7c   :  { %v3817_v61 = vld [vmem:[%s4924_s0 + $0x1c4] ss:$52 sps:$4 sm:$0xff]  }
  0x82   :  { %1907 = vmatmul.mubr.bf16.gmra.mrb[48].mxu1 %v3745_v5  ;;  %2019 = vmatmul.mubr.bf16.gmra.mrb[48].mxu0 %v3746_v6  ;;  %v3830_v5 = vld [vmem:[%s4924_s0 + $0x2f4] ss:$52 sps:$4 sm:$0xff]  }
  0x83   :  { %1914 = vmatprep.mubr.bf16.mxu1 %v3749_v7  ;;  %2026 = vmatprep.mubr.bf16.mxu0 %v3751_v8  ;;  %v3832_v6 = vld [vmem:[%s4924_s0 + $0x294] ss:$52 sps:$4 sm:$0xff]   ;;  %v3834_v7 = vld [vmem:[%s4924_s0 + $0x2f0] ss:$52 sps:$4 sm:$0xff]  }
  0x84   :  { %v3835_v8 = vld [vmem:[%s4924_s0 + $0x290] ss:$52 sps:$4 sm:$0xff]  }
  0x8a   :  { %1915 = vmatmul.mubr.bf16.gmra.mrb[52].mxu1 %v3754_v9  ;;  %2027 = vmatmul.mubr.bf16.gmra.mrb[52].mxu0 %v3755_v10  ;;  %v3838_v9 = vld [vmem:[%s4924_s0 + $0x35c] ss:$52 sps:$4 sm:$0xff]  }
  0x8b   :  { %1922 = vmatprep.mubr.bf16.mxu1 %v3759_v11  ;;  %2034 = vmatprep.mubr.bf16.mxu0 %v3761_v12  ;;  %v3840_v10 = vld [vmem:[%s4924_s0 + $0x2fc] ss:$52 sps:$4 sm:$0xff]   ;;  %v3842_v11 = vld [vmem:[%s4924_s0 + $0x358] ss:$52 sps:$4 sm:$0xff]  }
  0x8c   :  { %v3843_v12 = vld [vmem:[%s4924_s0 + $0x2f8] ss:$52 sps:$4 sm:$0xff]  }
  0x92   :  { %1923 = vmatmul.mubr.bf16.gmra.mrb[56].mxu1 %v3763_v14  ;;  %2035 = vmatmul.mubr.bf16.gmra.mrb[56].mxu0 %v3764_v15  ;;  %v3848_v14 = vld [vmem:[%s4924_s0 + $0x364] ss:$52 sps:$4 sm:$0xff]   ;;  %v158_v15 = vld [vmem:[%s4924_s0 + $0x428] sm:$0x11] }
  0x93   :  { %1930 = vmatprep.mubr.bf16.mxu1 %v2803_v16  ;;  %2042 = vmatprep.mubr.bf16.mxu0 %v3768_v17  ;;  %v3850_v16 = vld [vmem:[%s4924_s0 + $0x3c0] ss:$52 sps:$4 sm:$0xff]   ;;  %v2807_v18 = vcombine.high %v158_v15, %v158_v15 }
  0x94   :  { %v3851_v17 = vld [vmem:[%s4924_s0 + $0x360] ss:$52 sps:$4 sm:$0xff]  }
  0x9a   :  { %1931 = vmatmul.mubr.bf16.gmra.mrb[60].mxu1 %v2802_v19  ;;  %2043 = vmatmul.mubr.bf16.gmra.mrb[60].mxu0 %v3771_v20  ;;  %v3854_v19 = vld [vmem:[%s4924_s0 + $0x3cc] ss:$52 sps:$4 sm:$0xff]   ;;  %v159_v20 = vld [vmem:[%s4924_s0 + $0x430] sm:$0x11] }
  0x9b   :  { %2050 = vmatprep.mubr.bf16.mxu0 %v2805_v21  ;;  %2090 = vmatprep.mubr.bf16.mxu1 %v3779_v22  ;;  %v2806_v21 = vcombine.low %v158_v15, %v158_v15  ;;  %v3857_v22 = vld [vmem:[%s4924_s0 + $0x3c8] ss:$52 sps:$4 sm:$0xff]   ;;  %v3876_v15 = vld [vmem:[%s4924_s0 + $0x100] ss:$52 sps:$4 sm:$0xff]  }
  0xa2   :  { %2051 = vmatmul.mubr.bf16.gmra.mrb[64].mxu0 %v2804_v24  ;;  %2091 = vmatmul.mubr.bf16.vlgmr.msra.gmra.mrb[64].mxu1 %v3777_v23  ;;  %v2809_v23 = vcombine.high %v159_v20, %v159_v20  ;;  %v3863_v24 = vld [vmem:[%s4924_s0 + $0x2c] ss:$52 sps:$4 sm:$0xff]  }
  0xa3   :  { %3436 = vmatpush3.bf16.msra.mxu1 %v3782_v25  ;;  %2098 = vmatprep.mubr.bf16.mxu1 %v3783_v26 }
  0xa4   :  { %2210 = vmatprep.mubr.bf16.mxu0 %v3787_v27  ;;  %3437 = vmatprep.subr.bf16.mxu1 %v3790_v28 }
  0xa7   :  { %3438 = vmatpush3.bf16.msra.mxu1 %v3795_v29  ;;  %v3861_v29 = vld [vmem:[%s4924_s0 + $0x28] ss:$52 sps:$4 sm:$0xff]  }
  0xa8   :  { %3439 = vmatprep.subr.bf16.mxu1 %v3804_v30  ;;  %v2808_v30 = vcombine.low %v159_v20, %v159_v20  ;;  %v3877_v20 = vld [vmem:[%s4924_s0 + $0x1cc] ss:$52 sps:$4 sm:$0xff]  }
  0xaa   :  { %2099 = vmatmul.mubr.bf16.gmra.mrb[68].mxu1 %v3788_v32  ;;  %2211 = vmatmul.mubr.bf16.vlgmr.msra.gmra.mrb[68].mxu0 %v3785_v31 }
  0xab   :  { %3533 = vmatpush3.bf16.msra.mxu0 %v3789_v33  ;;  %2106 = vmatprep.mubr.bf16.mxu1 %v3791_v34 }
  0xac   :  { %2218 = vmatprep.mubr.bf16.mxu0 %v3793_v35  ;;  %3440 = vmatpush3.bf16.msra.mxu1 %v3805_v36  ;;  %v3865_v35 = vld [vmem:[%s4924_s0 + $0x94] ss:$52 sps:$4 sm:$0xff]  }
  0xad   :  { %3534 = vmatprep.subr.bf16.mxu0 %v3905_v4  ;;  %3441 = vmatprep.subr.bf16.mxu1 %v3813_v37 }
  0xaf   :  { %3535 = vmatpush3.bf16.msra.mxu0 %v3810_v38 }
  0xb0   :  { %3442 = vmatpush3.bf16.msra.mxu1 %v3814_v40  ;;  %3536 = vmatprep.subr.bf16.mxu0 %v3905_v4 }
  0xb1   :  { %3443 = vmatprep.subr.bf16.mxu1 %v3825_v42 }
  0xb2   :  { %2107 = vmatmul.mubr.bf16.gmra.mrb[72].mxu1 %v3796_v39  ;;  %2219 = vmatmul.mubr.bf16.gmra.mrb[72].mxu0 %v3797_v41 }
  0xb3   :  { %2114 = vmatprep.mubr.bf16.mxu1 %v3798_v43  ;;  %2226 = vmatprep.mubr.bf16.mxu0 %v3800_v44  ;;  %v3867_v44 = vld [vmem:[%s4924_s0 + $0x90] ss:$52 sps:$4 sm:$0xff]  }
  0xb4   :  { %3444 = vmatpush3.bf16.msra.mxu1 %v3828_v45  ;;  %3537 = vmatpush3.bf16.msra.mxu0 %v3829_v46  ;;  %v3868_v45 = vld [vmem:[%s4924_s0 + $0x30] ss:$52 sps:$4 sm:$0xff]  }
  0xb5   :  { %3445 = vmatprep.subr.bf16.mxu1 %v3836_v47  ;;  %3538 = vmatprep.subr.bf16.mxu0 %v3905_v4 }
  0xb8   :  { %3446 = vmatpush3.bf16.msra.mxu1 %v3837_v49  ;;  %3539 = vmatpush3.bf16.msra.mxu0 %v3852_v50  ;;  %v3869_v50 = vld [vmem:[%s4924_s0 + $0xfc] ss:$52 sps:$4 sm:$0xff]  }
  0xb9   :  { %3447 = vmatprep.subr.bf16.mxu1 %v3844_v51 }
  0xba   :  { %2115 = vmatmul.mubr.bf16.gmra.mrb[76].mxu1 %v3802_v48  ;;  %2227 = vmatmul.mubr.bf16.gmra.mrb[76].mxu0 %v3803_v52 }
  0xbb   :  { %2122 = vmatprep.mubr.bf16.mxu1 %v3806_v53  ;;  %2234 = vmatprep.mubr.bf16.mxu0 %v3808_v54 }
  0xbc   :  { %3448 = vmatpush3.bf16.msra.mxu1 %v3845_v55 }
  0xbd   :  { %3449 = vmatprep.subr.bf16.mxu1 %v3858_v56 }
  0xc0   :  { %3450 = vmatpush3.bf16.msra.mxu1 %v3859_v59  ;;  %v3871_v59 = vld [vmem:[%s4924_s0 + $0xf8] ss:$52 sps:$4 sm:$0xff]  }
  0xc2   :  { %2123 = vmatmul.mubr.bf16.gmra.mrb[80].mxu1 %v3811_v57  ;;  %2235 = vmatmul.mubr.bf16.gmra.mrb[80].mxu0 %v3812_v58 }
  0xc3   :  { %2130 = vmatprep.mubr.bf16.mxu1 %v3815_v60  ;;  %2242 = vmatprep.mubr.bf16.mxu0 %v3817_v61  ;;  %v3872_v60 = vld [vmem:[%s4924_s0 + $0x98] ss:$52 sps:$4 sm:$0xff]  }
  0xca   :  { %2131 = vmatmul.mubr.bf16.gmra.mrb[84].mxu1 %v3819_v62  ;;  %2243 = vmatmul.mubr.bf16.gmra.mrb[84].mxu0 %v3820_v63 }
  0xcb   :  { %2138 = vmatprep.mubr.bf16.mxu1 %v3821_v0  ;;  %2250 = vmatprep.mubr.bf16.mxu0 %v3823_v1  ;;  %v3873_v1 = vld [vmem:[%s4924_s0 + $0x164] ss:$52 sps:$4 sm:$0xff]  }
  0xd2   :  { %2139 = vmatmul.mubr.bf16.gmra.mrb[88].mxu1 %v3826_v2  ;;  %2251 = vmatmul.mubr.bf16.gmra.mrb[88].mxu0 %v3827_v3  ;;  %v4599_v2 = vld [vmem:[%s4925_s2] ss:$0 sm:$0xff] }
  0xd3   :  { %2146 = vmatprep.mubr.bf16.mxu1 %v3830_v5  ;;  %2258 = vmatprep.mubr.bf16.mxu0 %v3832_v6 }
  0xda   :  { %2147 = vmatmul.mubr.bf16.gmra.mrb[92].mxu1 %v3834_v7  ;;  %2259 = vmatmul.mubr.bf16.gmra.mrb[92].mxu0 %v3835_v8 }
  0xdb   :  { %2154 = vmatprep.mubr.bf16.mxu1 %v3838_v9  ;;  %2266 = vmatprep.mubr.bf16.mxu0 %v3840_v10 }
  0xe2   :  { %2155 = vmatmul.mubr.bf16.gmra.mrb[96].mxu1 %v3842_v11  ;;  %2267 = vmatmul.mubr.bf16.gmra.mrb[96].mxu0 %v3843_v12 }
  0xe3   :  { %2162 = vmatprep.mubr.bf16.mxu1 %v3846_v13  ;;  %2274 = vmatprep.mubr.bf16.mxu0 %v3848_v14  ;;  %v3875_v14 = vld [vmem:[%s4924_s0 + $0x160] ss:$52 sps:$4 sm:$0xff]  }
  0xea   :  { %2163 = vmatmul.mubr.bf16.gmra.mrb[100].mxu1 %v3850_v16  ;;  %2275 = vmatmul.mubr.bf16.gmra.mrb[100].mxu0 %v3851_v17 }
  0xeb   :  { %2170 = vmatprep.mubr.bf16.mxu1 %v2807_v18  ;;  %2282 = vmatprep.mubr.bf16.mxu0 %v3854_v19 }
  0xf2   :  { %2171 = vmatmul.mubr.bf16.gmra.mrb[104].mxu1 %v2806_v21  ;;  %2283 = vmatmul.mubr.bf16.gmra.mrb[104].mxu0 %v3857_v22 }
  0xf3   :  { %2290 = vmatprep.mubr.bf16.mxu0 %v2809_v23  ;;  %2330 = vmatprep.mubr.bf16.mxu1 %v3863_v24 }
  0xf5   :  { %v3041_v25 = vpop.f32.mrb[0].mxu0  ;;  %v3077_v26 = vpop.f32.mrb[0].mxu1 }
  0xf6   :  { %v3042_v27 = vpop.f32.mrb[1].mxu0  ;;  %v3078_v28 = vpop.f32.mrb[1].mxu1 }
  0xf7   :  { %v4552_v31 = vadd.f32 %v3042_v27, %v3041_v25  ;;  %v3044_v32 = vpop.f32.mrb[2].mxu0  ;;  %v4554_v33 = vadd.f32 %v3078_v28, %v3077_v26  ;;  %v3080_v34 = vpop.f32.mrb[2].mxu1 }
  0xf8   :  { %v3045_v36 = vpop.f32.mrb[3].mxu0  ;;  %v3081_v37 = vpop.f32.mrb[3].mxu1 }
  0xf9   :  { %v4559_v38 = vadd.f32 %v3045_v36, %v3044_v32  ;;  %v4561_v39 = vadd.f32 %v3081_v37, %v3080_v34  ;;  %v3879_v32 = vld [vmem:[%s4924_s0 + $0x1c8] ss:$52 sps:$4 sm:$0xff]  }
  0xfa   :  { %2291 = vmatmul.mubr.bf16.gmra.mrb[108].mxu0 %v2808_v30  ;;  %2331 = vmatmul.mubr.bf16.vlgmr.msra.gmra.mrb[108].mxu1 %v3861_v29  ;;  %v3880_v34 = vld [vmem:[%s4924_s0 + $0x168] ss:$52 sps:$4 sm:$0xff]  }
  0xfb   :  { %2338 = vmatprep.mubr.bf16.mxu1 %v3865_v35  ;;  %3540 = vmatprep.mubr.msk.bf16.mxu0 %vm3906_vm0, %v3905_v4 }
  0xfd   :  { %v3047_v40 = vpop.f32.mrb[4].mxu0  ;;  %v3083_v41 = vpop.f32.mrb[4].mxu1 }
  0xfe   :  { %v3048_v42 = vpop.f32.mrb[5].mxu0  ;;  %v3084_v43 = vpop.f32.mrb[5].mxu1 }
  0xff   :  { %v4571_v46 = vadd.f32 %v3048_v42, %v3047_v40  ;;  %v3050_v47 = vpop.f32.mrb[6].mxu0  ;;  %v4573_v48 = vadd.f32 %v3084_v43, %v3083_v41  ;;  %v3086_v49 = vpop.f32.mrb[6].mxu1  ;;  %v3881_v41 = vld [vmem:[%s4924_s0 + $0x234] ss:$52 sps:$4 sm:$0xff]  }
 0x100   :  { %v3051_v51 = vpop.f32.mrb[7].mxu0  ;;  %v3087_v52 = vpop.f32.mrb[7].mxu1 }
 0x101   :  { %v4578_v53 = vadd.f32 %v3051_v51, %v3050_v47  ;;  %v4580_v54 = vadd.f32 %v3087_v52, %v3086_v49  ;;  %v3883_v52 = vld [vmem:[%s4924_s0 + $0x230] ss:$52 sps:$4 sm:$0xff]  }
 0x102   :  { %2339 = vmatmul.mubr.bf16.gmra.mrb[112].mxu1 %v3867_v44  ;;  %3541 = vmatmul.mubr.msk.bf16.vlgmr.msra.gmra.mrb[112].mxu0 %vm1664_vm1, %v3868_v45 }
 0x103   :  { %2346 = vmatprep.mubr.bf16.mxu1 %v3869_v50  ;;  %3544 = vmatprep.mubr.msk.bf16.mxu0 %vm3906_vm0, %v3905_v4 }
 0x105   :  { %v3053_v55 = vpop.f32.mrb[8].mxu0  ;;  %v3089_v56 = vpop.f32.mrb[8].mxu1 }
 0x106   :  { %v3054_v57 = vpop.f32.mrb[9].mxu0  ;;  %v3090_v58 = vpop.f32.mrb[9].mxu1 }
 0x107   :  { %v4591_v61 = vadd.f32 %v3054_v57, %v3053_v55  ;;  %v3056_v62 = vpop.f32.mrb[10].mxu0  ;;  %v3091_v63 = vadd.f32 %v3090_v58, %v3089_v56  ;;  %v3092_v0 = vpop.f32.mrb[10].mxu1  ;;  %v3884_v55 = vld [vmem:[%s4924_s0 + $0x1d0] ss:$52 sps:$4 sm:$0xff]   ;;  %v1733_v56 = vadd.f32 %v4552_v31, %v4599_v2 }
 0x108   :  { %v3057_v3 = vpop.f32.mrb[11].mxu0  ;;  %v3093_v5 = vpop.f32.mrb[11].mxu1 }
 0x109   :  { %v4602_v6 = vadd.f32 %v3091_v63, %v4599_v2  ;;  %v4604_v7 = vadd.f32 %v3057_v3, %v3056_v62  ;;  %v3094_v8 = vadd.f32 %v3093_v5, %v3092_v0  ;;  %v3885_v62 = vld [vmem:[%s4924_s0 + $0x29c] ss:$52 sps:$4 sm:$0xff]  }
 0x10a   :  { %2347 = vmatmul.mubr.bf16.gmra.mrb[116].mxu1 %v3871_v59  ;;  %3545 = vmatmul.mubr.msk.bf16.gmra.mrb[116].mxu0 %vm1664_vm1, %v3872_v60 }
 0x10b   :  { %v4608_v9 = vadd.f32 %v3094_v8, %v4599_v2  ;;  %2354 = vmatprep.mubr.bf16.mxu1 %v3873_v1  ;;  %3548 = vmatprep.mubr.msk.bf16.mxu0 %vm3906_vm0, %v3905_v4  ;;  %v1736_v1 = vadd.f32 %v4559_v38, %v4599_v2  ;;  %v3887_v38 = vld [vmem:[%s4924_s0 + $0x298] ss:$52 sps:$4 sm:$0xff]  }
 0x10d   :  { %v3059_v10 = vpop.f32.mrb[12].mxu0  ;;  %v3095_v11 = vpop.f32.mrb[12].mxu1 }
 0x10e   :  { %v3060_v12 = vpop.f32.mrb[13].mxu0  ;;  %v3096_v13 = vpop.f32.mrb[13].mxu1 }
 0x10f   :  { %v4618_v16 = vadd.f32 %v3060_v12, %v3059_v10  ;;  %v3062_v17 = vpop.f32.mrb[14].mxu0  ;;  %v3097_v18 = vadd.f32 %v3096_v13, %v3095_v11  ;;  %v3098_v19 = vpop.f32.mrb[14].mxu1 }
 0x110   :  { %v3063_v21 = vpop.f32.mrb[15].mxu0  ;;  %v3099_v22 = vpop.f32.mrb[15].mxu1 }
 0x111   :  { %v4624_v23 = vadd.f32 %v3097_v18, %v4599_v2  ;;  %v4626_v24 = vadd.f32 %v3063_v21, %v3062_v17  ;;  %v3100_v25 = vadd.f32 %v3099_v22, %v3098_v19  ;;  %v3889_v21 = vld [vmem:[%s4924_s0 + $0x304] ss:$52 sps:$4 sm:$0xff]   ;;  %v1744_v22 = vadd.f32 %v4578_v53, %v4599_v2 }
 0x112   :  { %2355 = vmatmul.mubr.bf16.gmra.mrb[120].mxu1 %v3875_v14  ;;  %3549 = vmatmul.mubr.msk.bf16.gmra.mrb[120].mxu0 %vm1664_vm1, %v3876_v15  ;;  %v3888_v14 = vld [vmem:[%s4924_s0 + $0x238] ss:$52 sps:$4 sm:$0xff]   ;;  %v1741_v15 = vadd.f32 %v4571_v46, %v4599_v2 }
 0x113   :  { %v4630_v26 = vadd.f32 %v3100_v25, %v4599_v2  ;;  %2362 = vmatprep.mubr.bf16.mxu1 %v3877_v20  ;;  %3552 = vmatprep.mubr.msk.bf16.mxu0 %vm3906_vm0, %v3905_v4 }
 0x115   :  { %v3065_v27 = vpop.f32.mrb[16].mxu0  ;;  %v3101_v28 = vpop.f32.mrb[16].mxu1 }
 0x116   :  { %v3066_v29 = vpop.f32.mrb[17].mxu0  ;;  %v3102_v30 = vpop.f32.mrb[17].mxu1 }
 0x117   :  { %v4640_v35 = vadd.f32 %v3066_v29, %v3065_v27  ;;  %v3068_v36 = vpop.f32.mrb[18].mxu0  ;;  %v3103_v37 = vadd.f32 %v3102_v30, %v3101_v28  ;;  %v3104_v40 = vpop.f32.mrb[18].mxu1 }
 0x118   :  { %v3069_v42 = vpop.f32.mrb[19].mxu0  ;;  %v3105_v43 = vpop.f32.mrb[19].mxu1 }
 0x119   :  { %v4646_v44 = vadd.f32 %v3103_v37, %v4599_v2  ;;  %v4648_v45 = vadd.f32 %v3069_v42, %v3068_v36  ;;  %v3892_v42 = vld [vmem:[%s4924_s0 + $0x2a0] ss:$52 sps:$4 sm:$0xff]   ;;  %v1749_v43 = vadd.f32 %v4591_v61, %v4599_v2 }
 0x11a   :  { %2363 = vmatmul.mubr.bf16.gmra.mrb[124].mxu1 %v3879_v32  ;;  %3553 = vmatmul.mubr.msk.bf16.gmra.mrb[124].mxu0 %vm1664_vm1, %v3880_v34 }
 0x11b   :  { %2370 = vmatprep.mubr.bf16.mxu1 %v3881_v41  ;;  %3556 = vmatprep.mubr.msk.bf16.mxu0 %vm3906_vm0, %v3905_v4  ;;  %v3891_v41 = vld [vmem:[%s4924_s0 + $0x300] ss:$52 sps:$4 sm:$0xff]  }
 0x11d   :  { %v3071_v47 = vpop.f32.mrb[20].mxu0  ;;  %v3123_v49 = vpop.f32.mrb[20].mxu1 }
 0x11e   :  { %v3072_v50 = vpop.f32.mrb[21].mxu0  ;;  %v3124_v51 = vpop.f32.mrb[21].mxu1 }
 0x11f   :  { %v4661_v57 = vadd.f32 %v3072_v50, %v3071_v47  ;;  %v3125_v58 = vadd.f32 %v3124_v51, %v3123_v49  ;;  %v3074_v59 = vpop.f32.mrb[22].mxu0  ;;  %v3126_v60 = vpop.f32.mrb[22].mxu1 }
 0x120   :  { %v3075_v63 = vpop.f32.mrb[23].mxu0  ;;  %v3127_v0 = vpop.f32.mrb[23].mxu1 }
 0x121   :  { %v1853_v3 = vadd.f32 %v3125_v58, %v1733_v56  ;;  %v4668_v5 = vadd.f32 %v3075_v63, %v3074_v59  ;;  %v3128_v8 = vadd.f32 %v3127_v0, %v3126_v60 }
 0x122   :  { %2371 = vmatmul.mubr.bf16.gmra.mrb[128].mxu1 %v3883_v52  ;;  %3557 = vmatmul.mubr.msk.bf16.gmra.mrb[128].mxu0 %vm1664_vm1, %v3884_v55  ;;  %v3893_v52 = vld [vmem:[%s4924_s0 + $0x36c] ss:$52 sps:$4 sm:$0xff]   ;;  %v1752_v55 = vadd.f32 %v4604_v7, %v4599_v2 }
 0x123   :  { %v1856_v31 = vadd.f32 %v3128_v8, %v1736_v1  ;;  %2378 = vmatprep.mubr.bf16.mxu1 %v3885_v62  ;;  %3560 = vmatprep.mubr.msk.bf16.mxu0 %vm3906_vm0, %v3905_v4 }
 0x125   :  { %v3129_v10 = vpop.f32.mrb[24].mxu1  ;;  %v3205_v11 = vpop.f32.mrb[24].mxu0 }
 0x126   :  { %v3130_v12 = vpop.f32.mrb[25].mxu1  ;;  %v3206_v13 = vpop.f32.mrb[25].mxu0 }
 0x127   :  { %v3131_v17 = vadd.f32 %v3130_v12, %v3129_v10  ;;  %v3207_v18 = vadd.f32 %v3206_v13, %v3205_v11  ;;  %v3132_v19 = vpop.f32.mrb[26].mxu1  ;;  %v3208_v20 = vpop.f32.mrb[26].mxu0  ;;  %v3896_v10 = vld [vmem:[%s4924_s0 + $0x308] ss:$52 sps:$4 sm:$0xff]   ;;  %v1757_v11 = vadd.f32 %v4618_v16, %v4599_v2 }
 0x128   :  { %v3133_v25 = vpop.f32.mrb[27].mxu1  ;;  %v3209_v27 = vpop.f32.mrb[27].mxu0 }
 0x129   :  { %v1861_v28 = vadd.f32 %v3131_v17, %v1741_v15  ;;  %v4686_v29 = vadd.f32 %v3207_v18, %v1853_v3  ;;  %v3134_v30 = vadd.f32 %v3133_v25, %v3132_v19  ;;  %v3210_v32 = vadd.f32 %v3209_v27, %v3208_v20  ;;  %v3897_v15 = vld [vmem:[%s4924_s0 + $0x3d4] ss:$52 sps:$4 sm:$0xff]  }
 0x12a   :  { %2379 = vmatmul.mubr.bf16.gmra.mrb[132].mxu1 %v3887_v38  ;;  %3561 = vmatmul.mubr.msk.bf16.gmra.mrb[132].mxu0 %vm1664_vm1, %v3888_v14  ;;  %v1760_v17 = vadd.f32 %v4626_v24, %v4599_v2  ;;  %v160_v24 = vld [vmem:[%s4924_s0 + $0x438] sm:$0x11] }
 0x12b   :  { %v1864_v46 = vadd.f32 %v3134_v30, %v1744_v22  ;;  %v4689_v34 = vadd.f32 %v3210_v32, %v1856_v31  ;;  %2386 = vmatprep.mubr.bf16.mxu1 %v3889_v21  ;;  %3564 = vmatprep.mubr.msk.bf16.mxu0 %vm3906_vm0, %v3905_v4  ;;  %v3895_v31 = vld [vmem:[%s4924_s0 + $0x368] ss:$52 sps:$4 sm:$0xff]  }
 0x12d   :  { %v3135_v36 = vpop.f32.mrb[28].mxu1  ;;  %v3211_v37 = vpop.f32.mrb[28].mxu0 }
 0x12e   :  { %v3136_v53 = vpop.f32.mrb[29].mxu1  ;;  %v3212_v40 = vpop.f32.mrb[29].mxu0 }
 0x12f   :  { %v3137_v47 = vadd.f32 %v3136_v53, %v3135_v36  ;;  %v3213_v49 = vadd.f32 %v3212_v40, %v3211_v37  ;;  %v3138_v50 = vpop.f32.mrb[30].mxu1  ;;  %v3214_v51 = vpop.f32.mrb[30].mxu0  ;;  %v3899_v36 = vld [vmem:[%s4924_s0 + $0x3d0] ss:$52 sps:$4 sm:$0xff]   ;;  %v1765_v53 = vadd.f32 %v4640_v35, %v4599_v2 }
 0x130   :  { %v3139_v56 = vpop.f32.mrb[31].mxu1  ;;  %v3215_v58 = vpop.f32.mrb[31].mxu0  ;;  %v3900_v37 = vld [vmem:[%s4924_s0 + $0x370] ss:$52 sps:$4 sm:$0xff]  }
 0x131   :  { %v1869_v59 = vadd.f32 %v3137_v47, %v1749_v43  ;;  %v4706_v60 = vadd.f32 %v3213_v49, %v1861_v28  ;;  %v3140_v62 = vadd.f32 %v3139_v56, %v3138_v50  ;;  %v3216_v63 = vadd.f32 %v3215_v58, %v3214_v51 }
 0x132   :  { %2387 = vmatmul.mubr.bf16.gmra.mrb[136].mxu1 %v3891_v41  ;;  %3565 = vmatmul.mubr.msk.bf16.gmra.mrb[136].mxu0 %vm1664_vm1, %v3892_v42  ;;  %v2811_v47 = vcombine.high %v160_v24, %v160_v24  ;;  %v1768_v49 = vadd.f32 %v4648_v45, %v4599_v2 }
 0x133   :  { %v1872_v61 = vadd.f32 %v3140_v62, %v1752_v55  ;;  %v4709_v0 = vadd.f32 %v3216_v63, %v1864_v46  ;;  %2394 = vmatprep.mubr.bf16.mxu1 %v3893_v52  ;;  %3568 = vmatprep.mubr.msk.bf16.mxu0 %vm3906_vm0, %v3905_v4 }
 0x135   :  { %v3141_v1 = vpop.f32.mrb[32].mxu1  ;;  %v3217_v3 = vpop.f32.mrb[32].mxu0 }
 0x136   :  { %v3142_v7 = vpop.f32.mrb[33].mxu1  ;;  %v3218_v8 = vpop.f32.mrb[33].mxu0 }
 0x137   :  { %v3143_v12 = vadd.f32 %v3142_v7, %v3141_v1  ;;  %v3219_v13 = vadd.f32 %v3218_v8, %v3217_v3  ;;  %v3144_v38 = vpop.f32.mrb[34].mxu1  ;;  %v3220_v14 = vpop.f32.mrb[34].mxu0  ;;  %v2810_v1 = vcombine.low %v160_v24, %v160_v24  ;;  %v3903_v3 = vld [vmem:[%s4924_s0 + $0x3d8] ss:$52 sps:$4 sm:$0xff]   ;;  %v1773_v7 = vadd.f32 %v4661_v57, %v4599_v2 }
 0x138   :  { %v3145_v18 = vpop.f32.mrb[35].mxu1  ;;  %v3221_v19 = vpop.f32.mrb[35].mxu0  ;;  %v1781_v24 = vadd.f32 %v4554_v33, %v4599_v2 }
 0x139   :  { %v1877_v20 = vadd.f32 %v3143_v12, %v1757_v11  ;;  %v4726_v21 = vadd.f32 %v3219_v13, %v1869_v59  ;;  %v3146_v22 = vadd.f32 %v3145_v18, %v3144_v38  ;;  %v3222_v25 = vadd.f32 %v3221_v19, %v3220_v14 }
 0x13a   :  { %2395 = vmatmul.mubr.bf16.gmra.mrb[140].mxu1 %v3895_v31  ;;  %3569 = vmatmul.mubr.msk.bf16.gmra.mrb[140].mxu0 %vm1664_vm1, %v3896_v10  ;;  %v1776_v12 = vadd.f32 %v4668_v5, %v4599_v2 }
 0x13b   :  { %v1880_v16 = vadd.f32 %v3146_v22, %v1760_v17  ;;  %v4729_v27 = vadd.f32 %v3222_v25, %v1872_v61  ;;  %2402 = vmatprep.mubr.bf16.mxu1 %v3897_v15  ;;  %3572 = vmatprep.mubr.msk.bf16.mxu0 %vm3906_vm0, %v3905_v4 }
 0x13d   :  { %v3147_v28 = vpop.f32.mrb[36].mxu1  ;;  %v3223_v30 = vpop.f32.mrb[36].mxu0 }
 0x13e   :  { %v3148_v32 = vpop.f32.mrb[37].mxu1  ;;  %v3224_v46 = vpop.f32.mrb[37].mxu0 }
 0x13f   :  { %v3149_v40 = vadd.f32 %v3148_v32, %v3147_v28  ;;  %v3225_v41 = vadd.f32 %v3224_v46, %v3223_v30  ;;  %v3150_v42 = vpop.f32.mrb[38].mxu1  ;;  %v3226_v43 = vpop.f32.mrb[38].mxu0 }
 0x140   :  { %v3151_v50 = vpop.f32.mrb[39].mxu1  ;;  %v3227_v51 = vpop.f32.mrb[39].mxu0 }
 0x141   :  { %v1885_v52 = vadd.f32 %v3149_v40, %v1765_v53  ;;  %v4746_v55 = vadd.f32 %v3225_v41, %v1877_v20  ;;  %v3152_v56 = vadd.f32 %v3151_v50, %v3150_v42  ;;  %v3228_v58 = vadd.f32 %v3227_v51, %v3226_v43 }
 0x142   :  { %2403 = vmatmul.mubr.bf16.gmra.mrb[144].mxu1 %v3899_v36  ;;  %3573 = vmatmul.mubr.msk.bf16.gmra.mrb[144].mxu0 %vm1664_vm1, %v3900_v37  ;;  %v1784_v36 = vadd.f32 %v4561_v39, %v4599_v2 }
 0x143   :  { %v1888_v59 = vadd.f32 %v3152_v56, %v1768_v49  ;;  %v4749_v35 = vadd.f32 %v3228_v58, %v1880_v16  ;;  %2410 = vmatprep.mubr.bf16.mxu1 %v2811_v47  ;;  %3576 = vmatprep.mubr.msk.bf16.mxu0 %vm3906_vm0, %v3905_v4  ;;  %v3904_v16 = vld [vmem:[%s4924_s0 + $0x440] ss:$0 sps:$4 sm:$0x11]  }
 0x145   :  { %v3153_v62 = vpop.f32.mrb[40].mxu1  ;;  %v3229_v63 = vpop.f32.mrb[40].mxu0 }
 0x146   :  { %v3154_v45 = vpop.f32.mrb[41].mxu1  ;;  %v3230_v61 = vpop.f32.mrb[41].mxu0 }
 0x147   :  { %v3155_v8 = vadd.f32 %v3154_v45, %v3153_v62  ;;  %v3231_v31 = vadd.f32 %v3230_v61, %v3229_v63  ;;  %v3156_v10 = vpop.f32.mrb[42].mxu1  ;;  %v3232_v11 = vpop.f32.mrb[42].mxu0  ;;  %v1792_v62 = vadd.f32 %v4580_v54, %v4599_v2 }
 0x148   :  { %v3157_v13 = vpop.f32.mrb[43].mxu1  ;;  %v3233_v38 = vpop.f32.mrb[43].mxu0 }
 0x149   :  { %v1893_v14 = vadd.f32 %v3155_v8, %v1773_v7  ;;  %v4760_v15 = vadd.f32 %v3231_v31, %v1885_v52  ;;  %v3158_v17 = vadd.f32 %v3157_v13, %v3156_v10  ;;  %v3234_v18 = vadd.f32 %v3233_v38, %v3232_v11 }
 0x14a   :  { %2411 = vmatmul.mubr.bf16.gmra.mrb[148].mxu1 %v2810_v1  ;;  %3577 = vmatmul.mubr.msk.bf16.gmra.mrb[148].mxu0 %vm1664_vm1, %v3903_v3  ;;  %v1789_v52 = vadd.f32 %v4573_v48, %v4599_v2 }
 0x14b   :  { %v1896_v19 = vadd.f32 %v3158_v17, %v1776_v12  ;;  %v4763_v20 = vadd.f32 %v3234_v18, %v1888_v59  ;;  %3580 = vmatprep.mubr.msk.bf16.mxu0 %vm3906_vm0, %v3905_v4 }
 0x14d   :  { %v3159_v57 = vpop.f32.mrb[44].mxu1  ;;  %v3235_v22 = vpop.f32.mrb[44].mxu0 }
 0x14e   :  { %v3160_v25 = vpop.f32.mrb[45].mxu1  ;;  %v3236_v5 = vpop.f32.mrb[45].mxu0 }
 0x14f   :  { %v3161_v28 = vadd.f32 %v3160_v25, %v3159_v57  ;;  %v3237_v30 = vadd.f32 %v3236_v5, %v3235_v22  ;;  %v3162_v32 = vpop.f32.mrb[46].mxu1  ;;  %v3238_v46 = vpop.f32.mrb[46].mxu0 }
 0x150   :  { %v3163_v37 = vpop.f32.mrb[47].mxu1  ;;  %v3239_v4 = vpop.f32.mrb[47].mxu0 }
 0x151   :  { %v1901_v53 = vadd.f32 %v3161_v28, %v1781_v24  ;;  %v4774_v40 = vadd.f32 %v3237_v30, %v1893_v14  ;;  %v3164_v41 = vadd.f32 %v3163_v37, %v3162_v32  ;;  %v3240_v42 = vadd.f32 %v3239_v4, %v3238_v46 }
 0x152   :  { %3581 = vmatmul.mubr.msk.bf16.gmra.mrb[152].mxu0 %vm1664_vm1, %v3904_v16 }
 0x153   :  { %v1904_v43 = vadd.f32 %v3164_v41, %v1784_v36  ;;  %v4777_v47 = vadd.f32 %v3240_v42, %v1896_v19 }
 0x155   :  { %v3165_v33 = vpop.f32.mrb[48].mxu1  ;;  %v3241_v49 = vpop.f32.mrb[48].mxu0 }
 0x156   :  { %v3166_v50 = vpop.f32.mrb[49].mxu1  ;;  %v3242_v51 = vpop.f32.mrb[49].mxu0 }
 0x157   :  { %v3167_v39 = vadd.f32 %v3166_v50, %v3165_v33  ;;  %v3243_v56 = vadd.f32 %v3242_v51, %v3241_v49  ;;  %v3168_v58 = vpop.f32.mrb[50].mxu1  ;;  %v3244_v59 = vpop.f32.mrb[50].mxu0 }
 0x158   :  { %v3169_v63 = vpop.f32.mrb[51].mxu1  ;;  %v3245_v45 = vpop.f32.mrb[51].mxu0 }
 0x159   :  { %v1909_v61 = vadd.f32 %v3167_v39, %v1789_v52  ;;  %v4783_v1 = vadd.f32 %v3243_v56, %v1901_v53  ;;  %v3170_v3 = vadd.f32 %v3169_v63, %v3168_v58  ;;  %v3246_v7 = vadd.f32 %v3245_v45, %v3244_v59 }
 0x15b   :  { %v1912_v8 = vadd.f32 %v3170_v3, %v1792_v62  ;;  %v4785_v31 = vadd.f32 %v3246_v7, %v1904_v43 }
 0x15d   :  { %v3171_v10 = vpop.f32.mrb[52].mxu1  ;;  %v3247_v11 = vpop.f32.mrb[52].mxu0 }
 0x15e   :  { %v3172_v48 = vpop.f32.mrb[53].mxu1  ;;  %v3248_v12 = vpop.f32.mrb[53].mxu0 }
 0x15f   :  { %v3173_v13 = vadd.f32 %v3172_v48, %v3171_v10  ;;  %v3249_v38 = vadd.f32 %v3248_v12, %v3247_v11  ;;  %v3174_v14 = vpop.f32.mrb[54].mxu1  ;;  %v3250_v17 = vpop.f32.mrb[54].mxu0 }
 0x160   :  { %v3175_v18 = vpop.f32.mrb[55].mxu1  ;;  %v3251_v54 = vpop.f32.mrb[55].mxu0 }
 0x161   :  { %v1917_v2 = vadd.f32 %v3173_v13, %v4602_v6  ;;  %v4788_v19 = vadd.f32 %v3249_v38, %v1909_v61  ;;  %v3176_v57 = vadd.f32 %v3175_v18, %v3174_v14  ;;  %v3252_v22 = vadd.f32 %v3251_v54, %v3250_v17 }
 0x163   :  { %v1920_v25 = vadd.f32 %v3176_v57, %v4608_v9  ;;  %v4791_v5 = vadd.f32 %v3252_v22, %v1912_v8 }
 0x165   :  { %v3177_v16 = vpop.f32.mrb[56].mxu1  ;;  %v3253_v24 = vpop.f32.mrb[56].mxu0 }
 0x166   :  { %v3178_v28 = vpop.f32.mrb[57].mxu1  ;;  %v3254_v30 = vpop.f32.mrb[57].mxu0 }
 0x167   :  { %v3179_v32 = vadd.f32 %v3178_v28, %v3177_v16  ;;  %v3255_v46 = vadd.f32 %v3254_v30, %v3253_v24  ;;  %v3180_v36 = vpop.f32.mrb[58].mxu1  ;;  %v3256_v37 = vpop.f32.mrb[58].mxu0 }
 0x168   :  { %v3181_v4 = vpop.f32.mrb[59].mxu1  ;;  %v3257_v53 = vpop.f32.mrb[59].mxu0 }
 0x169   :  { %v1925_v6 = vadd.f32 %v3179_v32, %v4624_v23  ;;  %v4794_v41 = vadd.f32 %v3255_v46, %v1917_v2  ;;  %v3182_v42 = vadd.f32 %v3181_v4, %v3180_v36  ;;  %v3258_v43 = vadd.f32 %v3257_v53, %v3256_v37 }
 0x16b   :  { %v1928_v9 = vadd.f32 %v3182_v42, %v4630_v26  ;;  %v4797_v33 = vadd.f32 %v3258_v43, %v1920_v25 }
 0x16d   :  { %v3183_v49 = vpop.f32.mrb[60].mxu1  ;;  %v3259_v50 = vpop.f32.mrb[60].mxu0 }
 0x16e   :  { %v3184_v51 = vpop.f32.mrb[61].mxu1  ;;  %v3260_v52 = vpop.f32.mrb[61].mxu0 }
 0x16f   :  { %v3185_v39 = vadd.f32 %v3184_v51, %v3183_v49  ;;  %v3261_v56 = vadd.f32 %v3260_v52, %v3259_v50  ;;  %v3262_v58 = vpop.f32.mrb[62].mxu0  ;;  %v3186_v59 = vpop.f32.mrb[62].mxu1 }
 0x170   :  { %v3263_v62 = vpop.f32.mrb[63].mxu0  ;;  %v3187_v63 = vpop.f32.mrb[63].mxu1 }
 0x171   :  { %v1933_v23 = vadd.f32 %v3185_v39, %v4646_v44  ;;  %v4800_v45 = vadd.f32 %v3261_v56, %v1925_v6  ;;  %v3264_v61 = vadd.f32 %v3263_v62, %v3262_v58 }
 0x173   :  { %v4802_v3 = vadd.f32 %v3264_v61, %v1928_v9 }
 0x175   :  { %v3265_v26 = vpop.f32.mrb[64].mxu0  ;;  %v3287_v7 = vpop.f32.mrb[64].mxu1 }
 0x176   :  { %v3266_v8 = vpop.f32.mrb[65].mxu0  ;;  %v3288_v10 = vpop.f32.mrb[65].mxu1 }
 0x177   :  { %v3267_v11 = vadd.f32 %v3266_v8, %v3265_v26  ;;  %v3289_v48 = vadd.f32 %v3288_v10, %v3287_v7  ;;  %v3268_v12 = vpop.f32.mrb[66].mxu0  ;;  %v3290_v13 = vpop.f32.mrb[66].mxu1 }
 0x178   :  { %v3269_v38 = vpop.f32.mrb[67].mxu0  ;;  %v3291_v14 = vpop.f32.mrb[67].mxu1 }
 0x179   :  { %v4804_v17 = vadd.f32 %v3267_v11, %v1933_v23  ;;  %v2093_v18 = vadd.f32 %v3289_v48, %v4686_v29  ;;  %v3292_v44 = vadd.f32 %v3291_v14, %v3290_v13 }
 0x17b   :  { %v2096_v54 = vadd.f32 %v3292_v44, %v4689_v34 }
 0x17d   :  { %v3293_v2 = vpop.f32.mrb[68].mxu1  ;;  %v3369_v57 = vpop.f32.mrb[68].mxu0 }
 0x17e   :  { %v3294_v22 = vpop.f32.mrb[69].mxu1  ;;  %v3370_v25 = vpop.f32.mrb[69].mxu0 }
 0x17f   :  { %v3295_v16 = vadd.f32 %v3294_v22, %v3293_v2  ;;  %v3371_v24 = vadd.f32 %v3370_v25, %v3369_v57  ;;  %v3296_v28 = vpop.f32.mrb[70].mxu1  ;;  %v3372_v30 = vpop.f32.mrb[70].mxu0 }
 0x180   :  { %v3297_v32 = vpop.f32.mrb[71].mxu1  ;;  %v3373_v46 = vpop.f32.mrb[71].mxu0 }
 0x181   :  { %v2101_v36 = vadd.f32 %v3295_v16, %v4706_v60  ;;  %v4809_v37 = vadd.f32 %v3371_v24, %v2093_v18  ;;  %v3298_v4 = vadd.f32 %v3297_v32, %v3296_v28  ;;  %v3374_v53 = vadd.f32 %v3373_v46, %v3372_v30 }
 0x183   :  { %v2104_v29 = vadd.f32 %v3298_v4, %v4709_v0  ;;  %v4812_v6 = vadd.f32 %v3374_v53, %v2096_v54 }
 0x185   :  { %v3299_v34 = vpop.f32.mrb[72].mxu1  ;;  %v3375_v42 = vpop.f32.mrb[72].mxu0 }
 0x186   :  { %v3300_v43 = vpop.f32.mrb[73].mxu1  ;;  %v3376_v9 = vpop.f32.mrb[73].mxu0 }
 0x187   :  { %v3301_v49 = vadd.f32 %v3300_v43, %v3299_v34  ;;  %v3377_v50 = vadd.f32 %v3376_v9, %v3375_v42  ;;  %v3302_v51 = vpop.f32.mrb[74].mxu1  ;;  %v3378_v52 = vpop.f32.mrb[74].mxu0 }
 0x188   :  { %v3303_v39 = vpop.f32.mrb[75].mxu1  ;;  %v3379_v56 = vpop.f32.mrb[75].mxu0 }
 0x189   :  { %v2109_v60 = vadd.f32 %v3301_v49, %v4726_v21  ;;  %v4815_v58 = vadd.f32 %v3377_v50, %v2101_v36  ;;  %v3304_v59 = vadd.f32 %v3303_v39, %v3302_v51  ;;  %v3380_v62 = vadd.f32 %v3379_v56, %v3378_v52 }
 0x18b   :  { %v2112_v0 = vadd.f32 %v3304_v59, %v4729_v27  ;;  %v4818_v63 = vadd.f32 %v3380_v62, %v2104_v29 }
 0x18d   :  { %v3305_v23 = vpop.f32.mrb[76].mxu1  ;;  %v3381_v61 = vpop.f32.mrb[76].mxu0 }
 0x18e   :  { %v3306_v26 = vpop.f32.mrb[77].mxu1  ;;  %v3382_v7 = vpop.f32.mrb[77].mxu0 }
 0x18f   :  { %v3307_v8 = vadd.f32 %v3306_v26, %v3305_v23  ;;  %v3383_v10 = vadd.f32 %v3382_v7, %v3381_v61  ;;  %v3308_v11 = vpop.f32.mrb[78].mxu1  ;;  %v3384_v48 = vpop.f32.mrb[78].mxu0 }
 0x190   :  { %v3309_v12 = vpop.f32.mrb[79].mxu1  ;;  %v3385_v13 = vpop.f32.mrb[79].mxu0 }
 0x191   :  { %v2117_v21 = vadd.f32 %v3307_v8, %v4746_v55  ;;  %v4821_v38 = vadd.f32 %v3383_v10, %v2109_v60  ;;  %v3310_v14 = vadd.f32 %v3309_v12, %v3308_v11  ;;  %v3386_v18 = vadd.f32 %v3385_v13, %v3384_v48 }
 0x193   :  { %v2120_v27 = vadd.f32 %v3310_v14, %v4749_v35  ;;  %v4824_v44 = vadd.f32 %v3386_v18, %v2112_v0 }
 0x195   :  { %v3311_v54 = vpop.f32.mrb[80].mxu1  ;;  %v3387_v2 = vpop.f32.mrb[80].mxu0 }
 0x196   :  { %v3312_v57 = vpop.f32.mrb[81].mxu1  ;;  %v3388_v22 = vpop.f32.mrb[81].mxu0 }
 0x197   :  { %v3313_v25 = vadd.f32 %v3312_v57, %v3311_v54  ;;  %v3389_v16 = vadd.f32 %v3388_v22, %v3387_v2  ;;  %v3314_v24 = vpop.f32.mrb[82].mxu1  ;;  %v3390_v28 = vpop.f32.mrb[82].mxu0 }
 0x198   :  { %v3315_v30 = vpop.f32.mrb[83].mxu1  ;;  %v3391_v32 = vpop.f32.mrb[83].mxu0 }
 0x199   :  { %v2125_v55 = vadd.f32 %v3313_v25, %v4760_v15  ;;  %v4827_v46 = vadd.f32 %v3389_v16, %v2117_v21  ;;  %v3316_v36 = vadd.f32 %v3315_v30, %v3314_v24  ;;  %v3392_v4 = vadd.f32 %v3391_v32, %v3390_v28 }
 0x19b   :  { %v2128_v35 = vadd.f32 %v3316_v36, %v4763_v20  ;;  %v4830_v53 = vadd.f32 %v3392_v4, %v2120_v27 }
 0x19d   :  { %v3317_v29 = vpop.f32.mrb[84].mxu1  ;;  %v3393_v34 = vpop.f32.mrb[84].mxu0 }
 0x19e   :  { %v3318_v42 = vpop.f32.mrb[85].mxu1  ;;  %v3394_v43 = vpop.f32.mrb[85].mxu0 }
 0x19f   :  { %v3319_v9 = vadd.f32 %v3318_v42, %v3317_v29  ;;  %v3395_v49 = vadd.f32 %v3394_v43, %v3393_v34  ;;  %v3320_v50 = vpop.f32.mrb[86].mxu1  ;;  %v3396_v51 = vpop.f32.mrb[86].mxu0 }
 0x1a0   :  { %v3321_v52 = vpop.f32.mrb[87].mxu1  ;;  %v3397_v39 = vpop.f32.mrb[87].mxu0 }
 0x1a1   :  { %v2133_v15 = vadd.f32 %v3319_v9, %v4774_v40  ;;  %v4833_v56 = vadd.f32 %v3395_v49, %v2125_v55  ;;  %v3322_v60 = vadd.f32 %v3321_v52, %v3320_v50  ;;  %v3398_v59 = vadd.f32 %v3397_v39, %v3396_v51 }
 0x1a3   :  { %v2136_v20 = vadd.f32 %v3322_v60, %v4777_v47  ;;  %v4836_v62 = vadd.f32 %v3398_v59, %v2128_v35 }
 0x1a5   :  { %v3323_v0 = vpop.f32.mrb[88].mxu1  ;;  %v3399_v23 = vpop.f32.mrb[88].mxu0 }
 0x1a6   :  { %v3324_v61 = vpop.f32.mrb[89].mxu1  ;;  %v3400_v26 = vpop.f32.mrb[89].mxu0 }
 0x1a7   :  { %v3325_v7 = vadd.f32 %v3324_v61, %v3323_v0  ;;  %v3401_v8 = vadd.f32 %v3400_v26, %v3399_v23  ;;  %v3326_v10 = vpop.f32.mrb[90].mxu1  ;;  %v3402_v11 = vpop.f32.mrb[90].mxu0 }
 0x1a8   :  { %v3327_v48 = vpop.f32.mrb[91].mxu1  ;;  %v3403_v12 = vpop.f32.mrb[91].mxu0 }
 0x1a9   :  { %v2141_v40 = vadd.f32 %v3325_v7, %v4783_v1  ;;  %v4839_v13 = vadd.f32 %v3401_v8, %v2133_v15  ;;  %v3328_v21 = vadd.f32 %v3327_v48, %v3326_v10  ;;  %v3404_v14 = vadd.f32 %v3403_v12, %v3402_v11 }
 0x1ab   :  { %v2144_v47 = vadd.f32 %v3328_v21, %v4785_v31  ;;  %v4842_v18 = vadd.f32 %v3404_v14, %v2136_v20 }
 0x1ad   :  { %v3329_v27 = vpop.f32.mrb[92].mxu1  ;;  %v3405_v54 = vpop.f32.mrb[92].mxu0 }
 0x1ae   :  { %v3330_v2 = vpop.f32.mrb[93].mxu1  ;;  %v3406_v57 = vpop.f32.mrb[93].mxu0 }
 0x1af   :  { %v3331_v22 = vadd.f32 %v3330_v2, %v3329_v27  ;;  %v3407_v25 = vadd.f32 %v3406_v57, %v3405_v54  ;;  %v3332_v16 = vpop.f32.mrb[94].mxu1  ;;  %v3408_v24 = vpop.f32.mrb[94].mxu0 }
 0x1b0   :  { %v3333_v28 = vpop.f32.mrb[95].mxu1  ;;  %v3409_v30 = vpop.f32.mrb[95].mxu0 }
 0x1b1   :  { %v2149_v1 = vadd.f32 %v3331_v22, %v4788_v19  ;;  %v4845_v32 = vadd.f32 %v3407_v25, %v2141_v40  ;;  %v3334_v55 = vadd.f32 %v3333_v28, %v3332_v16  ;;  %v3410_v36 = vadd.f32 %v3409_v30, %v3408_v24 }
 0x1b3   :  { %v2152_v31 = vadd.f32 %v3334_v55, %v4791_v5  ;;  %v4848_v4 = vadd.f32 %v3410_v36, %v2144_v47 }
 0x1b5   :  { %v3335_v35 = vpop.f32.mrb[96].mxu1  ;;  %v3411_v29 = vpop.f32.mrb[96].mxu0 }
 0x1b6   :  { %v3336_v34 = vpop.f32.mrb[97].mxu1  ;;  %v3412_v42 = vpop.f32.mrb[97].mxu0 }
 0x1b7   :  { %v3337_v43 = vadd.f32 %v3336_v34, %v3335_v35  ;;  %v3413_v9 = vadd.f32 %v3412_v42, %v3411_v29  ;;  %v3338_v49 = vpop.f32.mrb[98].mxu1  ;;  %v3414_v50 = vpop.f32.mrb[98].mxu0 }
 0x1b8   :  { %v3339_v51 = vpop.f32.mrb[99].mxu1  ;;  %v3415_v52 = vpop.f32.mrb[99].mxu0 }
 0x1b9   :  { %v2157_v19 = vadd.f32 %v3337_v43, %v4794_v41  ;;  %v4851_v39 = vadd.f32 %v3413_v9, %v2149_v1  ;;  %v3340_v15 = vadd.f32 %v3339_v51, %v3338_v49  ;;  %v3416_v60 = vadd.f32 %v3415_v52, %v3414_v50 }
 0x1bb   :  { %v2160_v5 = vadd.f32 %v3340_v15, %v4797_v33  ;;  %v4854_v59 = vadd.f32 %v3416_v60, %v2152_v31 }
 0x1bd   :  { %v3341_v20 = vpop.f32.mrb[100].mxu1  ;;  %v3417_v0 = vpop.f32.mrb[100].mxu0 }
 0x1be   :  { %v3342_v23 = vpop.f32.mrb[101].mxu1  ;;  %v3418_v61 = vpop.f32.mrb[101].mxu0 }
 0x1bf   :  { %v3343_v26 = vadd.f32 %v3342_v23, %v3341_v20  ;;  %v3419_v7 = vadd.f32 %v3418_v61, %v3417_v0  ;;  %v3344_v8 = vpop.f32.mrb[102].mxu1  ;;  %v3420_v10 = vpop.f32.mrb[102].mxu0 }
 0x1c0   :  { %v3345_v11 = vpop.f32.mrb[103].mxu1  ;;  %v3421_v48 = vpop.f32.mrb[103].mxu0 }
 0x1c1   :  { %v2165_v41 = vadd.f32 %v3343_v26, %v4800_v45  ;;  %v4857_v12 = vadd.f32 %v3419_v7, %v2157_v19  ;;  %v3346_v40 = vadd.f32 %v3345_v11, %v3344_v8  ;;  %v3422_v21 = vadd.f32 %v3421_v48, %v3420_v10 }
 0x1c3   :  { %v2168_v33 = vadd.f32 %v3346_v40, %v4802_v3  ;;  %v4860_v14 = vadd.f32 %v3422_v21, %v2160_v5 }
 0x1c5   :  { %v3347_v47 = vpop.f32.mrb[104].mxu1  ;;  %v3423_v27 = vpop.f32.mrb[104].mxu0 }
 0x1c6   :  { %v3348_v54 = vpop.f32.mrb[105].mxu1  ;;  %v3424_v2 = vpop.f32.mrb[105].mxu0 }
 0x1c7   :  { %v3349_v57 = vadd.f32 %v3348_v54, %v3347_v47  ;;  %v3425_v22 = vadd.f32 %v3424_v2, %v3423_v27  ;;  %v3426_v25 = vpop.f32.mrb[106].mxu0  ;;  %v3350_v16 = vpop.f32.mrb[106].mxu1 }
 0x1c8   :  { %v3427_v24 = vpop.f32.mrb[107].mxu0  ;;  %v3351_v28 = vpop.f32.mrb[107].mxu1 }
 0x1c9   :  { %v2173_v45 = vadd.f32 %v3349_v57, %v4804_v17  ;;  %v4863_v30 = vadd.f32 %v3425_v22, %v2165_v41  ;;  %v3428_v1 = vadd.f32 %v3427_v24, %v3426_v25 }
 0x1cb   :  { %v4865_v55 = vadd.f32 %v3428_v1, %v2168_v33 }
 0x1cd   :  { %v3429_v3 = vpop.f32.mrb[108].mxu0  ;;  %v3451_v36 = vpop.f32.mrb[108].mxu1 }
 0x1ce   :  { %v3430_v31 = vpop.f32.mrb[109].mxu0  ;;  %v3452_v35 = vpop.f32.mrb[109].mxu1 }
 0x1cf   :  { %v3431_v29 = vadd.f32 %v3430_v31, %v3429_v3  ;;  %v3453_v34 = vadd.f32 %v3452_v35, %v3451_v36  ;;  %v3432_v42 = vpop.f32.mrb[110].mxu0  ;;  %v3454_v43 = vpop.f32.mrb[110].mxu1 }
 0x1d0   :  { %v3433_v9 = vpop.f32.mrb[111].mxu0  ;;  %v3455_v49 = vpop.f32.mrb[111].mxu1 }
 0x1d1   :  { %v4867_v50 = vadd.f32 %v3431_v29, %v2173_v45  ;;  %v3456_v51 = vadd.f32 %v3455_v49, %v3454_v43  ;;  %v2333_v17 = vadd.f32 %v3453_v34, %v4809_v37 }
 0x1d3   :  { %v2336_v52 = vadd.f32 %v3456_v51, %v4812_v6 }
 0x1d5   :  { %v3457_v19 = vpop.f32.mrb[112].mxu1  ;;  %v2452_v15 = vpop.f32.mrb[112].mxu0 }
 0x1d6   :  { %v2453_v60 = vadd.f32 %v2452_v15, %v2333_v17  ;;  %v3458_v5 = vpop.f32.mrb[113].mxu1  ;;  %v3542_v20 = vpop.f32.mrb[113].mxu0 }
 0x1d7   :  { %v3459_v0 = vadd.f32 %v3458_v5, %v3457_v19  ;;  %v3460_v23 = vpop.f32.mrb[114].mxu1  ;;  %v2455_v61 = vpop.f32.mrb[114].mxu0 }
 0x1d8   :  { %v2456_v26 = vadd.f32 %v2455_v61, %v2336_v52  ;;  %v3461_v7 = vpop.f32.mrb[115].mxu1  ;;  %v3543_v8 = vpop.f32.mrb[115].mxu0  ;;  %v2538_v48 = vmax.f32 %v2453_v60, 0.0 }
 0x1d9   :  { %v3462_v10 = vadd.f32 %v3461_v7, %v3460_v23  ;;  %v2341_v11 = vadd.f32 %v3459_v0, %v4815_v58 }
 0x1da   :  { %v2539_v41 = vmax.f32 %v2456_v26, 0.0 }
 0x1db   :  { %v2344_v37 = vadd.f32 %v3462_v10, %v4818_v63 }
 0x1dc   :  { %v2969_v40 = vpack.c.bf16 %v2539_v41, %v2538_v48 }
 0x1dd   :  { %v3463_v6 = vpop.f32.mrb[116].mxu1  ;;  %v2460_v21 = vpop.f32.mrb[116].mxu0 }
 0x1de   :  { %2970 = vst [vmem:[%s4926_s3] sm:$0xff] %v2969_v40   ;;  %v2461_v33 = vadd.f32 %v2460_v21, %v2341_v11  ;;  %v3464_v47 = vpop.f32.mrb[117].mxu1  ;;  %v3546_v27 = vpop.f32.mrb[117].mxu0 }
 0x1df   :  { %v3465_v54 = vadd.f32 %v3464_v47, %v3463_v6  ;;  %v3466_v2 = vpop.f32.mrb[118].mxu1  ;;  %v2463_v57 = vpop.f32.mrb[118].mxu0 }
 0x1e0   :  { %v2464_v22 = vadd.f32 %v2463_v57, %v2344_v37  ;;  %v3467_v25 = vpop.f32.mrb[119].mxu1  ;;  %v3547_v58 = vpop.f32.mrb[119].mxu0  ;;  %v2540_v63 = vmax.f32 %v2461_v33, 0.0 }
 0x1e1   :  { %v3468_v16 = vadd.f32 %v3467_v25, %v3466_v2  ;;  %v2349_v24 = vadd.f32 %v3465_v54, %v4821_v38 }
 0x1e2   :  { %v2541_v28 = vmax.f32 %v2464_v22, 0.0 }
 0x1e3   :  { %v2352_v45 = vadd.f32 %v3468_v16, %v4824_v44 }
 0x1e4   :  { %v2974_v1 = vpack.c.bf16 %v2541_v28, %v2540_v63 }
 0x1e5   :  { %v3469_v3 = vpop.f32.mrb[120].mxu1  ;;  %v2468_v36 = vpop.f32.mrb[120].mxu0 }
 0x1e6   :  { %3016 = vst [vmem:[%s4926_s3 + $0x8] sm:$0xff] %v2974_v1   ;;  %v2469_v31 = vadd.f32 %v2468_v36, %v2349_v24  ;;  %v3470_v35 = vpop.f32.mrb[121].mxu1  ;;  %v3550_v29 = vpop.f32.mrb[121].mxu0 }
 0x1e7   :  { %v3471_v34 = vadd.f32 %v3470_v35, %v3469_v3  ;;  %v3472_v42 = vpop.f32.mrb[122].mxu1  ;;  %v2471_v43 = vpop.f32.mrb[122].mxu0 }
 0x1e8   :  { %v2472_v9 = vadd.f32 %v2471_v43, %v2352_v45  ;;  %v3473_v49 = vpop.f32.mrb[123].mxu1  ;;  %v3551_v38 = vpop.f32.mrb[123].mxu0  ;;  %v2542_v44 = vmax.f32 %v2469_v31, 0.0 }
 0x1e9   :  { %v3474_v51 = vadd.f32 %v3473_v49, %v3472_v42  ;;  %v2357_v17 = vadd.f32 %v3471_v34, %v4827_v46 }
 0x1ea   :  { %v2543_v52 = vmax.f32 %v2472_v9, 0.0 }
 0x1eb   :  { %v2360_v19 = vadd.f32 %v3474_v51, %v4830_v53 }
 0x1ec   :  { %v2979_v15 = vpack.c.bf16 %v2543_v52, %v2542_v44 }
 0x1ed   :  { %v3475_v60 = vpop.f32.mrb[124].mxu1  ;;  %v2476_v5 = vpop.f32.mrb[124].mxu0 }
 0x1ee   :  { %3017 = vst [vmem:[%s4926_s3 + $0x10] sm:$0xff] %v2979_v15   ;;  %v2477_v20 = vadd.f32 %v2476_v5, %v2357_v17  ;;  %v3476_v0 = vpop.f32.mrb[125].mxu1  ;;  %v3554_v23 = vpop.f32.mrb[125].mxu0 }
 0x1ef   :  { %v3477_v61 = vadd.f32 %v3476_v0, %v3475_v60  ;;  %v3478_v26 = vpop.f32.mrb[126].mxu1  ;;  %v2479_v7 = vpop.f32.mrb[126].mxu0 }
 0x1f0   :  { %v2480_v8 = vadd.f32 %v2479_v7, %v2360_v19  ;;  %v3479_v10 = vpop.f32.mrb[127].mxu1  ;;  %v3555_v46 = vpop.f32.mrb[127].mxu0  ;;  %v2544_v53 = vmax.f32 %v2477_v20, 0.0 }
 0x1f1   :  { %v3480_v11 = vadd.f32 %v3479_v10, %v3478_v26  ;;  %v2365_v48 = vadd.f32 %v3477_v61, %v4833_v56 }
 0x1f2   :  { %v2545_v41 = vmax.f32 %v2480_v8, 0.0 }
 0x1f3   :  { %v2368_v37 = vadd.f32 %v3480_v11, %v4836_v62 }
 0x1f4   :  { %v2984_v40 = vpack.c.bf16 %v2545_v41, %v2544_v53 }
 0x1f5   :  { %v3481_v6 = vpop.f32.mrb[128].mxu1  ;;  %v2484_v21 = vpop.f32.mrb[128].mxu0 }
 0x1f6   :  { %3018 = vst [vmem:[%s4926_s3 + $0x18] sm:$0xff] %v2984_v40   ;;  %v2485_v33 = vadd.f32 %v2484_v21, %v2365_v48  ;;  %v3482_v47 = vpop.f32.mrb[129].mxu1  ;;  %v3558_v27 = vpop.f32.mrb[129].mxu0 }
 0x1f7   :  { %v3483_v54 = vadd.f32 %v3482_v47, %v3481_v6  ;;  %v3484_v2 = vpop.f32.mrb[130].mxu1  ;;  %v2487_v57 = vpop.f32.mrb[130].mxu0 }
 0x1f8   :  { %v2488_v22 = vadd.f32 %v2487_v57, %v2368_v37  ;;  %v3485_v25 = vpop.f32.mrb[131].mxu1  ;;  %v3559_v56 = vpop.f32.mrb[131].mxu0  ;;  %v2546_v62 = vmax.f32 %v2485_v33, 0.0 }
 0x1f9   :  { %v3486_v58 = vadd.f32 %v3485_v25, %v3484_v2  ;;  %v2373_v16 = vadd.f32 %v3483_v54, %v4839_v13 }
 0x1fa   :  { %v2547_v24 = vmax.f32 %v2488_v22, 0.0 }
 0x1fb   :  { %v2376_v63 = vadd.f32 %v3486_v58, %v4842_v18 }
 0x1fc   :  { %v2989_v28 = vpack.c.bf16 %v2547_v24, %v2546_v62 }
 0x1fd   :  { %v3487_v45 = vpop.f32.mrb[132].mxu1  ;;  %v2492_v1 = vpop.f32.mrb[132].mxu0 }
 0x1fe   :  { %3019 = vst [vmem:[%s4926_s3 + $0x20] sm:$0xff] %v2989_v28   ;;  %v2493_v3 = vadd.f32 %v2492_v1, %v2373_v16  ;;  %v3488_v36 = vpop.f32.mrb[133].mxu1  ;;  %v3562_v31 = vpop.f32.mrb[133].mxu0 }
 0x1ff   :  { %v3489_v35 = vadd.f32 %v3488_v36, %v3487_v45  ;;  %v3490_v29 = vpop.f32.mrb[134].mxu1  ;;  %v2495_v34 = vpop.f32.mrb[134].mxu0 }
 0x200   :  { %v2496_v42 = vadd.f32 %v2495_v34, %v2376_v63  ;;  %v3491_v43 = vpop.f32.mrb[135].mxu1  ;;  %v3563_v13 = vpop.f32.mrb[135].mxu0  ;;  %v2548_v18 = vmax.f32 %v2493_v3, 0.0 }
 0x201   :  { %v3492_v9 = vadd.f32 %v3491_v43, %v3490_v29  ;;  %v2381_v49 = vadd.f32 %v3489_v35, %v4845_v32 }
 0x202   :  { %v2549_v38 = vmax.f32 %v2496_v42, 0.0 }
 0x203   :  { %v2384_v51 = vadd.f32 %v3492_v9, %v4848_v4 }
 0x204   :  { %v2994_v17 = vpack.c.bf16 %v2549_v38, %v2548_v18 }
 0x205   :  { %v3493_v44 = vpop.f32.mrb[136].mxu1  ;;  %v2500_v52 = vpop.f32.mrb[136].mxu0 }
 0x206   :  { %3020 = vst [vmem:[%s4926_s3 + $0x28] sm:$0xff] %v2994_v17   ;;  %v2501_v19 = vadd.f32 %v2500_v52, %v2381_v49  ;;  %v3494_v15 = vpop.f32.mrb[137].mxu1  ;;  %v3566_v60 = vpop.f32.mrb[137].mxu0 }
 0x207   :  { %v3495_v5 = vadd.f32 %v3494_v15, %v3493_v44  ;;  %v3496_v20 = vpop.f32.mrb[138].mxu1  ;;  %v2503_v0 = vpop.f32.mrb[138].mxu0 }
 0x208   :  { %v2504_v23 = vadd.f32 %v2503_v0, %v2384_v51  ;;  %v3497_v61 = vpop.f32.mrb[139].mxu1  ;;  %v3567_v32 = vpop.f32.mrb[139].mxu0  ;;  %v2550_v4 = vmax.f32 %v2501_v19, 0.0 }
 0x209   :  { %v3498_v26 = vadd.f32 %v3497_v61, %v3496_v20  ;;  %v2389_v7 = vadd.f32 %v3495_v5, %v4851_v39 }
 0x20a   :  { %v2551_v8 = vmax.f32 %v2504_v23, 0.0 }
 0x20b   :  { %v2392_v10 = vadd.f32 %v3498_v26, %v4854_v59 }
 0x20c   :  { %v2999_v46 = vpack.c.bf16 %v2551_v8, %v2550_v4 }
 0x20d   :  { %v3499_v11 = vpop.f32.mrb[140].mxu1  ;;  %v2508_v48 = vpop.f32.mrb[140].mxu0 }
 0x20e   :  { %3021 = vst [vmem:[%s4926_s3 + $0x30] sm:$0xff] %v2999_v46   ;;  %v2509_v53 = vadd.f32 %v2508_v48, %v2389_v7  ;;  %v3500_v41 = vpop.f32.mrb[141].mxu1  ;;  %v3570_v37 = vpop.f32.mrb[141].mxu0 }
 0x20f   :  { %v3501_v40 = vadd.f32 %v3500_v41, %v3499_v11  ;;  %v3502_v6 = vpop.f32.mrb[142].mxu1  ;;  %v2511_v21 = vpop.f32.mrb[142].mxu0 }
 0x210   :  { %v2512_v33 = vadd.f32 %v2511_v21, %v2392_v10  ;;  %v3503_v47 = vpop.f32.mrb[143].mxu1  ;;  %v3571_v39 = vpop.f32.mrb[143].mxu0  ;;  %v2552_v59 = vmax.f32 %v2509_v53, 0.0 }
 0x211   :  { %v3504_v27 = vadd.f32 %v3503_v47, %v3502_v6  ;;  %v2397_v54 = vadd.f32 %v3501_v40, %v4857_v12 }
 0x212   :  { %v2553_v2 = vmax.f32 %v2512_v33, 0.0 }
 0x213   :  { %v2400_v57 = vadd.f32 %v3504_v27, %v4860_v14 }
 0x214   :  { %v3004_v22 = vpack.c.bf16 %v2553_v2, %v2552_v59 }
 0x215   :  { %v3505_v25 = vpop.f32.mrb[144].mxu1  ;;  %v2516_v56 = vpop.f32.mrb[144].mxu0 }
 0x216   :  { %3022 = vst [vmem:[%s4926_s3 + $0x38] sm:$0xff] %v3004_v22   ;;  %v2517_v58 = vadd.f32 %v2516_v56, %v2397_v54  ;;  %v3506_v16 = vpop.f32.mrb[145].mxu1  ;;  %v3574_v62 = vpop.f32.mrb[145].mxu0 }
 0x217   :  { %v3507_v24 = vadd.f32 %v3506_v16, %v3505_v25  ;;  %v3508_v63 = vpop.f32.mrb[146].mxu1  ;;  %v2519_v28 = vpop.f32.mrb[146].mxu0 }
 0x218   :  { %v2520_v45 = vadd.f32 %v2519_v28, %v2400_v57  ;;  %v3509_v1 = vpop.f32.mrb[147].mxu1  ;;  %v3575_v12 = vpop.f32.mrb[147].mxu0  ;;  %v2554_v14 = vmax.f32 %v2517_v58, 0.0 }
 0x219   :  { %v3510_v3 = vadd.f32 %v3509_v1, %v3508_v63  ;;  %v2405_v36 = vadd.f32 %v3507_v24, %v4863_v30 }
 0x21a   :  { %v2555_v31 = vmax.f32 %v2520_v45, 0.0 }
 0x21b   :  { %v2408_v35 = vadd.f32 %v3510_v3, %v4865_v55 }
 0x21c   :  { %v3009_v29 = vpack.c.bf16 %v2555_v31, %v2554_v14 }
 0x21d   :  { %v3511_v34 = vpop.f32.mrb[148].mxu1  ;;  %v2524_v42 = vpop.f32.mrb[148].mxu0 }
 0x21e   :  { %3023 = vst [vmem:[%s4926_s3 + $0x40] sm:$0xff] %v3009_v29   ;;  %v2525_v43 = vadd.f32 %v2524_v42, %v2405_v36  ;;  %v3512_v13 = vpop.f32.mrb[149].mxu1  ;;  %v3578_v9 = vpop.f32.mrb[149].mxu0 }
 0x21f   :  { %v3513_v49 = vadd.f32 %v3512_v13, %v3511_v34  ;;  %v2527_v18 = vpop.f32.mrb[150].mxu0  ;;  %v3514_v38 = vpop.f32.mrb[150].mxu1 }
 0x220   :  { %v2528_v51 = vadd.f32 %v2527_v18, %v2408_v35  ;;  %v3579_v17 = vpop.f32.mrb[151].mxu0  ;;  %v3515_v30 = vpop.f32.mrb[151].mxu1  ;;  %v2556_v52 = vmax.f32 %v2525_v43, 0.0 }
 0x221   :  { %v2413_v44 = vadd.f32 %v3513_v49, %v4867_v50 }
 0x222   :  { %v2557_v55 = vmax.f32 %v2528_v51, 0.0 }
 0x224   :  { %v3014_v19 = vpack.c.bf16 %v2557_v55, %v2556_v52 }
 0x225   :  { %v2532_v15 = vpop.f32.mrb[152].mxu0 }
 0x226   :  { %3024 = vst [vmem:[%s4926_s3 + $0x48] sm:$0xff] %v3014_v19   ;;  %v2533_v60 = vadd.f32 %v2532_v15, %v2413_v44  ;;  %v3582_v5 = vpop.f32.mrb[153].mxu0 }
 0x227   :  { %v2535_v20 = vpop.f32.mrb[154].mxu0 }
 0x228   :  { %v2558_v0 = vmax.f32 %v2533_v60, 0.0  ;;  %v3583_v23 = vpop.f32.mrb[155].mxu0 }
 0x22a   :  { %v2965_v61 = vpack.c.bf16 %v2558_v0, %v2558_v0 }
 0x22c   :  { %2664 = vst [vmem:[%s4926_s3 + $0x50] sm:$0x1] %v2965_v61 }

// kernel: baseline_forward.8
= control target key start
LH: loop header
LB: loop body
LE: loop exit
PB: predicated region body
PF: predicated region fallthrough
CT: control target
= control target key end

     0   :  { %vm78_vm0 = vcmask 1041408   ;;  %s233_s0 = inlined_call_operand.vmem [shape: bf16[9,18,128], index: 0, kind: input, shape index: {}]   ;;  %s234_s1 = inlined_call_operand.vmem [shape: bf16[18,128], index: 1, kind: output, shape index: {}]  }
   0x1   :  { %v126_v0 = vld [vmem:[%s233_s0] sm:$0xff]   ;;  %v11_v1 = vld [vmem:[%s233_s0 + $0xc] sm:$0xff]   ;;  %v150_v2 = vld [vmem:[%s233_s0 + $0x18] sm:$0xff]  }
   0x2   :  { %v127_v3 = vunpack.c.l.bf16 %v126_v0  ;;  %v128_v4 = vunpack.c.h.bf16 %v126_v0  ;;  %v17_v5 = vld [vmem:[%s233_s0 + $0x24] sm:$0xff]   ;;  %v151_v6 = vld [vmem:[%s233_s0 + $0x30] sm:$0xff]   ;;  %v38_v7 = vunpack.c.l.bf16 %v11_v1  ;;  %v39_v8 = vunpack.c.h.bf16 %v11_v1  ;;  %v16_v13 = vld [vmem:[%s233_s0 + $0x20] sm:$0x1] }
   0x3   :  { %v131_v9 = vunpack.c.l.bf16 %v150_v2  ;;  %v132_v10 = vunpack.c.h.bf16 %v150_v2  ;;  %v10_v11 = vld [vmem:[%s233_s0 + $0x8] sm:$0x1]  ;;  %v13_v12 = vld [vmem:[%s233_s0 + $0x14] sm:$0x1]  ;;  %v19_v14 = vld [vmem:[%s233_s0 + $0x2c] sm:$0x1]  ;;  %v44_v16 = vunpack.c.l.bf16 %v17_v5  ;;  %v45_v17 = vunpack.c.h.bf16 %v17_v5 }
   0x4   :  { %v23_v15 = vld [vmem:[%s233_s0 + $0x3c] sm:$0xff]   ;;  %v62_v18 = vadd.f32 %v127_v3, %v38_v7  ;;  %v70_v19 = vadd.f32 %v128_v4, %v39_v8  ;;  %v22_v20 = vld [vmem:[%s233_s0 + $0x38] sm:$0x1]  ;;  %v135_v21 = vunpack.c.l.bf16 %v151_v6  ;;  %v37_v22 = vunpack.c.l.bf16 %v10_v11  ;;  %v152_v26 = vld [vmem:[%s233_s0 + $0x48] sm:$0xff]  }
   0x5   :  { %v40_v23 = vunpack.c.l.bf16 %v13_v12  ;;  %v43_v24 = vunpack.c.l.bf16 %v16_v13  ;;  %v136_v25 = vunpack.c.h.bf16 %v151_v6  ;;  %v46_v29 = vunpack.c.l.bf16 %v19_v14  ;;  %v25_v32 = vld [vmem:[%s233_s0 + $0x44] sm:$0x1]  ;;  %v29_v35 = vld [vmem:[%s233_s0 + $0x54] sm:$0xff]   ;;  %v28_v42 = vld [vmem:[%s233_s0 + $0x50] sm:$0x1] }
   0x6   :  { %v63_v27 = vadd.f32 %v131_v9, %v62_v18  ;;  %v71_v28 = vadd.f32 %v132_v10, %v70_v19  ;;  %v50_v30 = vunpack.c.l.bf16 %v23_v15  ;;  %v51_v31 = vunpack.c.h.bf16 %v23_v15  ;;  %v153_v44 = vld [vmem:[%s233_s0 + $0x60] sm:$0xff]   ;;  %v31_v51 = vld [vmem:[%s233_s0 + $0x5c] sm:$0x1]  ;;  %v34_v59 = vld [vmem:[%s233_s0 + $0x68] sm:$0x1] }
   0x7   :  { %v49_v33 = vunpack.c.l.bf16 %v22_v20  ;;  %v79_v34 = vsel %vm78_vm0, %v37_v22, 0.0  ;;  %v80_v38 = vsel %vm78_vm0, %v40_v23, 0.0  ;;  %v82_v39 = vsel %vm78_vm0, %v43_v24, 0.0 }
   0x8   :  { %v64_v36 = vadd.f32 %v63_v27, %v44_v16  ;;  %v72_v37 = vadd.f32 %v71_v28, %v45_v17  ;;  %v139_v40 = vunpack.c.l.bf16 %v152_v26  ;;  %v140_v41 = vunpack.c.h.bf16 %v152_v26 }
   0x9   :  { %v81_v43 = vadd.f32 %v80_v38, %v79_v34  ;;  %v52_v47 = vunpack.c.l.bf16 %v25_v32  ;;  %v84_v48 = vsel %vm78_vm0, %v46_v29, 0.0  ;;  %v56_v49 = vunpack.c.l.bf16 %v29_v35 }
   0xa   :  { %v65_v45 = vadd.f32 %v135_v21, %v64_v36  ;;  %v73_v46 = vadd.f32 %v136_v25, %v72_v37  ;;  %v57_v50 = vunpack.c.h.bf16 %v29_v35  ;;  %v55_v55 = vunpack.c.l.bf16 %v28_v42 }
   0xb   :  { %v83_v52 = vadd.f32 %v82_v39, %v81_v43  ;;  %v86_v56 = vsel %vm78_vm0, %v49_v33, 0.0  ;;  %v143_v57 = vunpack.c.l.bf16 %v153_v44  ;;  %v144_v58 = vunpack.c.h.bf16 %v153_v44 }
   0xc   :  { %v66_v53 = vadd.f32 %v65_v45, %v50_v30  ;;  %v74_v54 = vadd.f32 %v73_v46, %v51_v31  ;;  %v58_v63 = vunpack.c.l.bf16 %v31_v51  ;;  %v88_v0 = vsel %vm78_vm0, %v52_v47, 0.0 }
   0xd   :  { %v85_v60 = vadd.f32 %v84_v48, %v83_v52  ;;  %v61_v4 = vunpack.c.l.bf16 %v34_v59  ;;  %v90_v5 = vsel %vm78_vm0, %v55_v55, 0.0 }
   0xe   :  { %v67_v61 = vadd.f32 %v139_v40, %v66_v53  ;;  %v75_v62 = vadd.f32 %v140_v41, %v74_v54  ;;  %v92_v9 = vsel %vm78_vm0, %v58_v63, 0.0 }
   0xf   :  { %v87_v1 = vadd.f32 %v86_v56, %v85_v60  ;;  %v94_v13 = vsel %vm78_vm0, %v61_v4, 0.0 }
  0x10   :  { %v68_v2 = vadd.f32 %v67_v61, %v56_v49  ;;  %v76_v3 = vadd.f32 %v75_v62, %v57_v50 }
  0x11   :  { %v89_v6 = vadd.f32 %v88_v0, %v87_v1 }
  0x12   :  { %v69_v7 = vadd.f32 %v143_v57, %v68_v2  ;;  %v77_v8 = vadd.f32 %v144_v58, %v76_v3 }
  0x13   :  { %v91_v10 = vadd.f32 %v90_v5, %v89_v6 }
  0x14   :  { %v96_v11 = vmul.f32 0.11111111, %v69_v7  ;;  %v97_v12 = vmul.f32 0.11111111, %v77_v8 }
  0x15   :  { %v93_v14 = vadd.f32 %v92_v9, %v91_v10 }
  0x16   :  { %v148_v15 = vpack.c.bf16 %v97_v12, %v96_v11 }
  0x17   :  { %v95_v16 = vadd.f32 %v94_v13, %v93_v14 }
  0x18   :  { %149 = vst [vmem:[%s234_s1] sm:$0xff] %v148_v15  }
  0x19   :  { %v98_v17 = vmul.f32 0.11111111, %v95_v16 }
  0x1b   :  { %v124_v18 = vpack.c.bf16 %v98_v17, %v98_v17 }
  0x1d   :  { %114 = vst [vmem:[%s234_s1 + $0x8] sm:$0x1] %v124_v18 }

// kernel: baseline_forward.9
= control target key start
LH: loop header
LB: loop body
LE: loop exit
PB: predicated region body
PF: predicated region fallthrough
CT: control target
= control target key end

     0   :  { %v614_v32 = vlaneseq  ;;  %v8575_v33 = vmov 1966171168   ;;  %s11577_s0 = inlined_call_operand.vmem [shape: bf16[2,1152], index: 0, kind: input, shape index: {}]   ;;  %s11578_s1 = inlined_call_operand.vmem [shape: bf16[1152,1024], index: 1, kind: input, shape index: {}]   ;;  %s11579_s2 = inlined_call_operand.vmem [shape: f32[1,1024], index: 2, kind: input, shape index: {}]   ;;  %s11580_s3 = inlined_call_operand.vmem [shape: bf16[1024,512], index: 3, kind: input, shape index: {}]   ;;  %s11581_s4 = inlined_call_operand.vmem [shape: f32[1,512], index: 4, kind: input, shape index: {}]   ;;  %s11582_s5 = inlined_call_operand.vmem [shape: bf16[512,256], index: 5, kind: input, shape index: {}]   ;;  %s11583_s6 = inlined_call_operand.vmem [shape: f32[1,256], index: 6, kind: input, shape index: {}]   ;;  %s11584_s7 = inlined_call_operand.vmem [shape: bf16[256,128], index: 7, kind: input, shape index: {}]   ;;  %s11585_s8 = inlined_call_operand.vmem [shape: f32[1,128], index: 8, kind: input, shape index: {}]   ;;  %s11586_s9 = inlined_call_operand.hbm [shape: f32[2,128], index: 9, kind: output, shape index: {}]  }
   0x1   :  { %v36_v0 = vld [vmem:[%s11578_s1] sm:$0xff]  ;;  %v658_v34 = vunpack.c.l.s4 %v8575_v33 }
   0x2   :  { %v40_v1 = vld [vmem:[%s11578_s1 + $0x20] sm:$0xff]  ;;  %v8694_v43 = vshrl.u32 %v614_v32, 7 }
   0x3   :  { %v164_v2 = vld [vmem:[%s11578_s1 + $0x400] sm:$0xff]  ;;  %v7012_v3 = vcombine.high %v36_v0, %v40_v1  ;;  %v7011_v5 = vcombine.low %v36_v0, %v40_v1  ;;  %v659_v44 = vunpack.c.0.s8 %v658_v34 }
   0x4   :  { %v168_v4 = vld [vmem:[%s11578_s1 + $0x420] sm:$0xff] }
   0x5   :  { %v44_v6 = vld [vmem:[%s11578_s1 + $0x40] sm:$0xff]  ;;  %v7140_v8 = vcombine.high %v164_v2, %v168_v4  ;;  %v7139_v9 = vcombine.low %v164_v2, %v168_v4  ;;  %3608 = vmatprep.subr.bf16.mxu1 %v7012_v3  ;;  %v8709_v53 = vsub.s32 %v659_v44, %v8694_v43 }
   0x6   :  { %v48_v7 = vld [vmem:[%s11578_s1 + $0x60] sm:$0xff]  ;;  %3609 = vmatpush1.bf16.msra.mxu1 %v7011_v5 }
   0x7   :  { %v7020_v10 = vcombine.high %v44_v6, %v48_v7  ;;  %v172_v11 = vld [vmem:[%s11578_s1 + $0x440] sm:$0xff]  ;;  %3649 = vmatprep.subr.bf16.mxu0 %v7140_v8  ;;  %v7019_v18 = vcombine.low %v44_v6, %v48_v7 }
   0x8   :  { %v176_v12 = vld [vmem:[%s11578_s1 + $0x460] sm:$0xff]  ;;  %3650 = vmatpush1.bf16.msra.mxu0 %v7139_v9 }
   0x9   :  { %v52_v13 = vld [vmem:[%s11578_s1 + $0x80] sm:$0xff]  ;;  %v7148_v14 = vcombine.high %v172_v11, %v176_v12  ;;  %3610 = vmatprep.subr.bf16.mxu1 %v7020_v10  ;;  %v7147_v19 = vcombine.low %v172_v11, %v176_v12 }
   0xa   :  { %v56_v15 = vld [vmem:[%s11578_s1 + $0xa0] sm:$0xff]  ;;  %3611 = vmatpush1.bf16.msra.mxu1 %v7019_v18 }
   0xb   :  { %v180_v16 = vld [vmem:[%s11578_s1 + $0x480] sm:$0xff]  ;;  %v7028_v20 = vcombine.high %v52_v13, %v56_v15  ;;  %3651 = vmatprep.subr.bf16.mxu0 %v7148_v14  ;;  %v7027_v26 = vcombine.low %v52_v13, %v56_v15 }
   0xc   :  { %v184_v17 = vld [vmem:[%s11578_s1 + $0x4a0] sm:$0xff]  ;;  %3652 = vmatpush1.bf16.msra.mxu0 %v7147_v19 }
   0xd   :  { %v7156_v21 = vcombine.high %v180_v16, %v184_v17  ;;  %v60_v22 = vld [vmem:[%s11578_s1 + $0xc0] sm:$0xff]  ;;  %3612 = vmatprep.subr.bf16.mxu1 %v7028_v20  ;;  %v7155_v27 = vcombine.low %v180_v16, %v184_v17 }
   0xe   :  { %v64_v23 = vld [vmem:[%s11578_s1 + $0xe0] sm:$0xff]  ;;  %3613 = vmatpush1.bf16.msra.mxu1 %v7027_v26 }
   0xf   :  { %v188_v24 = vld [vmem:[%s11578_s1 + $0x4c0] sm:$0xff]  ;;  %v7036_v28 = vcombine.high %v60_v22, %v64_v23  ;;  %3653 = vmatprep.subr.bf16.mxu0 %v7156_v21  ;;  %v7035_v37 = vcombine.low %v60_v22, %v64_v23 }
  0x10   :  { %v192_v25 = vld [vmem:[%s11578_s1 + $0x4e0] sm:$0xff]  ;;  %3654 = vmatpush1.bf16.msra.mxu0 %v7155_v27 }
  0x11   :  { %v7164_v29 = vcombine.high %v188_v24, %v192_v25  ;;  %v68_v30 = vld [vmem:[%s11578_s1 + $0x100] sm:$0xff]  ;;  %3614 = vmatprep.subr.bf16.mxu1 %v7036_v28  ;;  %v7163_v38 = vcombine.low %v188_v24, %v192_v25 }
  0x12   :  { %v72_v31 = vld [vmem:[%s11578_s1 + $0x120] sm:$0xff]  ;;  %3615 = vmatpush1.bf16.msra.mxu1 %v7035_v37 }
  0x13   :  { %v196_v35 = vld [vmem:[%s11578_s1 + $0x500] sm:$0xff]  ;;  %v7044_v39 = vcombine.high %v68_v30, %v72_v31  ;;  %3655 = vmatprep.subr.bf16.mxu0 %v7164_v29  ;;  %v7043_v47 = vcombine.low %v68_v30, %v72_v31 }
  0x14   :  { %v200_v36 = vld [vmem:[%s11578_s1 + $0x520] sm:$0xff]  ;;  %3656 = vmatpush1.bf16.msra.mxu0 %v7163_v38 }
  0x15   :  { %v7172_v40 = vcombine.high %v196_v35, %v200_v36  ;;  %v76_v41 = vld [vmem:[%s11578_s1 + $0x140] sm:$0xff]  ;;  %3616 = vmatprep.subr.bf16.mxu1 %v7044_v39  ;;  %v7171_v48 = vcombine.low %v196_v35, %v200_v36 }
  0x16   :  { %v80_v42 = vld [vmem:[%s11578_s1 + $0x160] sm:$0xff]  ;;  %3617 = vmatpush1.bf16.msra.mxu1 %v7043_v47 }
  0x17   :  { %v204_v45 = vld [vmem:[%s11578_s1 + $0x540] sm:$0xff]  ;;  %v7052_v49 = vcombine.high %v76_v41, %v80_v42  ;;  %3657 = vmatprep.subr.bf16.mxu0 %v7172_v40  ;;  %v7051_v56 = vcombine.low %v76_v41, %v80_v42 }
  0x18   :  { %v208_v46 = vld [vmem:[%s11578_s1 + $0x560] sm:$0xff]  ;;  %3658 = vmatpush1.bf16.msra.mxu0 %v7171_v48 }
  0x19   :  { %v7180_v50 = vcombine.high %v204_v45, %v208_v46  ;;  %v84_v51 = vld [vmem:[%s11578_s1 + $0x180] sm:$0xff]  ;;  %3618 = vmatprep.subr.bf16.mxu1 %v7052_v49  ;;  %v7179_v57 = vcombine.low %v204_v45, %v208_v46 }
  0x1a   :  { %v88_v52 = vld [vmem:[%s11578_s1 + $0x1a0] sm:$0xff]  ;;  %3619 = vmatpush1.bf16.msra.mxu1 %v7051_v56 }
  0x1b   :  { %v212_v54 = vld [vmem:[%s11578_s1 + $0x580] sm:$0xff]  ;;  %v7060_v58 = vcombine.high %v84_v51, %v88_v52  ;;  %3659 = vmatprep.subr.bf16.mxu0 %v7180_v50  ;;  %v7059_v2 = vcombine.low %v84_v51, %v88_v52 }
  0x1c   :  { %v216_v55 = vld [vmem:[%s11578_s1 + $0x5a0] sm:$0xff]  ;;  %3660 = vmatpush1.bf16.msra.mxu0 %v7179_v57 }
  0x1d   :  { %v8720_v59 = vld [vmem:[%s11577_s0] sm:$0xff]  ;;  %v7188_v60 = vcombine.high %v212_v54, %v216_v55  ;;  %3620 = vmatprep.subr.bf16.mxu1 %v7060_v58  ;;  %v7187_v4 = vcombine.low %v212_v54, %v216_v55 }
  0x1e   :  { %v92_v61 = vld [vmem:[%s11578_s1 + $0x1c0] sm:$0xff]  ;;  %v8730_v63 = vrot.slane %v8720_v59, %v8709_v53  ;;  %3621 = vmatpush1.bf16.msra.mxu1 %v7059_v2 }
  0x1f   :  { %v96_v62 = vld [vmem:[%s11578_s1 + $0x1e0] sm:$0xff]  ;;  %3661 = vmatprep.subr.bf16.mxu0 %v7188_v60 }
  0x20   :  { %v220_v0 = vld [vmem:[%s11578_s1 + $0x5c0] sm:$0xff]  ;;  %v671_v3 = vcombine.high %v8730_v63, %v8730_v63  ;;  %v7068_v5 = vcombine.high %v92_v61, %v96_v62  ;;  %v7067_v12 = vcombine.low %v92_v61, %v96_v62  ;;  %3662 = vmatpush1.bf16.msra.mxu0 %v7187_v4 }
  0x21   :  { %v224_v1 = vld [vmem:[%s11578_s1 + $0x5e0] sm:$0xff] }
  0x22   :  { %v7196_v6 = vcombine.high %v220_v0, %v224_v1  ;;  %v100_v7 = vld [vmem:[%s11578_s1 + $0x200] sm:$0xff]  ;;  %v8747_v9 = vrot.slane %v671_v3, %v8709_v53  ;;  %3622 = vmatprep.subr.bf16.mxu1 %v7068_v5  ;;  %v7195_v14 = vcombine.low %v220_v0, %v224_v1 }
  0x23   :  { %v104_v8 = vld [vmem:[%s11578_s1 + $0x220] sm:$0xff]  ;;  %3623 = vmatpush1.bf16.msra.mxu1 %v7067_v12 }
  0x24   :  { %v228_v10 = vld [vmem:[%s11578_s1 + $0x600] sm:$0xff]  ;;  %3640 = vmatprep.mubr.bf16.mxu1 %v8747_v9  ;;  %v8758_v13 = vcombine.high %v8747_v9, %v8747_v9  ;;  %v7076_v15 = vcombine.high %v100_v7, %v104_v8  ;;  %3663 = vmatprep.subr.bf16.mxu0 %v7196_v6  ;;  %v7075_v21 = vcombine.low %v100_v7, %v104_v8 }
  0x25   :  { %v232_v11 = vld [vmem:[%s11578_s1 + $0x620] sm:$0xff]  ;;  %3664 = vmatpush1.bf16.msra.mxu0 %v7195_v14  ;;  %v656_v7 = vcombine.high %v8720_v59, %v8720_v59  ;;  %v37_v59 = vld [vmem:[%s11578_s1 + $0x8] sm:$0xff] }
  0x26   :  { %v7204_v16 = vcombine.high %v228_v10, %v232_v11  ;;  %v108_v17 = vld [vmem:[%s11578_s1 + $0x240] sm:$0xff]  ;;  %3681 = vmatprep.mubr.bf16.mxu0 %v8758_v13  ;;  %3624 = vmatprep.subr.bf16.mxu1 %v7076_v15  ;;  %v7203_v22 = vcombine.low %v228_v10, %v232_v11 }
  0x27   :  { %v112_v18 = vld [vmem:[%s11578_s1 + $0x260] sm:$0xff]  ;;  %3625 = vmatpush1.bf16.msra.mxu1 %v7075_v21  ;;  %v8864_v21 = vrot.slane %v8730_v63, %v8709_v53 }
  0x28   :  { %v236_v19 = vld [vmem:[%s11578_s1 + $0x640] sm:$0xff]  ;;  %v7084_v23 = vcombine.high %v108_v17, %v112_v18  ;;  %3665 = vmatprep.subr.bf16.mxu0 %v7204_v16  ;;  %v7083_v29 = vcombine.low %v108_v17, %v112_v18  ;;  %v41_v16 = vld [vmem:[%s11578_s1 + $0x28] sm:$0xff]  ;;  %v8854_v17 = vrot.slane %v656_v7, %v8709_v53 }
  0x29   :  { %v240_v20 = vld [vmem:[%s11578_s1 + $0x660] sm:$0xff]  ;;  %3666 = vmatpush1.bf16.msra.mxu0 %v7203_v22 }
  0x2a   :  { %v7212_v24 = vcombine.high %v236_v19, %v240_v20  ;;  %v116_v25 = vld [vmem:[%s11578_s1 + $0x280] sm:$0xff]  ;;  %3626 = vmatprep.subr.bf16.mxu1 %v7084_v23  ;;  %v7211_v30 = vcombine.low %v236_v19, %v240_v20  ;;  %v7014_v23 = vcombine.high %v37_v59, %v41_v16 }
  0x2b   :  { %v120_v26 = vld [vmem:[%s11578_s1 + $0x2a0] sm:$0xff]  ;;  %3627 = vmatpush1.bf16.msra.mxu1 %v7083_v29  ;;  %v7013_v29 = vcombine.low %v37_v59, %v41_v16 }
  0x2c   :  { %v244_v27 = vld [vmem:[%s11578_s1 + $0x680] sm:$0xff]  ;;  %v7092_v31 = vcombine.high %v116_v25, %v120_v26  ;;  %3667 = vmatprep.subr.bf16.mxu0 %v7212_v24  ;;  %v7091_v37 = vcombine.low %v116_v25, %v120_v26  ;;  %v45_v25 = vld [vmem:[%s11578_s1 + $0x48] sm:$0xff] }
  0x2d   :  { %v248_v28 = vld [vmem:[%s11578_s1 + $0x6a0] sm:$0xff]  ;;  %3668 = vmatpush1.bf16.msra.mxu0 %v7211_v30  ;;  %v49_v26 = vld [vmem:[%s11578_s1 + $0x68] sm:$0xff]  ;;  %v8882_v30 = vcombine.high %v8864_v21, %v8864_v21 }
  0x2e   :  { %v7220_v32 = vcombine.high %v244_v27, %v248_v28  ;;  %v124_v33 = vld [vmem:[%s11578_s1 + $0x2c0] sm:$0xff]  ;;  %3628 = vmatprep.subr.bf16.mxu1 %v7092_v31  ;;  %v7219_v38 = vcombine.low %v244_v27, %v248_v28  ;;  %v672_v27 = vcombine.high %v8854_v17, %v8854_v17 }
  0x2f   :  { %v128_v34 = vld [vmem:[%s11578_s1 + $0x2e0] sm:$0xff]  ;;  %3629 = vmatpush1.bf16.msra.mxu1 %v7091_v37  ;;  %v57_v37 = vld [vmem:[%s11578_s1 + $0xa8] sm:$0xff] }
  0x30   :  { %v252_v35 = vld [vmem:[%s11578_s1 + $0x6c0] sm:$0xff]  ;;  %v7100_v39 = vcombine.high %v124_v33, %v128_v34  ;;  %3669 = vmatprep.subr.bf16.mxu0 %v7220_v32  ;;  %v7099_v46 = vcombine.low %v124_v33, %v128_v34  ;;  %v7022_v32 = vcombine.high %v45_v25, %v49_v26 }
  0x31   :  { %v256_v36 = vld [vmem:[%s11578_s1 + $0x6e0] sm:$0xff]  ;;  %3670 = vmatpush1.bf16.msra.mxu0 %v7219_v38  ;;  %v8897_v38 = vrot.slane %v672_v27, %v8709_v53  ;;  %v101_v27 = vld [vmem:[%s11578_s1 + $0x208] sm:$0xff] }
  0x32   :  { %v7228_v40 = vcombine.high %v252_v35, %v256_v36  ;;  %v132_v41 = vld [vmem:[%s11578_s1 + $0x300] sm:$0xff]  ;;  %3630 = vmatprep.subr.bf16.mxu1 %v7100_v39  ;;  %v7227_v47 = vcombine.low %v252_v35, %v256_v36  ;;  %v53_v35 = vld [vmem:[%s11578_s1 + $0x88] sm:$0xff]  ;;  %v7021_v39 = vcombine.low %v45_v25, %v49_v26 }
  0x33   :  { %v136_v42 = vld [vmem:[%s11578_s1 + $0x320] sm:$0xff]  ;;  %3631 = vmatpush1.bf16.msra.mxu1 %v7099_v46 }
  0x34   :  { %v260_v44 = vld [vmem:[%s11578_s1 + $0x700] sm:$0xff]  ;;  %v7108_v48 = vcombine.high %v132_v41, %v136_v42  ;;  %3671 = vmatprep.subr.bf16.mxu0 %v7228_v40  ;;  %v7107_v55 = vcombine.low %v132_v41, %v136_v42  ;;  %v7030_v41 = vcombine.high %v53_v35, %v57_v37 }
  0x35   :  { %v264_v45 = vld [vmem:[%s11578_s1 + $0x720] sm:$0xff]  ;;  %3672 = vmatpush1.bf16.msra.mxu0 %v7227_v47  ;;  %v65_v47 = vld [vmem:[%s11578_s1 + $0xe8] sm:$0xff] }
  0x36   :  { %v7236_v49 = vcombine.high %v260_v44, %v264_v45  ;;  %v140_v50 = vld [vmem:[%s11578_s1 + $0x340] sm:$0xff]  ;;  %3632 = vmatprep.subr.bf16.mxu1 %v7108_v48  ;;  %v7235_v56 = vcombine.low %v260_v44, %v264_v45  ;;  %v61_v45 = vld [vmem:[%s11578_s1 + $0xc8] sm:$0xff]  ;;  %v7029_v48 = vcombine.low %v53_v35, %v57_v37 }
  0x37   :  { %v144_v51 = vld [vmem:[%s11578_s1 + $0x360] sm:$0xff]  ;;  %3633 = vmatpush1.bf16.msra.mxu1 %v7107_v55  ;;  %v109_v35 = vld [vmem:[%s11578_s1 + $0x248] sm:$0xff] }
  0x38   :  { %v268_v52 = vld [vmem:[%s11578_s1 + $0x740] sm:$0xff]  ;;  %v7116_v57 = vcombine.high %v140_v50, %v144_v51  ;;  %3673 = vmatprep.subr.bf16.mxu0 %v7236_v49  ;;  %v7115_v1 = vcombine.low %v140_v50, %v144_v51  ;;  %v7038_v50 = vcombine.high %v61_v45, %v65_v47  ;;  %v113_v37 = vld [vmem:[%s11578_s1 + $0x268] sm:$0xff] }
  0x39   :  { %v272_v54 = vld [vmem:[%s11578_s1 + $0x760] sm:$0xff]  ;;  %3674 = vmatpush1.bf16.msra.mxu0 %v7235_v56  ;;  %v73_v56 = vld [vmem:[%s11578_s1 + $0x128] sm:$0xff] }
  0x3a   :  { %v7244_v58 = vcombine.high %v268_v52, %v272_v54  ;;  %v148_v60 = vld [vmem:[%s11578_s1 + $0x380] sm:$0xff]  ;;  %3634 = vmatprep.subr.bf16.mxu1 %v7116_v57  ;;  %v7243_v2 = vcombine.low %v268_v52, %v272_v54  ;;  %v69_v54 = vld [vmem:[%s11578_s1 + $0x108] sm:$0xff]  ;;  %v7037_v57 = vcombine.low %v61_v45, %v65_v47 }
  0x3b   :  { %v152_v61 = vld [vmem:[%s11578_s1 + $0x3a0] sm:$0xff]  ;;  %3635 = vmatpush1.bf16.msra.mxu1 %v7115_v1  ;;  %v121_v47 = vld [vmem:[%s11578_s1 + $0x2a8] sm:$0xff] }
  0x3c   :  { %v276_v62 = vld [vmem:[%s11578_s1 + $0x780] sm:$0xff]  ;;  %v7124_v3 = vcombine.high %v148_v60, %v152_v61  ;;  %3675 = vmatprep.subr.bf16.mxu0 %v7244_v58  ;;  %v7123_v11 = vcombine.low %v148_v60, %v152_v61  ;;  %v7046_v60 = vcombine.high %v69_v54, %v73_v56 }
  0x3d   :  { %v280_v0 = vld [vmem:[%s11578_s1 + $0x7a0] sm:$0xff]  ;;  %3676 = vmatpush1.bf16.msra.mxu0 %v7243_v2  ;;  %v81_v2 = vld [vmem:[%s11578_s1 + $0x168] sm:$0xff] }
  0x3e   :  { %v7252_v4 = vcombine.high %v276_v62, %v280_v0  ;;  %v156_v5 = vld [vmem:[%s11578_s1 + $0x3c0] sm:$0xff]  ;;  %3636 = vmatprep.subr.bf16.mxu1 %v7124_v3  ;;  %v7251_v12 = vcombine.low %v276_v62, %v280_v0  ;;  %v77_v0 = vld [vmem:[%s11578_s1 + $0x148] sm:$0xff]  ;;  %v7045_v3 = vcombine.low %v69_v54, %v73_v56 }
  0x3f   :  { %v160_v6 = vld [vmem:[%s11578_s1 + $0x3e0] sm:$0xff]  ;;  %3637 = vmatpush1.bf16.msra.mxu1 %v7123_v11  ;;  %v89_v11 = vld [vmem:[%s11578_s1 + $0x1a8] sm:$0xff] }
  0x40   :  { %v284_v8 = vld [vmem:[%s11578_s1 + $0x7c0] sm:$0xff]  ;;  %v7132_v14 = vcombine.high %v156_v5, %v160_v6  ;;  %3677 = vmatprep.subr.bf16.mxu0 %v7252_v4  ;;  %v7131_v20 = vcombine.low %v156_v5, %v160_v6  ;;  %v7054_v5 = vcombine.high %v77_v0, %v81_v2  ;;  %v125_v54 = vld [vmem:[%s11578_s1 + $0x2c8] sm:$0xff] }
  0x41   :  { %v288_v10 = vld [vmem:[%s11578_s1 + $0x7e0] sm:$0xff]  ;;  %3678 = vmatpush1.bf16.msra.mxu0 %v7251_v12  ;;  %v7053_v12 = vcombine.low %v77_v0, %v81_v2  ;;  %v129_v56 = vld [vmem:[%s11578_s1 + $0x2e8] sm:$0xff] }
  0x42   :  { %v7260_v15 = vcombine.high %v284_v8, %v288_v10  ;;  %v292_v18 = vld [vmem:[%s11578_s1 + $0x800] sm:$0xff]  ;;  %3638 = vmatprep.subr.bf16.mxu1 %v7132_v14  ;;  %v7259_v22 = vcombine.low %v284_v8, %v288_v10  ;;  %v85_v8 = vld [vmem:[%s11578_s1 + $0x188] sm:$0xff] }
  0x43   :  { %v296_v19 = vld [vmem:[%s11578_s1 + $0x820] sm:$0xff]  ;;  %3639 = vmatpush1.bf16.msra.mxu1 %v7131_v20  ;;  %v97_v20 = vld [vmem:[%s11578_s1 + $0x1e8] sm:$0xff] }
  0x44   :  { %3679 = vmatprep.subr.bf16.mxu0 %v7260_v15  ;;  %v7268_v24 = vcombine.high %v292_v18, %v296_v19  ;;  %v300_v63 = vld [vmem:[%s11578_s1 + $0x840] sm:$0xff]  ;;  %v7267_v31 = vcombine.low %v292_v18, %v296_v19  ;;  %3813 = vmatprep.subr.bf16.mxu1 %v7014_v23  ;;  %v7062_v15 = vcombine.high %v85_v8, %v89_v11  ;;  %v93_v18 = vld [vmem:[%s11578_s1 + $0x1c8] sm:$0xff] }
  0x45   :  { %v304_v28 = vld [vmem:[%s11578_s1 + $0x860] sm:$0xff]  ;;  %3680 = vmatpush1.bf16.msra.mxu0 %v7259_v22  ;;  %v7061_v22 = vcombine.low %v85_v8, %v89_v11  ;;  %v133_v0 = vld [vmem:[%s11578_s1 + $0x308] sm:$0xff] }
  0x46   :  { %v308_v33 = vld [vmem:[%s11578_s1 + $0x880] sm:$0xff]  ;;  %3690 = vmatprep.subr.bf16.mxu0 %v7268_v24  ;;  %v7276_v36 = vcombine.high %v300_v63, %v304_v28  ;;  %3641 = vmatmul.mubr.bf16.vlgmr.msra.gmra.mrb[0].mxu1 %v8864_v21  ;;  %v7275_v40 = vcombine.low %v300_v63, %v304_v28  ;;  %v7070_v24 = vcombine.high %v93_v18, %v97_v20  ;;  %v105_v28 = vld [vmem:[%s11578_s1 + $0x228] sm:$0xff] }
  0x47   :  { %v312_v34 = vld [vmem:[%s11578_s1 + $0x8a0] sm:$0xff]  ;;  %3814 = vmatpush1.bf16.msra.mxu1 %v7013_v29  ;;  %3845 = vmatprep.mubr.bf16.mxu1 %v8747_v9  ;;  %v7069_v29 = vcombine.low %v93_v18, %v97_v20  ;;  %v137_v2 = vld [vmem:[%s11578_s1 + $0x328] sm:$0xff] }
  0x48   :  { %3682 = vmatmul.mubr.bf16.vlgmr.msra.gmra.mrb[0].mxu0 %v8882_v30  ;;  %3815 = vmatprep.subr.bf16.mxu1 %v7022_v32  ;;  %v316_v42 = vld [vmem:[%s11578_s1 + $0x8c0] sm:$0xff]  ;;  %v7284_v46 = vcombine.high %v308_v33, %v312_v34  ;;  %v7283_v49 = vcombine.low %v308_v33, %v312_v34  ;;  %v7078_v32 = vcombine.high %v101_v27, %v105_v28  ;;  %v141_v8 = vld [vmem:[%s11578_s1 + $0x348] sm:$0xff] }
  0x49   :  { %3691 = vmatpush1.bf16.msra.mxu0 %v7267_v31  ;;  %v320_v44 = vld [vmem:[%s11578_s1 + $0x8e0] sm:$0xff]  ;;  %3722 = vmatprep.mubr.bf16.mxu0 %v8897_v38  ;;  %v145_v11 = vld [vmem:[%s11578_s1 + $0x368] sm:$0xff] }
  0x4a   :  { %3692 = vmatprep.subr.bf16.mxu0 %v7276_v36  ;;  %v324_v51 = vld [vmem:[%s11578_s1 + $0x900] sm:$0xff]  ;;  %v7292_v55 = vcombine.high %v316_v42, %v320_v44  ;;  %v7291_v58 = vcombine.low %v316_v42, %v320_v44  ;;  %v149_v18 = vld [vmem:[%s11578_s1 + $0x388] sm:$0xff] }
  0x4b   :  { %3816 = vmatpush1.bf16.msra.mxu1 %v7021_v39  ;;  %v328_v52 = vld [vmem:[%s11578_s1 + $0x920] sm:$0xff]  ;;  %v7077_v39 = vcombine.low %v101_v27, %v105_v28  ;;  %v153_v20 = vld [vmem:[%s11578_s1 + $0x3a8] sm:$0xff] }
  0x4c   :  { %3817 = vmatprep.subr.bf16.mxu1 %v7030_v41  ;;  %v332_v61 = vld [vmem:[%s11578_s1 + $0x940] sm:$0xff]  ;;  %v7300_v1 = vcombine.high %v324_v51, %v328_v52  ;;  %v7299_v4 = vcombine.low %v324_v51, %v328_v52  ;;  %v7086_v41 = vcombine.high %v109_v35, %v113_v37  ;;  %v157_v27 = vld [vmem:[%s11578_s1 + $0x3c8] sm:$0xff] }
  0x4d   :  { %3693 = vmatpush1.bf16.msra.mxu0 %v7275_v40  ;;  %v336_v62 = vld [vmem:[%s11578_s1 + $0x960] sm:$0xff]  ;;  %v161_v28 = vld [vmem:[%s11578_s1 + $0x3e8] sm:$0xff] }
  0x4e   :  { %3694 = vmatprep.subr.bf16.mxu0 %v7284_v46  ;;  %v340_v6 = vld [vmem:[%s11578_s1 + $0x980] sm:$0xff]  ;;  %v7308_v10 = vcombine.high %v332_v61, %v336_v62  ;;  %v7307_v14 = vcombine.low %v332_v61, %v336_v62  ;;  %v117_v46 = vld [vmem:[%s11578_s1 + $0x288] sm:$0xff] }
  0x4f   :  { %3818 = vmatpush1.bf16.msra.mxu1 %v7029_v48  ;;  %v344_v7 = vld [vmem:[%s11578_s1 + $0x9a0] sm:$0xff]  ;;  %v7085_v48 = vcombine.low %v109_v35, %v113_v37  ;;  %v165_v35 = vld [vmem:[%s11578_s1 + $0x408] sm:$0xff] }
  0x50   :  { %3819 = vmatprep.subr.bf16.mxu1 %v7038_v50  ;;  %v348_v59 = vld [vmem:[%s11578_s1 + $0x9c0] sm:$0xff]  ;;  %v7316_v19 = vcombine.high %v340_v6, %v344_v7  ;;  %v7315_v23 = vcombine.low %v340_v6, %v344_v7  ;;  %v7094_v50 = vcombine.high %v117_v46, %v121_v47  ;;  %v169_v37 = vld [vmem:[%s11578_s1 + $0x428] sm:$0xff] }
  0x51   :  { %3695 = vmatpush1.bf16.msra.mxu0 %v7283_v49  ;;  %v352_v16 = vld [vmem:[%s11578_s1 + $0x9e0] sm:$0xff] }
  0x52   :  { %3696 = vmatprep.subr.bf16.mxu0 %v7292_v55  ;;  %v356_v25 = vld [vmem:[%s11578_s1 + $0xa00] sm:$0xff]  ;;  %v7324_v63 = vcombine.high %v348_v59, %v352_v16  ;;  %v7323_v31 = vcombine.low %v348_v59, %v352_v16 }
  0x53   :  { %3820 = vmatpush1.bf16.msra.mxu1 %v7037_v57  ;;  %v360_v26 = vld [vmem:[%s11578_s1 + $0xa20] sm:$0xff]  ;;  %v7093_v57 = vcombine.low %v117_v46, %v121_v47  ;;  %v177_v47 = vld [vmem:[%s11578_s1 + $0x468] sm:$0xff] }
  0x54   :  { %3821 = vmatprep.subr.bf16.mxu1 %v7046_v60  ;;  %v364_v33 = vld [vmem:[%s11578_s1 + $0xa40] sm:$0xff]  ;;  %v7332_v36 = vcombine.high %v356_v25, %v360_v26  ;;  %v7331_v40 = vcombine.low %v356_v25, %v360_v26  ;;  %v7102_v60 = vcombine.high %v125_v54, %v129_v56 }
  0x55   :  { %3697 = vmatpush1.bf16.msra.mxu0 %v7291_v58  ;;  %v368_v34 = vld [vmem:[%s11578_s1 + $0xa60] sm:$0xff] }
  0x56   :  { %3698 = vmatprep.subr.bf16.mxu0 %v7300_v1  ;;  %v372_v42 = vld [vmem:[%s11578_s1 + $0xa80] sm:$0xff]  ;;  %v7340_v44 = vcombine.high %v364_v33, %v368_v34  ;;  %v7339_v49 = vcombine.low %v364_v33, %v368_v34 }
  0x57   :  { %3822 = vmatpush1.bf16.msra.mxu1 %v7045_v3  ;;  %v376_v45 = vld [vmem:[%s11578_s1 + $0xaa0] sm:$0xff]  ;;  %v7101_v3 = vcombine.low %v125_v54, %v129_v56 }
  0x58   :  { %3823 = vmatprep.subr.bf16.mxu1 %v7054_v5  ;;  %v380_v51 = vld [vmem:[%s11578_s1 + $0xac0] sm:$0xff]  ;;  %v7348_v55 = vcombine.high %v372_v42, %v376_v45  ;;  %v7347_v58 = vcombine.low %v372_v42, %v376_v45  ;;  %v7110_v5 = vcombine.high %v133_v0, %v137_v2  ;;  %v173_v45 = vld [vmem:[%s11578_s1 + $0x448] sm:$0xff] }
  0x59   :  { %3699 = vmatpush1.bf16.msra.mxu0 %v7299_v4  ;;  %v384_v52 = vld [vmem:[%s11578_s1 + $0xae0] sm:$0xff] }
  0x5a   :  { %3700 = vmatprep.subr.bf16.mxu0 %v7308_v10  ;;  %v388_v61 = vld [vmem:[%s11578_s1 + $0xb00] sm:$0xff]  ;;  %v7356_v1 = vcombine.high %v380_v51, %v384_v52  ;;  %v7355_v4 = vcombine.low %v380_v51, %v384_v52  ;;  %v7150_v51 = vcombine.high %v173_v45, %v177_v47 }
  0x5b   :  { %3824 = vmatpush1.bf16.msra.mxu1 %v7053_v12  ;;  %v392_v62 = vld [vmem:[%s11578_s1 + $0xb20] sm:$0xff]  ;;  %v7109_v12 = vcombine.low %v133_v0, %v137_v2 }
  0x5c   :  { %3825 = vmatprep.subr.bf16.mxu1 %v7062_v15  ;;  %v396_v6 = vld [vmem:[%s11578_s1 + $0xb40] sm:$0xff]  ;;  %v7364_v10 = vcombine.high %v388_v61, %v392_v62  ;;  %v7118_v15 = vcombine.high %v141_v8, %v145_v11 }
  0x5d   :  { %3701 = vmatpush1.bf16.msra.mxu0 %v7307_v14  ;;  %v400_v7 = vld [vmem:[%s11578_s1 + $0xb60] sm:$0xff]  ;;  %v7363_v14 = vcombine.low %v388_v61, %v392_v62 }
  0x5e   :  { %3702 = vmatprep.subr.bf16.mxu0 %v7316_v19  ;;  %v404_v59 = vld [vmem:[%s11578_s1 + $0xb80] sm:$0xff]  ;;  %v7372_v19 = vcombine.high %v396_v6, %v400_v7 }
  0x5f   :  { %3826 = vmatpush1.bf16.msra.mxu1 %v7061_v22  ;;  %v408_v16 = vld [vmem:[%s11578_s1 + $0xba0] sm:$0xff]  ;;  %v7117_v22 = vcombine.low %v141_v8, %v145_v11 }
  0x60   :  { %3827 = vmatprep.subr.bf16.mxu1 %v7070_v24  ;;  %v7126_v24 = vcombine.high %v149_v18, %v153_v20  ;;  %v412_v25 = vld [vmem:[%s11578_s1 + $0xbc0] sm:$0xff] }
  0x61   :  { %3703 = vmatpush1.bf16.msra.mxu0 %v7315_v23  ;;  %v7371_v23 = vcombine.low %v396_v6, %v400_v7  ;;  %v416_v26 = vld [vmem:[%s11578_s1 + $0xbe0] sm:$0xff] }
  0x62   :  { %3704 = vmatprep.subr.bf16.mxu0 %v7324_v63  ;;  %v7380_v63 = vcombine.high %v404_v59, %v408_v16  ;;  %v420_v33 = vld [vmem:[%s11578_s1 + $0xc00] sm:$0xff] }
  0x63   :  { %3828 = vmatpush1.bf16.msra.mxu1 %v7069_v29  ;;  %v7125_v29 = vcombine.low %v149_v18, %v153_v20  ;;  %v424_v34 = vld [vmem:[%s11578_s1 + $0xc20] sm:$0xff] }
  0x64   :  { %3829 = vmatprep.subr.bf16.mxu1 %v7078_v32  ;;  %v7134_v32 = vcombine.high %v157_v27, %v161_v28  ;;  %v428_v42 = vld [vmem:[%s11578_s1 + $0xc40] sm:$0xff]  ;;  %v7396_v46 = vcombine.high %v420_v33, %v424_v34 }
  0x65   :  { %3705 = vmatpush1.bf16.msra.mxu0 %v7323_v31  ;;  %v7379_v31 = vcombine.low %v404_v59, %v408_v16  ;;  %v436_v52 = vld [vmem:[%s11578_s1 + $0xc80] sm:$0xff] }
  0x66   :  { %3706 = vmatprep.subr.bf16.mxu0 %v7332_v36  ;;  %v7388_v36 = vcombine.high %v412_v25, %v416_v26  ;;  %v440_v54 = vld [vmem:[%s11578_s1 + $0xca0] sm:$0xff] }
  0x67   :  { %3830 = vmatpush1.bf16.msra.mxu1 %v7077_v39  ;;  %v7133_v39 = vcombine.low %v157_v27, %v161_v28  ;;  %v444_v62 = vld [vmem:[%s11578_s1 + $0xcc0] sm:$0xff]  ;;  %v7412_v2 = vcombine.high %v436_v52, %v440_v54 }
  0x68   :  { %3831 = vmatprep.subr.bf16.mxu1 %v7086_v41  ;;  %v7142_v41 = vcombine.high %v165_v35, %v169_v37  ;;  %v448_v0 = vld [vmem:[%s11578_s1 + $0xce0] sm:$0xff] }
  0x69   :  { %3707 = vmatpush1.bf16.msra.mxu0 %v7331_v40  ;;  %v7387_v40 = vcombine.low %v412_v25, %v416_v26  ;;  %v452_v7 = vld [vmem:[%s11578_s1 + $0xd00] sm:$0xff]  ;;  %v7420_v11 = vcombine.high %v444_v62, %v448_v0 }
  0x6a   :  { %3708 = vmatprep.subr.bf16.mxu0 %v7340_v44  ;;  %v432_v44 = vld [vmem:[%s11578_s1 + $0xc60] sm:$0xff] }
  0x6b   :  { %3832 = vmatpush1.bf16.msra.mxu1 %v7085_v48  ;;  %v7141_v48 = vcombine.low %v165_v35, %v169_v37  ;;  %v7404_v56 = vcombine.high %v428_v42, %v432_v44  ;;  %v456_v8 = vld [vmem:[%s11578_s1 + $0xd20] sm:$0xff]  ;;  %v221_v37 = vld [vmem:[%s11578_s1 + $0x5c8] sm:$0xff] }
  0x6c   :  { %3833 = vmatprep.subr.bf16.mxu1 %v7094_v50  ;;  %v7395_v50 = vcombine.low %v420_v33, %v424_v34  ;;  %v460_v16 = vld [vmem:[%s11578_s1 + $0xd40] sm:$0xff]  ;;  %v7428_v20 = vcombine.high %v452_v7, %v456_v8 }
  0x6d   :  { %3709 = vmatpush1.bf16.msra.mxu0 %v7339_v49  ;;  %v9085_v49 = vrot.slane %v8854_v17, %v8709_v53  ;;  %v185_v17 = vld [vmem:[%s11578_s1 + $0x4a8] sm:$0xff]  ;;  %v464_v18 = vld [vmem:[%s11578_s1 + $0xd60] sm:$0xff] }
  0x6e   :  { %3710 = vmatprep.subr.bf16.mxu0 %v7348_v55  ;;  %v181_v55 = vld [vmem:[%s11578_s1 + $0x488] sm:$0xff]  ;;  %v468_v26 = vld [vmem:[%s11578_s1 + $0xd80] sm:$0xff]  ;;  %v7436_v28 = vcombine.high %v460_v16, %v464_v18 }
  0x6f   :  { %3834 = vmatpush1.bf16.msra.mxu1 %v7093_v57  ;;  %v9101_v57 = vcombine.high %v8897_v38, %v8897_v38  ;;  %v7158_v61 = vcombine.high %v181_v55, %v185_v17  ;;  %v472_v27 = vld [vmem:[%s11578_s1 + $0xda0] sm:$0xff] }
  0x70   :  { %3835 = vmatprep.subr.bf16.mxu1 %v7102_v60  ;;  %v7403_v60 = vcombine.low %v428_v42, %v432_v44  ;;  %v476_v34 = vld [vmem:[%s11578_s1 + $0xdc0] sm:$0xff] }
  0x71   :  { %3711 = vmatpush1.bf16.msra.mxu0 %v7347_v58  ;;  %v7149_v58 = vcombine.low %v173_v45, %v177_v47  ;;  %v480_v35 = vld [vmem:[%s11578_s1 + $0xde0] sm:$0xff] }
  0x72   :  { %3712 = vmatprep.subr.bf16.mxu0 %v7356_v1  ;;  %v189_v1 = vld [vmem:[%s11578_s1 + $0x4c8] sm:$0xff]  ;;  %v484_v44 = vld [vmem:[%s11578_s1 + $0xe00] sm:$0xff]  ;;  %v7452_v47 = vcombine.high %v476_v34, %v480_v35 }
  0x73   :  { %3836 = vmatpush1.bf16.msra.mxu1 %v7101_v3  ;;  %v193_v3 = vld [vmem:[%s11578_s1 + $0x4e8] sm:$0xff]  ;;  %v488_v45 = vld [vmem:[%s11578_s1 + $0xe20] sm:$0xff] }
  0x74   :  { %3837 = vmatprep.subr.bf16.mxu1 %v7110_v5  ;;  %v7411_v5 = vcombine.low %v436_v52, %v440_v54  ;;  %v7166_v6 = vcombine.high %v189_v1, %v193_v3  ;;  %v492_v54 = vld [vmem:[%s11578_s1 + $0xe40] sm:$0xff] }
  0x75   :  { %3713 = vmatpush1.bf16.msra.mxu0 %v7355_v4  ;;  %v7157_v4 = vcombine.low %v181_v55, %v185_v17  ;;  %v496_v55 = vld [vmem:[%s11578_s1 + $0xe60] sm:$0xff]  ;;  %v7460_v17 = vcombine.high %v484_v44, %v488_v45 }
  0x76   :  { %3714 = vmatprep.subr.bf16.mxu0 %v7364_v10  ;;  %v197_v10 = vld [vmem:[%s11578_s1 + $0x508] sm:$0xff] }
  0x77   :  { %3838 = vmatpush1.bf16.msra.mxu1 %v7109_v12  ;;  %v201_v12 = vld [vmem:[%s11578_s1 + $0x528] sm:$0xff] }
  0x78   :  { %3839 = vmatprep.subr.bf16.mxu1 %v7118_v15  ;;  %v7419_v15 = vcombine.low %v444_v62, %v448_v0  ;;  %v7174_v59 = vcombine.high %v197_v10, %v201_v12  ;;  %v500_v0 = vld [vmem:[%s11578_s1 + $0xe80] sm:$0xff] }
  0x79   :  { %3715 = vmatpush1.bf16.msra.mxu0 %v7363_v14  ;;  %v7165_v14 = vcombine.low %v189_v1, %v193_v3  ;;  %v504_v1 = vld [vmem:[%s11578_s1 + $0xea0] sm:$0xff]  ;;  %v7468_v3 = vcombine.high %v492_v54, %v496_v55 }
  0x7a   :  { %3716 = vmatprep.subr.bf16.mxu0 %v7372_v19  ;;  %v205_v19 = vld [vmem:[%s11578_s1 + $0x548] sm:$0xff] }
  0x7b   :  { %3840 = vmatpush1.bf16.msra.mxu1 %v7117_v22  ;;  %v209_v22 = vld [vmem:[%s11578_s1 + $0x568] sm:$0xff] }
  0x7c   :  { %3841 = vmatprep.subr.bf16.mxu1 %v7126_v24  ;;  %v7427_v24 = vcombine.low %v452_v7, %v456_v8  ;;  %v7182_v25 = vcombine.high %v205_v19, %v209_v22  ;;  %v508_v8 = vld [vmem:[%s11578_s1 + $0xec0] sm:$0xff] }
  0x7d   :  { %3717 = vmatpush1.bf16.msra.mxu0 %v7371_v23  ;;  %v7173_v23 = vcombine.low %v197_v10, %v201_v12  ;;  %v512_v10 = vld [vmem:[%s11578_s1 + $0xee0] sm:$0xff]  ;;  %v7476_v12 = vcombine.high %v500_v0, %v504_v1 }
  0x7e   :  { %3718 = vmatprep.subr.bf16.mxu0 %v7380_v63  ;;  %v213_v63 = vld [vmem:[%s11578_s1 + $0x588] sm:$0xff] }
  0x7f   :  { %3842 = vmatpush1.bf16.msra.mxu1 %v7125_v29  ;;  %v217_v29 = vld [vmem:[%s11578_s1 + $0x5a8] sm:$0xff] }
  0x80   :  { %3843 = vmatprep.subr.bf16.mxu1 %v7134_v32  ;;  %v7435_v32 = vcombine.low %v460_v16, %v464_v18  ;;  %v7190_v33 = vcombine.high %v213_v63, %v217_v29  ;;  %v516_v18 = vld [vmem:[%s11578_s1 + $0xf00] sm:$0xff] }
  0x81   :  { %3719 = vmatpush1.bf16.msra.mxu0 %v7379_v31  ;;  %v7181_v31 = vcombine.low %v205_v19, %v209_v22  ;;  %v520_v19 = vld [vmem:[%s11578_s1 + $0xf20] sm:$0xff]  ;;  %v7484_v22 = vcombine.high %v508_v8, %v512_v10 }
  0x82   :  { %3720 = vmatprep.subr.bf16.mxu0 %v7388_v36  ;;  %v7444_v36 = vcombine.high %v468_v26, %v472_v27 }
  0x83   :  { %3844 = vmatpush1.bf16.msra.mxu1 %v7133_v39  ;;  %v225_v39 = vld [vmem:[%s11578_s1 + $0x5e8] sm:$0xff] }
  0x84   :  { %3854 = vmatprep.subr.bf16.mxu1 %v7142_v41  ;;  %v7443_v41 = vcombine.low %v468_v26, %v472_v27  ;;  %v7198_v42 = vcombine.high %v221_v37, %v225_v39  ;;  %v524_v27 = vld [vmem:[%s11578_s1 + $0xf40] sm:$0xff] }
  0x85   :  { %3721 = vmatpush1.bf16.msra.mxu0 %v7387_v40  ;;  %v7189_v40 = vcombine.low %v213_v63, %v217_v29  ;;  %v528_v63 = vld [vmem:[%s11578_s1 + $0xf60] sm:$0xff]  ;;  %v7492_v29 = vcombine.high %v516_v18, %v520_v19 }
  0x86   :  { %3731 = vmatprep.subr.bf16.mxu0 %v7396_v46  ;;  %3846 = vmatmul.mubr.bf16.vlgmr.msra.gmra.mrb[4].mxu1 %v8864_v21  ;;  %v229_v46 = vld [vmem:[%s11578_s1 + $0x608] sm:$0xff] }
  0x87   :  { %3855 = vmatpush1.bf16.msra.mxu1 %v7141_v48  ;;  %3886 = vmatprep.mubr.bf16.mxu1 %v8758_v13  ;;  %v233_v48 = vld [vmem:[%s11578_s1 + $0x628] sm:$0xff] }
  0x88   :  { %3723 = vmatmul.mubr.bf16.vlgmr.msra.gmra.mrb[0].mxu0 %v9085_v49  ;;  %3856 = vmatprep.subr.bf16.mxu1 %v7150_v51  ;;  %v7451_v51 = vcombine.low %v476_v34, %v480_v35  ;;  %v7206_v52 = vcombine.high %v229_v46, %v233_v48  ;;  %v532_v35 = vld [vmem:[%s11578_s1 + $0xf80] sm:$0xff] }
  0x89   :  { %3732 = vmatpush1.bf16.msra.mxu0 %v7395_v50  ;;  %3763 = vmatprep.mubr.bf16.mxu0 %v9101_v57  ;;  %v7197_v50 = vcombine.low %v221_v37, %v225_v39  ;;  %v277_v37 = vld [vmem:[%s11578_s1 + $0x788] sm:$0xff]  ;;  %v7500_v39 = vcombine.high %v524_v27, %v528_v63 }
  0x8a   :  { %3733 = vmatprep.subr.bf16.mxu0 %v7404_v56  ;;  %v237_v56 = vld [vmem:[%s11578_s1 + $0x648] sm:$0xff] }
  0x8b   :  { %3857 = vmatpush1.bf16.msra.mxu1 %v7149_v58  ;;  %v241_v58 = vld [vmem:[%s11578_s1 + $0x668] sm:$0xff] }
  0x8c   :  { %3858 = vmatprep.subr.bf16.mxu1 %v7158_v61  ;;  %v7459_v61 = vcombine.low %v484_v44, %v488_v45  ;;  %v7214_v62 = vcombine.high %v237_v56, %v241_v58  ;;  %v540_v45 = vld [vmem:[%s11578_s1 + $0xfc0] sm:$0xff] }
  0x8d   :  { %3734 = vmatpush1.bf16.msra.mxu0 %v7403_v60  ;;  %v7205_v60 = vcombine.low %v229_v46, %v233_v48  ;;  %v544_v46 = vld [vmem:[%s11578_s1 + $0xfe0] sm:$0xff] }
  0x8e   :  { %3735 = vmatprep.subr.bf16.mxu0 %v7412_v2  ;;  %v245_v2 = vld [vmem:[%s11578_s1 + $0x688] sm:$0xff] }
  0x8f   :  { %3859 = vmatpush1.bf16.msra.mxu1 %v7157_v4  ;;  %v249_v4 = vld [vmem:[%s11578_s1 + $0x6a8] sm:$0xff] }
  0x90   :  { %3860 = vmatprep.subr.bf16.mxu1 %v7166_v6  ;;  %v7467_v6 = vcombine.low %v492_v54, %v496_v55  ;;  %v7222_v7 = vcombine.high %v245_v2, %v249_v4  ;;  %v548_v55 = vld [vmem:[%s11578_s1 + $0x1000] sm:$0xff] }
  0x91   :  { %3736 = vmatpush1.bf16.msra.mxu0 %v7411_v5  ;;  %v7213_v5 = vcombine.low %v237_v56, %v241_v58  ;;  %v552_v56 = vld [vmem:[%s11578_s1 + $0x1020] sm:$0xff]  ;;  %v7516_v58 = vcombine.high %v540_v45, %v544_v46 }
  0x92   :  { %3737 = vmatprep.subr.bf16.mxu0 %v7420_v11  ;;  %v253_v11 = vld [vmem:[%s11578_s1 + $0x6c8] sm:$0xff] }
  0x93   :  { %3861 = vmatpush1.bf16.msra.mxu1 %v7165_v14  ;;  %v257_v14 = vld [vmem:[%s11578_s1 + $0x6e8] sm:$0xff] }
  0x94   :  { %3862 = vmatprep.subr.bf16.mxu1 %v7174_v59  ;;  %v7475_v59 = vcombine.low %v500_v0, %v504_v1  ;;  %v7230_v16 = vcombine.high %v253_v11, %v257_v14  ;;  %v556_v1 = vld [vmem:[%s11578_s1 + $0x1040] sm:$0xff] }
  0x95   :  { %3738 = vmatpush1.bf16.msra.mxu0 %v7419_v15  ;;  %v7221_v15 = vcombine.low %v245_v2, %v249_v4  ;;  %v560_v2 = vld [vmem:[%s11578_s1 + $0x1060] sm:$0xff]  ;;  %v7524_v4 = vcombine.high %v548_v55, %v552_v56 }
  0x96   :  { %3739 = vmatprep.subr.bf16.mxu0 %v7428_v20  ;;  %v261_v20 = vld [vmem:[%s11578_s1 + $0x708] sm:$0xff] }
  0x97   :  { %3863 = vmatpush1.bf16.msra.mxu1 %v7173_v23  ;;  %v265_v23 = vld [vmem:[%s11578_s1 + $0x728] sm:$0xff] }
  0x98   :  { %3864 = vmatprep.subr.bf16.mxu1 %v7182_v25  ;;  %v7483_v25 = vcombine.low %v508_v8, %v512_v10  ;;  %v7238_v26 = vcombine.high %v261_v20, %v265_v23  ;;  %v7523_v8 = vcombine.low %v548_v55, %v552_v56 }
  0x99   :  { %3740 = vmatpush1.bf16.msra.mxu0 %v7427_v24  ;;  %v7229_v24 = vcombine.low %v253_v11, %v257_v14  ;;  %v564_v11 = vld [vmem:[%s11578_s1 + $0x1080] sm:$0xff]  ;;  %v309_v14 = vld [vmem:[%s11578_s1 + $0x888] sm:$0xff] }
  0x9a   :  { %3741 = vmatprep.subr.bf16.mxu0 %v7436_v28  ;;  %v269_v28 = vld [vmem:[%s11578_s1 + $0x748] sm:$0xff] }
  0x9b   :  { %3865 = vmatpush1.bf16.msra.mxu1 %v7181_v31  ;;  %v273_v31 = vld [vmem:[%s11578_s1 + $0x768] sm:$0xff] }
  0x9c   :  { %3866 = vmatprep.subr.bf16.mxu1 %v7190_v33  ;;  %v7491_v33 = vcombine.low %v516_v18, %v520_v19  ;;  %v7246_v34 = vcombine.high %v269_v28, %v273_v31  ;;  %v7531_v18 = vcombine.low %v556_v1, %v560_v2 }
  0x9d   :  { %3742 = vmatpush1.bf16.msra.mxu0 %v7435_v32  ;;  %v7237_v32 = vcombine.low %v261_v20, %v265_v23  ;;  %v572_v20 = vld [vmem:[%s11578_s1 + $0x10c0] sm:$0xff]  ;;  %v317_v23 = vld [vmem:[%s11578_s1 + $0x8c8] sm:$0xff] }
  0x9e   :  { %3743 = vmatprep.subr.bf16.mxu0 %v7444_v36  ;;  %v536_v36 = vld [vmem:[%s11578_s1 + $0xfa0] sm:$0xff] }
  0x9f   :  { %3867 = vmatpush1.bf16.msra.mxu1 %v7189_v40  ;;  %v281_v40 = vld [vmem:[%s11578_s1 + $0x7a8] sm:$0xff]  ;;  %v7508_v48 = vcombine.high %v532_v35, %v536_v36 }
  0xa0   :  { %3868 = vmatprep.subr.bf16.mxu1 %v7198_v42  ;;  %v7499_v42 = vcombine.low %v524_v27, %v528_v63  ;;  %v7254_v44 = vcombine.high %v277_v37, %v281_v40 }
  0xa1   :  { %3744 = vmatpush1.bf16.msra.mxu0 %v7443_v41  ;;  %v7245_v41 = vcombine.low %v269_v28, %v273_v31  ;;  %v584_v31 = vld [vmem:[%s11578_s1 + $0x1120] sm:$0xff] }
  0xa2   :  { %3745 = vmatprep.subr.bf16.mxu0 %v7452_v47  ;;  %v285_v47 = vld [vmem:[%s11578_s1 + $0x7c8] sm:$0xff] }
  0xa3   :  { %3869 = vmatpush1.bf16.msra.mxu1 %v7197_v50  ;;  %v289_v50 = vld [vmem:[%s11578_s1 + $0x7e8] sm:$0xff] }
  0xa4   :  { %3870 = vmatprep.subr.bf16.mxu1 %v7206_v52  ;;  %v7507_v52 = vcombine.low %v532_v35, %v536_v36  ;;  %v7262_v54 = vcombine.high %v285_v47, %v289_v50 }
  0xa5   :  { %3746 = vmatpush1.bf16.msra.mxu0 %v7451_v51  ;;  %v7253_v51 = vcombine.low %v277_v37, %v281_v40  ;;  %v592_v40 = vld [vmem:[%s11578_s1 + $0x1160] sm:$0xff] }
  0xa6   :  { %3747 = vmatprep.subr.bf16.mxu0 %v7460_v17  ;;  %v293_v17 = vld [vmem:[%s11578_s1 + $0x808] sm:$0xff] }
  0xa7   :  { %3871 = vmatpush1.bf16.msra.mxu1 %v7205_v60  ;;  %v297_v60 = vld [vmem:[%s11578_s1 + $0x828] sm:$0xff] }
  0xa8   :  { %3872 = vmatprep.subr.bf16.mxu1 %v7214_v62  ;;  %v7515_v62 = vcombine.low %v540_v45, %v544_v46  ;;  %v7270_v0 = vcombine.high %v293_v17, %v297_v60 }
  0xa9   :  { %3748 = vmatpush1.bf16.msra.mxu0 %v7459_v61  ;;  %v7261_v61 = vcombine.low %v285_v47, %v289_v50  ;;  %v600_v50 = vld [vmem:[%s11578_s1 + $0x11a0] sm:$0xff] }
  0xaa   :  { %3749 = vmatprep.subr.bf16.mxu0 %v7468_v3  ;;  %v301_v3 = vld [vmem:[%s11578_s1 + $0x848] sm:$0xff] }
  0xab   :  { %3873 = vmatpush1.bf16.msra.mxu1 %v7213_v5  ;;  %v305_v5 = vld [vmem:[%s11578_s1 + $0x868] sm:$0xff] }
  0xac   :  { %3874 = vmatprep.subr.bf16.mxu1 %v7222_v7  ;;  %v9289_v7 = vcombine.high %v9085_v49, %v9085_v49  ;;  %v7278_v10 = vcombine.high %v301_v3, %v305_v5 }
  0xad   :  { %3750 = vmatpush1.bf16.msra.mxu0 %v7467_v6  ;;  %v7269_v6 = vcombine.low %v293_v17, %v297_v60  ;;  %v608_v60 = vld [vmem:[%s11578_s1 + $0x11e0] sm:$0xff] }
  0xae   :  { %3751 = vmatprep.subr.bf16.mxu0 %v7476_v12  ;;  %v568_v12 = vld [vmem:[%s11578_s1 + $0x10a0] sm:$0xff] }
  0xaf   :  { %3875 = vmatpush1.bf16.msra.mxu1 %v7221_v15  ;;  %v7532_v15 = vcombine.high %v556_v1, %v560_v2  ;;  %v7539_v63 = vcombine.low %v564_v11, %v568_v12 }
  0xb0   :  { %3876 = vmatprep.subr.bf16.mxu1 %v7230_v16  ;;  %v7277_v16 = vcombine.low %v301_v3, %v305_v5  ;;  %v361_v5 = vld [vmem:[%s11578_s1 + $0xa28] sm:$0xff] }
  0xb1   :  { %3752 = vmatpush1.bf16.msra.mxu0 %v7475_v59  ;;  %v313_v59 = vld [vmem:[%s11578_s1 + $0x8a8] sm:$0xff] }
  0xb2   :  { %3753 = vmatprep.subr.bf16.mxu0 %v7484_v22  ;;  %v7286_v19 = vcombine.high %v309_v14, %v313_v59  ;;  %v576_v22 = vld [vmem:[%s11578_s1 + $0x10e0] sm:$0xff]  ;;  %v7285_v27 = vcombine.low %v309_v14, %v313_v59  ;;  %v365_v59 = vld [vmem:[%s11578_s1 + $0xa48] sm:$0xff] }
  0xb3   :  { %3877 = vmatpush1.bf16.msra.mxu1 %v7229_v24  ;;  %v7540_v24 = vcombine.high %v564_v11, %v568_v12  ;;  %v7547_v36 = vcombine.low %v572_v20, %v576_v22  ;;  %v7010_v11 = vld.sshfl [vmem:[%s11577_s0 + $0x8] sm:$0x1 pattern:$0x75316420] }
  0xb4   :  { %3878 = vmatprep.subr.bf16.mxu1 %v7238_v26  ;;  %v8576_v26 = vmov 0  }
  0xb5   :  { %3754 = vmatpush1.bf16.msra.mxu0 %v7483_v25  ;;  %v321_v25 = vld [vmem:[%s11578_s1 + $0x8e8] sm:$0xff] }
  0xb6   :  { %3755 = vmatprep.subr.bf16.mxu0 %v7492_v29  ;;  %v7294_v28 = vcombine.high %v317_v23, %v321_v25  ;;  %v580_v29 = vld [vmem:[%s11578_s1 + $0x1100] sm:$0xff]  ;;  %v7293_v35 = vcombine.low %v317_v23, %v321_v25 }
  0xb7   :  { %3879 = vmatpush1.bf16.msra.mxu1 %v7237_v32  ;;  %v325_v32 = vld [vmem:[%s11578_s1 + $0x908] sm:$0xff]  ;;  %v7555_v46 = vcombine.low %v580_v29, %v584_v31 }
  0xb8   :  { %3880 = vmatprep.subr.bf16.mxu1 %v7246_v34  ;;  %v329_v34 = vld [vmem:[%s11578_s1 + $0x928] sm:$0xff] }
  0xb9   :  { %3756 = vmatpush1.bf16.msra.mxu0 %v7491_v33  ;;  %v7548_v33 = vcombine.high %v572_v20, %v576_v22  ;;  %v7302_v37 = vcombine.high %v325_v32, %v329_v34  ;;  %v7301_v45 = vcombine.low %v325_v32, %v329_v34  ;;  %v50_v20 = vld [vmem:[%s11578_s1 + $0x70] sm:$0xff]  ;;  %v9395_v22 = vrot.slane %v7010_v11, %v8709_v53  ;;  %v381_v34 = vld [vmem:[%s11578_s1 + $0xac8] sm:$0xff] }
  0xba   :  { %3757 = vmatprep.subr.bf16.mxu0 %v7500_v39  ;;  %v588_v39 = vld [vmem:[%s11578_s1 + $0x1140] sm:$0xff] }
  0xbb   :  { %3881 = vmatpush1.bf16.msra.mxu1 %v7245_v41  ;;  %v333_v41 = vld [vmem:[%s11578_s1 + $0x948] sm:$0xff]  ;;  %v7563_v56 = vcombine.low %v588_v39, %v592_v40 }
  0xbc   :  { %3882 = vmatprep.subr.bf16.mxu1 %v7254_v44  ;;  %v337_v44 = vld [vmem:[%s11578_s1 + $0x968] sm:$0xff] }
  0xbd   :  { %3758 = vmatpush1.bf16.msra.mxu0 %v7499_v42  ;;  %v7556_v42 = vcombine.high %v580_v29, %v584_v31  ;;  %v7310_v47 = vcombine.high %v333_v41, %v337_v44  ;;  %v7309_v55 = vcombine.low %v333_v41, %v337_v44  ;;  %v58_v29 = vld [vmem:[%s11578_s1 + $0xb0] sm:$0xff]  ;;  %v389_v44 = vld [vmem:[%s11578_s1 + $0xb08] sm:$0xff] }
  0xbe   :  { %3759 = vmatprep.subr.bf16.mxu0 %v7508_v48  ;;  %v596_v48 = vld [vmem:[%s11578_s1 + $0x1180] sm:$0xff] }
  0xbf   :  { %3883 = vmatpush1.bf16.msra.mxu1 %v7253_v51  ;;  %v341_v51 = vld [vmem:[%s11578_s1 + $0x988] sm:$0xff]  ;;  %v7571_v2 = vcombine.low %v596_v48, %v600_v50 }
  0xc0   :  { %3884 = vmatprep.subr.bf16.mxu1 %v7262_v54  ;;  %v345_v54 = vld [vmem:[%s11578_s1 + $0x9a8] sm:$0xff] }
  0xc1   :  { %3760 = vmatpush1.bf16.msra.mxu0 %v7507_v52  ;;  %v7564_v52 = vcombine.high %v588_v39, %v592_v40  ;;  %v7318_v17 = vcombine.high %v341_v51, %v345_v54  ;;  %v7317_v1 = vcombine.low %v341_v51, %v345_v54  ;;  %v66_v39 = vld [vmem:[%s11578_s1 + $0xf0] sm:$0xff]  ;;  %v397_v54 = vld [vmem:[%s11578_s1 + $0xb48] sm:$0xff] }
  0xc2   :  { %3761 = vmatprep.subr.bf16.mxu0 %v7516_v58  ;;  %v604_v58 = vld [vmem:[%s11578_s1 + $0x11c0] sm:$0xff] }
  0xc3   :  { %3885 = vmatpush1.bf16.msra.mxu1 %v7261_v61  ;;  %v349_v61 = vld [vmem:[%s11578_s1 + $0x9c8] sm:$0xff]  ;;  %v7579_v14 = vcombine.low %v604_v58, %v608_v60 }
  0xc4   :  { %3895 = vmatprep.subr.bf16.mxu1 %v7270_v0  ;;  %v353_v0 = vld [vmem:[%s11578_s1 + $0x9e8] sm:$0xff] }
  0xc5   :  { %3762 = vmatpush1.bf16.msra.mxu0 %v7515_v62  ;;  %v7572_v62 = vcombine.high %v596_v48, %v600_v50  ;;  %v7326_v3 = vcombine.high %v349_v61, %v353_v0  ;;  %v7325_v12 = vcombine.low %v349_v61, %v353_v0  ;;  %v74_v48 = vld [vmem:[%s11578_s1 + $0x130] sm:$0xff]  ;;  %v405_v0 = vld [vmem:[%s11578_s1 + $0xb88] sm:$0xff] }
  0xc6   :  { %3772 = vmatprep.subr.bf16.mxu0 %v7524_v4  ;;  %3887 = vmatmul.mubr.bf16.vlgmr.msra.gmra.mrb[4].mxu1 %v8882_v30  ;;  %v357_v4 = vld [vmem:[%s11578_s1 + $0xa08] sm:$0xff] }
  0xc7   :  { %3896 = vmatpush1.bf16.msra.mxu1 %v7269_v6  ;;  %3927 = vmatprep.mubr.bf16.mxu1 %v8897_v38  ;;  %v38_v6 = vld [vmem:[%s11578_s1 + $0x10] sm:$0xff]  ;;  %v7333_v23 = vcombine.low %v357_v4, %v361_v5 }
  0xc8   :  { %3764 = vmatmul.mubr.bf16.vlgmr.msra.gmra.mrb[0].mxu0 %v9289_v7  ;;  %3897 = vmatprep.subr.bf16.mxu1 %v7278_v10  ;;  %v42_v10 = vld [vmem:[%s11578_s1 + $0x30] sm:$0xff] }
  0xc9   :  { %3773 = vmatpush1.bf16.msra.mxu0 %v7523_v8  ;;  %3804 = vmatprep.mubr.bf16.mxu0 %v8576_v26  ;;  %v7580_v8 = vcombine.high %v604_v58, %v608_v60  ;;  %v82_v58 = vld [vmem:[%s11578_s1 + $0x170] sm:$0xff] }
  0xca   :  { %3774 = vmatprep.subr.bf16.mxu0 %v7532_v15  ;;  %v7334_v15 = vcombine.high %v357_v4, %v361_v5 }
  0xcb   :  { %3898 = vmatpush1.bf16.msra.mxu1 %v7277_v16  ;;  %v369_v16 = vld [vmem:[%s11578_s1 + $0xa68] sm:$0xff] }
  0xcc   :  { %3899 = vmatprep.subr.bf16.mxu1 %v7286_v19  ;;  %v7016_v19 = vcombine.high %v38_v6, %v42_v10  ;;  %v7342_v25 = vcombine.high %v365_v59, %v369_v16  ;;  %v7341_v31 = vcombine.low %v365_v59, %v369_v16 }
  0xcd   :  { %3775 = vmatpush1.bf16.msra.mxu0 %v7531_v18  ;;  %v46_v18 = vld [vmem:[%s11578_s1 + $0x50] sm:$0xff] }
  0xce   :  { %3776 = vmatprep.subr.bf16.mxu0 %v7540_v24  ;;  %v7015_v24 = vcombine.low %v38_v6, %v42_v10  ;;  %v7024_v53 = vcombine.high %v46_v18, %v50_v20  ;;  %v7023_v32 = vcombine.low %v46_v18, %v50_v20 }
  0xcf   :  { %3900 = vmatpush1.bf16.msra.mxu1 %v7285_v27  ;;  %v373_v27 = vld [vmem:[%s11578_s1 + $0xa88] sm:$0xff] }
  0xd0   :  { %3901 = vmatprep.subr.bf16.mxu1 %v7294_v28  ;;  %v54_v28 = vld [vmem:[%s11578_s1 + $0x90] sm:$0xff] }
  0xd1   :  { %3777 = vmatpush1.bf16.msra.mxu0 %v7539_v63  ;;  %v377_v63 = vld [vmem:[%s11578_s1 + $0xaa8] sm:$0xff]  ;;  %v7031_v41 = vcombine.low %v54_v28, %v58_v29 }
  0xd2   :  { %3778 = vmatprep.subr.bf16.mxu0 %v7548_v33  ;;  %v7350_v33 = vcombine.high %v373_v27, %v377_v63  ;;  %v7349_v40 = vcombine.low %v373_v27, %v377_v63 }
  0xd3   :  { %3902 = vmatpush1.bf16.msra.mxu1 %v7293_v35  ;;  %v385_v35 = vld [vmem:[%s11578_s1 + $0xae8] sm:$0xff] }
  0xd4   :  { %3903 = vmatprep.subr.bf16.mxu1 %v7302_v37  ;;  %v7032_v37 = vcombine.high %v54_v28, %v58_v29  ;;  %v7357_v50 = vcombine.low %v381_v34, %v385_v35 }
  0xd5   :  { %3779 = vmatpush1.bf16.msra.mxu0 %v7547_v36  ;;  %v62_v36 = vld [vmem:[%s11578_s1 + $0xd0] sm:$0xff] }
  0xd6   :  { %3780 = vmatprep.subr.bf16.mxu0 %v7556_v42  ;;  %v7358_v42 = vcombine.high %v381_v34, %v385_v35  ;;  %v7039_v51 = vcombine.low %v62_v36, %v66_v39 }
  0xd7   :  { %3904 = vmatpush1.bf16.msra.mxu1 %v7301_v45  ;;  %v393_v45 = vld [vmem:[%s11578_s1 + $0xb28] sm:$0xff] }
  0xd8   :  { %3905 = vmatprep.subr.bf16.mxu1 %v7310_v47  ;;  %v7040_v47 = vcombine.high %v62_v36, %v66_v39  ;;  %v7365_v60 = vcombine.low %v389_v44, %v393_v45 }
  0xd9   :  { %3781 = vmatpush1.bf16.msra.mxu0 %v7555_v46  ;;  %v70_v46 = vld [vmem:[%s11578_s1 + $0x110] sm:$0xff] }
  0xda   :  { %3782 = vmatprep.subr.bf16.mxu0 %v7564_v52  ;;  %v7366_v52 = vcombine.high %v389_v44, %v393_v45  ;;  %v7047_v61 = vcombine.low %v70_v46, %v74_v48 }
  0xdb   :  { %3906 = vmatpush1.bf16.msra.mxu1 %v7309_v55  ;;  %v401_v55 = vld [vmem:[%s11578_s1 + $0xb68] sm:$0xff] }
  0xdc   :  { %3907 = vmatprep.subr.bf16.mxu1 %v7318_v17  ;;  %v7048_v17 = vcombine.high %v70_v46, %v74_v48 }
  0xdd   :  { %3783 = vmatpush1.bf16.msra.mxu0 %v7563_v56  ;;  %v78_v56 = vld [vmem:[%s11578_s1 + $0x150] sm:$0xff] }
  0xde   :  { %3784 = vmatprep.subr.bf16.mxu0 %v7572_v62  ;;  %v7374_v62 = vcombine.high %v397_v54, %v401_v55 }
  0xdf   :  { %3908 = vmatpush1.bf16.msra.mxu1 %v7317_v1  ;;  %v7056_v1 = vcombine.high %v78_v56, %v82_v58 }
  0xe0   :  { %3909 = vmatprep.subr.bf16.mxu1 %v7326_v3 }
  0xe1   :  { %3785 = vmatpush1.bf16.msra.mxu0 %v7571_v2  ;;  %v409_v2 = vld [vmem:[%s11578_s1 + $0xba8] sm:$0xff] }
  0xe2   :  { %3786 = vmatprep.subr.bf16.mxu0 %v7580_v8 }
  0xe3   :  { %3910 = vmatpush1.bf16.msra.mxu1 %v7325_v12 }
  0xe4   :  { %3911 = vmatprep.subr.bf16.mxu1 %v7334_v15 }
  0xe5   :  { %3787 = vmatpush1.bf16.msra.mxu0 %v7579_v14 }
  0xe6   :  { %4018 = vmatprep.subr.bf16.mxu0 %v7016_v19 }
  0xe7   :  { %3912 = vmatpush1.bf16.msra.mxu1 %v7333_v23 }
  0xe8   :  { %3805 = vmatmul.mubr.bf16.vlgmr.msra.gmra.mrb[0].mxu0 %v9395_v22  ;;  %3913 = vmatprep.subr.bf16.mxu1 %v7342_v25 }
  0xe9   :  { %4019 = vmatpush1.bf16.msra.mxu0 %v7015_v24  ;;  %4050 = vmatprep.mubr.bf16.mxu0 %v8747_v9 }
  0xea   :  { %4020 = vmatprep.subr.bf16.mxu0 %v7024_v53 }
  0xeb   :  { %3914 = vmatpush1.bf16.msra.mxu1 %v7341_v31 }
  0xec   :  { %3915 = vmatprep.subr.bf16.mxu1 %v7350_v33 }
  0xed   :  { %4021 = vmatpush1.bf16.msra.mxu0 %v7023_v32 }
  0xee   :  { %4022 = vmatprep.subr.bf16.mxu0 %v7032_v37 }
  0xef   :  { %3916 = vmatpush1.bf16.msra.mxu1 %v7349_v40 }
  0xf0   :  { %3917 = vmatprep.subr.bf16.mxu1 %v7358_v42 }
  0xf1   :  { %4023 = vmatpush1.bf16.msra.mxu0 %v7031_v41 }
  0xf2   :  { %4024 = vmatprep.subr.bf16.mxu0 %v7040_v47 }
  0xf3   :  { %3918 = vmatpush1.bf16.msra.mxu1 %v7357_v50 }
  0xf4   :  { %3919 = vmatprep.subr.bf16.mxu1 %v7366_v52 }
  0xf5   :  { %4025 = vmatpush1.bf16.msra.mxu0 %v7039_v51 }
  0xf6   :  { %4026 = vmatprep.subr.bf16.mxu0 %v7048_v17 }
  0xf7   :  { %14 = vsyncpa [#allocation3], 0  ;;  %v86_v3 = vld [vmem:[%s11578_s1 + $0x190] sm:$0xff]  ;;  %3920 = vmatpush1.bf16.msra.mxu1 %v7365_v60  ;;  %v7373_v5 = vcombine.low %v397_v54, %v401_v55  ;;  %v7055_v6 = vcombine.low %v78_v56, %v82_v58  ;;  %v7382_v8 = vcombine.high %v405_v0, %v409_v2  ;;  %v413_v11 = vld [vmem:[%s11578_s1 + $0xbc8] sm:$0xff]  ;;  %v7381_v59 = vcombine.low %v405_v0, %v409_v2  ;;  %s8577_s29 = smov [#allocation2]  }
  0xf8   :  { %v90_v4 = vld [vmem:[%s11578_s1 + $0x1b0] sm:$0xff]  ;;  %3921 = vmatprep.subr.bf16.mxu1 %v7374_v62  ;;  %v417_v12 = vld [vmem:[%s11578_s1 + $0xbe8] sm:$0xff]  ;;  %s7002_s30 = sshll.u32 %s8577_s29, 4  ;;  %s7003_s30 = int_to_ptr.vmem [resolvable:$true] %s7002_s30 }
  0xf9   :  { %4027 = vmatpush1.bf16.msra.mxu0 %v7047_v61  ;;  %v7064_v10 = vcombine.high %v86_v3, %v90_v4  ;;  %v94_v14 = vld [vmem:[%s11578_s1 + $0x1d0] sm:$0xff]  ;;  %v7063_v16 = vcombine.low %v86_v3, %v90_v4  ;;  %v7390_v18 = vcombine.high %v413_v11, %v417_v12  ;;  %v421_v20 = vld [vmem:[%s11578_s1 + $0xc08] sm:$0xff]  ;;  %v7389_v27 = vcombine.low %v413_v11, %v417_v12  ;;  %s8551_s10 = scalar_lea.vmem %s7003_s30, 32  ;;  %p8556_p1 = scmp.lt.s32.totalorder %s7003_s30, %s7003_s30 }
  0xfa   :  { %4028 = vmatprep.subr.bf16.mxu0 %v7056_v1  ;;  %v98_v15 = vld [vmem:[%s11578_s1 + $0x1f0] sm:$0xff]  ;;  %v425_v23 = vld [vmem:[%s11578_s1 + $0xc28] sm:$0xff]  ;;  %p8552_p0 = scmp.ne.s32.totalorder %s7003_s30, %s8551_s10  ;;  %p8557_p2 = scmp.lt.s32.totalorder %s8551_s10, %s8551_s10 }
  0xfb   :  { %3922 = vmatpush1.bf16.msra.mxu1 %v7373_v5  ;;  %v7072_v19 = vcombine.high %v94_v14, %v98_v15  ;;  %v102_v24 = vld [vmem:[%s11578_s1 + $0x210] sm:$0xff]  ;;  %v7071_v63 = vcombine.low %v94_v14, %v98_v15  ;;  %v7398_v28 = vcombine.high %v421_v20, %v425_v23  ;;  %v429_v29 = vld [vmem:[%s11578_s1 + $0xc48] sm:$0xff]  ;;  %v7397_v34 = vcombine.low %v421_v20, %v425_v23 }
  0xfc   :  { %3923 = vmatprep.subr.bf16.mxu1 %v7382_v8  ;;  %v106_v25 = vld [vmem:[%s11578_s1 + $0x230] sm:$0xff]  ;;  %v433_v31 = vld [vmem:[%s11578_s1 + $0xc68] sm:$0xff]  ;;  %p8558_p3 = por %p8557_p2, %p8556_p1 }
  0xfd   :  { %4029 = vmatpush1.bf16.msra.mxu0 %v7055_v6  ;;  %v7080_v53 = vcombine.high %v102_v24, %v106_v25  ;;  %v110_v32 = vld [vmem:[%s11578_s1 + $0x250] sm:$0xff]  ;;  %v7079_v35 = vcombine.low %v102_v24, %v106_v25  ;;  %v7406_v36 = vcombine.high %v429_v29, %v433_v31  ;;  %v437_v39 = vld [vmem:[%s11578_s1 + $0xc88] sm:$0xff]  ;;  %v7405_v44 = vcombine.low %v429_v29, %v433_v31 }
  0xfe   :  { %4030 = vmatprep.subr.bf16.mxu0 %v7064_v10  ;;  %v114_v33 = vld [vmem:[%s11578_s1 + $0x270] sm:$0xff]  ;;  %v441_v40 = vld [vmem:[%s11578_s1 + $0xca8] sm:$0xff]  ;;  %p8559_p4 = pnand %p8558_p3, %p8552_p0 }
  0xff   :  { %3924 = vmatpush1.bf16.msra.mxu1 %v7381_v59  ;;  %v7088_v37 = vcombine.high %v110_v32, %v114_v33  ;;  %v118_v41 = vld [vmem:[%s11578_s1 + $0x290] sm:$0xff]  ;;  %v7087_v45 = vcombine.low %v110_v32, %v114_v33  ;;  %v7414_v46 = vcombine.high %v437_v39, %v441_v40  ;;  %v445_v48 = vld [vmem:[%s11578_s1 + $0xcc8] sm:$0xff]  ;;  %v7413_v54 = vcombine.low %v437_v39, %v441_v40 }
 0x100   :  { %3925 = vmatprep.subr.bf16.mxu1 %v7390_v18  ;;  %v122_v42 = vld [vmem:[%s11578_s1 + $0x2b0] sm:$0xff]  ;;  %v449_v50 = vld [vmem:[%s11578_s1 + $0xce8] sm:$0xff] }
 0x101   :  { %4031 = vmatpush1.bf16.msra.mxu0 %v7063_v16  ;;  %v7096_v47 = vcombine.high %v118_v41, %v122_v42  ;;  %v126_v51 = vld [vmem:[%s11578_s1 + $0x2d0] sm:$0xff]  ;;  %v7095_v55 = vcombine.low %v118_v41, %v122_v42  ;;  %v7422_v56 = vcombine.high %v445_v48, %v449_v50  ;;  %v453_v58 = vld [vmem:[%s11578_s1 + $0xd08] sm:$0xff]  ;;  %v7421_v0 = vcombine.low %v445_v48, %v449_v50 }
 0x102   :  { %4032 = vmatprep.subr.bf16.mxu0 %v7072_v19  ;;  %v130_v52 = vld [vmem:[%s11578_s1 + $0x2f0] sm:$0xff]  ;;  %v457_v60 = vld [vmem:[%s11578_s1 + $0xd28] sm:$0xff] }
 0x103   :  { %3926 = vmatpush1.bf16.msra.mxu1 %v7389_v27  ;;  %v7104_v17 = vcombine.high %v126_v51, %v130_v52  ;;  %v134_v61 = vld [vmem:[%s11578_s1 + $0x310] sm:$0xff]  ;;  %v7103_v1 = vcombine.low %v126_v51, %v130_v52  ;;  %v7430_v2 = vcombine.high %v453_v58, %v457_v60  ;;  %v461_v4 = vld [vmem:[%s11578_s1 + $0xd48] sm:$0xff]  ;;  %v7429_v10 = vcombine.low %v453_v58, %v457_v60 }
 0x104   :  { %3936 = vmatprep.subr.bf16.mxu1 %v7398_v28  ;;  %v138_v62 = vld [vmem:[%s11578_s1 + $0x330] sm:$0xff]  ;;  %v465_v5 = vld [vmem:[%s11578_s1 + $0xd68] sm:$0xff] }
 0x105   :  { %4033 = vmatpush1.bf16.msra.mxu0 %v7071_v63  ;;  %v7112_v3 = vcombine.high %v134_v61, %v138_v62  ;;  %v142_v6 = vld [vmem:[%s11578_s1 + $0x350] sm:$0xff]  ;;  %v7111_v11 = vcombine.low %v134_v61, %v138_v62  ;;  %v7438_v12 = vcombine.high %v461_v4, %v465_v5  ;;  %v469_v15 = vld [vmem:[%s11578_s1 + $0xd88] sm:$0xff]  ;;  %v7437_v19 = vcombine.low %v461_v4, %v465_v5 }
 0x106   :  { %4034 = vmatprep.subr.bf16.mxu0 %v7080_v53  ;;  %3928 = vmatmul.mubr.bf16.vlgmr.msra.gmra.mrb[4].mxu1 %v9085_v49  ;;  %v146_v8 = vld [vmem:[%s11578_s1 + $0x370] sm:$0xff]  ;;  %v473_v59 = vld [vmem:[%s11578_s1 + $0xda8] sm:$0xff] }
 0x107   :  { %3937 = vmatpush1.bf16.msra.mxu1 %v7397_v34  ;;  %3968 = vmatprep.mubr.bf16.mxu1 %v9101_v57  ;;  %v7120_v14 = vcombine.high %v142_v6, %v146_v8  ;;  %v150_v16 = vld [vmem:[%s11578_s1 + $0x390] sm:$0xff]  ;;  %v7119_v20 = vcombine.low %v142_v6, %v146_v8  ;;  %v7446_v23 = vcombine.high %v469_v15, %v473_v59  ;;  %v477_v27 = vld [vmem:[%s11578_s1 + $0xdc8] sm:$0xff] }
 0x108   :  { %3938 = vmatprep.subr.bf16.mxu1 %v7406_v36  ;;  %v154_v18 = vld [vmem:[%s11578_s1 + $0x3b0] sm:$0xff]  ;;  %v481_v63 = vld [vmem:[%s11578_s1 + $0xde8] sm:$0xff]  ;;  %v7445_v32 = vcombine.low %v469_v15, %v473_v59 }
 0x109   :  { %4035 = vmatpush1.bf16.msra.mxu0 %v7079_v35  ;;  %v7128_v25 = vcombine.high %v150_v16, %v154_v18  ;;  %v158_v53 = vld [vmem:[%s11578_s1 + $0x3d0] sm:$0xff]  ;;  %v7127_v34 = vcombine.low %v150_v16, %v154_v18  ;;  %v7454_v35 = vcombine.high %v477_v27, %v481_v63  ;;  %v489_v39 = vld [vmem:[%s11578_s1 + $0xe28] sm:$0xff]  ;;  %v7453_v42 = vcombine.low %v477_v27, %v481_v63 }
 0x10a   :  { %4036 = vmatprep.subr.bf16.mxu0 %v7088_v37  ;;  %v162_v29 = vld [vmem:[%s11578_s1 + $0x3f0] sm:$0xff]  ;;  %v485_v37 = vld [vmem:[%s11578_s1 + $0xe08] sm:$0xff] }
 0x10b   :  { %3939 = vmatpush1.bf16.msra.mxu1 %v7405_v44  ;;  %v7136_v36 = vcombine.high %v158_v53, %v162_v29  ;;  %v166_v40 = vld [vmem:[%s11578_s1 + $0x410] sm:$0xff]  ;;  %v7135_v44 = vcombine.low %v158_v53, %v162_v29  ;;  %v497_v48 = vld [vmem:[%s11578_s1 + $0xe68] sm:$0xff]  ;;  %v7461_v52 = vcombine.low %v485_v37, %v489_v39 }
 0x10c   :  { %3940 = vmatprep.subr.bf16.mxu1 %v7414_v46  ;;  %v170_v41 = vld [vmem:[%s11578_s1 + $0x430] sm:$0xff]  ;;  %v505_v58 = vld [vmem:[%s11578_s1 + $0xea8] sm:$0xff] }
 0x10d   :  { %4037 = vmatpush1.bf16.msra.mxu0 %v7087_v45  ;;  %v7462_v45 = vcombine.high %v485_v37, %v489_v39  ;;  %v7144_v46 = vcombine.high %v166_v40, %v170_v41  ;;  %v174_v50 = vld [vmem:[%s11578_s1 + $0x450] sm:$0xff]  ;;  %v513_v4 = vld [vmem:[%s11578_s1 + $0xee8] sm:$0xff] }
 0x10e   :  { %4038 = vmatprep.subr.bf16.mxu0 %v7096_v47  ;;  %v493_v47 = vld [vmem:[%s11578_s1 + $0xe48] sm:$0xff]  ;;  %v178_v51 = vld [vmem:[%s11578_s1 + $0x470] sm:$0xff] }
 0x10f   :  { %3941 = vmatpush1.bf16.msra.mxu1 %v7413_v54  ;;  %v7143_v54 = vcombine.low %v166_v40, %v170_v41  ;;  %v182_v60 = vld [vmem:[%s11578_s1 + $0x490] sm:$0xff]  ;;  %v7469_v62 = vcombine.low %v493_v47, %v497_v48  ;;  %v521_v15 = vld [vmem:[%s11578_s1 + $0xf28] sm:$0xff] }
 0x110   :  { %3942 = vmatprep.subr.bf16.mxu1 %v7422_v56  ;;  %v7152_v56 = vcombine.high %v174_v50, %v178_v51  ;;  %v186_v61 = vld [vmem:[%s11578_s1 + $0x4b0] sm:$0xff]  ;;  %v529_v27 = vld [vmem:[%s11578_s1 + $0xf68] sm:$0xff] }
 0x111   :  { %4039 = vmatpush1.bf16.msra.mxu0 %v7095_v55  ;;  %v7470_v55 = vcombine.high %v493_v47, %v497_v48  ;;  %v190_v5 = vld [vmem:[%s11578_s1 + $0x4d0] sm:$0xff] }
 0x112   :  { %4040 = vmatprep.subr.bf16.mxu0 %v7104_v17  ;;  %v501_v17 = vld [vmem:[%s11578_s1 + $0xe88] sm:$0xff]  ;;  %v194_v6 = vld [vmem:[%s11578_s1 + $0x4f0] sm:$0xff] }
 0x113   :  { %3943 = vmatpush1.bf16.msra.mxu1 %v7421_v0  ;;  %v7151_v0 = vcombine.low %v174_v50, %v178_v51  ;;  %v7477_v8 = vcombine.low %v501_v17, %v505_v58  ;;  %v198_v59 = vld [vmem:[%s11578_s1 + $0x510] sm:$0xff] }
 0x114   :  { %3944 = vmatprep.subr.bf16.mxu1 %v7430_v2  ;;  %v7160_v2 = vcombine.high %v182_v60, %v186_v61  ;;  %v202_v16 = vld [vmem:[%s11578_s1 + $0x530] sm:$0xff] }
 0x115   :  { %4041 = vmatpush1.bf16.msra.mxu0 %v7103_v1  ;;  %v7478_v1 = vcombine.high %v501_v17, %v505_v58  ;;  %v206_v63 = vld [vmem:[%s11578_s1 + $0x550] sm:$0xff] }
 0x116   :  { %4042 = vmatprep.subr.bf16.mxu0 %v7112_v3  ;;  %v509_v3 = vld [vmem:[%s11578_s1 + $0xec8] sm:$0xff]  ;;  %v210_v53 = vld [vmem:[%s11578_s1 + $0x570] sm:$0xff] }
 0x117   :  { %3945 = vmatpush1.bf16.msra.mxu1 %v7429_v10  ;;  %v7159_v10 = vcombine.low %v182_v60, %v186_v61  ;;  %v7485_v18 = vcombine.low %v509_v3, %v513_v4  ;;  %v218_v37 = vld [vmem:[%s11578_s1 + $0x5b0] sm:$0xff]  ;;  %v7183_v40 = vcombine.low %v206_v63, %v210_v53 }
 0x118   :  { %3946 = vmatprep.subr.bf16.mxu1 %v7438_v12  ;;  %v7168_v12 = vcombine.high %v190_v5, %v194_v6  ;;  %v226_v47 = vld [vmem:[%s11578_s1 + $0x5f0] sm:$0xff] }
 0x119   :  { %4043 = vmatpush1.bf16.msra.mxu0 %v7111_v11  ;;  %v9557_v24 = vpop.f32.mrb[0].mxu1  ;;  %v7486_v11 = vcombine.high %v509_v3, %v513_v4  ;;  %v234_v17 = vld [vmem:[%s11578_s1 + $0x630] sm:$0xff] }
 0x11a   :  { %4044 = vmatprep.subr.bf16.mxu0 %v7120_v14  ;;  %v9565_v28 = vpop.f32.mrb[1].mxu1  ;;  %v517_v14 = vld [vmem:[%s11578_s1 + $0xf08] sm:$0xff]  ;;  %v242_v3 = vld [vmem:[%s11578_s1 + $0x670] sm:$0xff] }
 0x11b   :  { %v3646_v31 = vpop.f32.mrb[2].mxu1  ;;  %3947 = vmatpush1.bf16.msra.mxu1 %v7437_v19  ;;  %v7167_v19 = vcombine.low %v190_v5, %v194_v6  ;;  %v7493_v29 = vcombine.low %v517_v14, %v521_v15 }
 0x11c   :  { %v3647_v33 = vpop.f32.mrb[3].mxu1  ;;  %3948 = vmatprep.subr.bf16.mxu1 %v7446_v23  ;;  %v7176_v23 = vcombine.high %v198_v59, %v202_v16  ;;  %v7175_v31 = vcombine.low %v198_v59, %v202_v16 }
 0x11d   :  { %4045 = vmatpush1.bf16.msra.mxu0 %v7119_v20  ;;  %v7494_v20 = vcombine.high %v517_v14, %v521_v15  ;;  %v7184_v33 = vcombine.high %v206_v63, %v210_v53  ;;  %v250_v14 = vld [vmem:[%s11578_s1 + $0x6b0] sm:$0xff] }
 0x11e   :  { %4046 = vmatprep.subr.bf16.mxu0 %v7128_v25  ;;  %v525_v25 = vld [vmem:[%s11578_s1 + $0xf48] sm:$0xff] }
 0x11f   :  { %3949 = vmatpush1.bf16.msra.mxu1 %v7445_v32  ;;  %v7502_v32 = vcombine.high %v525_v25, %v529_v27  ;;  %v7501_v39 = vcombine.low %v525_v25, %v529_v27  ;;  %v258_v25 = vld [vmem:[%s11578_s1 + $0x6f0] sm:$0xff] }
 0x120   :  { %3950 = vmatprep.subr.bf16.mxu1 %v7454_v35  ;;  %v537_v35 = vld [vmem:[%s11578_s1 + $0xfa8] sm:$0xff] }
 0x121   :  { %4047 = vmatpush1.bf16.msra.mxu0 %v7127_v34  ;;  %v533_v34 = vld [vmem:[%s11578_s1 + $0xf88] sm:$0xff] }
 0x122   :  { %4048 = vmatprep.subr.bf16.mxu0 %v7136_v36  ;;  %v214_v36 = vld [vmem:[%s11578_s1 + $0x590] sm:$0xff]  ;;  %v7510_v41 = vcombine.high %v533_v34, %v537_v35  ;;  %v7509_v48 = vcombine.low %v533_v34, %v537_v35 }
 0x123   :  { %3951 = vmatpush1.bf16.msra.mxu1 %v7453_v42  ;;  %v7192_v42 = vcombine.high %v214_v36, %v218_v37  ;;  %v7191_v50 = vcombine.low %v214_v36, %v218_v37  ;;  %v266_v34 = vld [vmem:[%s11578_s1 + $0x730] sm:$0xff] }
 0x124   :  { %3952 = vmatprep.subr.bf16.mxu1 %v7462_v45  ;;  %v545_v45 = vld [vmem:[%s11578_s1 + $0xfe8] sm:$0xff] }
 0x125   :  { %4049 = vmatpush1.bf16.msra.mxu0 %v7135_v44  ;;  %v541_v44 = vld [vmem:[%s11578_s1 + $0xfc8] sm:$0xff] }
 0x126   :  { %4059 = vmatprep.subr.bf16.mxu0 %v7144_v46  ;;  %v222_v46 = vld [vmem:[%s11578_s1 + $0x5d0] sm:$0xff]  ;;  %v7518_v51 = vcombine.high %v541_v44, %v545_v45  ;;  %v7517_v58 = vcombine.low %v541_v44, %v545_v45 }
 0x127   :  { %3953 = vmatpush1.bf16.msra.mxu1 %v7461_v52  ;;  %v7200_v52 = vcombine.high %v222_v46, %v226_v47  ;;  %v7199_v60 = vcombine.low %v222_v46, %v226_v47  ;;  %v274_v44 = vld [vmem:[%s11578_s1 + $0x770] sm:$0xff] }
 0x128   :  { %4051 = vmatmul.mubr.bf16.vlgmr.msra.gmra.mrb[4].mxu0 %v8864_v21  ;;  %3954 = vmatprep.subr.bf16.mxu1 %v7470_v55  ;;  %v553_v55 = vld [vmem:[%s11578_s1 + $0x1028] sm:$0xff] }
 0x129   :  { %4060 = vmatpush1.bf16.msra.mxu0 %v7143_v54  ;;  %4091 = vmatprep.mubr.bf16.mxu0 %v8758_v13  ;;  %v549_v54 = vld [vmem:[%s11578_s1 + $0x1008] sm:$0xff] }
 0x12a   :  { %4061 = vmatprep.subr.bf16.mxu0 %v7152_v56  ;;  %v230_v56 = vld [vmem:[%s11578_s1 + $0x610] sm:$0xff]  ;;  %v7526_v61 = vcombine.high %v549_v54, %v553_v55  ;;  %v7525_v4 = vcombine.low %v549_v54, %v553_v55 }
 0x12b   :  { %3955 = vmatpush1.bf16.msra.mxu1 %v7469_v62  ;;  %v7208_v62 = vcombine.high %v230_v56, %v234_v17  ;;  %v7207_v5 = vcombine.low %v230_v56, %v234_v17  ;;  %v282_v54 = vld [vmem:[%s11578_s1 + $0x7b0] sm:$0xff] }
 0x12c   :  { %3956 = vmatprep.subr.bf16.mxu1 %v7478_v1  ;;  %v561_v1 = vld [vmem:[%s11578_s1 + $0x1068] sm:$0xff] }
 0x12d   :  { %4062 = vmatpush1.bf16.msra.mxu0 %v7151_v0  ;;  %v557_v0 = vld [vmem:[%s11578_s1 + $0x1048] sm:$0xff] }
 0x12e   :  { %4063 = vmatprep.subr.bf16.mxu0 %v7160_v2  ;;  %v238_v2 = vld [vmem:[%s11578_s1 + $0x650] sm:$0xff]  ;;  %v7534_v6 = vcombine.high %v557_v0, %v561_v1  ;;  %v7533_v15 = vcombine.low %v557_v0, %v561_v1 }
 0x12f   :  { %3957 = vmatpush1.bf16.msra.mxu1 %v7477_v8  ;;  %v7216_v8 = vcombine.high %v238_v2, %v242_v3  ;;  %v7215_v59 = vcombine.low %v238_v2, %v242_v3  ;;  %v290_v0 = vld [vmem:[%s11578_s1 + $0x7f0] sm:$0xff] }
 0x130   :  { %3958 = vmatprep.subr.bf16.mxu1 %v7486_v11  ;;  %v569_v11 = vld [vmem:[%s11578_s1 + $0x10a8] sm:$0xff] }
 0x131   :  { %4064 = vmatpush1.bf16.msra.mxu0 %v7159_v10  ;;  %v565_v10 = vld [vmem:[%s11578_s1 + $0x1088] sm:$0xff] }
 0x132   :  { %4065 = vmatprep.subr.bf16.mxu0 %v7168_v12  ;;  %v246_v12 = vld [vmem:[%s11578_s1 + $0x690] sm:$0xff]  ;;  %v7542_v16 = vcombine.high %v565_v10, %v569_v11  ;;  %v7541_v27 = vcombine.low %v565_v10, %v569_v11 }
 0x133   :  { %3959 = vmatpush1.bf16.msra.mxu1 %v7485_v18  ;;  %v7224_v18 = vcombine.high %v246_v12, %v250_v14  ;;  %v7223_v63 = vcombine.low %v246_v12, %v250_v14  ;;  %v298_v10 = vld [vmem:[%s11578_s1 + $0x830] sm:$0xff] }
 0x134   :  { %3960 = vmatprep.subr.bf16.mxu1 %v7494_v20  ;;  %v577_v20 = vld [vmem:[%s11578_s1 + $0x10e8] sm:$0xff] }
 0x135   :  { %4066 = vmatpush1.bf16.msra.mxu0 %v7167_v19  ;;  %v573_v19 = vld [vmem:[%s11578_s1 + $0x10c8] sm:$0xff] }
 0x136   :  { %4067 = vmatprep.subr.bf16.mxu0 %v7176_v23  ;;  %v254_v23 = vld [vmem:[%s11578_s1 + $0x6d0] sm:$0xff]  ;;  %v7550_v53 = vcombine.high %v573_v19, %v577_v20  ;;  %v7549_v35 = vcombine.low %v573_v19, %v577_v20 }
 0x137   :  { %3961 = vmatpush1.bf16.msra.mxu1 %v7493_v29  ;;  %v7232_v29 = vcombine.high %v254_v23, %v258_v25  ;;  %v7231_v36 = vcombine.low %v254_v23, %v258_v25  ;;  %v306_v19 = vld [vmem:[%s11578_s1 + $0x870] sm:$0xff] }
 0x138   :  { %3962 = vmatprep.subr.bf16.mxu1 %v7502_v32  ;;  %v585_v32 = vld [vmem:[%s11578_s1 + $0x1128] sm:$0xff] }
 0x139   :  { %4068 = vmatpush1.bf16.msra.mxu0 %v7175_v31  ;;  %v581_v31 = vld [vmem:[%s11578_s1 + $0x1108] sm:$0xff] }
 0x13a   :  { %4069 = vmatprep.subr.bf16.mxu0 %v7184_v33  ;;  %v262_v33 = vld [vmem:[%s11578_s1 + $0x710] sm:$0xff]  ;;  %v7558_v37 = vcombine.high %v581_v31, %v585_v32  ;;  %v7557_v45 = vcombine.low %v581_v31, %v585_v32 }
 0x13b   :  { %3963 = vmatpush1.bf16.msra.mxu1 %v7501_v39  ;;  %v7240_v39 = vcombine.high %v262_v33, %v266_v34  ;;  %v7239_v46 = vcombine.low %v262_v33, %v266_v34  ;;  %v314_v31 = vld [vmem:[%s11578_s1 + $0x8b0] sm:$0xff] }
 0x13c   :  { %3964 = vmatprep.subr.bf16.mxu1 %v7510_v41  ;;  %v593_v41 = vld [vmem:[%s11578_s1 + $0x1168] sm:$0xff] }
 0x13d   :  { %4070 = vmatpush1.bf16.msra.mxu0 %v7183_v40  ;;  %v589_v40 = vld [vmem:[%s11578_s1 + $0x1148] sm:$0xff] }
 0x13e   :  { %4071 = vmatprep.subr.bf16.mxu0 %v7192_v42  ;;  %v270_v42 = vld [vmem:[%s11578_s1 + $0x750] sm:$0xff]  ;;  %v7566_v47 = vcombine.high %v589_v40, %v593_v41  ;;  %v7565_v55 = vcombine.low %v589_v40, %v593_v41 }
 0x13f   :  { %3965 = vmatpush1.bf16.msra.mxu1 %v7509_v48  ;;  %v7248_v48 = vcombine.high %v270_v42, %v274_v44  ;;  %v7247_v56 = vcombine.low %v270_v42, %v274_v44  ;;  %v322_v40 = vld [vmem:[%s11578_s1 + $0x8f0] sm:$0xff] }
 0x140   :  { %3966 = vmatprep.subr.bf16.mxu1 %v7518_v51  ;;  %v601_v51 = vld [vmem:[%s11578_s1 + $0x11a8] sm:$0xff] }
 0x141   :  { %4072 = vmatpush1.bf16.msra.mxu0 %v7191_v50  ;;  %v597_v50 = vld [vmem:[%s11578_s1 + $0x1188] sm:$0xff] }
 0x142   :  { %4073 = vmatprep.subr.bf16.mxu0 %v7200_v52  ;;  %v278_v52 = vld [vmem:[%s11578_s1 + $0x790] sm:$0xff]  ;;  %v7574_v17 = vcombine.high %v597_v50, %v601_v51  ;;  %v7573_v1 = vcombine.low %v597_v50, %v601_v51 }
 0x143   :  { %3967 = vmatpush1.bf16.msra.mxu1 %v7517_v58  ;;  %v7256_v58 = vcombine.high %v278_v52, %v282_v54  ;;  %v7255_v2 = vcombine.low %v278_v52, %v282_v54 }
 0x144   :  { %3977 = vmatprep.subr.bf16.mxu1 %v7526_v61  ;;  %v609_v61 = vld [vmem:[%s11578_s1 + $0x11e8] sm:$0xff] }
 0x145   :  { %4074 = vmatpush1.bf16.msra.mxu0 %v7199_v60  ;;  %v605_v60 = vld [vmem:[%s11578_s1 + $0x11c8] sm:$0xff] }
 0x146   :  { %4075 = vmatprep.subr.bf16.mxu0 %v7208_v62  ;;  %3969 = vmatmul.mubr.bf16.vlgmr.msra.gmra.mrb[4].mxu1 %v9289_v7  ;;  %v286_v62 = vld [vmem:[%s11578_s1 + $0x7d0] sm:$0xff]  ;;  %v7582_v3 = vcombine.high %v605_v60, %v609_v61  ;;  %v7581_v11 = vcombine.low %v605_v60, %v609_v61 }
 0x147   :  { %3978 = vmatpush1.bf16.msra.mxu1 %v7525_v4  ;;  %4009 = vmatprep.mubr.bf16.mxu1 %v8576_v26  ;;  %v7264_v4 = vcombine.high %v286_v62, %v290_v0  ;;  %v7263_v12 = vcombine.low %v286_v62, %v290_v0 }
 0x148   :  { %3979 = vmatprep.subr.bf16.mxu1 %v7534_v6  ;;  %v43_v6 = vld [vmem:[%s11578_s1 + $0x38] sm:$0xff] }
 0x149   :  { %4076 = vmatpush1.bf16.msra.mxu0 %v7207_v5  ;;  %v39_v5 = vld [vmem:[%s11578_s1 + $0x18] sm:$0xff] }
 0x14a   :  { %4077 = vmatprep.subr.bf16.mxu0 %v7216_v8  ;;  %v294_v8 = vld [vmem:[%s11578_s1 + $0x810] sm:$0xff]  ;;  %v7018_v14 = vcombine.high %v39_v5, %v43_v6  ;;  %v7017_v20 = vcombine.low %v39_v5, %v43_v6 }
 0x14b   :  { %3980 = vmatpush1.bf16.msra.mxu1 %v7533_v15  ;;  %v7272_v15 = vcombine.high %v294_v8, %v298_v10  ;;  %v7271_v23 = vcombine.low %v294_v8, %v298_v10 }
 0x14c   :  { %3981 = vmatprep.subr.bf16.mxu1 %v7542_v16  ;;  %v51_v16 = vld [vmem:[%s11578_s1 + $0x78] sm:$0xff] }
 0x14d   :  { %4078 = vmatpush1.bf16.msra.mxu0 %v7215_v59  ;;  %v47_v59 = vld [vmem:[%s11578_s1 + $0x58] sm:$0xff] }
 0x14e   :  { %4079 = vmatprep.subr.bf16.mxu0 %v7224_v18  ;;  %v302_v18 = vld [vmem:[%s11578_s1 + $0x850] sm:$0xff]  ;;  %v7026_v25 = vcombine.high %v47_v59, %v51_v16  ;;  %v7025_v32 = vcombine.low %v47_v59, %v51_v16 }
 0x14f   :  { %3982 = vmatpush1.bf16.msra.mxu1 %v7541_v27  ;;  %v7280_v27 = vcombine.high %v302_v18, %v306_v19  ;;  %v7279_v33 = vcombine.low %v302_v18, %v306_v19 }
 0x150   :  { %3983 = vmatprep.subr.bf16.mxu1 %v7550_v53  ;;  %v59_v53 = vld [vmem:[%s11578_s1 + $0xb8] sm:$0xff] }
 0x151   :  { %4080 = vmatpush1.bf16.msra.mxu0 %v7223_v63  ;;  %v55_v63 = vld [vmem:[%s11578_s1 + $0x98] sm:$0xff] }
 0x152   :  { %4081 = vmatprep.subr.bf16.mxu0 %v7232_v29  ;;  %v310_v29 = vld [vmem:[%s11578_s1 + $0x890] sm:$0xff]  ;;  %v7034_v34 = vcombine.high %v55_v63, %v59_v53  ;;  %v7033_v41 = vcombine.low %v55_v63, %v59_v53 }
 0x153   :  { %3984 = vmatpush1.bf16.msra.mxu1 %v7549_v35  ;;  %v7288_v35 = vcombine.high %v310_v29, %v314_v31  ;;  %v7287_v42 = vcombine.low %v310_v29, %v314_v31 }
 0x154   :  { %3985 = vmatprep.subr.bf16.mxu1 %v7558_v37  ;;  %v67_v37 = vld [vmem:[%s11578_s1 + $0xf8] sm:$0xff] }
 0x155   :  { %4082 = vmatpush1.bf16.msra.mxu0 %v7231_v36  ;;  %v63_v36 = vld [vmem:[%s11578_s1 + $0xd8] sm:$0xff] }
 0x156   :  { %4083 = vmatprep.subr.bf16.mxu0 %v7240_v39  ;;  %v318_v39 = vld [vmem:[%s11578_s1 + $0x8d0] sm:$0xff]  ;;  %v7042_v44 = vcombine.high %v63_v36, %v67_v37  ;;  %v7041_v50 = vcombine.low %v63_v36, %v67_v37 }
 0x157   :  { %3986 = vmatpush1.bf16.msra.mxu1 %v7557_v45  ;;  %v7296_v45 = vcombine.high %v318_v39, %v322_v40  ;;  %v7295_v51 = vcombine.low %v318_v39, %v322_v40 }
 0x158   :  { %3987 = vmatprep.subr.bf16.mxu1 %v7566_v47  ;;  %v75_v47 = vld [vmem:[%s11578_s1 + $0x138] sm:$0xff] }
 0x159   :  { %4084 = vmatpush1.bf16.msra.mxu0 %v7239_v46  ;;  %v71_v46 = vld [vmem:[%s11578_s1 + $0x118] sm:$0xff] }
 0x15a   :  { %4085 = vmatprep.subr.bf16.mxu0 %v7248_v48  ;;  %v330_v48 = vld [vmem:[%s11578_s1 + $0x930] sm:$0xff]  ;;  %v7050_v52 = vcombine.high %v71_v46, %v75_v47  ;;  %v7049_v60 = vcombine.low %v71_v46, %v75_v47 }
 0x15b   :  { %3988 = vmatpush1.bf16.msra.mxu1 %v7565_v55  ;;  %v79_v55 = vld [vmem:[%s11578_s1 + $0x158] sm:$0xff] }
 0x15c   :  { %3989 = vmatprep.subr.bf16.mxu1 %v7574_v17  ;;  %v334_v17 = vld [vmem:[%s11578_s1 + $0x950] sm:$0xff] }
 0x15d   :  { %4086 = vmatpush1.bf16.msra.mxu0 %v7247_v56  ;;  %v83_v56 = vld [vmem:[%s11578_s1 + $0x178] sm:$0xff] }
 0x15e   :  { %4087 = vmatprep.subr.bf16.mxu0 %v7256_v58  ;;  %v338_v58 = vld [vmem:[%s11578_s1 + $0x970] sm:$0xff]  ;;  %v7058_v62 = vcombine.high %v79_v55, %v83_v56  ;;  %v7057_v5 = vcombine.low %v79_v55, %v83_v56 }
 0x15f   :  { %3990 = vmatpush1.bf16.msra.mxu1 %v7573_v1  ;;  %v7312_v0 = vcombine.high %v334_v17, %v338_v58  ;;  %v87_v1 = vld [vmem:[%s11578_s1 + $0x198] sm:$0xff]  ;;  %v7311_v6 = vcombine.low %v334_v17, %v338_v58 }
 0x160   :  { %3991 = vmatprep.subr.bf16.mxu1 %v7582_v3  ;;  %v342_v3 = vld [vmem:[%s11578_s1 + $0x990] sm:$0xff] }
 0x161   :  { %4088 = vmatpush1.bf16.msra.mxu0 %v7255_v2  ;;  %v91_v2 = vld [vmem:[%s11578_s1 + $0x1b8] sm:$0xff] }
 0x162   :  { %4089 = vmatprep.subr.bf16.mxu0 %v7264_v4  ;;  %v346_v4 = vld [vmem:[%s11578_s1 + $0x9b0] sm:$0xff]  ;;  %v7066_v8 = vcombine.high %v87_v1, %v91_v2  ;;  %v7065_v59 = vcombine.low %v87_v1, %v91_v2 }
 0x163   :  { %3992 = vmatpush1.bf16.msra.mxu1 %v7581_v11  ;;  %v7320_v10 = vcombine.high %v342_v3, %v346_v4  ;;  %v95_v11 = vld [vmem:[%s11578_s1 + $0x1d8] sm:$0xff]  ;;  %v7319_v16 = vcombine.low %v342_v3, %v346_v4 }
 0x164   :  { %4223 = vmatprep.subr.bf16.mxu1 %v7018_v14  ;;  %v350_v14 = vld [vmem:[%s11578_s1 + $0x9d0] sm:$0xff] }
 0x165   :  { %4090 = vmatpush1.bf16.msra.mxu0 %v7263_v12  ;;  %v99_v12 = vld [vmem:[%s11578_s1 + $0x1f8] sm:$0xff] }
 0x166   :  { %4100 = vmatprep.subr.bf16.mxu0 %v7272_v15  ;;  %4010 = vmatmul.mubr.bf16.vlgmr.msra.gmra.mrb[4].mxu1 %v9395_v22  ;;  %v354_v15 = vld [vmem:[%s11578_s1 + $0x9f0] sm:$0xff]  ;;  %v7074_v18 = vcombine.high %v95_v11, %v99_v12  ;;  %v7073_v63 = vcombine.low %v95_v11, %v99_v12 }
 0x167   :  { %4224 = vmatpush1.bf16.msra.mxu1 %v7017_v20  ;;  %4255 = vmatprep.mubr.bf16.mxu1 %v8747_v9  ;;  %v326_v9 = vld [vmem:[%s11578_s1 + $0x910] sm:$0xff]  ;;  %v7328_v19 = vcombine.high %v350_v14, %v354_v15  ;;  %v103_v20 = vld [vmem:[%s11578_s1 + $0x218] sm:$0xff]  ;;  %v7327_v53 = vcombine.low %v350_v14, %v354_v15 }
 0x168   :  { %4092 = vmatmul.mubr.bf16.vlgmr.msra.gmra.mrb[4].mxu0 %v8882_v30  ;;  %4225 = vmatprep.subr.bf16.mxu1 %v7026_v25  ;;  %v7304_v54 = vcombine.high %v326_v9, %v330_v48  ;;  %v7303_v61 = vcombine.low %v326_v9, %v330_v48  ;;  %v358_v25 = vld [vmem:[%s11578_s1 + $0xa10] sm:$0xff] }
 0x169   :  { %4101 = vmatpush1.bf16.msra.mxu0 %v7271_v23  ;;  %4132 = vmatprep.mubr.bf16.mxu0 %v8897_v38  ;;  %v107_v23 = vld [vmem:[%s11578_s1 + $0x238] sm:$0xff] }
 0x16a   :  { %4102 = vmatprep.subr.bf16.mxu0 %v7280_v27  ;;  %v362_v27 = vld [vmem:[%s11578_s1 + $0xa30] sm:$0xff]  ;;  %v7082_v29 = vcombine.high %v103_v20, %v107_v23  ;;  %v7081_v36 = vcombine.low %v103_v20, %v107_v23 }
 0x16b   :  { %4226 = vmatpush1.bf16.msra.mxu1 %v7025_v32  ;;  %v7336_v31 = vcombine.high %v358_v25, %v362_v27  ;;  %v111_v32 = vld [vmem:[%s11578_s1 + $0x258] sm:$0xff]  ;;  %v7335_v37 = vcombine.low %v358_v25, %v362_v27 }
 0x16c   :  { %4227 = vmatprep.subr.bf16.mxu1 %v7034_v34  ;;  %v366_v34 = vld [vmem:[%s11578_s1 + $0xa50] sm:$0xff] }
 0x16d   :  { %4103 = vmatpush1.bf16.msra.mxu0 %v7279_v33  ;;  %v115_v33 = vld [vmem:[%s11578_s1 + $0x278] sm:$0xff] }
 0x16e   :  { %4104 = vmatprep.subr.bf16.mxu0 %v7288_v35  ;;  %v370_v35 = vld [vmem:[%s11578_s1 + $0xa70] sm:$0xff]  ;;  %v7090_v39 = vcombine.high %v111_v32, %v115_v33  ;;  %v7089_v46 = vcombine.low %v111_v32, %v115_v33 }
 0x16f   :  { %4228 = vmatpush1.bf16.msra.mxu1 %v7033_v41  ;;  %v7344_v40 = vcombine.high %v366_v34, %v370_v35  ;;  %v119_v41 = vld [vmem:[%s11578_s1 + $0x298] sm:$0xff]  ;;  %v7343_v47 = vcombine.low %v366_v34, %v370_v35 }
 0x170   :  { %4229 = vmatprep.subr.bf16.mxu1 %v7042_v44  ;;  %v374_v44 = vld [vmem:[%s11578_s1 + $0xa90] sm:$0xff] }
 0x171   :  { %4105 = vmatpush1.bf16.msra.mxu0 %v7287_v42  ;;  %v123_v42 = vld [vmem:[%s11578_s1 + $0x2b8] sm:$0xff] }
 0x172   :  { %4106 = vmatprep.subr.bf16.mxu0 %v7296_v45  ;;  %v378_v45 = vld [vmem:[%s11578_s1 + $0xab0] sm:$0xff]  ;;  %v7098_v9 = vcombine.high %v119_v41, %v123_v42  ;;  %v7097_v55 = vcombine.low %v119_v41, %v123_v42 }
 0x173   :  { %4230 = vmatpush1.bf16.msra.mxu1 %v7041_v50  ;;  %v7352_v48 = vcombine.high %v374_v44, %v378_v45  ;;  %v127_v50 = vld [vmem:[%s11578_s1 + $0x2d8] sm:$0xff]  ;;  %v7351_v56 = vcombine.low %v374_v44, %v378_v45 }
 0x174   :  { %4231 = vmatprep.subr.bf16.mxu1 %v7050_v52  ;;  %v382_v52 = vld [vmem:[%s11578_s1 + $0xad0] sm:$0xff] }
 0x175   :  { %4107 = vmatpush1.bf16.msra.mxu0 %v7295_v51  ;;  %v131_v51 = vld [vmem:[%s11578_s1 + $0x2f8] sm:$0xff] }
 0x176   :  { %4108 = vmatprep.subr.bf16.mxu0 %v7304_v54  ;;  %v386_v54 = vld [vmem:[%s11578_s1 + $0xaf0] sm:$0xff]  ;;  %v7106_v17 = vcombine.high %v127_v50, %v131_v51  ;;  %v7105_v1 = vcombine.low %v127_v50, %v131_v51 }
 0x177   :  { %4232 = vmatpush1.bf16.msra.mxu1 %v7049_v60  ;;  %v7360_v58 = vcombine.high %v382_v52, %v386_v54  ;;  %v135_v60 = vld [vmem:[%s11578_s1 + $0x318] sm:$0xff]  ;;  %v7359_v2 = vcombine.low %v382_v52, %v386_v54 }
 0x178   :  { %4233 = vmatprep.subr.bf16.mxu1 %v7058_v62  ;;  %v390_v62 = vld [vmem:[%s11578_s1 + $0xb10] sm:$0xff] }
 0x179   :  { %4109 = vmatpush1.bf16.msra.mxu0 %v7303_v61  ;;  %v139_v61 = vld [vmem:[%s11578_s1 + $0x338] sm:$0xff] }
 0x17a   :  { %4110 = vmatprep.subr.bf16.mxu0 %v7312_v0  ;;  %v394_v0 = vld [vmem:[%s11578_s1 + $0xb30] sm:$0xff]  ;;  %v7114_v3 = vcombine.high %v135_v60, %v139_v61  ;;  %v7113_v11 = vcombine.low %v135_v60, %v139_v61 }
 0x17b   :  { %4234 = vmatpush1.bf16.msra.mxu1 %v7057_v5  ;;  %v7368_v4 = vcombine.high %v390_v62, %v394_v0  ;;  %v143_v5 = vld [vmem:[%s11578_s1 + $0x358] sm:$0xff]  ;;  %v7367_v12 = vcombine.low %v390_v62, %v394_v0 }
 0x17c   :  { %4235 = vmatprep.subr.bf16.mxu1 %v7066_v8  ;;  %v398_v8 = vld [vmem:[%s11578_s1 + $0xb50] sm:$0xff] }
 0x17d   :  { %4111 = vmatpush1.bf16.msra.mxu0 %v7311_v6  ;;  %v147_v6 = vld [vmem:[%s11578_s1 + $0x378] sm:$0xff] }
 0x17e   :  { %4112 = vmatprep.subr.bf16.mxu0 %v7320_v10  ;;  %v402_v10 = vld [vmem:[%s11578_s1 + $0xb70] sm:$0xff]  ;;  %v7122_v14 = vcombine.high %v143_v5, %v147_v6  ;;  %v7121_v20 = vcombine.low %v143_v5, %v147_v6 }
 0x17f   :  { %4236 = vmatpush1.bf16.msra.mxu1 %v7065_v59  ;;  %v7376_v15 = vcombine.high %v398_v8, %v402_v10  ;;  %v151_v59 = vld [vmem:[%s11578_s1 + $0x398] sm:$0xff]  ;;  %v7375_v23 = vcombine.low %v398_v8, %v402_v10 }
 0x180   :  { %4237 = vmatprep.subr.bf16.mxu1 %v7074_v18  ;;  %v406_v18 = vld [vmem:[%s11578_s1 + $0xb90] sm:$0xff]  ;;  %v199_v10 = vld [vmem:[%s11578_s1 + $0x518] sm:$0xff] }
 0x181   :  { %4113 = vmatpush1.bf16.msra.mxu0 %v7319_v16  ;;  %v155_v16 = vld [vmem:[%s11578_s1 + $0x3b8] sm:$0xff] }
 0x182   :  { %4114 = vmatprep.subr.bf16.mxu0 %v7328_v19  ;;  %v410_v19 = vld [vmem:[%s11578_s1 + $0xbb0] sm:$0xff]  ;;  %v7130_v25 = vcombine.high %v151_v59, %v155_v16  ;;  %v7129_v32 = vcombine.low %v151_v59, %v155_v16  ;;  %v10030_v16 = vsub.s32 0, %v8694_v43 }
 0x183   :  { %4238 = vmatpush1.bf16.msra.mxu1 %v7073_v63  ;;  %v7384_v27 = vcombine.high %v406_v18, %v410_v19  ;;  %v159_v63 = vld [vmem:[%s11578_s1 + $0x3d8] sm:$0xff]  ;;  %v7383_v33 = vcombine.low %v406_v18, %v410_v19 }
 0x184   :  { %4239 = vmatprep.subr.bf16.mxu1 %v7082_v29  ;;  %v414_v29 = vld [vmem:[%s11578_s1 + $0xbd0] sm:$0xff]  ;;  %v207_v19 = vld [vmem:[%s11578_s1 + $0x558] sm:$0xff] }
 0x185   :  { %4115 = vmatpush1.bf16.msra.mxu0 %v7327_v53  ;;  %v163_v53 = vld [vmem:[%s11578_s1 + $0x3f8] sm:$0xff] }
 0x186   :  { %4116 = vmatprep.subr.bf16.mxu0 %v7336_v31  ;;  %v418_v31 = vld [vmem:[%s11578_s1 + $0xbf0] sm:$0xff]  ;;  %v7138_v34 = vcombine.high %v159_v63, %v163_v53  ;;  %v7137_v41 = vcombine.low %v159_v63, %v163_v53 }
 0x187   :  { %4240 = vmatpush1.bf16.msra.mxu1 %v7081_v36  ;;  %v7392_v35 = vcombine.high %v414_v29, %v418_v31  ;;  %v167_v36 = vld [vmem:[%s11578_s1 + $0x418] sm:$0xff]  ;;  %v7391_v42 = vcombine.low %v414_v29, %v418_v31  ;;  %v466_v63 = vld [vmem:[%s11578_s1 + $0xd70] sm:$0xff] }
 0x188   :  { %4241 = vmatprep.subr.bf16.mxu1 %v7090_v39  ;;  %v422_v39 = vld [vmem:[%s11578_s1 + $0xc10] sm:$0xff] }
 0x189   :  { %4117 = vmatpush1.bf16.msra.mxu0 %v7335_v37  ;;  %v171_v37 = vld [vmem:[%s11578_s1 + $0x438] sm:$0xff] }
 0x18a   :  { %4118 = vmatprep.subr.bf16.mxu0 %v7344_v40  ;;  %v426_v40 = vld [vmem:[%s11578_s1 + $0xc30] sm:$0xff]  ;;  %v7146_v44 = vcombine.high %v167_v36, %v171_v37  ;;  %v7145_v50 = vcombine.low %v167_v36, %v171_v37 }
 0x18b   :  { %4242 = vmatpush1.bf16.msra.mxu1 %v7089_v46  ;;  %v7400_v45 = vcombine.high %v422_v39, %v426_v40  ;;  %v175_v46 = vld [vmem:[%s11578_s1 + $0x458] sm:$0xff]  ;;  %v7399_v51 = vcombine.low %v422_v39, %v426_v40  ;;  %v470_v37 = vld [vmem:[%s11578_s1 + $0xd90] sm:$0xff] }
 0x18c   :  { %4243 = vmatprep.subr.bf16.mxu1 %v7098_v9  ;;  %v430_v9 = vld [vmem:[%s11578_s1 + $0xc50] sm:$0xff] }
 0x18d   :  { %4119 = vmatpush1.bf16.msra.mxu0 %v7343_v47  ;;  %v179_v47 = vld [vmem:[%s11578_s1 + $0x478] sm:$0xff]  ;;  %v474_v39 = vld [vmem:[%s11578_s1 + $0xdb0] sm:$0xff] }
 0x18e   :  { %4120 = vmatprep.subr.bf16.mxu0 %v7352_v48  ;;  %v434_v48 = vld [vmem:[%s11578_s1 + $0xc70] sm:$0xff]  ;;  %v7154_v52 = vcombine.high %v175_v46, %v179_v47  ;;  %v7153_v60 = vcombine.low %v175_v46, %v179_v47  ;;  %v223_v46 = vld [vmem:[%s11578_s1 + $0x5d8] sm:$0xff] }
 0x18f   :  { %4244 = vmatpush1.bf16.msra.mxu1 %v7097_v55  ;;  %v7408_v54 = vcombine.high %v430_v9, %v434_v48  ;;  %v183_v55 = vld [vmem:[%s11578_s1 + $0x498] sm:$0xff]  ;;  %v7407_v61 = vcombine.low %v430_v9, %v434_v48 }
 0x190   :  { %4245 = vmatprep.subr.bf16.mxu1 %v7106_v17  ;;  %v438_v17 = vld [vmem:[%s11578_s1 + $0xc90] sm:$0xff]  ;;  %v227_v47 = vld [vmem:[%s11578_s1 + $0x5f8] sm:$0xff] }
 0x191   :  { %4121 = vmatpush1.bf16.msra.mxu0 %v7351_v56  ;;  %v187_v56 = vld [vmem:[%s11578_s1 + $0x4b8] sm:$0xff] }
 0x192   :  { %4122 = vmatprep.subr.bf16.mxu0 %v7360_v58  ;;  %v442_v58 = vld [vmem:[%s11578_s1 + $0xcb0] sm:$0xff]  ;;  %v7162_v62 = vcombine.high %v183_v55, %v187_v56 }
 0x193   :  { %4246 = vmatpush1.bf16.msra.mxu1 %v7105_v1  ;;  %v7416_v0 = vcombine.high %v438_v17, %v442_v58  ;;  %v195_v1 = vld [vmem:[%s11578_s1 + $0x4f8] sm:$0xff]  ;;  %v7415_v5 = vcombine.low %v438_v17, %v442_v58  ;;  %v7447_v17 = vcombine.low %v470_v37, %v474_v39 }
 0x194   :  { %4247 = vmatprep.subr.bf16.mxu1 %v7114_v3  ;;  %v450_v3 = vld [vmem:[%s11578_s1 + $0xcf0] sm:$0xff] }
 0x195   :  { %4123 = vmatpush1.bf16.msra.mxu0 %v7359_v2  ;;  %v446_v2 = vld [vmem:[%s11578_s1 + $0xcd0] sm:$0xff] }
 0x196   :  { %4124 = vmatprep.subr.bf16.mxu0 %v7368_v4  ;;  %v7161_v4 = vcombine.low %v183_v55, %v187_v56  ;;  %v7424_v8 = vcombine.high %v446_v2, %v450_v3 }
 0x197   :  { %4248 = vmatpush1.bf16.msra.mxu1 %v7113_v11  ;;  %v203_v11 = vld [vmem:[%s11578_s1 + $0x538] sm:$0xff] }
 0x198   :  { %4249 = vmatprep.subr.bf16.mxu1 %v7122_v14  ;;  %v7178_v59 = vcombine.high %v199_v10, %v203_v11  ;;  %v7177_v53 = vcombine.low %v199_v10, %v203_v11  ;;  %v498_v10 = vld [vmem:[%s11578_s1 + $0xe70] sm:$0xff] }
 0x199   :  { %4125 = vmatpush1.bf16.msra.mxu0 %v7367_v12  ;;  %v458_v12 = vld [vmem:[%s11578_s1 + $0xd30] sm:$0xff] }
 0x19a   :  { %4126 = vmatprep.subr.bf16.mxu0 %v7376_v15  ;;  %v7423_v15 = vcombine.low %v446_v2, %v450_v3 }
 0x19b   :  { %4250 = vmatpush1.bf16.msra.mxu1 %v7121_v20  ;;  %v211_v20 = vld [vmem:[%s11578_s1 + $0x578] sm:$0xff] }
 0x19c   :  { %4251 = vmatprep.subr.bf16.mxu1 %v7130_v25  ;;  %v10044_v25 = vsub.s32 1, %v8694_v43  ;;  %v7186_v31 = vcombine.high %v207_v19, %v211_v20  ;;  %v7185_v40 = vcombine.low %v207_v19, %v211_v20  ;;  %v506_v19 = vld [vmem:[%s11578_s1 + $0xeb0] sm:$0xff] }
 0x19d   :  { %4127 = vmatpush1.bf16.msra.mxu0 %v7375_v23  ;;  %v10041_v23 = vld [vmem:[%s11579_s2] sm:$0xff] }
 0x19e   :  { %4128 = vmatprep.subr.bf16.mxu0 %v7384_v27  ;;  %v462_v27 = vld [vmem:[%s11578_s1 + $0xd50] sm:$0xff]  ;;  %v621_v36 = vrot.slane %v10041_v23, %v10044_v25 }
 0x19f   :  { %4252 = vmatpush1.bf16.msra.mxu1 %v7129_v32  ;;  %v617_v32 = vrot.slane %v10041_v23, %v10030_v16 }
 0x1a0   :  { %4253 = vmatprep.subr.bf16.mxu1 %v7138_v34  ;;  %v215_v34 = vld [vmem:[%s11578_s1 + $0x598] sm:$0xff]  ;;  %v3645_v9 = vadd.f32 %v9565_v28, %v621_v36  ;;  %v7202_v28 = vcombine.high %v223_v46, %v227_v47 }
 0x1a1   :  { %4129 = vmatpush1.bf16.msra.mxu0 %v7383_v33  ;;  %v7440_v33 = vcombine.high %v462_v27, %v466_v63 }
 0x1a2   :  { %4130 = vmatprep.subr.bf16.mxu0 %v7392_v35  ;;  %v219_v35 = vld [vmem:[%s11578_s1 + $0x5b8] sm:$0xff] }
 0x1a3   :  { %4254 = vmatpush1.bf16.msra.mxu1 %v7137_v41  ;;  %v7439_v41 = vcombine.low %v462_v27, %v466_v63 }
 0x1a4   :  { %4264 = vmatprep.subr.bf16.mxu1 %v7146_v44  ;;  %v3643_v44 = vadd.f32 %v9557_v24, %v617_v32  ;;  %v482_v24 = vld [vmem:[%s11578_s1 + $0xdf0] sm:$0xff] }
 0x1a5   :  { %4131 = vmatpush1.bf16.msra.mxu0 %v7391_v42  ;;  %v7194_v42 = vcombine.high %v215_v34, %v219_v35  ;;  %v510_v32 = vld [vmem:[%s11578_s1 + $0xed0] sm:$0xff] }
 0x1a6   :  { %4141 = vmatprep.subr.bf16.mxu0 %v7400_v45  ;;  %4256 = vmatmul.mubr.bf16.vlgmr.msra.gmra.mrb[8].mxu1 %v8864_v21  ;;  %v191_v21 = vld [vmem:[%s11578_s1 + $0x4d8] sm:$0xff]  ;;  %v7448_v45 = vcombine.high %v470_v37, %v474_v39 }
 0x1a7   :  { %4265 = vmatpush1.bf16.msra.mxu1 %v7145_v50  ;;  %4296 = vmatprep.mubr.bf16.mxu1 %v8758_v13  ;;  %v7170_v6 = vcombine.high %v191_v21, %v195_v1  ;;  %v454_v13 = vld [vmem:[%s11578_s1 + $0xd10] sm:$0xff]  ;;  %v7169_v14 = vcombine.low %v191_v21, %v195_v1  ;;  %v7201_v1 = vcombine.low %v223_v46, %v227_v47  ;;  %v263_v39 = vld [vmem:[%s11578_s1 + $0x718] sm:$0xff] }
 0x1a8   :  { %4133 = vmatmul.mubr.bf16.vlgmr.msra.gmra.mrb[4].mxu0 %v9085_v49  ;;  %4266 = vmatprep.subr.bf16.mxu1 %v7154_v52  ;;  %v7432_v18 = vcombine.high %v454_v13, %v458_v12  ;;  %v7431_v29 = vcombine.low %v454_v13, %v458_v12  ;;  %v478_v50 = vld [vmem:[%s11578_s1 + $0xdd0] sm:$0xff] }
 0x1a9   :  { %4142 = vmatpush1.bf16.msra.mxu0 %v7399_v51  ;;  %4173 = vmatprep.mubr.bf16.mxu0 %v9101_v57  ;;  %v490_v21 = vld [vmem:[%s11578_s1 + $0xe30] sm:$0xff]  ;;  %v7455_v2 = vcombine.low %v478_v50, %v482_v24 }
 0x1aa   :  { %4143 = vmatprep.subr.bf16.mxu0 %v7408_v54  ;;  %v7193_v54 = vcombine.low %v215_v34, %v219_v35 }
 0x1ab   :  { %4267 = vmatpush1.bf16.msra.mxu1 %v7153_v60  ;;  %v7456_v60 = vcombine.high %v478_v50, %v482_v24  ;;  %v526_v50 = vld [vmem:[%s11578_s1 + $0xf50] sm:$0xff] }
 0x1ac   :  { %4268 = vmatprep.subr.bf16.mxu1 %v7162_v62  ;;  %v235_v62 = vld [vmem:[%s11578_s1 + $0x638] sm:$0xff]  ;;  %v530_v24 = vld [vmem:[%s11578_s1 + $0xf70] sm:$0xff] }
 0x1ad   :  { %4144 = vmatpush1.bf16.msra.mxu0 %v7407_v61  ;;  %v231_v61 = vld [vmem:[%s11578_s1 + $0x618] sm:$0xff] }
 0x1ae   :  { %4145 = vmatprep.subr.bf16.mxu0 %v7416_v0  ;;  %v486_v0 = vld [vmem:[%s11578_s1 + $0xe10] sm:$0xff]  ;;  %v7210_v3 = vcombine.high %v231_v61, %v235_v62  ;;  %v7209_v11 = vcombine.low %v231_v61, %v235_v62 }
 0x1af   :  { %4269 = vmatpush1.bf16.msra.mxu1 %v7161_v4  ;;  %v7464_v4 = vcombine.high %v486_v0, %v490_v21  ;;  %v7463_v13 = vcombine.low %v486_v0, %v490_v21  ;;  %v538_v61 = vld [vmem:[%s11578_s1 + $0xfb0] sm:$0xff]  ;;  %v7503_v0 = vcombine.low %v526_v50, %v530_v24 }
 0x1b0   :  { %4270 = vmatprep.subr.bf16.mxu1 %v7170_v6  ;;  %v243_v6 = vld [vmem:[%s11578_s1 + $0x678] sm:$0xff] }
 0x1b1   :  { %4146 = vmatpush1.bf16.msra.mxu0 %v7415_v5  ;;  %v239_v5 = vld [vmem:[%s11578_s1 + $0x658] sm:$0xff] }
 0x1b2   :  { %4147 = vmatprep.subr.bf16.mxu0 %v7424_v8  ;;  %v494_v8 = vld [vmem:[%s11578_s1 + $0xe50] sm:$0xff]  ;;  %v7218_v12 = vcombine.high %v239_v5, %v243_v6  ;;  %v7217_v20 = vcombine.low %v239_v5, %v243_v6 }
 0x1b3   :  { %4271 = vmatpush1.bf16.msra.mxu1 %v7169_v14  ;;  %v7472_v14 = vcombine.high %v494_v8, %v498_v10  ;;  %v7471_v27 = vcombine.low %v494_v8, %v498_v10  ;;  %v546_v5 = vld [vmem:[%s11578_s1 + $0xff0] sm:$0xff] }
 0x1b4   :  { %4272 = vmatprep.subr.bf16.mxu1 %v7178_v59  ;;  %v251_v59 = vld [vmem:[%s11578_s1 + $0x6b8] sm:$0xff] }
 0x1b5   :  { %4148 = vmatpush1.bf16.msra.mxu0 %v7423_v15  ;;  %v247_v15 = vld [vmem:[%s11578_s1 + $0x698] sm:$0xff] }
 0x1b6   :  { %4149 = vmatprep.subr.bf16.mxu0 %v7432_v18  ;;  %v502_v18 = vld [vmem:[%s11578_s1 + $0xe90] sm:$0xff]  ;;  %v7226_v63 = vcombine.high %v247_v15, %v251_v59  ;;  %v7225_v34 = vcombine.low %v247_v15, %v251_v59 }
 0x1b7   :  { %4273 = vmatpush1.bf16.msra.mxu1 %v7177_v53  ;;  %v7480_v53 = vcombine.high %v502_v18, %v506_v19  ;;  %v7479_v35 = vcombine.low %v502_v18, %v506_v19  ;;  %v554_v15 = vld [vmem:[%s11578_s1 + $0x1030] sm:$0xff] }
 0x1b8   :  { %4274 = vmatprep.subr.bf16.mxu1 %v7186_v31  ;;  %v259_v31 = vld [vmem:[%s11578_s1 + $0x6f8] sm:$0xff] }
 0x1b9   :  { %4150 = vmatpush1.bf16.msra.mxu0 %v7431_v29  ;;  %v255_v29 = vld [vmem:[%s11578_s1 + $0x6d8] sm:$0xff] }
 0x1ba   :  { %4151 = vmatprep.subr.bf16.mxu0 %v7440_v33  ;;  %v514_v33 = vld [vmem:[%s11578_s1 + $0xef0] sm:$0xff]  ;;  %v7234_v36 = vcombine.high %v255_v29, %v259_v31 }
 0x1bb   :  { %v3806_v48 = vpop.f32.mrb[0].mxu0  ;;  %4275 = vmatpush1.bf16.msra.mxu1 %v7185_v40  ;;  %v7488_v37 = vcombine.high %v510_v32, %v514_v33  ;;  %v267_v40 = vld [vmem:[%s11578_s1 + $0x738] sm:$0xff] }
 0x1bc   :  { %v10082_v51 = vadd.f32 %v3806_v48, %v3643_v44  ;;  %v3808_v52 = vpop.f32.mrb[1].mxu0  ;;  %4276 = vmatprep.subr.bf16.mxu1 %v7194_v42  ;;  %v522_v42 = vld [vmem:[%s11578_s1 + $0xf30] sm:$0xff]  ;;  %v7233_v44 = vcombine.low %v255_v29, %v259_v31  ;;  %v7242_v46 = vcombine.high %v263_v39, %v267_v40  ;;  %v275_v48 = vld [vmem:[%s11578_s1 + $0x778] sm:$0xff] }
 0x1bd   :  { %v10084_v55 = vadd.f32 %v3808_v52, %v3645_v9  ;;  %v3810_v56 = vpop.f32.mrb[2].mxu0  ;;  %4152 = vmatpush1.bf16.msra.mxu0 %v7439_v41  ;;  %v518_v41 = vld [vmem:[%s11578_s1 + $0xf10] sm:$0xff]  ;;  %v271_v9 = vld [vmem:[%s11578_s1 + $0x758] sm:$0xff]  ;;  %v7241_v52 = vcombine.low %v263_v39, %v267_v40 }
 0x1be   :  { %v3811_v58 = vpop.f32.mrb[3].mxu0  ;;  %4153 = vmatprep.subr.bf16.mxu0 %v7448_v45  ;;  %v7487_v45 = vcombine.low %v510_v32, %v514_v33  ;;  %v7496_v47 = vcombine.high %v518_v41, %v522_v42  ;;  %v7250_v56 = vcombine.high %v271_v9, %v275_v48  ;;  %v7249_v62 = vcombine.low %v271_v9, %v275_v48  ;;  %v562_v29 = vld [vmem:[%s11578_s1 + $0x1070] sm:$0xff] }
 0x1bf   :  { %4277 = vmatpush1.bf16.msra.mxu1 %v7193_v54  ;;  %v7495_v54 = vcombine.low %v518_v41, %v522_v42  ;;  %v283_v58 = vld [vmem:[%s11578_s1 + $0x7b8] sm:$0xff]  ;;  %v570_v39 = vld [vmem:[%s11578_s1 + $0x10b0] sm:$0xff] }
 0x1c0   :  { %4278 = vmatprep.subr.bf16.mxu1 %v7202_v28  ;;  %v279_v28 = vld [vmem:[%s11578_s1 + $0x798] sm:$0xff] }
 0x1c1   :  { %4154 = vmatpush1.bf16.msra.mxu0 %v7447_v17  ;;  %v7504_v17 = vcombine.high %v526_v50, %v530_v24  ;;  %v7258_v21 = vcombine.high %v279_v28, %v283_v58  ;;  %v7257_v6 = vcombine.low %v279_v28, %v283_v58 }
 0x1c2   :  { %4155 = vmatprep.subr.bf16.mxu0 %v7456_v60  ;;  %v534_v60 = vld [vmem:[%s11578_s1 + $0xf90] sm:$0xff] }
 0x1c3   :  { %4279 = vmatpush1.bf16.msra.mxu1 %v7201_v1  ;;  %v7512_v1 = vcombine.high %v534_v60, %v538_v61  ;;  %v7511_v8 = vcombine.low %v534_v60, %v538_v61  ;;  %v335_v61 = vld [vmem:[%s11578_s1 + $0x958] sm:$0xff] }
 0x1c4   :  { %4280 = vmatprep.subr.bf16.mxu1 %v7210_v3  ;;  %v291_v3 = vld [vmem:[%s11578_s1 + $0x7f8] sm:$0xff] }
 0x1c5   :  { %4156 = vmatpush1.bf16.msra.mxu0 %v7455_v2  ;;  %v287_v2 = vld [vmem:[%s11578_s1 + $0x7d8] sm:$0xff] }
 0x1c6   :  { %4157 = vmatprep.subr.bf16.mxu0 %v7464_v4  ;;  %v542_v4 = vld [vmem:[%s11578_s1 + $0xfd0] sm:$0xff]  ;;  %v7266_v10 = vcombine.high %v287_v2, %v291_v3  ;;  %v7265_v59 = vcombine.low %v287_v2, %v291_v3 }
 0x1c7   :  { %4281 = vmatpush1.bf16.msra.mxu1 %v7209_v11  ;;  %v7520_v11 = vcombine.high %v542_v4, %v546_v5  ;;  %v7519_v18 = vcombine.low %v542_v4, %v546_v5  ;;  %v343_v5 = vld [vmem:[%s11578_s1 + $0x998] sm:$0xff] }
 0x1c8   :  { %4282 = vmatprep.subr.bf16.mxu1 %v7218_v12  ;;  %v299_v12 = vld [vmem:[%s11578_s1 + $0x838] sm:$0xff] }
 0x1c9   :  { %4158 = vmatpush1.bf16.msra.mxu0 %v7463_v13  ;;  %v295_v13 = vld [vmem:[%s11578_s1 + $0x818] sm:$0xff] }
 0x1ca   :  { %4159 = vmatprep.subr.bf16.mxu0 %v7472_v14  ;;  %v550_v14 = vld [vmem:[%s11578_s1 + $0x1010] sm:$0xff]  ;;  %v7274_v19 = vcombine.high %v295_v13, %v299_v12  ;;  %v7273_v31 = vcombine.low %v295_v13, %v299_v12 }
 0x1cb   :  { %4283 = vmatpush1.bf16.msra.mxu1 %v7217_v20  ;;  %v7528_v20 = vcombine.high %v550_v14, %v554_v15  ;;  %v7527_v32 = vcombine.low %v550_v14, %v554_v15  ;;  %v351_v15 = vld [vmem:[%s11578_s1 + $0x9d8] sm:$0xff] }
 0x1cc   :  { %4284 = vmatprep.subr.bf16.mxu1 %v7226_v63  ;;  %v307_v63 = vld [vmem:[%s11578_s1 + $0x878] sm:$0xff] }
 0x1cd   :  { %4160 = vmatpush1.bf16.msra.mxu0 %v7471_v27  ;;  %v303_v27 = vld [vmem:[%s11578_s1 + $0x858] sm:$0xff] }
 0x1ce   :  { %4161 = vmatprep.subr.bf16.mxu0 %v7480_v53  ;;  %v558_v53 = vld [vmem:[%s11578_s1 + $0x1050] sm:$0xff]  ;;  %v7282_v33 = vcombine.high %v303_v27, %v307_v63  ;;  %v7281_v40 = vcombine.low %v303_v27, %v307_v63 }
 0x1cf   :  { %4285 = vmatpush1.bf16.msra.mxu1 %v7225_v34  ;;  %v7536_v34 = vcombine.high %v558_v53, %v562_v29  ;;  %v7535_v41 = vcombine.low %v558_v53, %v562_v29  ;;  %v359_v29 = vld [vmem:[%s11578_s1 + $0xa18] sm:$0xff] }
 0x1d0   :  { %4286 = vmatprep.subr.bf16.mxu1 %v7234_v36  ;;  %v315_v36 = vld [vmem:[%s11578_s1 + $0x8b8] sm:$0xff] }
 0x1d1   :  { %4162 = vmatpush1.bf16.msra.mxu0 %v7479_v35  ;;  %v311_v35 = vld [vmem:[%s11578_s1 + $0x898] sm:$0xff] }
 0x1d2   :  { %4163 = vmatprep.subr.bf16.mxu0 %v7488_v37  ;;  %v566_v37 = vld [vmem:[%s11578_s1 + $0x1090] sm:$0xff]  ;;  %v7290_v42 = vcombine.high %v311_v35, %v315_v36  ;;  %v7289_v9 = vcombine.low %v311_v35, %v315_v36  ;;  %v4429_v36 = vmax.f32 %v10084_v55, 0.0 }
 0x1d3   :  { %4287 = vmatpush1.bf16.msra.mxu1 %v7233_v44  ;;  %v7544_v44 = vcombine.high %v566_v37, %v570_v39  ;;  %v7543_v48 = vcombine.low %v566_v37, %v570_v39  ;;  %v8056_v35 = vld [vmem:[%s11580_s3 + $0x4] ss:$16 sps:$4 sm:$0xff]   ;;  %v367_v37 = vld [vmem:[%s11578_s1 + $0xa58] sm:$0xff] }
 0x1d4   :  { %4288 = vmatprep.subr.bf16.mxu1 %v7242_v46  ;;  %v574_v46 = vld [vmem:[%s11578_s1 + $0x10d0] sm:$0xff]  ;;  %v371_v39 = vld [vmem:[%s11578_s1 + $0xa78] sm:$0xff] }
 0x1d5   :  { %4164 = vmatpush1.bf16.msra.mxu0 %v7487_v45  ;;  %v323_v45 = vld [vmem:[%s11578_s1 + $0x8f8] sm:$0xff]  ;;  %v8059_v55 = vld [vmem:[%s11580_s3 + $0x24] ss:$16 sps:$4 sm:$0xff]  }
 0x1d6   :  { %4165 = vmatprep.subr.bf16.mxu0 %v7496_v47  ;;  %v578_v47 = vld [vmem:[%s11578_s1 + $0x10f0] sm:$0xff] }
 0x1d7   :  { %4289 = vmatpush1.bf16.msra.mxu1 %v7241_v52  ;;  %v7552_v24 = vcombine.high %v574_v46, %v578_v47  ;;  %v327_v52 = vld [vmem:[%s11578_s1 + $0x918] sm:$0xff]  ;;  %v7551_v28 = vcombine.low %v574_v46, %v578_v47  ;;  %v7345_v46 = vcombine.low %v367_v37, %v371_v39  ;;  %v8057_v47 = vld [vmem:[%s11580_s3 + $0x20] ss:$16 sps:$4 sm:$0xff]  }
 0x1d8   :  { %4290 = vmatprep.subr.bf16.mxu1 %v7250_v56  ;;  %v586_v56 = vld [vmem:[%s11578_s1 + $0x1130] sm:$0xff] }
 0x1d9   :  { %4166 = vmatpush1.bf16.msra.mxu0 %v7495_v54  ;;  %v331_v54 = vld [vmem:[%s11578_s1 + $0x938] sm:$0xff] }
 0x1da   :  { %4167 = vmatprep.subr.bf16.mxu0 %v7504_v17  ;;  %v7306_v58 = vcombine.high %v327_v52, %v331_v54 }
 0x1db   :  { %4291 = vmatpush1.bf16.msra.mxu1 %v7249_v62  ;;  %v339_v62 = vld [vmem:[%s11578_s1 + $0x978] sm:$0xff] }
 0x1dc   :  { %4292 = vmatprep.subr.bf16.mxu1 %v7258_v21  ;;  %v594_v21 = vld [vmem:[%s11578_s1 + $0x1170] sm:$0xff]  ;;  %v7314_v3 = vcombine.high %v335_v61, %v339_v62 }
 0x1dd   :  { %4168 = vmatpush1.bf16.msra.mxu0 %v7503_v0  ;;  %v590_v0 = vld [vmem:[%s11578_s1 + $0x1150] sm:$0xff] }
 0x1de   :  { %4169 = vmatprep.subr.bf16.mxu0 %v7512_v1  ;;  %v7305_v1 = vcombine.low %v327_v52, %v331_v54  ;;  %v7568_v4 = vcombine.high %v590_v0, %v594_v21  ;;  %v7567_v13 = vcombine.low %v590_v0, %v594_v21  ;;  %v8060_v54 = vld [vmem:[%s11580_s3 + $0x40] ss:$16 sps:$4 sm:$0xff]   ;;  %v399_v0 = vld [vmem:[%s11578_s1 + $0xb58] sm:$0xff] }
 0x1df   :  { %4293 = vmatpush1.bf16.msra.mxu1 %v7257_v6  ;;  %v347_v6 = vld [vmem:[%s11578_s1 + $0x9b8] sm:$0xff] }
 0x1e0   :  { %4294 = vmatprep.subr.bf16.mxu1 %v7266_v10  ;;  %v602_v10 = vld [vmem:[%s11578_s1 + $0x11b0] sm:$0xff]  ;;  %v7322_v12 = vcombine.high %v343_v5, %v347_v6  ;;  %v403_v21 = vld [vmem:[%s11578_s1 + $0xb78] sm:$0xff] }
 0x1e1   :  { %4170 = vmatpush1.bf16.msra.mxu0 %v7511_v8  ;;  %v598_v8 = vld [vmem:[%s11578_s1 + $0x1190] sm:$0xff] }
 0x1e2   :  { %4171 = vmatprep.subr.bf16.mxu0 %v7520_v11  ;;  %v7313_v11 = vcombine.low %v335_v61, %v339_v62  ;;  %v7576_v14 = vcombine.high %v598_v8, %v602_v10  ;;  %v7575_v27 = vcombine.low %v598_v8, %v602_v10  ;;  %v8068_v62 = vld [vmem:[%s11580_s3 + $0x84] ss:$16 sps:$4 sm:$0xff]   ;;  %v7377_v8 = vcombine.low %v399_v0, %v403_v21  ;;  %v8069_v10 = vld [vmem:[%s11580_s3 + $0xa0] ss:$16 sps:$4 sm:$0xff]  }
 0x1e3   :  { %4295 = vmatpush1.bf16.msra.mxu1 %v7265_v59  ;;  %v355_v59 = vld [vmem:[%s11578_s1 + $0x9f8] sm:$0xff] }
 0x1e4   :  { %4305 = vmatprep.subr.bf16.mxu1 %v7274_v19  ;;  %v610_v19 = vld [vmem:[%s11578_s1 + $0x11f0] sm:$0xff]  ;;  %v7330_v63 = vcombine.high %v351_v15, %v355_v59 }
 0x1e5   :  { %4172 = vmatpush1.bf16.msra.mxu0 %v7519_v18  ;;  %v606_v18 = vld [vmem:[%s11578_s1 + $0x11d0] sm:$0xff] }
 0x1e6   :  { %4182 = vmatprep.subr.bf16.mxu0 %v7528_v20  ;;  %4297 = vmatmul.mubr.bf16.vlgmr.msra.gmra.mrb[8].mxu1 %v8882_v30  ;;  %v319_v30 = vld [vmem:[%s11578_s1 + $0x8d8] sm:$0xff]  ;;  %v7321_v20 = vcombine.low %v343_v5, %v347_v6  ;;  %v7584_v53 = vcombine.high %v606_v18, %v610_v19 }
 0x1e7   :  { %4306 = vmatpush1.bf16.msra.mxu1 %v7273_v31  ;;  %4337 = vmatprep.mubr.bf16.mxu1 %v8897_v38  ;;  %v7298_v50 = vcombine.high %v319_v30, %v323_v45  ;;  %v582_v38 = vld [vmem:[%s11578_s1 + $0x1110] sm:$0xff]  ;;  %v7297_v17 = vcombine.low %v319_v30, %v323_v45  ;;  %v363_v31 = vld [vmem:[%s11578_s1 + $0xa38] sm:$0xff]  ;;  %v10310_v45 = vpack.c.bf16 %v4429_v36, %v4429_v36 }
 0x1e8   :  { %4174 = vmatmul.mubr.bf16.vlgmr.msra.gmra.mrb[4].mxu0 %v9289_v7  ;;  %4307 = vmatprep.subr.bf16.mxu1 %v7282_v33  ;;  %v7560_v60 = vcombine.high %v582_v38, %v586_v56  ;;  %v7559_v2 = vcombine.low %v582_v38, %v586_v56  ;;  %v7583_v33 = vcombine.low %v606_v18, %v610_v19  ;;  %v379_v30 = vld [vmem:[%s11578_s1 + $0xab8] sm:$0xff]  ;;  %v8065_v56 = vld [vmem:[%s11580_s3 + $0x64] ss:$16 sps:$4 sm:$0xff]  }
 0x1e9   :  { %4183 = vmatpush1.bf16.msra.mxu0 %v7527_v32  ;;  %4214 = vmatprep.mubr.bf16.mxu0 %v8576_v26  ;;  %v7329_v32 = vcombine.low %v351_v15, %v355_v59  ;;  %v407_v5 = vld [vmem:[%s11578_s1 + $0xb98] sm:$0xff]  ;;  %v8072_v59 = vld [vmem:[%s11580_s3 + $0xc0] ss:$16 sps:$4 sm:$0xff]   ;;  %v8077_v19 = vld [vmem:[%s11580_s3 + $0xe4] ss:$16 sps:$4 sm:$0xff]  }
 0x1ea   :  { %4184 = vmatprep.subr.bf16.mxu0 %v7536_v34  ;;  %v7338_v34 = vcombine.high %v359_v29, %v363_v31  ;;  %v411_v6 = vld [vmem:[%s11578_s1 + $0xbb8] sm:$0xff] }
 0x1eb   :  { %4308 = vmatpush1.bf16.msra.mxu1 %v7281_v40  ;;  %v7337_v40 = vcombine.low %v359_v29, %v363_v31  ;;  %v7385_v15 = vcombine.low %v407_v5, %v411_v6  ;;  %v8080_v31 = vld [vmem:[%s11580_s3 + $0x104] ss:$16 sps:$4 sm:$0xff]  }
 0x1ec   :  { %4309 = vmatprep.subr.bf16.mxu1 %v7290_v42  ;;  %v7346_v42 = vcombine.high %v367_v37, %v371_v39  ;;  %v8083_v37 = vld [vmem:[%s11580_s3 + $0x124] ss:$16 sps:$4 sm:$0xff]   ;;  %v439_v39 = vld [vmem:[%s11578_s1 + $0xc98] sm:$0xff] }
 0x1ed   :  { %4185 = vmatpush1.bf16.msra.mxu0 %v7535_v41  ;;  %v8054_v41 = vld [vmem:[%s11580_s3] ss:$16 sps:$4 sm:$0xff]  }
 0x1ee   :  { %4186 = vmatprep.subr.bf16.mxu0 %v7544_v44  ;;  %v375_v44 = vld [vmem:[%s11578_s1 + $0xa98] sm:$0xff] }
 0x1ef   :  { %4310 = vmatpush1.bf16.msra.mxu1 %v7289_v9  ;;  %v7354_v9 = vcombine.high %v375_v44, %v379_v30  ;;  %v7353_v52 = vcombine.low %v375_v44, %v379_v30  ;;  %v8086_v44 = vld [vmem:[%s11580_s3 + $0x144] ss:$16 sps:$4 sm:$0xff]  }
 0x1f0   :  { %4311 = vmatprep.subr.bf16.mxu1 %v7298_v50  ;;  %v383_v50 = vld [vmem:[%s11578_s1 + $0xad8] sm:$0xff] }
 0x1f1   :  { %4187 = vmatpush1.bf16.msra.mxu0 %v7543_v48  ;;  %v8062_v48 = vld [vmem:[%s11580_s3 + $0x44] ss:$16 sps:$4 sm:$0xff]  }
 0x1f2   :  { %4188 = vmatprep.subr.bf16.mxu0 %v7552_v24  ;;  %v387_v24 = vld [vmem:[%s11578_s1 + $0xaf8] sm:$0xff] }
 0x1f3   :  { %4312 = vmatpush1.bf16.msra.mxu1 %v7297_v17  ;;  %v7362_v38 = vcombine.high %v383_v50, %v387_v24  ;;  %v391_v17 = vld [vmem:[%s11578_s1 + $0xb18] sm:$0xff] }
 0x1f4   :  { %4313 = vmatprep.subr.bf16.mxu1 %v7306_v58  ;;  %v7361_v58 = vcombine.low %v383_v50, %v387_v24  ;;  %v459_v50 = vld [vmem:[%s11578_s1 + $0xd38] sm:$0xff] }
 0x1f5   :  { %4189 = vmatpush1.bf16.msra.mxu0 %v7551_v28  ;;  %v395_v28 = vld [vmem:[%s11578_s1 + $0xb38] sm:$0xff] }
 0x1f6   :  { %4190 = vmatprep.subr.bf16.mxu0 %v7560_v60  ;;  %v8063_v60 = vld [vmem:[%s11580_s3 + $0x60] ss:$16 sps:$4 sm:$0xff]   ;;  %v7370_v61 = vcombine.high %v391_v17, %v395_v28 }
 0x1f7   :  { %4314 = vmatpush1.bf16.msra.mxu1 %v7305_v1  ;;  %v7369_v1 = vcombine.low %v391_v17, %v395_v28  ;;  %v467_v17 = vld [vmem:[%s11578_s1 + $0xd78] sm:$0xff] }
 0x1f8   :  { %4315 = vmatprep.subr.bf16.mxu1 %v7314_v3  ;;  %v7378_v3 = vcombine.high %v399_v0, %v403_v21  ;;  %v475_v0 = vld [vmem:[%s11578_s1 + $0xdb8] sm:$0xff]  ;;  %v628_v21 = vsub.s32 3, %v8694_v43 }
 0x1f9   :  { %4191 = vmatpush1.bf16.msra.mxu0 %v7559_v2  ;;  %v8066_v2 = vld [vmem:[%s11580_s3 + $0x80] ss:$16 sps:$4 sm:$0xff]  }
 0x1fa   :  { %4192 = vmatprep.subr.bf16.mxu0 %v7568_v4  ;;  %v8071_v4 = vld [vmem:[%s11580_s3 + $0xa4] ss:$16 sps:$4 sm:$0xff]  }
 0x1fb   :  { %4316 = vmatpush1.bf16.msra.mxu1 %v7313_v11  ;;  %v7386_v11 = vcombine.high %v407_v5, %v411_v6  ;;  %v8098_v5 = vld [vmem:[%s11580_s3 + $0x1c4] ss:$16 sps:$4 sm:$0xff]   ;;  %v479_v6 = vld [vmem:[%s11578_s1 + $0xdd8] sm:$0xff] }
 0x1fc   :  { %4317 = vmatprep.subr.bf16.mxu1 %v7322_v12  ;;  %v415_v12 = vld [vmem:[%s11578_s1 + $0xbd8] sm:$0xff] }
 0x1fd   :  { %4193 = vmatpush1.bf16.msra.mxu0 %v7567_v13  ;;  %v8074_v13 = vld [vmem:[%s11580_s3 + $0xc4] ss:$16 sps:$4 sm:$0xff]  }
 0x1fe   :  { %4194 = vmatprep.subr.bf16.mxu0 %v7576_v14  ;;  %v419_v14 = vld [vmem:[%s11578_s1 + $0xbf8] sm:$0xff] }
 0x1ff   :  { %4318 = vmatpush1.bf16.msra.mxu1 %v7321_v20  ;;  %v7394_v18 = vcombine.high %v415_v12, %v419_v14  ;;  %v423_v20 = vld [vmem:[%s11578_s1 + $0xc18] sm:$0xff] }
 0x200   :  { %4319 = vmatprep.subr.bf16.mxu1 %v7330_v63  ;;  %v7393_v63 = vcombine.low %v415_v12, %v419_v14 }
 0x201   :  { %4195 = vmatpush1.bf16.msra.mxu0 %v7575_v27  ;;  %v427_v27 = vld [vmem:[%s11578_s1 + $0xc38] sm:$0xff] }
 0x202   :  { %4196 = vmatprep.subr.bf16.mxu0 %v7584_v53  ;;  %v8075_v53 = vld [vmem:[%s11580_s3 + $0xe0] ss:$16 sps:$4 sm:$0xff]   ;;  %v7402_v29 = vcombine.high %v423_v20, %v427_v27 }
 0x203   :  { %4320 = vmatpush1.bf16.msra.mxu1 %v7329_v32  ;;  %v431_v32 = vld [vmem:[%s11578_s1 + $0xc58] sm:$0xff] }
 0x204   :  { %4321 = vmatprep.subr.bf16.mxu1 %v7338_v34  ;;  %v7401_v34 = vcombine.low %v423_v20, %v427_v27 }
 0x205   :  { %4197 = vmatpush1.bf16.msra.mxu0 %v7583_v33  ;;  %v435_v33 = vld [vmem:[%s11578_s1 + $0xc78] sm:$0xff] }
 0x206   :  { %6002 = vmatprep.subr.bf16.mxu0 %v8056_v35  ;;  %v8078_v35 = vld [vmem:[%s11580_s3 + $0x100] ss:$16 sps:$4 sm:$0xff]   ;;  %v7410_v36 = vcombine.high %v431_v32, %v435_v33 }
 0x207   :  { %4322 = vmatpush1.bf16.msra.mxu1 %v7337_v40  ;;  %v443_v40 = vld [vmem:[%s11578_s1 + $0xcb8] sm:$0xff] }
 0x208   :  { %4215 = vmatmul.mubr.bf16.vlgmr.msra.gmra.mrb[4].mxu0 %v9395_v22  ;;  %4323 = vmatprep.subr.bf16.mxu1 %v7346_v42  ;;  %v8081_v42 = vld [vmem:[%s11580_s3 + $0x120] ss:$16 sps:$4 sm:$0xff]   ;;  %v7417_v30 = vcombine.low %v439_v39, %v443_v40 }
 0x209   :  { %6003 = vmatpush1.bf16.msra.mxu0 %v8054_v41  ;;  %6034 = vmatprep.mubr.bf16.mxu0 %v10310_v45  ;;  %v7409_v41 = vcombine.low %v431_v32, %v435_v33  ;;  %v495_v33 = vld [vmem:[%s11578_s1 + $0xe58] sm:$0xff] }
 0x20a   :  { %6004 = vmatprep.subr.bf16.mxu0 %v8059_v55  ;;  %v7418_v55 = vcombine.high %v439_v39, %v443_v40  ;;  %v8107_v39 = vld [vmem:[%s11580_s3 + $0x224] ss:$16 sps:$4 sm:$0xff]   ;;  %v503_v40 = vld [vmem:[%s11578_s1 + $0xe98] sm:$0xff] }
 0x20b   :  { %4324 = vmatpush1.bf16.msra.mxu1 %v7345_v46  ;;  %v8084_v46 = vld [vmem:[%s11580_s3 + $0x140] ss:$16 sps:$4 sm:$0xff]  }
 0x20c   :  { %4325 = vmatprep.subr.bf16.mxu1 %v7354_v9  ;;  %v8089_v9 = vld [vmem:[%s11580_s3 + $0x164] ss:$16 sps:$4 sm:$0xff]  }
 0x20d   :  { %6005 = vmatpush1.bf16.msra.mxu0 %v8057_v47 }
 0x20e   :  { %6006 = vmatprep.subr.bf16.mxu0 %v8062_v48  ;;  %v455_v48 = vld [vmem:[%s11578_s1 + $0xd18] sm:$0xff] }
 0x20f   :  { %4326 = vmatpush1.bf16.msra.mxu1 %v7353_v52  ;;  %v8087_v52 = vld [vmem:[%s11580_s3 + $0x160] ss:$16 sps:$4 sm:$0xff]   ;;  %v7433_v28 = vcombine.low %v455_v48, %v459_v50 }
 0x210   :  { %4327 = vmatprep.subr.bf16.mxu1 %v7362_v38  ;;  %v8092_v38 = vld [vmem:[%s11580_s3 + $0x184] ss:$16 sps:$4 sm:$0xff]  }
 0x211   :  { %6007 = vmatpush1.bf16.msra.mxu0 %v8060_v54  ;;  %v7434_v54 = vcombine.high %v455_v48, %v459_v50  ;;  %v8113_v50 = vld [vmem:[%s11580_s3 + $0x264] ss:$16 sps:$4 sm:$0xff]  }
 0x212   :  { %6008 = vmatprep.subr.bf16.mxu0 %v8065_v56  ;;  %v463_v56 = vld [vmem:[%s11578_s1 + $0xd58] sm:$0xff] }
 0x213   :  { %4328 = vmatpush1.bf16.msra.mxu1 %v7361_v58  ;;  %v8090_v58 = vld [vmem:[%s11580_s3 + $0x180] ss:$16 sps:$4 sm:$0xff]  }
 0x214   :  { %4329 = vmatprep.subr.bf16.mxu1 %v7370_v61  ;;  %v8095_v61 = vld [vmem:[%s11580_s3 + $0x1a4] ss:$16 sps:$4 sm:$0xff]  }
 0x215   :  { %6009 = vmatpush1.bf16.msra.mxu0 %v8063_v60  ;;  %v7442_v60 = vcombine.high %v463_v56, %v467_v17 }
 0x216   :  { %6010 = vmatprep.subr.bf16.mxu0 %v8068_v62  ;;  %v471_v62 = vld [vmem:[%s11578_s1 + $0xd98] sm:$0xff] }
 0x217   :  { %4330 = vmatpush1.bf16.msra.mxu1 %v7369_v1  ;;  %v7441_v1 = vcombine.low %v463_v56, %v467_v17  ;;  %v7449_v12 = vcombine.low %v471_v62, %v475_v0  ;;  %v8116_v17 = vld [vmem:[%s11580_s3 + $0x284] ss:$16 sps:$4 sm:$0xff]  }
 0x218   :  { %4331 = vmatprep.subr.bf16.mxu1 %v7378_v3  ;;  %v7450_v3 = vcombine.high %v471_v62, %v475_v0  ;;  %v8119_v0 = vld [vmem:[%s11580_s3 + $0x2a4] ss:$16 sps:$4 sm:$0xff]  }
 0x219   :  { %6011 = vmatpush1.bf16.msra.mxu0 %v8066_v2  ;;  %v8093_v2 = vld [vmem:[%s11580_s3 + $0x1a0] ss:$16 sps:$4 sm:$0xff]  }
 0x21a   :  { %6012 = vmatprep.subr.bf16.mxu0 %v8071_v4 }
 0x21b   :  { %4332 = vmatpush1.bf16.msra.mxu1 %v7377_v8  ;;  %v483_v8 = vld [vmem:[%s11578_s1 + $0xdf8] sm:$0xff] }
 0x21c   :  { %4333 = vmatprep.subr.bf16.mxu1 %v7386_v11  ;;  %v7457_v27 = vcombine.low %v479_v6, %v483_v8 }
 0x21d   :  { %6013 = vmatpush1.bf16.msra.mxu0 %v8069_v10  ;;  %v629_v10 = vrot.slane %v10041_v23, %v628_v21  ;;  %v487_v23 = vld [vmem:[%s11578_s1 + $0xe18] sm:$0xff] }
 0x21e   :  { %6014 = vmatprep.subr.bf16.mxu0 %v8074_v13 }
 0x21f   :  { %4334 = vmatpush1.bf16.msra.mxu1 %v7385_v15  ;;  %v8096_v15 = vld [vmem:[%s11580_s3 + $0x1c0] ss:$16 sps:$4 sm:$0xff]  }
 0x220   :  { %4335 = vmatprep.subr.bf16.mxu1 %v7394_v18  ;;  %v8101_v18 = vld [vmem:[%s11580_s3 + $0x1e4] ss:$16 sps:$4 sm:$0xff]  }
 0x221   :  { %6015 = vmatpush1.bf16.msra.mxu0 %v8072_v59  ;;  %v7458_v59 = vcombine.high %v479_v6, %v483_v8  ;;  %v8122_v8 = vld [vmem:[%s11580_s3 + $0x2c4] ss:$16 sps:$4 sm:$0xff]  }
 0x222   :  { %6016 = vmatprep.subr.bf16.mxu0 %v8077_v19  ;;  %v491_v19 = vld [vmem:[%s11578_s1 + $0xe38] sm:$0xff] }
 0x223   :  { %4336 = vmatpush1.bf16.msra.mxu1 %v7393_v63  ;;  %v8099_v63 = vld [vmem:[%s11580_s3 + $0x1e0] ss:$16 sps:$4 sm:$0xff]  }
 0x224   :  { %4346 = vmatprep.subr.bf16.mxu1 %v7402_v29  ;;  %v4428_v29 = vmax.f32 %v10082_v51, 0.0  ;;  %v8102_v51 = vld [vmem:[%s11580_s3 + $0x200] ss:$16 sps:$4 sm:$0xff]  }
 0x225   :  { %6017 = vmatpush1.bf16.msra.mxu0 %v8075_v53  ;;  %v7466_v53 = vcombine.high %v487_v23, %v491_v19 }
 0x226   :  { %6018 = vmatprep.subr.bf16.mxu0 %v8080_v31  ;;  %4338 = vmatmul.mubr.bf16.vlgmr.msra.gmra.mrb[8].mxu1 %v9085_v49  ;;  %v447_v49 = vld [vmem:[%s11578_s1 + $0xcd8] sm:$0xff]  ;;  %v8104_v31 = vld [vmem:[%s11580_s3 + $0x204] ss:$16 sps:$4 sm:$0xff]  }
 0x227   :  { %4347 = vmatpush1.bf16.msra.mxu1 %v7401_v34  ;;  %4378 = vmatprep.mubr.bf16.mxu1 %v9101_v57  ;;  %v451_v57 = vld [vmem:[%s11578_s1 + $0xcf8] sm:$0xff] }
 0x228   :  { %4348 = vmatprep.subr.bf16.mxu1 %v7410_v36  ;;  %v7426_v47 = vcombine.high %v447_v49, %v451_v57  ;;  %v7425_v24 = vcombine.low %v447_v49, %v451_v57  ;;  %v499_v34 = vld [vmem:[%s11578_s1 + $0xe78] sm:$0xff]  ;;  %v10506_v36 = vpack.c.bf16 %v4428_v29, %v4428_v29  ;;  %v8110_v57 = vld [vmem:[%s11580_s3 + $0x244] ss:$16 sps:$4 sm:$0xff]  }
 0x229   :  { %6019 = vmatpush1.bf16.msra.mxu0 %v8078_v35  ;;  %v7465_v35 = vcombine.low %v487_v23, %v491_v19  ;;  %v8123_v19 = vld [vmem:[%s11580_s3 + $0x2e0] ss:$16 sps:$4 sm:$0xff]  }
 0x22a   :  { %6020 = vmatprep.subr.bf16.mxu0 %v8083_v37  ;;  %v7474_v37 = vcombine.high %v495_v33, %v499_v34 }
 0x22b   :  { %4349 = vmatpush1.bf16.msra.mxu1 %v7409_v41  ;;  %v507_v41 = vld [vmem:[%s11578_s1 + $0xeb8] sm:$0xff] }
 0x22c   :  { %4350 = vmatprep.subr.bf16.mxu1 %v7418_v55  ;;  %v7473_v55 = vcombine.low %v495_v33, %v499_v34  ;;  %v7482_v49 = vcombine.high %v503_v40, %v507_v41  ;;  %v8131_v33 = vld [vmem:[%s11580_s3 + $0x324] ss:$16 sps:$4 sm:$0xff]   ;;  %v567_v34 = vld [vmem:[%s11578_s1 + $0x1098] sm:$0xff] }
 0x22d   :  { %6021 = vmatpush1.bf16.msra.mxu0 %v8081_v42 }
 0x22e   :  { %6022 = vmatprep.subr.bf16.mxu0 %v8086_v44  ;;  %v8105_v44 = vld [vmem:[%s11580_s3 + $0x220] ss:$16 sps:$4 sm:$0xff]  }
 0x22f   :  { %4351 = vmatpush1.bf16.msra.mxu1 %v7417_v30  ;;  %v511_v30 = vld [vmem:[%s11578_s1 + $0xed8] sm:$0xff] }
 0x230   :  { %4352 = vmatprep.subr.bf16.mxu1 %v7426_v47  ;;  %v7481_v47 = vcombine.low %v503_v40, %v507_v41  ;;  %v8134_v40 = vld [vmem:[%s11580_s3 + $0x344] ss:$16 sps:$4 sm:$0xff]  }
 0x231   :  { %6023 = vmatpush1.bf16.msra.mxu0 %v8084_v46  ;;  %v515_v46 = vld [vmem:[%s11578_s1 + $0xef8] sm:$0xff] }
 0x232   :  { %6024 = vmatprep.subr.bf16.mxu0 %v8089_v9  ;;  %v8108_v9 = vld [vmem:[%s11580_s3 + $0x240] ss:$16 sps:$4 sm:$0xff]   ;;  %v7490_v48 = vcombine.high %v511_v30, %v515_v46 }
 0x233   :  { %4353 = vmatpush1.bf16.msra.mxu1 %v7425_v24  ;;  %v519_v24 = vld [vmem:[%s11578_s1 + $0xf18] sm:$0xff] }
 0x234   :  { %4354 = vmatprep.subr.bf16.mxu1 %v7434_v54  ;;  %v7489_v54 = vcombine.low %v511_v30, %v515_v46  ;;  %v587_v30 = vld [vmem:[%s11578_s1 + $0x1138] sm:$0xff] }
 0x235   :  { %6025 = vmatpush1.bf16.msra.mxu0 %v8087_v52  ;;  %v523_v52 = vld [vmem:[%s11578_s1 + $0xf38] sm:$0xff] }
 0x236   :  { %6026 = vmatprep.subr.bf16.mxu0 %v8092_v38  ;;  %v8111_v38 = vld [vmem:[%s11580_s3 + $0x260] ss:$16 sps:$4 sm:$0xff]   ;;  %v7498_v56 = vcombine.high %v519_v24, %v523_v52 }
 0x237   :  { %4355 = vmatpush1.bf16.msra.mxu1 %v7433_v28  ;;  %v527_v28 = vld [vmem:[%s11578_s1 + $0xf58] sm:$0xff] }
 0x238   :  { %4356 = vmatprep.subr.bf16.mxu1 %v7442_v60  ;;  %v7497_v60 = vcombine.low %v519_v24, %v523_v52  ;;  %v595_v24 = vld [vmem:[%s11578_s1 + $0x1178] sm:$0xff] }
 0x239   :  { %6027 = vmatpush1.bf16.msra.mxu0 %v8090_v58  ;;  %v10464_v4 = vpop.f32.mrb[4].mxu1  ;;  %v531_v58 = vld [vmem:[%s11578_s1 + $0xf78] sm:$0xff] }
 0x23a   :  { %6028 = vmatprep.subr.bf16.mxu0 %v8095_v61  ;;  %v4013_v11 = vpop.f32.mrb[5].mxu1  ;;  %v8114_v61 = vld [vmem:[%s11580_s3 + $0x280] ss:$16 sps:$4 sm:$0xff]   ;;  %v7506_v62 = vcombine.high %v527_v28, %v531_v58 }
 0x23b   :  { %v4015_v13 = vpop.f32.mrb[6].mxu1  ;;  %4357 = vmatpush1.bf16.msra.mxu1 %v7441_v1  ;;  %v7951_v20 = vadd.f32 %v4013_v11, %v629_v10  ;;  %v535_v1 = vld [vmem:[%s11578_s1 + $0xf98] sm:$0xff] }
 0x23c   :  { %v4016_v14 = vpop.f32.mrb[7].mxu1  ;;  %4358 = vmatprep.subr.bf16.mxu1 %v7450_v3  ;;  %v7505_v3 = vcombine.low %v527_v28, %v531_v58  ;;  %v543_v10 = vld [vmem:[%s11578_s1 + $0xfd8] sm:$0xff] }
 0x23d   :  { %6029 = vmatpush1.bf16.msra.mxu0 %v8093_v2  ;;  %v4431_v32 = vmax.f32 %v7951_v20, 0.0  ;;  %v539_v2 = vld [vmem:[%s11578_s1 + $0xfb8] sm:$0xff] }
 0x23e   :  { %6030 = vmatprep.subr.bf16.mxu0 %v8098_v5  ;;  %v8117_v5 = vld [vmem:[%s11580_s3 + $0x2a0] ss:$16 sps:$4 sm:$0xff]   ;;  %v7514_v6 = vcombine.high %v535_v1, %v539_v2  ;;  %v547_v11 = vld [vmem:[%s11578_s1 + $0xff8] sm:$0xff]  ;;  %v7513_v13 = vcombine.low %v535_v1, %v539_v2  ;;  %v8146_v2 = vld [vmem:[%s11580_s3 + $0x3c4] ss:$16 sps:$4 sm:$0xff]  }
 0x23f   :  { %4359 = vmatpush1.bf16.msra.mxu1 %v7449_v12  ;;  %v10517_v42 = vpack.c.bf16 %v4431_v32, %v4431_v32  ;;  %v8120_v12 = vld [vmem:[%s11580_s3 + $0x2c0] ss:$16 sps:$4 sm:$0xff]   ;;  %v7522_v14 = vcombine.high %v543_v10, %v547_v11  ;;  %v7521_v23 = vcombine.low %v543_v10, %v547_v11  ;;  %v599_v28 = vld [vmem:[%s11578_s1 + $0x1198] sm:$0xff] }
 0x240   :  { %4360 = vmatprep.subr.bf16.mxu1 %v7458_v59  ;;  %v551_v59 = vld [vmem:[%s11578_s1 + $0x1018] sm:$0xff] }
 0x241   :  { %6031 = vmatpush1.bf16.msra.mxu0 %v8096_v15  ;;  %v8125_v15 = vld [vmem:[%s11580_s3 + $0x2e4] ss:$16 sps:$4 sm:$0xff]   ;;  %v603_v58 = vld [vmem:[%s11578_s1 + $0x11b8] sm:$0xff] }
 0x242   :  { %6032 = vmatprep.subr.bf16.mxu0 %v8101_v18  ;;  %v555_v18 = vld [vmem:[%s11578_s1 + $0x1038] sm:$0xff] }
 0x243   :  { %4361 = vmatpush1.bf16.msra.mxu1 %v7457_v27  ;;  %v7530_v20 = vcombine.high %v551_v59, %v555_v18  ;;  %v8128_v27 = vld [vmem:[%s11580_s3 + $0x304] ss:$16 sps:$4 sm:$0xff]   ;;  %v7529_v29 = vcombine.low %v551_v59, %v555_v18  ;;  %v8150_v18 = vld [vmem:[%s11580_s3 + $0x8] ss:$16 sps:$4 sm:$0xff]  }
 0x244   :  { %4362 = vmatprep.subr.bf16.mxu1 %v7466_v53  ;;  %v563_v53 = vld [vmem:[%s11578_s1 + $0x1078] sm:$0xff] }
 0x245   :  { %6033 = vmatpush1.bf16.msra.mxu0 %v8099_v63  ;;  %v559_v63 = vld [vmem:[%s11578_s1 + $0x1058] sm:$0xff] }
 0x246   :  { %6043 = vmatprep.subr.bf16.mxu0 %v8104_v31  ;;  %v8126_v31 = vld [vmem:[%s11580_s3 + $0x300] ss:$16 sps:$4 sm:$0xff]   ;;  %v7538_v32 = vcombine.high %v559_v63, %v563_v53 }
 0x247   :  { %4363 = vmatpush1.bf16.msra.mxu1 %v7465_v35  ;;  %v571_v35 = vld [vmem:[%s11578_s1 + $0x10b8] sm:$0xff] }
 0x248   :  { %6035 = vmatmul.mubr.bf16.vlgmr.msra.gmra.mrb[8].mxu0 %v10506_v36  ;;  %4364 = vmatprep.subr.bf16.mxu1 %v7474_v37  ;;  %v8129_v37 = vld [vmem:[%s11580_s3 + $0x320] ss:$16 sps:$4 sm:$0xff]   ;;  %v7545_v41 = vcombine.low %v567_v34, %v571_v35 }
 0x249   :  { %6044 = vmatpush1.bf16.msra.mxu0 %v8102_v51  ;;  %6075 = vmatprep.mubr.bf16.mxu0 %v10517_v42  ;;  %v7537_v51 = vcombine.low %v559_v63, %v563_v53  ;;  %v8153_v63 = vld [vmem:[%s11580_s3 + $0x28] ss:$16 sps:$4 sm:$0xff]   ;;  %v8158_v53 = vld [vmem:[%s11580_s3 + $0x4c] ss:$16 sps:$4 sm:$0xff]  }
 0x24a   :  { %6045 = vmatprep.subr.bf16.mxu0 %v8107_v39  ;;  %v7546_v39 = vcombine.high %v567_v34, %v571_v35  ;;  %v8159_v34 = vld [vmem:[%s11580_s3 + $0x68] ss:$16 sps:$4 sm:$0xff]   ;;  %v8164_v35 = vld [vmem:[%s11580_s3 + $0x8c] ss:$16 sps:$4 sm:$0xff]  }
 0x24b   :  { %4365 = vmatpush1.bf16.msra.mxu1 %v7473_v55  ;;  %v8132_v55 = vld [vmem:[%s11580_s3 + $0x340] ss:$16 sps:$4 sm:$0xff]  }
 0x24c   :  { %4366 = vmatprep.subr.bf16.mxu1 %v7482_v49  ;;  %v8137_v49 = vld [vmem:[%s11580_s3 + $0x364] ss:$16 sps:$4 sm:$0xff]  }
 0x24d   :  { %6046 = vmatpush1.bf16.msra.mxu0 %v8105_v44 }
 0x24e   :  { %6047 = vmatprep.subr.bf16.mxu0 %v8110_v57  ;;  %v583_v57 = vld [vmem:[%s11578_s1 + $0x1118] sm:$0xff] }
 0x24f   :  { %4367 = vmatpush1.bf16.msra.mxu1 %v7481_v47  ;;  %v8135_v47 = vld [vmem:[%s11580_s3 + $0x360] ss:$16 sps:$4 sm:$0xff]   ;;  %v7561_v52 = vcombine.low %v583_v57, %v587_v30 }
 0x250   :  { %4368 = vmatprep.subr.bf16.mxu1 %v7490_v48  ;;  %v8140_v48 = vld [vmem:[%s11580_s3 + $0x384] ss:$16 sps:$4 sm:$0xff]  }
 0x251   :  { %6048 = vmatpush1.bf16.msra.mxu0 %v8108_v9  ;;  %v7562_v9 = vcombine.high %v583_v57, %v587_v30  ;;  %v8168_v57 = vld [vmem:[%s11580_s3 + $0xc8] ss:$16 sps:$4 sm:$0xff]   ;;  %v8176_v30 = vld [vmem:[%s11580_s3 + $0xec] ss:$16 sps:$4 sm:$0xff]  }
 0x252   :  { %6049 = vmatprep.subr.bf16.mxu0 %v8113_v50  ;;  %v591_v50 = vld [vmem:[%s11578_s1 + $0x1158] sm:$0xff] }
 0x253   :  { %4369 = vmatpush1.bf16.msra.mxu1 %v7489_v54  ;;  %v8138_v54 = vld [vmem:[%s11580_s3 + $0x380] ss:$16 sps:$4 sm:$0xff]  }
 0x254   :  { %4370 = vmatprep.subr.bf16.mxu1 %v7498_v56  ;;  %v624_v56 = vsub.s32 2, %v8694_v43 }
 0x255   :  { %6050 = vmatpush1.bf16.msra.mxu0 %v8111_v38  ;;  %v7570_v38 = vcombine.high %v591_v50, %v595_v24 }
 0x256   :  { %6051 = vmatprep.subr.bf16.mxu0 %v8116_v17  ;;  %v8143_v17 = vld [vmem:[%s11580_s3 + $0x3a4] ss:$16 sps:$4 sm:$0xff]  }
 0x257   :  { %4371 = vmatpush1.bf16.msra.mxu1 %v7497_v60  ;;  %v7569_v60 = vcombine.low %v591_v50, %v595_v24  ;;  %v8213_v50 = vld [vmem:[%s11580_s3 + $0x4e0] ss:$16 sps:$4 sm:$0xff]   ;;  %v8221_v24 = vld [vmem:[%s11580_s3 + $0x504] ss:$16 sps:$4 sm:$0xff]  }
 0x258   :  { %4372 = vmatprep.subr.bf16.mxu1 %v7506_v62  ;;  %v7578_v62 = vcombine.high %v599_v28, %v603_v58 }
 0x259   :  { %6052 = vmatpush1.bf16.msra.mxu0 %v8114_v61  ;;  %v8141_v61 = vld [vmem:[%s11580_s3 + $0x3a0] ss:$16 sps:$4 sm:$0xff]  }
 0x25a   :  { %6053 = vmatprep.subr.bf16.mxu0 %v8119_v0  ;;  %v10674_v0 = vld [vmem:[%s11579_s2] sm:$0xff] }
 0x25b   :  { %4373 = vmatpush1.bf16.msra.mxu1 %v7505_v3  ;;  %v625_v1 = vrot.slane %v10674_v0, %v624_v56  ;;  %v607_v3 = vld [vmem:[%s11578_s1 + $0x11d8] sm:$0xff] }
 0x25c   :  { %4374 = vmatprep.subr.bf16.mxu1 %v7514_v6  ;;  %v7577_v6 = vcombine.low %v599_v28, %v603_v58  ;;  %v8186_v28 = vld [vmem:[%s11580_s3 + $0x128] ss:$16 sps:$4 sm:$0xff]   ;;  %v8194_v58 = vld [vmem:[%s11580_s3 + $0x14c] ss:$16 sps:$4 sm:$0xff]  }
 0x25d   :  { %6054 = vmatpush1.bf16.msra.mxu0 %v8117_v5  ;;  %v611_v5 = vld [vmem:[%s11578_s1 + $0x11f8] sm:$0xff]  ;;  %v7950_v11 = vadd.f32 %v10464_v4, %v625_v1  ;;  %v8173_v4 = vld [vmem:[%s11580_s3 + $0x404] ss:$16 sps:$4 sm:$0xff]  }
 0x25e   :  { %6055 = vmatprep.subr.bf16.mxu0 %v8122_v8  ;;  %v8144_v8 = vld [vmem:[%s11580_s3 + $0x3c0] ss:$16 sps:$4 sm:$0xff]   ;;  %v7586_v10 = vcombine.high %v607_v3, %v611_v5  ;;  %v8200_v1 = vld [vmem:[%s11580_s3 + $0x16c] ss:$16 sps:$4 sm:$0xff]  }
 0x25f   :  { %4375 = vmatpush1.bf16.msra.mxu1 %v7513_v13  ;;  %v8149_v13 = vld [vmem:[%s11580_s3 + $0x3e4] ss:$16 sps:$4 sm:$0xff]   ;;  %v4430_v59 = vmax.f32 %v7950_v11, 0.0  ;;  %v8204_v11 = vld [vmem:[%s11580_s3 + $0x188] ss:$16 sps:$4 sm:$0xff]  }
 0x260   :  { %4376 = vmatprep.subr.bf16.mxu1 %v7522_v14  ;;  %v8147_v14 = vld [vmem:[%s11580_s3 + $0x3e0] ss:$16 sps:$4 sm:$0xff]  }
 0x261   :  { %6056 = vmatpush1.bf16.msra.mxu0 %v8120_v12  ;;  %v7585_v12 = vcombine.low %v607_v3, %v611_v5  ;;  %v8239_v3 = vld [vmem:[%s11580_s3 + $0x564] ss:$16 sps:$4 sm:$0xff]   ;;  %v8198_v5 = vld [vmem:[%s11580_s3 + $0x168] ss:$16 sps:$4 sm:$0xff]  }
 0x262   :  { %6057 = vmatprep.subr.bf16.mxu0 %v8125_v15  ;;  %v8152_v15 = vld [vmem:[%s11580_s3 + $0xc] ss:$16 sps:$4 sm:$0xff]  }
 0x263   :  { %4377 = vmatpush1.bf16.msra.mxu1 %v7521_v23  ;;  %v8155_v23 = vld [vmem:[%s11580_s3 + $0x2c] ss:$16 sps:$4 sm:$0xff]  }
 0x264   :  { %4387 = vmatprep.subr.bf16.mxu1 %v7530_v20  ;;  %v8171_v20 = vld [vmem:[%s11580_s3 + $0x400] ss:$16 sps:$4 sm:$0xff]  }
 0x265   :  { %6058 = vmatpush1.bf16.msra.mxu0 %v8123_v19  ;;  %v10710_v19 = vpack.c.bf16 %v4430_v59, %v4430_v59  ;;  %v8218_v59 = vld [vmem:[%s11580_s3 + $0x1cc] ss:$16 sps:$4 sm:$0xff]  }
 0x266   :  { %6059 = vmatprep.subr.bf16.mxu0 %v8128_v27  ;;  %4379 = vmatmul.mubr.bf16.vlgmr.msra.gmra.mrb[8].mxu1 %v9289_v7  ;;  %v575_v7 = vld [vmem:[%s11578_s1 + $0x10d8] sm:$0xff]  ;;  %v8179_v27 = vld [vmem:[%s11580_s3 + $0x424] ss:$16 sps:$4 sm:$0xff]  }
 0x267   :  { %4388 = vmatpush1.bf16.msra.mxu1 %v7529_v29  ;;  %4419 = vmatprep.mubr.bf16.mxu1 %v8576_v26  ;;  %v579_v26 = vld [vmem:[%s11578_s1 + $0x10f8] sm:$0xff]  ;;  %v8185_v29 = vld [vmem:[%s11580_s3 + $0x444] ss:$16 sps:$4 sm:$0xff]  }
 0x268   :  { %4389 = vmatprep.subr.bf16.mxu1 %v7538_v32  ;;  %v7554_v44 = vcombine.high %v575_v7, %v579_v26  ;;  %v7553_v46 = vcombine.low %v575_v7, %v579_v26  ;;  %v8183_v32 = vld [vmem:[%s11580_s3 + $0x440] ss:$16 sps:$4 sm:$0xff]   ;;  %v8203_v26 = vld [vmem:[%s11580_s3 + $0x4a4] ss:$16 sps:$4 sm:$0xff]  }
 0x269   :  { %6060 = vmatpush1.bf16.msra.mxu0 %v8126_v31  ;;  %v8161_v31 = vld [vmem:[%s11580_s3 + $0x6c] ss:$16 sps:$4 sm:$0xff]   ;;  %v8195_v7 = vld [vmem:[%s11580_s3 + $0x480] ss:$16 sps:$4 sm:$0xff]  }
 0x26a   :  { %6061 = vmatprep.subr.bf16.mxu0 %v8131_v33  ;;  %v8191_v33 = vld [vmem:[%s11580_s3 + $0x464] ss:$16 sps:$4 sm:$0xff]  }
 0x26b   :  { %4390 = vmatpush1.bf16.msra.mxu1 %v7537_v51  ;;  %v8189_v51 = vld [vmem:[%s11580_s3 + $0x460] ss:$16 sps:$4 sm:$0xff]  }
 0x26c   :  { %4391 = vmatprep.subr.bf16.mxu1 %v7546_v39  ;;  %v8162_v39 = vld [vmem:[%s11580_s3 + $0x88] ss:$16 sps:$4 sm:$0xff]  }
 0x26d   :  { %6062 = vmatpush1.bf16.msra.mxu0 %v8129_v37  ;;  %v8197_v37 = vld [vmem:[%s11580_s3 + $0x484] ss:$16 sps:$4 sm:$0xff]  }
 0x26e   :  { %6063 = vmatprep.subr.bf16.mxu0 %v8134_v40  ;;  %v8167_v40 = vld [vmem:[%s11580_s3 + $0xac] ss:$16 sps:$4 sm:$0xff]  }
 0x26f   :  { %4392 = vmatpush1.bf16.msra.mxu1 %v7545_v41  ;;  %v8165_v41 = vld [vmem:[%s11580_s3 + $0xa8] ss:$16 sps:$4 sm:$0xff]  }
 0x270   :  { %4393 = vmatprep.subr.bf16.mxu1 %v7554_v44  ;;  %v8201_v44 = vld [vmem:[%s11580_s3 + $0x4a0] ss:$16 sps:$4 sm:$0xff]  }
 0x271   :  { %6064 = vmatpush1.bf16.msra.mxu0 %v8132_v55  ;;  %v8170_v55 = vld [vmem:[%s11580_s3 + $0xcc] ss:$16 sps:$4 sm:$0xff]  }
 0x272   :  { %6065 = vmatprep.subr.bf16.mxu0 %v8137_v49  ;;  %v8209_v49 = vld [vmem:[%s11580_s3 + $0x4c4] ss:$16 sps:$4 sm:$0xff]  }
 0x273   :  { %4394 = vmatpush1.bf16.msra.mxu1 %v7553_v46  ;;  %v8207_v46 = vld [vmem:[%s11580_s3 + $0x4c0] ss:$16 sps:$4 sm:$0xff]  }
 0x274   :  { %4395 = vmatprep.subr.bf16.mxu1 %v7562_v9  ;;  %v8174_v9 = vld [vmem:[%s11580_s3 + $0xe8] ss:$16 sps:$4 sm:$0xff]  }
 0x275   :  { %6066 = vmatpush1.bf16.msra.mxu0 %v8135_v47  ;;  %v8215_v47 = vld [vmem:[%s11580_s3 + $0x4e4] ss:$16 sps:$4 sm:$0xff]  }
 0x276   :  { %6067 = vmatprep.subr.bf16.mxu0 %v8140_v48  ;;  %v8182_v48 = vld [vmem:[%s11580_s3 + $0x10c] ss:$16 sps:$4 sm:$0xff]  }
 0x277   :  { %4396 = vmatpush1.bf16.msra.mxu1 %v7561_v52  ;;  %v8180_v52 = vld [vmem:[%s11580_s3 + $0x108] ss:$16 sps:$4 sm:$0xff]  }
 0x278   :  { %4397 = vmatprep.subr.bf16.mxu1 %v7570_v38  ;;  %v8219_v38 = vld [vmem:[%s11580_s3 + $0x500] ss:$16 sps:$4 sm:$0xff]  }
 0x279   :  { %6068 = vmatpush1.bf16.msra.mxu0 %v8138_v54  ;;  %v8188_v54 = vld [vmem:[%s11580_s3 + $0x12c] ss:$16 sps:$4 sm:$0xff]  }
 0x27a   :  { %6069 = vmatprep.subr.bf16.mxu0 %v8143_v17  ;;  %v8227_v17 = vld [vmem:[%s11580_s3 + $0x524] ss:$16 sps:$4 sm:$0xff]  }
 0x27b   :  { %4398 = vmatpush1.bf16.msra.mxu1 %v7569_v60  ;;  %v8225_v60 = vld [vmem:[%s11580_s3 + $0x520] ss:$16 sps:$4 sm:$0xff]  }
 0x27c   :  { %4399 = vmatprep.subr.bf16.mxu1 %v7578_v62  ;;  %v8192_v62 = vld [vmem:[%s11580_s3 + $0x148] ss:$16 sps:$4 sm:$0xff]  }
 0x27d   :  { %6070 = vmatpush1.bf16.msra.mxu0 %v8141_v61  ;;  %v8233_v61 = vld [vmem:[%s11580_s3 + $0x544] ss:$16 sps:$4 sm:$0xff]  }
 0x27e   :  { %6071 = vmatprep.subr.bf16.mxu0 %v8146_v2  ;;  %v8231_v2 = vld [vmem:[%s11580_s3 + $0x540] ss:$16 sps:$4 sm:$0xff]  }
 0x27f   :  { %4400 = vmatpush1.bf16.msra.mxu1 %v7577_v6  ;;  %v8206_v6 = vld [vmem:[%s11580_s3 + $0x18c] ss:$16 sps:$4 sm:$0xff]  }
 0x280   :  { %4401 = vmatprep.subr.bf16.mxu1 %v7586_v10  ;;  %v8245_v10 = vld [vmem:[%s11580_s3 + $0x584] ss:$16 sps:$4 sm:$0xff]  }
 0x281   :  { %6072 = vmatpush1.bf16.msra.mxu0 %v8144_v8  ;;  %v8237_v8 = vld [vmem:[%s11580_s3 + $0x560] ss:$16 sps:$4 sm:$0xff]  }
 0x282   :  { %6073 = vmatprep.subr.bf16.mxu0 %v8149_v13  ;;  %v8212_v13 = vld [vmem:[%s11580_s3 + $0x1ac] ss:$16 sps:$4 sm:$0xff]  }
 0x283   :  { %4402 = vmatpush1.bf16.msra.mxu1 %v7585_v12  ;;  %v8243_v12 = vld [vmem:[%s11580_s3 + $0x580] ss:$16 sps:$4 sm:$0xff]  }
 0x284   :  { %6166 = vmatprep.subr.bf16.mxu1 %v8152_v15  ;;  %v8210_v15 = vld [vmem:[%s11580_s3 + $0x1a8] ss:$16 sps:$4 sm:$0xff]  }
 0x285   :  { %6074 = vmatpush1.bf16.msra.mxu0 %v8147_v14  ;;  %v8251_v14 = vld [vmem:[%s11580_s3 + $0x5a4] ss:$16 sps:$4 sm:$0xff]  }
 0x286   :  { %6084 = vmatprep.subr.bf16.mxu0 %v8173_v4  ;;  %4420 = vmatmul.mubr.bf16.vlgmr.msra.gmra.mrb[8].mxu1 %v9395_v22  ;;  %v8177_v22 = vld [vmem:[%s11580_s3 + $0x420] ss:$16 sps:$4 sm:$0xff]  }
 0x287   :  { %6167 = vmatpush1.bf16.msra.mxu1 %v8150_v18  ;;  %6198 = vmatprep.mubr.bf16.mxu1 %v10310_v45  ;;  %v8156_v45 = vld [vmem:[%s11580_s3 + $0x48] ss:$16 sps:$4 sm:$0xff]   ;;  %v8249_v4 = vld [vmem:[%s11580_s3 + $0x5a0] ss:$16 sps:$4 sm:$0xff]   ;;  %v8257_v18 = vld [vmem:[%s11580_s3 + $0x5c4] ss:$16 sps:$4 sm:$0xff]  }
 0x288   :  { %6076 = vmatmul.mubr.bf16.vlgmr.msra.gmra.mrb[8].mxu0 %v10710_v19  ;;  %6168 = vmatprep.subr.bf16.mxu1 %v8155_v23  ;;  %v8216_v23 = vld [vmem:[%s11580_s3 + $0x1c8] ss:$16 sps:$4 sm:$0xff]  }
 0x289   :  { %6085 = vmatpush1.bf16.msra.mxu0 %v8171_v20  ;;  %v8224_v20 = vld [vmem:[%s11580_s3 + $0x1ec] ss:$16 sps:$4 sm:$0xff]  }
 0x28a   :  { %6086 = vmatprep.subr.bf16.mxu0 %v8179_v27  ;;  %v8255_v27 = vld [vmem:[%s11580_s3 + $0x5c0] ss:$16 sps:$4 sm:$0xff]  }
 0x28b   :  { %6169 = vmatpush1.bf16.msra.mxu1 %v8153_v63  ;;  %v8263_v63 = vld [vmem:[%s11580_s3 + $0x5e4] ss:$16 sps:$4 sm:$0xff]  }
 0x28c   :  { %6170 = vmatprep.subr.bf16.mxu1 %v8158_v53  ;;  %v8222_v53 = vld [vmem:[%s11580_s3 + $0x1e8] ss:$16 sps:$4 sm:$0xff]  }
 0x28d   :  { %6087 = vmatpush1.bf16.msra.mxu0 %v8177_v22  ;;  %v8230_v22 = vld [vmem:[%s11580_s3 + $0x20c] ss:$16 sps:$4 sm:$0xff]  }
 0x28e   :  { %6088 = vmatprep.subr.bf16.mxu0 %v8185_v29  ;;  %v8261_v29 = vld [vmem:[%s11580_s3 + $0x5e0] ss:$16 sps:$4 sm:$0xff]  }
 0x28f   :  { %6171 = vmatpush1.bf16.msra.mxu1 %v8156_v45  ;;  %v8317_v45 = vld [vmem:[%s11580_s3 + $0x604] ss:$16 sps:$4 sm:$0xff]  }
 0x290   :  { %6172 = vmatprep.subr.bf16.mxu1 %v8161_v31  ;;  %v8228_v31 = vld [vmem:[%s11580_s3 + $0x208] ss:$16 sps:$4 sm:$0xff]  }
 0x291   :  { %6089 = vmatpush1.bf16.msra.mxu0 %v8183_v32  ;;  %v8236_v32 = vld [vmem:[%s11580_s3 + $0x22c] ss:$16 sps:$4 sm:$0xff]  }
 0x292   :  { %6090 = vmatprep.subr.bf16.mxu0 %v8191_v33  ;;  %v8234_v33 = vld [vmem:[%s11580_s3 + $0x228] ss:$16 sps:$4 sm:$0xff]  }
 0x293   :  { %6173 = vmatpush1.bf16.msra.mxu1 %v8159_v34  ;;  %v8242_v34 = vld [vmem:[%s11580_s3 + $0x24c] ss:$16 sps:$4 sm:$0xff]  }
 0x294   :  { %6174 = vmatprep.subr.bf16.mxu1 %v8164_v35  ;;  %v8240_v35 = vld [vmem:[%s11580_s3 + $0x248] ss:$16 sps:$4 sm:$0xff]  }
 0x295   :  { %6091 = vmatpush1.bf16.msra.mxu0 %v8189_v51  ;;  %v8254_v51 = vld [vmem:[%s11580_s3 + $0x28c] ss:$16 sps:$4 sm:$0xff]  }
 0x296   :  { %6092 = vmatprep.subr.bf16.mxu0 %v8197_v37  ;;  %v8252_v37 = vld [vmem:[%s11580_s3 + $0x288] ss:$16 sps:$4 sm:$0xff]  }
 0x297   :  { %6175 = vmatpush1.bf16.msra.mxu1 %v8162_v39  ;;  %v632_v39 = vsub.s32 4, %v8694_v43 }
 0x298   :  { %6176 = vmatprep.subr.bf16.mxu1 %v8167_v40  ;;  %v636_v40 = vsub.s32 5, %v8694_v43 }
 0x299   :  { %6093 = vmatpush1.bf16.msra.mxu0 %v8195_v7  ;;  %v8260_v7 = vld [vmem:[%s11580_s3 + $0x2ac] ss:$16 sps:$4 sm:$0xff]  }
 0x29a   :  { %6094 = vmatprep.subr.bf16.mxu0 %v8203_v26  ;;  %v633_v26 = vrot.slane %v10674_v0, %v632_v39  ;;  %v8369_v39 = vld [vmem:[%s11580_s3 + $0x720] ss:$16 sps:$4 sm:$0xff]  }
 0x29b   :  { %6177 = vmatpush1.bf16.msra.mxu1 %v8165_v41  ;;  %v8258_v41 = vld [vmem:[%s11580_s3 + $0x2a8] ss:$16 sps:$4 sm:$0xff]  }
 0x29c   :  { %6178 = vmatprep.subr.bf16.mxu1 %v8170_v55  ;;  %v637_v55 = vrot.slane %v10674_v0, %v636_v40  ;;  %v8377_v40 = vld [vmem:[%s11580_s3 + $0x744] ss:$16 sps:$4 sm:$0xff]  }
 0x29d   :  { %6095 = vmatpush1.bf16.msra.mxu0 %v8201_v44  ;;  %v8266_v44 = vld [vmem:[%s11580_s3 + $0x2cc] ss:$16 sps:$4 sm:$0xff]  }
 0x29e   :  { %6096 = vmatprep.subr.bf16.mxu0 %v8209_v49 }
 0x29f   :  { %6179 = vmatpush1.bf16.msra.mxu1 %v8168_v57 }
 0x2a0   :  { %6180 = vmatprep.subr.bf16.mxu1 %v8176_v30 }
 0x2a1   :  { %6097 = vmatpush1.bf16.msra.mxu0 %v8207_v46  ;;  %v8264_v46 = vld [vmem:[%s11580_s3 + $0x2c8] ss:$16 sps:$4 sm:$0xff]  }
 0x2a2   :  { %6098 = vmatprep.subr.bf16.mxu0 %v8215_v47 }
 0x2a3   :  { %6181 = vmatpush1.bf16.msra.mxu1 %v8174_v9 }
 0x2a4   :  { %6182 = vmatprep.subr.bf16.mxu1 %v8182_v48  ;;  %v8269_v48 = vld [vmem:[%s11580_s3 + $0x2ec] ss:$16 sps:$4 sm:$0xff]  }
 0x2a5   :  { %6099 = vmatpush1.bf16.msra.mxu0 %v8213_v50 }
 0x2a6   :  { %6100 = vmatprep.subr.bf16.mxu0 %v8221_v24 }
 0x2a7   :  { %6183 = vmatpush1.bf16.msra.mxu1 %v8180_v52 }
 0x2a8   :  { %6184 = vmatprep.subr.bf16.mxu1 %v8188_v54  ;;  %v8267_v54 = vld [vmem:[%s11580_s3 + $0x2e8] ss:$16 sps:$4 sm:$0xff]  }
 0x2a9   :  { %6101 = vmatpush1.bf16.msra.mxu0 %v8219_v38 }
 0x2aa   :  { %6102 = vmatprep.subr.bf16.mxu0 %v8227_v17  ;;  %v8272_v17 = vld [vmem:[%s11580_s3 + $0x30c] ss:$16 sps:$4 sm:$0xff]  }
 0x2ab   :  { %6185 = vmatpush1.bf16.msra.mxu1 %v8186_v28  ;;  %v8315_v28 = vld [vmem:[%s11580_s3 + $0x600] ss:$16 sps:$4 sm:$0xff]  }
 0x2ac   :  { %6186 = vmatprep.subr.bf16.mxu1 %v8194_v58 }
 0x2ad   :  { %6103 = vmatpush1.bf16.msra.mxu0 %v8225_v60  ;;  %v8323_v60 = vld [vmem:[%s11580_s3 + $0x624] ss:$16 sps:$4 sm:$0xff]  }
 0x2ae   :  { %6104 = vmatprep.subr.bf16.mxu0 %v8233_v61  ;;  %v8270_v61 = vld [vmem:[%s11580_s3 + $0x308] ss:$16 sps:$4 sm:$0xff]  }
 0x2af   :  { %6187 = vmatpush1.bf16.msra.mxu1 %v8192_v62  ;;  %v8275_v62 = vld [vmem:[%s11580_s3 + $0x32c] ss:$16 sps:$4 sm:$0xff]  }
 0x2b0   :  { %6188 = vmatprep.subr.bf16.mxu1 %v8200_v1  ;;  %v8321_v1 = vld [vmem:[%s11580_s3 + $0x620] ss:$16 sps:$4 sm:$0xff]  }
 0x2b1   :  { %6105 = vmatpush1.bf16.msra.mxu0 %v8231_v2  ;;  %v8329_v2 = vld [vmem:[%s11580_s3 + $0x644] ss:$16 sps:$4 sm:$0xff]  }
 0x2b2   :  { %6106 = vmatprep.subr.bf16.mxu0 %v8239_v3  ;;  %v8273_v3 = vld [vmem:[%s11580_s3 + $0x328] ss:$16 sps:$4 sm:$0xff]  }
 0x2b3   :  { %6189 = vmatpush1.bf16.msra.mxu1 %v8198_v5  ;;  %v8278_v5 = vld [vmem:[%s11580_s3 + $0x34c] ss:$16 sps:$4 sm:$0xff]  }
 0x2b4   :  { %6190 = vmatprep.subr.bf16.mxu1 %v8206_v6  ;;  %v8327_v6 = vld [vmem:[%s11580_s3 + $0x640] ss:$16 sps:$4 sm:$0xff]  }
 0x2b5   :  { %6107 = vmatpush1.bf16.msra.mxu0 %v8237_v8  ;;  %v8335_v8 = vld [vmem:[%s11580_s3 + $0x664] ss:$16 sps:$4 sm:$0xff]  }
 0x2b6   :  { %6108 = vmatprep.subr.bf16.mxu0 %v8245_v10  ;;  %v8276_v10 = vld [vmem:[%s11580_s3 + $0x348] ss:$16 sps:$4 sm:$0xff]  }
 0x2b7   :  { %6191 = vmatpush1.bf16.msra.mxu1 %v8204_v11  ;;  %v8281_v11 = vld [vmem:[%s11580_s3 + $0x36c] ss:$16 sps:$4 sm:$0xff]  }
 0x2b8   :  { %6192 = vmatprep.subr.bf16.mxu1 %v8212_v13  ;;  %v8333_v13 = vld [vmem:[%s11580_s3 + $0x660] ss:$16 sps:$4 sm:$0xff]  }
 0x2b9   :  { %6109 = vmatpush1.bf16.msra.mxu0 %v8243_v12  ;;  %v8341_v12 = vld [vmem:[%s11580_s3 + $0x684] ss:$16 sps:$4 sm:$0xff]  }
 0x2ba   :  { %6110 = vmatprep.subr.bf16.mxu0 %v8251_v14  ;;  %v8279_v14 = vld [vmem:[%s11580_s3 + $0x368] ss:$16 sps:$4 sm:$0xff]  }
 0x2bb   :  { %6193 = vmatpush1.bf16.msra.mxu1 %v8210_v15  ;;  %v8284_v15 = vld [vmem:[%s11580_s3 + $0x38c] ss:$16 sps:$4 sm:$0xff]  }
 0x2bc   :  { %6194 = vmatprep.subr.bf16.mxu1 %v8218_v59  ;;  %v8339_v59 = vld [vmem:[%s11580_s3 + $0x680] ss:$16 sps:$4 sm:$0xff]  }
 0x2bd   :  { %6111 = vmatpush1.bf16.msra.mxu0 %v8249_v4  ;;  %v8347_v4 = vld [vmem:[%s11580_s3 + $0x6a4] ss:$16 sps:$4 sm:$0xff]  }
 0x2be   :  { %6112 = vmatprep.subr.bf16.mxu0 %v8257_v18  ;;  %v8282_v18 = vld [vmem:[%s11580_s3 + $0x388] ss:$16 sps:$4 sm:$0xff]  }
 0x2bf   :  { %6195 = vmatpush1.bf16.msra.mxu1 %v8216_v23  ;;  %v8287_v23 = vld [vmem:[%s11580_s3 + $0x3ac] ss:$16 sps:$4 sm:$0xff]  }
 0x2c0   :  { %6196 = vmatprep.subr.bf16.mxu1 %v8224_v20  ;;  %v8345_v20 = vld [vmem:[%s11580_s3 + $0x6a0] ss:$16 sps:$4 sm:$0xff]  }
 0x2c1   :  { %6113 = vmatpush1.bf16.msra.mxu0 %v8255_v27  ;;  %v8353_v27 = vld [vmem:[%s11580_s3 + $0x6c4] ss:$16 sps:$4 sm:$0xff]  }
 0x2c2   :  { %6114 = vmatprep.subr.bf16.mxu0 %v8263_v63  ;;  %v8285_v63 = vld [vmem:[%s11580_s3 + $0x3a8] ss:$16 sps:$4 sm:$0xff]  }
 0x2c3   :  { %6197 = vmatpush1.bf16.msra.mxu1 %v8222_v53  ;;  %v8290_v53 = vld [vmem:[%s11580_s3 + $0x3cc] ss:$16 sps:$4 sm:$0xff]  }
 0x2c4   :  { %6207 = vmatprep.subr.bf16.mxu1 %v8230_v22  ;;  %v8351_v22 = vld [vmem:[%s11580_s3 + $0x6c0] ss:$16 sps:$4 sm:$0xff]  }
 0x2c5   :  { %6115 = vmatpush1.bf16.msra.mxu0 %v8261_v29  ;;  %v8359_v29 = vld [vmem:[%s11580_s3 + $0x6e4] ss:$16 sps:$4 sm:$0xff]  }
 0x2c6   :  { %6199 = vmatmul.mubr.bf16.vlgmr.msra.gmra.mrb[12].mxu1 %v10506_v36  ;;  %6125 = vmatprep.subr.bf16.mxu0 %v8317_v45  ;;  %v8248_v36 = vld [vmem:[%s11580_s3 + $0x26c] ss:$16 sps:$4 sm:$0xff]   ;;  %v8288_v45 = vld [vmem:[%s11580_s3 + $0x3c8] ss:$16 sps:$4 sm:$0xff]  }
 0x2c7   :  { %6208 = vmatpush1.bf16.msra.mxu1 %v8228_v31  ;;  %6239 = vmatprep.mubr.bf16.mxu1 %v10517_v42  ;;  %v8246_v42 = vld [vmem:[%s11580_s3 + $0x268] ss:$16 sps:$4 sm:$0xff]   ;;  %v8293_v31 = vld [vmem:[%s11580_s3 + $0x3ec] ss:$16 sps:$4 sm:$0xff]  }
 0x2c8   :  { %6209 = vmatprep.subr.bf16.mxu1 %v8236_v32  ;;  %v8357_v32 = vld [vmem:[%s11580_s3 + $0x6e0] ss:$16 sps:$4 sm:$0xff]  }
 0x2cb   :  { %6210 = vmatpush1.bf16.msra.mxu1 %v8234_v33  ;;  %v8365_v33 = vld [vmem:[%s11580_s3 + $0x704] ss:$16 sps:$4 sm:$0xff]  }
 0x2cc   :  { %6211 = vmatprep.subr.bf16.mxu1 %v8242_v34  ;;  %v8291_v34 = vld [vmem:[%s11580_s3 + $0x3e8] ss:$16 sps:$4 sm:$0xff]  }
 0x2cf   :  { %6212 = vmatpush1.bf16.msra.mxu1 %v8240_v35  ;;  %v8296_v35 = vld [vmem:[%s11580_s3 + $0x40c] ss:$16 sps:$4 sm:$0xff]  }
 0x2d0   :  { %6213 = vmatprep.subr.bf16.mxu1 %v8248_v36  ;;  %v8363_v36 = vld [vmem:[%s11580_s3 + $0x700] ss:$16 sps:$4 sm:$0xff]  }
 0x2d3   :  { %6214 = vmatpush1.bf16.msra.mxu1 %v8246_v42  ;;  %v8371_v42 = vld [vmem:[%s11580_s3 + $0x724] ss:$16 sps:$4 sm:$0xff]  }
 0x2d4   :  { %6215 = vmatprep.subr.bf16.mxu1 %v8254_v51  ;;  %v8294_v51 = vld [vmem:[%s11580_s3 + $0x408] ss:$16 sps:$4 sm:$0xff]  }
 0x2d7   :  { %6216 = vmatpush1.bf16.msra.mxu1 %v8252_v37  ;;  %v8299_v37 = vld [vmem:[%s11580_s3 + $0x42c] ss:$16 sps:$4 sm:$0xff]  }
 0x2d8   :  { %6217 = vmatprep.subr.bf16.mxu1 %v8260_v7  ;;  %v8297_v7 = vld [vmem:[%s11580_s3 + $0x428] ss:$16 sps:$4 sm:$0xff]  }
 0x2db   :  { %v4216_v49 = vpop.f32.mrb[4].mxu0  ;;  %6218 = vmatpush1.bf16.msra.mxu1 %v8258_v41  ;;  %v8375_v41 = vld [vmem:[%s11580_s3 + $0x740] ss:$16 sps:$4 sm:$0xff]  }
 0x2dc   :  { %v7952_v57 = vadd.f32 %v4216_v49, %v633_v26  ;;  %v4218_v30 = vpop.f32.mrb[5].mxu0  ;;  %6219 = vmatprep.subr.bf16.mxu1 %v8266_v44  ;;  %v8302_v26 = vld [vmem:[%s11580_s3 + $0x44c] ss:$16 sps:$4 sm:$0xff]   ;;  %v8381_v49 = vld [vmem:[%s11580_s3 + $0x760] ss:$16 sps:$4 sm:$0xff]  }
 0x2dd   :  { %v7953_v47 = vadd.f32 %v4218_v30, %v637_v55  ;;  %v4220_v9 = vpop.f32.mrb[6].mxu0  ;;  %v8300_v55 = vld [vmem:[%s11580_s3 + $0x448] ss:$16 sps:$4 sm:$0xff]   ;;  %v8305_v44 = vld [vmem:[%s11580_s3 + $0x46c] ss:$16 sps:$4 sm:$0xff]  }
 0x2de   :  { %v4432_v50 = vmax.f32 %v7952_v57, 0.0  ;;  %v4221_v24 = vpop.f32.mrb[7].mxu0  ;;  %v8389_v57 = vld [vmem:[%s11580_s3 + $0x784] ss:$16 sps:$4 sm:$0xff]   ;;  %v8303_v30 = vld [vmem:[%s11580_s3 + $0x468] ss:$16 sps:$4 sm:$0xff]  }
 0x2df   :  { %v4433_v52 = vmax.f32 %v7953_v47, 0.0  ;;  %6220 = vmatpush1.bf16.msra.mxu1 %v8264_v46  ;;  %v8308_v46 = vld [vmem:[%s11580_s3 + $0x48c] ss:$16 sps:$4 sm:$0xff]   ;;  %v8387_v47 = vld [vmem:[%s11580_s3 + $0x780] ss:$16 sps:$4 sm:$0xff]  }
 0x2e0   :  { %6221 = vmatprep.subr.bf16.mxu1 %v8269_v48  ;;  %v10960_v58 = vpack.c.bf16 %v4432_v50, %v4432_v50  ;;  %v8395_v9 = vld [vmem:[%s11580_s3 + $0x7a4] ss:$16 sps:$4 sm:$0xff]   ;;  %v8306_v48 = vld [vmem:[%s11580_s3 + $0x488] ss:$16 sps:$4 sm:$0xff]   ;;  %v8311_v50 = vld [vmem:[%s11580_s3 + $0x4ac] ss:$16 sps:$4 sm:$0xff]  }
 0x2e1   :  { %v10952_v38 = vpack.c.bf16 %v4433_v52, %v4433_v52  ;;  %v8393_v24 = vld [vmem:[%s11580_s3 + $0x7a0] ss:$16 sps:$4 sm:$0xff]   ;;  %v8401_v52 = vld [vmem:[%s11580_s3 + $0x7c4] ss:$16 sps:$4 sm:$0xff]  }
 0x2e3   :  { %6116 = vmatprep.mubr.bf16.mxu0 %v10952_v38  ;;  %6222 = vmatpush1.bf16.msra.mxu1 %v8267_v54  ;;  %v8309_v54 = vld [vmem:[%s11580_s3 + $0x4a8] ss:$16 sps:$4 sm:$0xff]  }
 0x2e4   :  { %6117 = vmatmul.mubr.bf16.vlgmr.msra.gmra.mrb[8].mxu0 %v10960_v58  ;;  %6223 = vmatprep.subr.bf16.mxu1 %v8272_v17  ;;  %v8399_v17 = vld [vmem:[%s11580_s3 + $0x7c0] ss:$16 sps:$4 sm:$0xff]  }
 0x2e5   :  { %6126 = vmatpush1.bf16.msra.mxu0 %v8315_v28  ;;  %v8407_v28 = vld [vmem:[%s11580_s3 + $0x7e4] ss:$16 sps:$4 sm:$0xff]  }
 0x2e6   :  { %6127 = vmatprep.subr.bf16.mxu0 %v8323_v60  ;;  %v8312_v60 = vld [vmem:[%s11580_s3 + $0x4c8] ss:$16 sps:$4 sm:$0xff]  }
 0x2e7   :  { %6224 = vmatpush1.bf16.msra.mxu1 %v8270_v61  ;;  %v8320_v61 = vld [vmem:[%s11580_s3 + $0x4ec] ss:$16 sps:$4 sm:$0xff]  }
 0x2e8   :  { %6225 = vmatprep.subr.bf16.mxu1 %v8275_v62  ;;  %v8405_v62 = vld [vmem:[%s11580_s3 + $0x7e0] ss:$16 sps:$4 sm:$0xff]  }
 0x2e9   :  { %6128 = vmatpush1.bf16.msra.mxu0 %v8321_v1  ;;  %v8440_v1 = vld [vmem:[%s11582_s5 + $0x4] ss:$8 sps:$4 sm:$0xff]  }
 0x2ea   :  { %6129 = vmatprep.subr.bf16.mxu0 %v8329_v2  ;;  %v8318_v2 = vld [vmem:[%s11580_s3 + $0x4e8] ss:$16 sps:$4 sm:$0xff]  }
 0x2eb   :  { %6226 = vmatpush1.bf16.msra.mxu1 %v8273_v3  ;;  %v8326_v3 = vld [vmem:[%s11580_s3 + $0x50c] ss:$16 sps:$4 sm:$0xff]  }
 0x2ec   :  { %6227 = vmatprep.subr.bf16.mxu1 %v8278_v5  ;;  %v8324_v5 = vld [vmem:[%s11580_s3 + $0x508] ss:$16 sps:$4 sm:$0xff]  }
 0x2ed   :  { %6130 = vmatpush1.bf16.msra.mxu0 %v8327_v6  ;;  %v8332_v6 = vld [vmem:[%s11580_s3 + $0x52c] ss:$16 sps:$4 sm:$0xff]  }
 0x2ee   :  { %6131 = vmatprep.subr.bf16.mxu0 %v8335_v8  ;;  %v8330_v8 = vld [vmem:[%s11580_s3 + $0x528] ss:$16 sps:$4 sm:$0xff]  }
 0x2ef   :  { %6228 = vmatpush1.bf16.msra.mxu1 %v8276_v10  ;;  %v8338_v10 = vld [vmem:[%s11580_s3 + $0x54c] ss:$16 sps:$4 sm:$0xff]  }
 0x2f0   :  { %6229 = vmatprep.subr.bf16.mxu1 %v8281_v11  ;;  %v8336_v11 = vld [vmem:[%s11580_s3 + $0x548] ss:$16 sps:$4 sm:$0xff]  }
 0x2f1   :  { %6132 = vmatpush1.bf16.msra.mxu0 %v8333_v13  ;;  %v8344_v13 = vld [vmem:[%s11580_s3 + $0x56c] ss:$16 sps:$4 sm:$0xff]  }
 0x2f2   :  { %6133 = vmatprep.subr.bf16.mxu0 %v8341_v12  ;;  %v8342_v12 = vld [vmem:[%s11580_s3 + $0x568] ss:$16 sps:$4 sm:$0xff]  }
 0x2f3   :  { %6230 = vmatpush1.bf16.msra.mxu1 %v8279_v14  ;;  %v8350_v14 = vld [vmem:[%s11580_s3 + $0x58c] ss:$16 sps:$4 sm:$0xff]  }
 0x2f4   :  { %6231 = vmatprep.subr.bf16.mxu1 %v8284_v15  ;;  %v8348_v15 = vld [vmem:[%s11580_s3 + $0x588] ss:$16 sps:$4 sm:$0xff]  }
 0x2f5   :  { %6134 = vmatpush1.bf16.msra.mxu0 %v8339_v59  ;;  %v8356_v59 = vld [vmem:[%s11580_s3 + $0x5ac] ss:$16 sps:$4 sm:$0xff]  }
 0x2f6   :  { %6135 = vmatprep.subr.bf16.mxu0 %v8347_v4  ;;  %v8354_v4 = vld [vmem:[%s11580_s3 + $0x5a8] ss:$16 sps:$4 sm:$0xff]  }
 0x2f7   :  { %6232 = vmatpush1.bf16.msra.mxu1 %v8282_v18  ;;  %v8362_v18 = vld [vmem:[%s11580_s3 + $0x5cc] ss:$16 sps:$4 sm:$0xff]  }
 0x2f8   :  { %6233 = vmatprep.subr.bf16.mxu1 %v8287_v23  ;;  %v8360_v23 = vld [vmem:[%s11580_s3 + $0x5c8] ss:$16 sps:$4 sm:$0xff]  }
 0x2f9   :  { %6136 = vmatpush1.bf16.msra.mxu0 %v8345_v20  ;;  %v8368_v20 = vld [vmem:[%s11580_s3 + $0x5ec] ss:$16 sps:$4 sm:$0xff]  }
 0x2fa   :  { %6137 = vmatprep.subr.bf16.mxu0 %v8353_v27  ;;  %v8366_v27 = vld [vmem:[%s11580_s3 + $0x5e8] ss:$16 sps:$4 sm:$0xff]  }
 0x2fb   :  { %6234 = vmatpush1.bf16.msra.mxu1 %v8285_v63  ;;  %v8374_v63 = vld [vmem:[%s11580_s3 + $0x60c] ss:$16 sps:$4 sm:$0xff]  }
 0x2fc   :  { %6235 = vmatprep.subr.bf16.mxu1 %v8290_v53  ;;  %v8372_v53 = vld [vmem:[%s11580_s3 + $0x608] ss:$16 sps:$4 sm:$0xff]  }
 0x2fd   :  { %6138 = vmatpush1.bf16.msra.mxu0 %v8351_v22  ;;  %v8380_v22 = vld [vmem:[%s11580_s3 + $0x62c] ss:$16 sps:$4 sm:$0xff]  }
 0x2fe   :  { %6139 = vmatprep.subr.bf16.mxu0 %v8359_v29  ;;  %v8378_v29 = vld [vmem:[%s11580_s3 + $0x628] ss:$16 sps:$4 sm:$0xff]  }
 0x2ff   :  { %6236 = vmatpush1.bf16.msra.mxu1 %v8288_v45  ;;  %v8386_v45 = vld [vmem:[%s11580_s3 + $0x64c] ss:$16 sps:$4 sm:$0xff]  }
 0x300   :  { %6237 = vmatprep.subr.bf16.mxu1 %v8293_v31  ;;  %v8384_v31 = vld [vmem:[%s11580_s3 + $0x648] ss:$16 sps:$4 sm:$0xff]  }
 0x301   :  { %6140 = vmatpush1.bf16.msra.mxu0 %v8357_v32  ;;  %v8390_v32 = vld [vmem:[%s11580_s3 + $0x668] ss:$16 sps:$4 sm:$0xff]  }
 0x302   :  { %6141 = vmatprep.subr.bf16.mxu0 %v8365_v33  ;;  %v8398_v33 = vld [vmem:[%s11580_s3 + $0x68c] ss:$16 sps:$4 sm:$0xff]  }
 0x303   :  { %6238 = vmatpush1.bf16.msra.mxu1 %v8291_v34  ;;  %v640_v34 = vsub.s32 6, %v8694_v43 }
 0x304   :  { %6248 = vmatprep.subr.bf16.mxu1 %v8296_v35  ;;  %v8396_v35 = vld [vmem:[%s11580_s3 + $0x688] ss:$16 sps:$4 sm:$0xff]  }
 0x305   :  { %6142 = vmatpush1.bf16.msra.mxu0 %v8363_v36  ;;  %v644_v36 = vsub.s32 7, %v8694_v43  ;;  %v8531_v43 = vld [vmem:[%s11582_s5 + $0x1f0] ss:$8 sps:$4 sm:$0xff]  }
 0x306   :  { %6143 = vmatprep.subr.bf16.mxu0 %v8371_v42  ;;  %6240 = vmatmul.mubr.bf16.vlgmr.msra.gmra.mrb[12].mxu1 %v10710_v19  ;;  %v8383_v19 = vld [vmem:[%s11580_s3 + $0x764] ss:$16 sps:$4 sm:$0xff]   ;;  %v8404_v42 = vld [vmem:[%s11580_s3 + $0x6ac] ss:$16 sps:$4 sm:$0xff]  }
 0x307   :  { %6249 = vmatpush1.bf16.msra.mxu1 %v8294_v51  ;;  %6280 = vmatprep.mubr.bf16.mxu1 %v10952_v38  ;;  %v8314_v38 = vld [vmem:[%s11580_s3 + $0x4cc] ss:$16 sps:$4 sm:$0xff]   ;;  %v641_v51 = vrot.slane %v10674_v0, %v640_v34  ;;  %v8471_v34 = vld [vmem:[%s11582_s5 + $0xb0] ss:$8 sps:$4 sm:$0xff]  }
 0x308   :  { %6250 = vmatprep.subr.bf16.mxu1 %v8299_v37  ;;  %v645_v37 = vrot.slane %v10674_v0, %v644_v36  ;;  %v8474_v36 = vld [vmem:[%s11582_s5 + $0xc0] ss:$8 sps:$4 sm:$0xff]  }
 0x309   :  { %6144 = vmatpush1.bf16.msra.mxu0 %v8369_v39  ;;  %v8402_v39 = vld [vmem:[%s11580_s3 + $0x6a8] ss:$16 sps:$4 sm:$0xff]  }
 0x30a   :  { %6145 = vmatprep.subr.bf16.mxu0 %v8377_v40  ;;  %v8410_v40 = vld [vmem:[%s11580_s3 + $0x6cc] ss:$16 sps:$4 sm:$0xff]  }
 0x30b   :  { %6251 = vmatpush1.bf16.msra.mxu1 %v8297_v7 }
 0x30c   :  { %6252 = vmatprep.subr.bf16.mxu1 %v8302_v26 }
 0x30d   :  { %6146 = vmatpush1.bf16.msra.mxu0 %v8375_v41 }
 0x30e   :  { %6147 = vmatprep.subr.bf16.mxu0 %v8383_v19 }
 0x30f   :  { %6253 = vmatpush1.bf16.msra.mxu1 %v8300_v55 }
 0x310   :  { %6254 = vmatprep.subr.bf16.mxu1 %v8305_v44  ;;  %v8408_v44 = vld [vmem:[%s11580_s3 + $0x6c8] ss:$16 sps:$4 sm:$0xff]  }
 0x311   :  { %6148 = vmatpush1.bf16.msra.mxu0 %v8381_v49 }
 0x312   :  { %6149 = vmatprep.subr.bf16.mxu0 %v8389_v57  ;;  %v8413_v57 = vld [vmem:[%s11580_s3 + $0x6ec] ss:$16 sps:$4 sm:$0xff]  }
 0x313   :  { %6255 = vmatpush1.bf16.msra.mxu1 %v8303_v30 }
 0x314   :  { %6256 = vmatprep.subr.bf16.mxu1 %v8308_v46 }
 0x315   :  { %6150 = vmatpush1.bf16.msra.mxu0 %v8387_v47  ;;  %v8411_v47 = vld [vmem:[%s11580_s3 + $0x6e8] ss:$16 sps:$4 sm:$0xff]  }
 0x316   :  { %6151 = vmatprep.subr.bf16.mxu0 %v8395_v9  ;;  %v8438_v9 = vld [vmem:[%s11582_s5] ss:$8 sps:$4 sm:$0xff]  }
 0x317   :  { %6257 = vmatpush1.bf16.msra.mxu1 %v8306_v48 }
 0x318   :  { %6258 = vmatprep.subr.bf16.mxu1 %v8311_v50  ;;  %v8416_v50 = vld [vmem:[%s11580_s3 + $0x70c] ss:$16 sps:$4 sm:$0xff]  }
 0x319   :  { %6152 = vmatpush1.bf16.msra.mxu0 %v8393_v24  ;;  %v8443_v24 = vld [vmem:[%s11582_s5 + $0x14] ss:$8 sps:$4 sm:$0xff]  }
 0x31a   :  { %6153 = vmatprep.subr.bf16.mxu0 %v8401_v52  ;;  %v8414_v52 = vld [vmem:[%s11580_s3 + $0x708] ss:$16 sps:$4 sm:$0xff]  }
 0x31b   :  { %6259 = vmatpush1.bf16.msra.mxu1 %v8309_v54  ;;  %v8441_v54 = vld [vmem:[%s11582_s5 + $0x10] ss:$8 sps:$4 sm:$0xff]  }
 0x31c   :  { %6260 = vmatprep.subr.bf16.mxu1 %v8314_v38  ;;  %v8419_v38 = vld [vmem:[%s11580_s3 + $0x72c] ss:$16 sps:$4 sm:$0xff]  }
 0x31d   :  { %6154 = vmatpush1.bf16.msra.mxu0 %v8399_v17  ;;  %v8446_v17 = vld [vmem:[%s11582_s5 + $0x24] ss:$8 sps:$4 sm:$0xff]  }
 0x31e   :  { %6155 = vmatprep.subr.bf16.mxu0 %v8407_v28  ;;  %v8417_v28 = vld [vmem:[%s11580_s3 + $0x728] ss:$16 sps:$4 sm:$0xff]  }
 0x31f   :  { %6261 = vmatpush1.bf16.msra.mxu1 %v8312_v60  ;;  %v8444_v60 = vld [vmem:[%s11582_s5 + $0x20] ss:$8 sps:$4 sm:$0xff]  }
 0x320   :  { %6262 = vmatprep.subr.bf16.mxu1 %v8320_v61  ;;  %v8422_v61 = vld [vmem:[%s11580_s3 + $0x74c] ss:$16 sps:$4 sm:$0xff]  }
 0x321   :  { %6156 = vmatpush1.bf16.msra.mxu0 %v8405_v62  ;;  %v8449_v62 = vld [vmem:[%s11582_s5 + $0x34] ss:$8 sps:$4 sm:$0xff]  }
 0x322   :  { %6734 = vmatprep.subr.bf16.mxu0 %v8440_v1  ;;  %v8420_v1 = vld [vmem:[%s11580_s3 + $0x748] ss:$16 sps:$4 sm:$0xff]  }
 0x323   :  { %6263 = vmatpush1.bf16.msra.mxu1 %v8318_v2  ;;  %v8447_v2 = vld [vmem:[%s11582_s5 + $0x30] ss:$8 sps:$4 sm:$0xff]  }
 0x324   :  { %6264 = vmatprep.subr.bf16.mxu1 %v8326_v3  ;;  %v8425_v3 = vld [vmem:[%s11580_s3 + $0x76c] ss:$16 sps:$4 sm:$0xff]  }
 0x327   :  { %6265 = vmatpush1.bf16.msra.mxu1 %v8324_v5  ;;  %v8452_v5 = vld [vmem:[%s11582_s5 + $0x44] ss:$8 sps:$4 sm:$0xff]  }
 0x328   :  { %6266 = vmatprep.subr.bf16.mxu1 %v8332_v6  ;;  %v8423_v6 = vld [vmem:[%s11580_s3 + $0x768] ss:$16 sps:$4 sm:$0xff]  }
 0x32b   :  { %6267 = vmatpush1.bf16.msra.mxu1 %v8330_v8  ;;  %v8450_v8 = vld [vmem:[%s11582_s5 + $0x40] ss:$8 sps:$4 sm:$0xff]  }
 0x32c   :  { %6268 = vmatprep.subr.bf16.mxu1 %v8338_v10  ;;  %v8428_v10 = vld [vmem:[%s11580_s3 + $0x78c] ss:$16 sps:$4 sm:$0xff]  }
 0x32f   :  { %6269 = vmatpush1.bf16.msra.mxu1 %v8336_v11  ;;  %v8455_v11 = vld [vmem:[%s11582_s5 + $0x54] ss:$8 sps:$4 sm:$0xff]  }
 0x330   :  { %6270 = vmatprep.subr.bf16.mxu1 %v8344_v13  ;;  %v8426_v13 = vld [vmem:[%s11580_s3 + $0x788] ss:$16 sps:$4 sm:$0xff]  }
 0x333   :  { %6271 = vmatpush1.bf16.msra.mxu1 %v8342_v12  ;;  %v8453_v12 = vld [vmem:[%s11582_s5 + $0x50] ss:$8 sps:$4 sm:$0xff]  }
 0x334   :  { %6272 = vmatprep.subr.bf16.mxu1 %v8350_v14  ;;  %v8431_v14 = vld [vmem:[%s11580_s3 + $0x7ac] ss:$16 sps:$4 sm:$0xff]  }
 0x337   :  { %6273 = vmatpush1.bf16.msra.mxu1 %v8348_v15  ;;  %v8458_v15 = vld [vmem:[%s11582_s5 + $0x64] ss:$8 sps:$4 sm:$0xff]  }
 0x338   :  { %6274 = vmatprep.subr.bf16.mxu1 %v8356_v59  ;;  %v8429_v59 = vld [vmem:[%s11580_s3 + $0x7a8] ss:$16 sps:$4 sm:$0xff]  }
 0x33b   :  { %6275 = vmatpush1.bf16.msra.mxu1 %v8354_v4  ;;  %v8456_v4 = vld [vmem:[%s11582_s5 + $0x60] ss:$8 sps:$4 sm:$0xff]  }
 0x33c   :  { %6276 = vmatprep.subr.bf16.mxu1 %v8362_v18  ;;  %v8434_v18 = vld [vmem:[%s11580_s3 + $0x7cc] ss:$16 sps:$4 sm:$0xff]  }
 0x33f   :  { %6277 = vmatpush1.bf16.msra.mxu1 %v8360_v23  ;;  %v8461_v23 = vld [vmem:[%s11582_s5 + $0x74] ss:$8 sps:$4 sm:$0xff]  }
 0x340   :  { %6278 = vmatprep.subr.bf16.mxu1 %v8368_v20  ;;  %v8432_v20 = vld [vmem:[%s11580_s3 + $0x7c8] ss:$16 sps:$4 sm:$0xff]  }
 0x343   :  { %6279 = vmatpush1.bf16.msra.mxu1 %v8366_v27  ;;  %v8459_v27 = vld [vmem:[%s11582_s5 + $0x70] ss:$8 sps:$4 sm:$0xff]  }
 0x344   :  { %6289 = vmatprep.subr.bf16.mxu1 %v8374_v63  ;;  %v8437_v63 = vld [vmem:[%s11580_s3 + $0x7ec] ss:$16 sps:$4 sm:$0xff]  }
 0x346   :  { %6281 = vmatmul.mubr.bf16.vlgmr.msra.gmra.mrb[12].mxu1 %v10960_v58  ;;  %v8392_v58 = vld [vmem:[%s11580_s3 + $0x66c] ss:$16 sps:$4 sm:$0xff]  }
 0x347   :  { %6290 = vmatpush1.bf16.msra.mxu1 %v8372_v53  ;;  %v8464_v53 = vld [vmem:[%s11582_s5 + $0x84] ss:$8 sps:$4 sm:$0xff]  }
 0x348   :  { %6291 = vmatprep.subr.bf16.mxu1 %v8380_v22  ;;  %v8435_v22 = vld [vmem:[%s11580_s3 + $0x7e8] ss:$16 sps:$4 sm:$0xff]  }
 0x34b   :  { %6292 = vmatpush1.bf16.msra.mxu1 %v8378_v29  ;;  %v8462_v29 = vld [vmem:[%s11582_s5 + $0x80] ss:$8 sps:$4 sm:$0xff]  }
 0x34c   :  { %6293 = vmatprep.subr.bf16.mxu1 %v8386_v45  ;;  %v8467_v45 = vld [vmem:[%s11582_s5 + $0x94] ss:$8 sps:$4 sm:$0xff]  }
 0x34f   :  { %6294 = vmatpush1.bf16.msra.mxu1 %v8384_v31  ;;  %v8465_v31 = vld [vmem:[%s11582_s5 + $0x90] ss:$8 sps:$4 sm:$0xff]  }
 0x350   :  { %6295 = vmatprep.subr.bf16.mxu1 %v8392_v58  ;;  %v8470_v58 = vld [vmem:[%s11582_s5 + $0xa4] ss:$8 sps:$4 sm:$0xff]  }
 0x353   :  { %6296 = vmatpush1.bf16.msra.mxu1 %v8390_v32  ;;  %v8468_v32 = vld [vmem:[%s11582_s5 + $0xa0] ss:$8 sps:$4 sm:$0xff]  }
 0x354   :  { %6297 = vmatprep.subr.bf16.mxu1 %v8398_v33  ;;  %v8473_v33 = vld [vmem:[%s11582_s5 + $0xb4] ss:$8 sps:$4 sm:$0xff]  }
 0x357   :  { %6298 = vmatpush1.bf16.msra.mxu1 %v8396_v35  ;;  %v8476_v35 = vld [vmem:[%s11582_s5 + $0xc4] ss:$8 sps:$4 sm:$0xff]  }
 0x358   :  { %6299 = vmatprep.subr.bf16.mxu1 %v8404_v42  ;;  %v8479_v42 = vld [vmem:[%s11582_s5 + $0xd4] ss:$8 sps:$4 sm:$0xff]  }
 0x359   :  { %v4421_v7 = vpop.f32.mrb[8].mxu1 }
 0x35a   :  { %v7954_v26 = vadd.f32 %v4421_v7, %v641_v51  ;;  %v4423_v41 = vpop.f32.mrb[9].mxu1  ;;  %v8477_v51 = vld [vmem:[%s11582_s5 + $0xd0] ss:$8 sps:$4 sm:$0xff]  }
 0x35b   :  { %v7955_v19 = vadd.f32 %v4423_v41, %v645_v37  ;;  %v4425_v55 = vpop.f32.mrb[10].mxu1  ;;  %6300 = vmatpush1.bf16.msra.mxu1 %v8402_v39  ;;  %v8482_v37 = vld [vmem:[%s11582_s5 + $0xe4] ss:$8 sps:$4 sm:$0xff]   ;;  %v8480_v39 = vld [vmem:[%s11582_s5 + $0xe0] ss:$8 sps:$4 sm:$0xff]  }
 0x35c   :  { %v4434_v0 = vmax.f32 %v7954_v26, 0.0  ;;  %v4426_v49 = vpop.f32.mrb[11].mxu1  ;;  %6301 = vmatprep.subr.bf16.mxu1 %v8410_v40  ;;  %v8485_v40 = vld [vmem:[%s11582_s5 + $0xf4] ss:$8 sps:$4 sm:$0xff]   ;;  %v8483_v7 = vld [vmem:[%s11582_s5 + $0xf0] ss:$8 sps:$4 sm:$0xff]  }
 0x35d   :  { %v4435_v30 = vmax.f32 %v7955_v19, 0.0  ;;  %v8488_v26 = vld [vmem:[%s11582_s5 + $0x104] ss:$8 sps:$4 sm:$0xff]   ;;  %v8539_v49 = vld [vmem:[%s11584_s7 + $0x10] sm:$0xff]  }
 0x35e   :  { %v11256_v48 = vpack.c.bf16 %v4434_v0, %v4434_v0  ;;  %v8534_v41 = vld [vmem:[%s11584_s7 + $0x40] sm:$0xff]   ;;  %v8536_v55 = vld [vmem:[%s11584_s7 + $0x48] sm:$0xff]   ;;  %v8538_v0 = vld [vmem:[%s11584_s7 + $0x50] sm:$0xff]  }
 0x35f   :  { %v4443_v46 = vpack.c.bf16 %v4435_v30, %v4435_v30  ;;  %6302 = vmatpush1.bf16.msra.mxu1 %v8408_v44  ;;  %v8535_v19 = vld [vmem:[%s11584_s7] sm:$0xff]   ;;  %v8537_v44 = vld [vmem:[%s11584_s7 + $0x8] sm:$0xff]   ;;  %v8541_v30 = vld [vmem:[%s11584_s7 + $0x18] sm:$0xff]  }
 0x360   :  { %6303 = vmatprep.subr.bf16.mxu1 %v8413_v57  ;;  %v8540_v57 = vld [vmem:[%s11584_s7 + $0x58] sm:$0xff]  }
 0x361   :  { %6157 = vmatprep.mubr.bf16.mxu0 %v4443_v46  ;;  %6321 = vmatprep.mubr.bf16.mxu1 %v4443_v46  ;;  %v8542_v46 = vld [vmem:[%s11584_s7 + $0x60] sm:$0xff]  }
 0x362   :  { %6158 = vmatmul.mubr.bf16.vlgmr.msra.gmra.mrb[8].mxu0 %v11256_v48 }
 0x363   :  { %6304 = vmatpush1.bf16.msra.mxu1 %v8411_v47  ;;  %6735 = vmatpush1.bf16.msra.mxu0 %v8438_v9  ;;  %v8543_v47 = vld [vmem:[%s11584_s7 + $0x20] sm:$0xff]   ;;  %v8544_v9 = vld [vmem:[%s11584_s7 + $0x68] sm:$0xff]  }
 0x364   :  { %6305 = vmatprep.subr.bf16.mxu1 %v8416_v50  ;;  %6736 = vmatprep.subr.bf16.mxu0 %v8443_v24  ;;  %v11440_v50 = vld [vmem:[%s11581_s4] sm:$0xf] }
 0x365   :  { %v4705_v24 = vrot.slane %v11440_v50, %v10030_v16 }
 0x367   :  { %6306 = vmatpush1.bf16.msra.mxu1 %v8414_v52  ;;  %6737 = vmatpush1.bf16.msra.mxu0 %v8441_v54  ;;  %v4709_v52 = vrot.slane %v11440_v50, %v10044_v25 }
 0x368   :  { %6307 = vmatprep.subr.bf16.mxu1 %v8419_v38  ;;  %6738 = vmatprep.subr.bf16.mxu0 %v8446_v17 }
 0x36b   :  { %6308 = vmatpush1.bf16.msra.mxu1 %v8417_v28  ;;  %6739 = vmatpush1.bf16.msra.mxu0 %v8444_v60 }
 0x36c   :  { %6309 = vmatprep.subr.bf16.mxu1 %v8422_v61  ;;  %6740 = vmatprep.subr.bf16.mxu0 %v8449_v62 }
 0x36f   :  { %6310 = vmatpush1.bf16.msra.mxu1 %v8420_v1  ;;  %6741 = vmatpush1.bf16.msra.mxu0 %v8447_v2 }
 0x370   :  { %6311 = vmatprep.subr.bf16.mxu1 %v8425_v3  ;;  %6742 = vmatprep.subr.bf16.mxu0 %v8452_v5  ;;  %v8486_v3 = vld [vmem:[%s11582_s5 + $0x100] ss:$8 sps:$4 sm:$0xff]  }
 0x373   :  { %6312 = vmatpush1.bf16.msra.mxu1 %v8423_v6  ;;  %6743 = vmatpush1.bf16.msra.mxu0 %v8450_v8  ;;  %v8491_v6 = vld [vmem:[%s11582_s5 + $0x114] ss:$8 sps:$4 sm:$0xff]   ;;  %v8489_v8 = vld [vmem:[%s11582_s5 + $0x110] ss:$8 sps:$4 sm:$0xff]  }
 0x374   :  { %6313 = vmatprep.subr.bf16.mxu1 %v8428_v10  ;;  %6744 = vmatprep.subr.bf16.mxu0 %v8455_v11  ;;  %v8494_v10 = vld [vmem:[%s11582_s5 + $0x124] ss:$8 sps:$4 sm:$0xff]   ;;  %v8492_v11 = vld [vmem:[%s11582_s5 + $0x120] ss:$8 sps:$4 sm:$0xff]  }
 0x377   :  { %6314 = vmatpush1.bf16.msra.mxu1 %v8426_v13  ;;  %6745 = vmatpush1.bf16.msra.mxu0 %v8453_v12  ;;  %v8497_v13 = vld [vmem:[%s11582_s5 + $0x134] ss:$8 sps:$4 sm:$0xff]   ;;  %v8495_v12 = vld [vmem:[%s11582_s5 + $0x130] ss:$8 sps:$4 sm:$0xff]  }
 0x378   :  { %6315 = vmatprep.subr.bf16.mxu1 %v8431_v14  ;;  %6746 = vmatprep.subr.bf16.mxu0 %v8458_v15  ;;  %v8500_v14 = vld [vmem:[%s11582_s5 + $0x144] ss:$8 sps:$4 sm:$0xff]   ;;  %v8498_v15 = vld [vmem:[%s11582_s5 + $0x140] ss:$8 sps:$4 sm:$0xff]  }
 0x37b   :  { %6316 = vmatpush1.bf16.msra.mxu1 %v8429_v59  ;;  %6747 = vmatpush1.bf16.msra.mxu0 %v8456_v4  ;;  %v8503_v59 = vld [vmem:[%s11582_s5 + $0x154] ss:$8 sps:$4 sm:$0xff]   ;;  %v8501_v4 = vld [vmem:[%s11582_s5 + $0x150] ss:$8 sps:$4 sm:$0xff]  }
 0x37c   :  { %6317 = vmatprep.subr.bf16.mxu1 %v8434_v18  ;;  %6748 = vmatprep.subr.bf16.mxu0 %v8461_v23  ;;  %v8506_v18 = vld [vmem:[%s11582_s5 + $0x164] ss:$8 sps:$4 sm:$0xff]   ;;  %v8504_v23 = vld [vmem:[%s11582_s5 + $0x160] ss:$8 sps:$4 sm:$0xff]  }
 0x37f   :  { %6318 = vmatpush1.bf16.msra.mxu1 %v8432_v20  ;;  %6749 = vmatpush1.bf16.msra.mxu0 %v8459_v27  ;;  %v8509_v20 = vld [vmem:[%s11582_s5 + $0x174] ss:$8 sps:$4 sm:$0xff]   ;;  %v8507_v27 = vld [vmem:[%s11582_s5 + $0x170] ss:$8 sps:$4 sm:$0xff]  }
 0x380   :  { %6319 = vmatprep.subr.bf16.mxu1 %v8437_v63  ;;  %6750 = vmatprep.subr.bf16.mxu0 %v8464_v53  ;;  %v4717_v63 = vrot.slane %v11440_v50, %v628_v21  ;;  %v8512_v53 = vld [vmem:[%s11582_s5 + $0x184] ss:$8 sps:$4 sm:$0xff]   ;;  %v8515_v21 = vld [vmem:[%s11582_s5 + $0x194] ss:$8 sps:$4 sm:$0xff]  }
 0x383   :  { %6320 = vmatpush1.bf16.msra.mxu1 %v8435_v22  ;;  %6751 = vmatpush1.bf16.msra.mxu0 %v8462_v29 }
 0x384   :  { %6752 = vmatprep.subr.bf16.mxu0 %v8467_v45  ;;  %7924 = vmatprep.subr.bf16.mxu1 %v8534_v41  ;;  %v4713_v41 = vrot.slane %v11440_v50, %v624_v56 }
 0x386   :  { %6322 = vmatmul.mubr.bf16.vlgmr.msra.gmra.mrb[12].mxu1 %v11256_v48  ;;  %v8545_v48 = vld [vmem:[%s11584_s7 + $0x28] sm:$0xff]  }
 0x387   :  { %6753 = vmatpush1.bf16.msra.mxu0 %v8465_v31  ;;  %7925 = vmatpush3.bf16.msra.mxu1 %v8535_v19  ;;  %v8530_v19 = vld [vmem:[%s11582_s5 + $0x1e4] ss:$8 sps:$4 sm:$0xff]  }
 0x388   :  { %6754 = vmatprep.subr.bf16.mxu0 %v8470_v58  ;;  %7926 = vmatprep.subr.bf16.mxu1 %v8536_v55  ;;  %v8510_v58 = vld [vmem:[%s11582_s5 + $0x180] ss:$8 sps:$4 sm:$0xff]  }
 0x389   :  { %v8528_v55 = vld [vmem:[%s11582_s5 + $0x1e0] ss:$8 sps:$4 sm:$0xff]  }
 0x38b   :  { %6755 = vmatpush1.bf16.msra.mxu0 %v8468_v32  ;;  %7927 = vmatpush3.bf16.msra.mxu1 %v8537_v44 }
 0x38c   :  { %6756 = vmatprep.subr.bf16.mxu0 %v8473_v33  ;;  %7928 = vmatprep.subr.bf16.mxu1 %v8538_v0  ;;  %v8533_v0 = vld [vmem:[%s11582_s5 + $0x1f4] ss:$8 sps:$4 sm:$0xff]  }
 0x38f   :  { %6757 = vmatpush1.bf16.msra.mxu0 %v8471_v34  ;;  %7929 = vmatpush3.bf16.msra.mxu1 %v8539_v49 }
 0x390   :  { %6758 = vmatprep.subr.bf16.mxu0 %v8476_v35  ;;  %7930 = vmatprep.subr.bf16.mxu1 %v8540_v57  ;;  %v8513_v35 = vld [vmem:[%s11582_s5 + $0x190] ss:$8 sps:$4 sm:$0xff]  }
 0x391   :  { %v8546_v57 = vld [vmem:[%s11584_s7 + $0x70] sm:$0xff]  }
 0x393   :  { %6759 = vmatpush1.bf16.msra.mxu0 %v8474_v36  ;;  %7931 = vmatpush3.bf16.msra.mxu1 %v8541_v30  ;;  %v8518_v36 = vld [vmem:[%s11582_s5 + $0x1a4] ss:$8 sps:$4 sm:$0xff]   ;;  %v8547_v30 = vld [vmem:[%s11584_s7 + $0x30] sm:$0xff]  }
 0x394   :  { %6760 = vmatprep.subr.bf16.mxu0 %v8479_v42  ;;  %7932 = vmatprep.subr.bf16.mxu1 %v8542_v46  ;;  %v8516_v42 = vld [vmem:[%s11582_s5 + $0x1a0] ss:$8 sps:$4 sm:$0xff]   ;;  %v8548_v46 = vld [vmem:[%s11584_s7 + $0x78] sm:$0xff]  }
 0x397   :  { %6761 = vmatpush1.bf16.msra.mxu0 %v8477_v51  ;;  %7933 = vmatpush3.bf16.msra.mxu1 %v8543_v47  ;;  %v8521_v51 = vld [vmem:[%s11582_s5 + $0x1b4] ss:$8 sps:$4 sm:$0xff]  }
 0x398   :  { %6762 = vmatprep.subr.bf16.mxu0 %v8482_v37  ;;  %7934 = vmatprep.subr.bf16.mxu1 %v8544_v9  ;;  %v8519_v37 = vld [vmem:[%s11582_s5 + $0x1b0] ss:$8 sps:$4 sm:$0xff]   ;;  %v6402_v9 = vld [vmem:[%s11583_s6] sm:$0x3] }
 0x399   :  { %v8549_v47 = vld [vmem:[%s11584_s7 + $0x38] sm:$0xff]   ;;  %v6411_v50 = vrot.slane %v6402_v9, %v10044_v25 }
 0x39b   :  { %6763 = vmatpush1.bf16.msra.mxu0 %v8480_v39  ;;  %7935 = vmatpush3.bf16.msra.mxu1 %v8545_v48  ;;  %v8524_v39 = vld [vmem:[%s11582_s5 + $0x1c4] ss:$8 sps:$4 sm:$0xff]   ;;  %v6407_v48 = vrot.slane %v6402_v9, %v10030_v16  ;;  %v7907_v16 = vld [vmem:[%s11585_s8] ss:$0 sm:$0xff] }
 0x39c   :  { %6764 = vmatprep.subr.bf16.mxu0 %v8485_v40  ;;  %v8522_v40 = vld [vmem:[%s11582_s5 + $0x1c0] ss:$8 sps:$4 sm:$0xff]   ;;  %7936 = vmatprep.subr.bf16.mxu1 %v8546_v57 }
 0x39f   :  { %6765 = vmatpush1.bf16.msra.mxu0 %v8483_v7  ;;  %v8527_v7 = vld [vmem:[%s11582_s5 + $0x1d4] ss:$8 sps:$4 sm:$0xff]   ;;  %7937 = vmatpush3.bf16.msra.mxu1 %v8547_v30 }
 0x3a0   :  { %6775 = vmatprep.subr.bf16.mxu0 %v8488_v26  ;;  %v8525_v26 = vld [vmem:[%s11582_s5 + $0x1d0] ss:$8 sps:$4 sm:$0xff]   ;;  %7938 = vmatprep.subr.bf16.mxu1 %v8548_v46 }
 0x3a3   :  { %7939 = vmatpush3.bf16.msra.mxu1 %v8549_v47 }
 0x435   :  { %v6159_v54 = vpop.f32.mrb[8].mxu0 }
 0x436   :  { %v7956_v38 = vadd.f32 %v6159_v54, %v4705_v24  ;;  %v6161_v17 = vpop.f32.mrb[9].mxu0 }
 0x437   :  { %v7957_v28 = vadd.f32 %v6161_v17, %v4709_v52  ;;  %v6163_v60 = vpop.f32.mrb[10].mxu0 }
 0x438   :  { %v6330_v61 = vmax.f32 %v7956_v38, 0.0  ;;  %v6164_v62 = vpop.f32.mrb[11].mxu0 }
 0x439   :  { %v6331_v1 = vmax.f32 %v7957_v28, 0.0 }
 0x43a   :  { %v6334_v5 = vpack.c.bf16 %v6330_v61, %v6330_v61 }
 0x43b   :  { %v6335_v2 = vpack.c.bf16 %v6331_v1, %v6331_v1 }
 0x43d   :  { %6766 = vmatprep.mubr.bf16.mxu0 %v6335_v2 }
 0x43e   :  { %6767 = vmatmul.mubr.bf16.vlgmr.msra.gmra.mrb[12].mxu0 %v6334_v5 }
 0x43f   :  { %6776 = vmatpush1.bf16.msra.mxu0 %v8486_v3 }
 0x440   :  { %6777 = vmatprep.subr.bf16.mxu0 %v8491_v6 }
 0x443   :  { %6778 = vmatpush1.bf16.msra.mxu0 %v8489_v8 }
 0x444   :  { %6779 = vmatprep.subr.bf16.mxu0 %v8494_v10 }
 0x447   :  { %6780 = vmatpush1.bf16.msra.mxu0 %v8492_v11 }
 0x448   :  { %6781 = vmatprep.subr.bf16.mxu0 %v8497_v13 }
 0x44b   :  { %6782 = vmatpush1.bf16.msra.mxu0 %v8495_v12 }
 0x44c   :  { %6783 = vmatprep.subr.bf16.mxu0 %v8500_v14 }
 0x44f   :  { %6784 = vmatpush1.bf16.msra.mxu0 %v8498_v15 }
 0x450   :  { %6785 = vmatprep.subr.bf16.mxu0 %v8503_v59 }
 0x453   :  { %6786 = vmatpush1.bf16.msra.mxu0 %v8501_v4 }
 0x454   :  { %6787 = vmatprep.subr.bf16.mxu0 %v8506_v18 }
 0x457   :  { %6788 = vmatpush1.bf16.msra.mxu0 %v8504_v23 }
 0x458   :  { %6789 = vmatprep.subr.bf16.mxu0 %v8509_v20 }
 0x459   :  { %v6323_v22 = vpop.f32.mrb[12].mxu1 }
 0x45a   :  { %v6325_v29 = vpop.f32.mrb[13].mxu1  ;;  %v7958_v44 = vadd.f32 %v6323_v22, %v4713_v41 }
 0x45b   :  { %v7959_v45 = vadd.f32 %v6325_v29, %v4717_v63  ;;  %6790 = vmatpush1.bf16.msra.mxu0 %v8507_v27  ;;  %v6327_v31 = vpop.f32.mrb[14].mxu1 }
 0x45c   :  { %v6328_v32 = vpop.f32.mrb[15].mxu1  ;;  %6791 = vmatprep.subr.bf16.mxu0 %v8512_v53  ;;  %v6332_v56 = vmax.f32 %v7958_v44, 0.0 }
 0x45d   :  { %v6333_v33 = vmax.f32 %v7959_v45, 0.0 }
 0x45e   :  { %v6336_v49 = vpack.c.bf16 %v6332_v56, %v6332_v56 }
 0x45f   :  { %v6337_v34 = vpack.c.bf16 %v6333_v33, %v6333_v33  ;;  %6792 = vmatpush1.bf16.msra.mxu0 %v8510_v58 }
 0x460   :  { %6793 = vmatprep.subr.bf16.mxu0 %v8515_v21 }
 0x461   :  { %6807 = vmatprep.mubr.bf16.mxu0 %v6337_v34 }
 0x463   :  { %6794 = vmatpush1.bf16.msra.mxu0 %v8513_v35 }
 0x464   :  { %6795 = vmatprep.subr.bf16.mxu0 %v8518_v36 }
 0x467   :  { %6796 = vmatpush1.bf16.msra.mxu0 %v8516_v42 }
 0x468   :  { %6797 = vmatprep.subr.bf16.mxu0 %v8521_v51 }
 0x46b   :  { %6798 = vmatpush1.bf16.msra.mxu0 %v8519_v37 }
 0x46c   :  { %6799 = vmatprep.subr.bf16.mxu0 %v8524_v39 }
 0x46f   :  { %6800 = vmatpush1.bf16.msra.mxu0 %v8522_v40 }
 0x470   :  { %6801 = vmatprep.subr.bf16.mxu0 %v8527_v7 }
 0x473   :  { %6802 = vmatpush1.bf16.msra.mxu0 %v8525_v26 }
 0x474   :  { %6803 = vmatprep.subr.bf16.mxu0 %v8530_v19 }
 0x477   :  { %6804 = vmatpush1.bf16.msra.mxu0 %v8528_v55 }
 0x478   :  { %6805 = vmatprep.subr.bf16.mxu0 %v8533_v0 }
 0x47b   :  { %6806 = vmatpush1.bf16.msra.mxu0 %v8531_v43 }
 0x47e   :  { %6808 = vmatmul.mubr.bf16.vlgmr.msra.gmra.mrb[12].mxu0 %v6336_v49 }
 0x551   :  { %v6809_v24 = vpop.f32.mrb[12].mxu0 }
 0x552   :  { %v7960_v52 = vadd.f32 %v6809_v24, %v6407_v48  ;;  %v6811_v54 = vpop.f32.mrb[13].mxu0 }
 0x553   :  { %v7961_v38 = vadd.f32 %v6811_v54, %v6411_v50  ;;  %v6813_v17 = vpop.f32.mrb[14].mxu0 }
 0x554   :  { %v6816_v28 = vmax.f32 %v7960_v52, 0.0  ;;  %v6814_v60 = vpop.f32.mrb[15].mxu0 }
 0x555   :  { %v6817_v61 = vmax.f32 %v7961_v38, 0.0 }
 0x556   :  { %v6818_v1 = vpack.c.bf16 %v6816_v28, %v6816_v28 }
 0x557   :  { %v6819_v62 = vpack.c.bf16 %v6817_v61, %v6817_v61 }
 0x559   :  { %6987 = vmatprep.mubr.bf16.mxu1 %v6819_v62 }
 0x55a   :  { %6988 = vmatmul.mubr.bf16.vlgmr.msra.gmra.mrb[16].mxu1 %v6818_v1 }
 0x62d   :  { %v7940_v2 = vpop.f32.mrb[16].mxu1 }
 0x62e   :  { %v7941_v3 = vpop.f32.mrb[17].mxu1 }
 0x62f   :  { %v7942_v25 = vadd.f32 %v7941_v3, %v7940_v2  ;;  %v7943_v5 = vpop.f32.mrb[18].mxu1 }
 0x630   :  { %v7944_v6 = vpop.f32.mrb[19].mxu1 }
 0x631   :  { %v6990_v8 = vadd.f32 %v7942_v25, %v7907_v16 }
 0x633   :  { %6995 = vst [vmem:[#allocation2] sm:$0x3] %v6990_v8 }
 0x634   :  { %8562 = shalt.err (!%p8559_p4)
}
 0x635   :  { %s8563_s0 = scalar_lea.hbm %s11586_s9, 32 }
 0x636   :  { %p8564_p5 = scmp.ne.s32.totalorder %s11586_s9, %s8563_s0  ;;  %p8567_p6 = scmp.lt.u32.totalorder %s8563_s0, %s11586_s9 }
 0x638   :  { %p8569_p7 = pnand %p8567_p6, %p8564_p5 }
 0x63a   :  { %8572 = shalt.err (!%p8569_p7)
}
 0x63b   :  { %7005 = dma.vmem_to_hbm [thread:$0]  %s7003_s30, 32, %s11586_s9, [#allocation3]  }
 0x63c   :  { %8573 = dma.done.wait [#allocation3], 32  }
 0x63d   :  { %8574 = vsyncadd [#allocation3], 4294967264 }
 0x63e   :  { %7009 = vsyncpa [#allocation3], 1 }

</bundles_post_ra>
